<compile_context>
chip_gen: v5e
topology: v5e:2x2
jax: 0.10.0
libtpu: 0.0.40
codegen_flags: <defaults>
</compile_context>

<pallas_src>
import functools

import jax
import jax.numpy as jnp
from jax.experimental import pallas as pl
from jax.experimental.pallas import tpu as pltpu

NEG_BIG = -1e30  # mask value for padded vocab lanes inside the greedy argmax


def _round_up(x, m):
    return ((x + m - 1) // m) * m


# ----------------------------- in-kernel helpers ----------------------------


def _gate_math(gates, c, Hp):
    """gates: (B, 4*Hp) f32 pre-activations in PyTorch (i, f, g, o) order."""
    i = jax.nn.sigmoid(gates[:, 0 * Hp:1 * Hp])
    f = jax.nn.sigmoid(gates[:, 1 * Hp:2 * Hp])
    g = jnp.tanh(gates[:, 2 * Hp:3 * Hp])
    o = jax.nn.sigmoid(gates[:, 3 * Hp:4 * Hp])
    c_new = f * c + i * g
    h_new = o * jnp.tanh(c_new)
    return h_new, c_new


# ----------------------- fused kernel: teacher forcing -----------------------


def seq2seq_train_kernel(xoh_ref, xproj_ref, enc_wh_ref, enc_b_ref,
                         dec_wh_ref, dec_b_ref, wout_ref, bout_ref,
                         out_ref, h_all_ref):
    ST, Bp, Kp = xoh_ref.shape
    Hp = enc_wh_ref.shape[0]
    Vp = wout_ref.shape[1]
    T = out_ref.shape[1] // Vp
    S = ST - T

    enc_b = enc_b_ref[...]
    dec_b = dec_b_ref[...]

    # Embedding + input projection of ALL encoder and decoder steps as one
    # 128-row MXU matmul (block-diagonal enc/dec projection table).
    xw = jnp.dot(xoh_ref[...].reshape(ST * Bp, Kp), xproj_ref[...],
                 preferred_element_type=jnp.float32)            # (ST*Bp, 4Hp)
    xw = xw.reshape(ST, Bp, 4 * Hp)

    h = jnp.zeros((Bp, Hp), jnp.float32)
    c = jnp.zeros((Bp, Hp), jnp.float32)

    # Encoder recurrence (short static loop -> fully unrolled).
    for t in range(S):
        gates = xw[t] + jnp.dot(h.astype(enc_wh_ref.dtype), enc_wh_ref[...],
                                preferred_element_type=jnp.float32) + enc_b
        h, c = _gate_math(gates, c, Hp)

    # Teacher-forced decoder recurrence; h written straight into VMEM scratch.
    for t in range(T):
        gates = xw[S + t] + jnp.dot(h.astype(dec_wh_ref.dtype), dec_wh_ref[...],
                                    preferred_element_type=jnp.float32) + dec_b
        h, c = _gate_math(gates, c, Hp)
        h_all_ref[t * Bp:(t + 1) * Bp, :] = h

    # One batched output projection, then lane-dense per-step stores into the
    # (Bp, T*Vp) output slab.
    logits = jnp.dot(h_all_ref[...].astype(wout_ref.dtype), wout_ref[...],
                     preferred_element_type=jnp.float32) + bout_ref[...]
    for t in range(T):
        out_ref[:, t * Vp:(t + 1) * Vp] = logits[t * Bp:(t + 1) * Bp, :]


def run_seq2seq_train(xoh, xproj, enc_wh, enc_b, dec_wh, dec_b, wout, bout, T):
    ST, Bp, _ = xoh.shape
    Hp = enc_wh.shape[0]
    Vp = wout.shape[1]
    return pl.pallas_call(
        seq2seq_train_kernel,
        out_shape=jax.ShapeDtypeStruct((Bp, T * Vp), jnp.float32),
        scratch_shapes=[pltpu.VMEM((T * Bp, Hp), jnp.float32)],
    )(xoh, xproj, enc_wh, enc_b, dec_wh, dec_b, wout, bout)


# ------------------------ fused kernel: greedy decode ------------------------


def seq2seq_greedy_kernel(src_oh_ref, onehot0_ref, enc_xproj_ref, enc_wh_ref,
                          enc_b_ref, dec_xproj_ref, dec_wh_ref, dec_b_ref,
                          wout_ref, bout_ref, out_ref, *, tgt_vocab):
    S, Bp, SVp = src_oh_ref.shape
    Hp = enc_wh_ref.shape[0]
    Vp = wout_ref.shape[1]
    T = out_ref.shape[1] // Vp

    enc_b = enc_b_ref[...]
    dec_b = dec_b_ref[...]
    bout = bout_ref[...]

    # Encoder: hoisted input projection (embedding folded into W_x).
    xw = jnp.dot(src_oh_ref[...].reshape(S * Bp, SVp), enc_xproj_ref[...],
                 preferred_element_type=jnp.float32).reshape(S, Bp, 4 * Hp)

    h = jnp.zeros((Bp, Hp), jnp.float32)
    c = jnp.zeros((Bp, Hp), jnp.float32)
    for t in range(S):
        gates = xw[t] + jnp.dot(h.astype(enc_wh_ref.dtype), enc_wh_ref[...],
                                preferred_element_type=jnp.float32) + enc_b
        h, c = _gate_math(gates, c, Hp)

    # Greedy decode: embedding + input projection fused into one matmul/step.
    onehot = onehot0_ref[...]                                    # (Bp, Vp) bf16
    lane = jax.lax.broadcasted_iota(jnp.int32, (Bp, Vp), 1)
    valid = lane < tgt_vocab
    for t in range(T):
        gates = (jnp.dot(onehot, dec_xproj_ref[...],
                         preferred_element_type=jnp.float32)
                 + jnp.dot(h.astype(dec_wh_ref.dtype), dec_wh_ref[...],
                           preferred_element_type=jnp.float32)
                 + dec_b)
        h, c = _gate_math(gates, c, Hp)
        logits = jnp.dot(h.astype(wout_ref.dtype), wout_ref[...],
                         preferred_element_type=jnp.float32) + bout   # (Bp, Vp)
        out_ref[:, t * Vp:(t + 1) * Vp] = logits

        # Greedy feedback: first-argmax over real vocab lanes only.
        masked = jnp.where(valid, logits, NEG_BIG)
        m = jnp.max(masked, axis=-1, keepdims=True)
        first = jnp.min(jnp.where(masked == m, lane, Vp),
                        axis=-1, keepdims=True)                   # (Bp, 1)
        onehot = (lane == first).astype(onehot0_ref.dtype)


def run_seq2seq_greedy(src_oh, onehot0, enc_xproj, enc_wh, enc_b,
                       dec_xproj, dec_wh, dec_b, wout, bout, T, tgt_vocab):
    Bp = onehot0.shape[0]
    Vp = wout.shape[1]
    kernel = functools.partial(seq2seq_greedy_kernel, tgt_vocab=tgt_vocab)
    return pl.pallas_call(
        kernel,
        out_shape=jax.ShapeDtypeStruct((Bp, T * Vp), jnp.float32),
    )(src_oh, onehot0, enc_xproj, enc_wh, enc_b,
      dec_xproj, dec_wh, dec_b, wout, bout)


# ------------------------------ params / packing -----------------------------


def init_params(key, src_vocab, tgt_vocab, emb, hidden):
    ks = jax.random.split(key, 10)
    s = 0.1
    n = lambda k, shp: jax.random.normal(k, shp, jnp.float32) * s
    return dict(
        enc_embed=n(ks[0], (src_vocab, emb)),
        enc_wih=n(ks[1], (emb, 4 * hidden)),
        enc_whh=n(ks[2], (hidden, 4 * hidden)),
        enc_b=n(ks[3], (4 * hidden,)),
        dec_embed=n(ks[4], (tgt_vocab, emb)),
        dec_wih=n(ks[5], (emb, 4 * hidden)),
        dec_whh=n(ks[6], (hidden, 4 * hidden)),
        dec_b=n(ks[7], (4 * hidden,)),
        dec_wout=n(ks[8], (hidden, tgt_vocab)),
        dec_bout=n(ks[9], (tgt_vocab,)),
    )


def pack_params(p, emb, hidden, src_vocab, tgt_vocab):
    """Fold embeddings into the gate projections, pad to lane sizes, cast bf16."""
    del emb  # embedding width disappears after folding emb @ W_x
    Hp = _round_up(hidden, 128)
    SVp = _round_up(src_vocab, 128)
    TVp = _round_up(tgt_vocab, 128)

    def pad_gates(w):
        # (..., 4*hidden) -> (..., 4*Hp), each gate block padded separately
        parts = []
        for g in range(4):
            blk = w[..., g * hidden:(g + 1) * hidden]
            pad = [(0, 0)] * (w.ndim - 1) + [(0, Hp - hidden)]
            parts.append(jnp.pad(blk, pad))
        return jnp.concatenate(parts, axis=-1)

    # Embedding lookup folded into the input projection (done once, in f32).
    enc_xproj = p["enc_embed"] @ p["enc_wih"]            # (src_vocab, 4*hidden)
    dec_xproj = p["dec_embed"] @ p["dec_wih"]            # (tgt_vocab, 4*hidden)
    enc_xproj = jnp.pad(pad_gates(enc_xproj),
                        ((0, SVp - src_vocab), (0, 0))).astype(jnp.bfloat16)
    dec_xproj = jnp.pad(pad_gates(dec_xproj),
                        ((0, TVp - tgt_vocab), (0, 0))).astype(jnp.bfloat16)
    xproj = jnp.concatenate([enc_xproj, dec_xproj], axis=0)   # (SVp+TVp, 4Hp)

    enc_wh = jnp.pad(pad_gates(p["enc_whh"]),
                     ((0, Hp - hidden), (0, 0))).astype(jnp.bfloat16)
    dec_wh = jnp.pad(pad_gates(p["dec_whh"]),
                     ((0, Hp - hidden), (0, 0))).astype(jnp.bfloat16)

    wout = jnp.pad(p["dec_wout"],
                   ((0, Hp - hidden), (0, TVp - tgt_vocab))).astype(jnp.bfloat16)
    bout = jnp.pad(p["dec_bout"], (0, TVp - tgt_vocab))[None, :]   # zeros on pad

    return dict(
        enc_xproj=enc_xproj, dec_xproj=dec_xproj, xproj=xproj,
        enc_wh=enc_wh, dec_wh=dec_wh,
        enc_b=pad_gates(p["enc_b"])[None, :],
        dec_b=pad_gates(p["dec_b"])[None, :],
        wout=wout, bout=bout,
    )


# -------------------------------- Seq2seq glue -------------------------------


def seq2seq_forward(packed, input_ids, target_ids, *, tgt_vocab,
                    is_training=True):
    """input_ids (B, S) int32, target_ids (B, T) int32 -> (B, T, V) f32."""
    B, T = target_ids.shape
    Bp = _round_up(B, 8)
    pad_b = Bp - B
    inp = jnp.pad(input_ids, ((0, pad_b), (0, 0)))
    tgt = jnp.pad(target_ids, ((0, pad_b), (0, 0)))

    SVp = packed["enc_xproj"].shape[0]
    TVp = packed["dec_xproj"].shape[0]
    Vp = packed["wout"].shape[1]

    if is_training:
        # step 0 uses target[:,0]; step i>=1 uses target[:, i-1]
        dec_in = jnp.concatenate([tgt[:, :1], tgt[:, :-1]], axis=1)    # (Bp, T)
        # Encoder + decoder token ids in one (S+T, Bp) table; decoder ids are
        # offset by SVp so the one-hot hits the decoder block of `xproj`.
        ids_all = jnp.concatenate([inp.T, dec_in.T + SVp], axis=0)
        xoh = jax.nn.one_hot(ids_all, SVp + TVp, dtype=jnp.bfloat16)
        flat = run_seq2seq_train(xoh, packed["xproj"], packed["enc_wh"],
                                 packed["enc_b"], packed["dec_wh"],
                                 packed["dec_b"], packed["wout"],
                                 packed["bout"], T)                 # (Bp, T*Vp)
    else:
        src_oh = jax.nn.one_hot(inp.T, SVp, dtype=jnp.bfloat16)    # (S, Bp, SVp)
        onehot0 = jax.nn.one_hot(tgt[:, 0], TVp, dtype=jnp.bfloat16)  # (Bp, TVp)
        flat = run_seq2seq_greedy(src_oh, onehot0, packed["enc_xproj"],
                                  packed["enc_wh"], packed["enc_b"],
                                  packed["dec_xproj"], packed["dec_wh"],
                                  packed["dec_b"], packed["wout"],
                                  packed["bout"], T, tgt_vocab)     # (Bp, T*Vp)

    logits = flat.reshape(Bp, T, Vp)            # contiguous reshape: free
    return logits[:B, :, :tgt_vocab]            # (B, T, V)


if __name__ == "__main__":
    B, S, T = 2, 8, 8
    E, H = 32, 32
    SRC_V, TGT_V = 48, 64

    key = jax.random.PRNGKey(0)
    k_par, k_in, k_tgt = jax.random.split(key, 3)
    params = init_params(k_par, SRC_V, TGT_V, E, H)
    packed = pack_params(params, E, H, SRC_V, TGT_V)

    input_ids = jax.random.randint(k_in, (B, S), 0, SRC_V, dtype=jnp.int32)
    target_ids = jax.random.randint(k_tgt, (B, T), 0, TGT_V, dtype=jnp.int32)

    fwd_train = jax.jit(functools.partial(seq2seq_forward, tgt_vocab=TGT_V,
                                          is_training=True))
    out_train = fwd_train(packed, input_ids, target_ids)
    jax.block_until_ready(out_train)
    assert out_train.shape == (B, T, TGT_V)

    fwd_infer = jax.jit(functools.partial(seq2seq_forward, tgt_vocab=TGT_V,
                                          is_training=False))
    out_infer = fwd_infer(packed, input_ids, target_ids)
    jax.block_until_ready(out_infer)
    assert out_infer.shape == (B, T, TGT_V)

    print("KERNEL_OK")
</pallas_src>

<mosaic_0001>
module attributes {stable_mosaic.version = 11 : i64} {
  func.func @seq2seq_train_kernel(%arg0: memref<16x8x256xbf16, #tpu.memory_space<vmem>>, %arg1: memref<256x512xbf16, #tpu.memory_space<vmem>>, %arg2: memref<128x512xbf16, #tpu.memory_space<vmem>>, %arg3: memref<1x512xf32, #tpu.memory_space<vmem>>, %arg4: memref<128x512xbf16, #tpu.memory_space<vmem>>, %arg5: memref<1x512xf32, #tpu.memory_space<vmem>>, %arg6: memref<128x128xbf16, #tpu.memory_space<vmem>>, %arg7: memref<1x128xf32, #tpu.memory_space<vmem>>, %arg8: memref<8x1024xf32, #tpu.memory_space<vmem>>, %arg9: memref<64x128xf32, #tpu.memory_space<vmem>>) attributes {dimension_semantics = [], scalar_prefetch = 0 : i64, scratch_operands = 1 : i64, tpu.core_type = #tpu.core_type<tc>} {
    %c0 = arith.constant 0 : index
    %c0_0 = arith.constant 0 : index
    %0 = vector.load %arg3[%c0, %c0_0] : memref<1x512xf32, #tpu.memory_space<vmem>>, vector<1x512xf32>
    %c0_1 = arith.constant 0 : index
    %c0_2 = arith.constant 0 : index
    %1 = vector.load %arg5[%c0_1, %c0_2] : memref<1x512xf32, #tpu.memory_space<vmem>>, vector<1x512xf32>
    %c0_3 = arith.constant 0 : index
    %c0_4 = arith.constant 0 : index
    %c0_5 = arith.constant 0 : index
    %2 = vector.load %arg0[%c0_3, %c0_4, %c0_5] : memref<16x8x256xbf16, #tpu.memory_space<vmem>>, vector<16x8x256xbf16>
    %3 = vector.shape_cast %2 : vector<16x8x256xbf16> to vector<128x256xbf16>
    %c0_6 = arith.constant 0 : index
    %c0_7 = arith.constant 0 : index
    %4 = vector.load %arg1[%c0_6, %c0_7] : memref<256x512xbf16, #tpu.memory_space<vmem>>, vector<256x512xbf16>
    %cst = arith.constant dense<0.000000e+00> : vector<128x512xf32>
    %5 = tpu.matmul %3, %4, %cst {dimension_numbers = #tpu.dot_dimension_numbers<[1], [0], [0], [1], [0, 0, 1, 1], [], []>} : vector<128x256xbf16>, vector<256x512xbf16>, vector<128x512xf32> -> vector<128x512xf32>
    %6 = vector.shape_cast %5 : vector<128x512xf32> to vector<16x8x512xf32>
    %cst_8 = arith.constant 0.000000e+00 : f32
    %7 = vector.broadcast %cst_8 : f32 to vector<8x128xf32>
    %cst_9 = arith.constant 0.000000e+00 : f32
    %8 = vector.broadcast %cst_9 : f32 to vector<8x128xf32>
    %9 = vector.extract_strided_slice %6 {offsets = [0, 0, 0], sizes = [1, 8, 512], strides = [1, 1, 1]} : vector<16x8x512xf32> to vector<1x8x512xf32>
    %10 = vector.shape_cast %9 : vector<1x8x512xf32> to vector<8x512xf32>
    %11 = arith.truncf %7 : vector<8x128xf32> to vector<8x128xbf16>
    %c0_10 = arith.constant 0 : index
    %c0_11 = arith.constant 0 : index
    %12 = vector.load %arg2[%c0_10, %c0_11] : memref<128x512xbf16, #tpu.memory_space<vmem>>, vector<128x512xbf16>
    %cst_12 = arith.constant dense<0.000000e+00> : vector<8x512xf32>
    %13 = tpu.matmul %11, %12, %cst_12 {dimension_numbers = #tpu.dot_dimension_numbers<[1], [0], [0], [1], [0, 0, 1, 1], [], []>} : vector<8x128xbf16>, vector<128x512xbf16>, vector<8x512xf32> -> vector<8x512xf32>
    %14 = arith.addf %10, %13 : vector<8x512xf32>
    %15 = vector.broadcast %0 : vector<1x512xf32> to vector<8x512xf32>
    %16 = arith.addf %14, %15 : vector<8x512xf32>
    %17 = vector.extract_strided_slice %16 {offsets = [0, 0], sizes = [8, 128], strides = [1, 1]} : vector<8x512xf32> to vector<8x128xf32>
    %18 = arith.negf %17 : vector<8x128xf32>
    %19 = math.exp %18 : vector<8x128xf32>
    %cst_13 = arith.constant 1.000000e+00 : f32
    %20 = vector.broadcast %cst_13 : f32 to vector<8x128xf32>
    %21 = arith.addf %20, %19 : vector<8x128xf32>
    %22 = arith.divf %20, %21 : vector<8x128xf32>
    %23 = vector.extract_strided_slice %16 {offsets = [0, 128], sizes = [8, 128], strides = [1, 1]} : vector<8x512xf32> to vector<8x128xf32>
    %24 = arith.negf %23 : vector<8x128xf32>
    %25 = math.exp %24 : vector<8x128xf32>
    %cst_14 = arith.constant 1.000000e+00 : f32
    %26 = vector.broadcast %cst_14 : f32 to vector<8x128xf32>
    %27 = arith.addf %26, %25 : vector<8x128xf32>
    %28 = arith.divf %26, %27 : vector<8x128xf32>
    %29 = vector.extract_strided_slice %16 {offsets = [0, 256], sizes = [8, 128], strides = [1, 1]} : vector<8x512xf32> to vector<8x128xf32>
    %30 = math.tanh %29 : vector<8x128xf32>
    %31 = vector.extract_strided_slice %16 {offsets = [0, 384], sizes = [8, 128], strides = [1, 1]} : vector<8x512xf32> to vector<8x128xf32>
    %32 = arith.negf %31 : vector<8x128xf32>
    %33 = math.exp %32 : vector<8x128xf32>
    %cst_15 = arith.constant 1.000000e+00 : f32
    %34 = vector.broadcast %cst_15 : f32 to vector<8x128xf32>
    %35 = arith.addf %34, %33 : vector<8x128xf32>
    %36 = arith.divf %34, %35 : vector<8x128xf32>
    %37 = arith.mulf %28, %8 : vector<8x128xf32>
    %38 = arith.mulf %22, %30 : vector<8x128xf32>
    %39 = arith.addf %37, %38 : vector<8x128xf32>
    %40 = math.tanh %39 : vector<8x128xf32>
    %41 = arith.mulf %36, %40 : vector<8x128xf32>
    %42 = vector.extract_strided_slice %6 {offsets = [1, 0, 0], sizes = [1, 8, 512], strides = [1, 1, 1]} : vector<16x8x512xf32> to vector<1x8x512xf32>
    %43 = vector.shape_cast %42 : vector<1x8x512xf32> to vector<8x512xf32>
    %44 = arith.truncf %41 : vector<8x128xf32> to vector<8x128xbf16>
    %c0_16 = arith.constant 0 : index
    %c0_17 = arith.constant 0 : index
    %45 = vector.load %arg2[%c0_16, %c0_17] : memref<128x512xbf16, #tpu.memory_space<vmem>>, vector<128x512xbf16>
    %cst_18 = arith.constant dense<0.000000e+00> : vector<8x512xf32>
    %46 = tpu.matmul %44, %45, %cst_18 {dimension_numbers = #tpu.dot_dimension_numbers<[1], [0], [0], [1], [0, 0, 1, 1], [], []>} : vector<8x128xbf16>, vector<128x512xbf16>, vector<8x512xf32> -> vector<8x512xf32>
    %47 = arith.addf %43, %46 : vector<8x512xf32>
    %48 = vector.broadcast %0 : vector<1x512xf32> to vector<8x512xf32>
    %49 = arith.addf %47, %48 : vector<8x512xf32>
    %50 = vector.extract_strided_slice %49 {offsets = [0, 0], sizes = [8, 128], strides = [1, 1]} : vector<8x512xf32> to vector<8x128xf32>
    %51 = arith.negf %50 : vector<8x128xf32>
    %52 = math.exp %51 : vector<8x128xf32>
    %cst_19 = arith.constant 1.000000e+00 : f32
    %53 = vector.broadcast %cst_19 : f32 to vector<8x128xf32>
    %54 = arith.addf %53, %52 : vector<8x128xf32>
    %55 = arith.divf %53, %54 : vector<8x128xf32>
    %56 = vector.extract_strided_slice %49 {offsets = [0, 128], sizes = [8, 128], strides = [1, 1]} : vector<8x512xf32> to vector<8x128xf32>
    %57 = arith.negf %56 : vector<8x128xf32>
    %58 = math.exp %57 : vector<8x128xf32>
    %cst_20 = arith.constant 1.000000e+00 : f32
    %59 = vector.broadcast %cst_20 : f32 to vector<8x128xf32>
    %60 = arith.addf %59, %58 : vector<8x128xf32>
    %61 = arith.divf %59, %60 : vector<8x128xf32>
    %62 = vector.extract_strided_slice %49 {offsets = [0, 256], sizes = [8, 128], strides = [1, 1]} : vector<8x512xf32> to vector<8x128xf32>
    %63 = math.tanh %62 : vector<8x128xf32>
    %64 = vector.extract_strided_slice %49 {offsets = [0, 384], sizes = [8, 128], strides = [1, 1]} : vector<8x512xf32> to vector<8x128xf32>
    %65 = arith.negf %64 : vector<8x128xf32>
    %66 = math.exp %65 : vector<8x128xf32>
    %cst_21 = arith.constant 1.000000e+00 : f32
    %67 = vector.broadcast %cst_21 : f32 to vector<8x128xf32>
    %68 = arith.addf %67, %66 : vector<8x128xf32>
    %69 = arith.divf %67, %68 : vector<8x128xf32>
    %70 = arith.mulf %61, %39 : vector<8x128xf32>
    %71 = arith.mulf %55, %63 : vector<8x128xf32>
    %72 = arith.addf %70, %71 : vector<8x128xf32>
    %73 = math.tanh %72 : vector<8x128xf32>
    %74 = arith.mulf %69, %73 : vector<8x128xf32>
    %75 = vector.extract_strided_slice %6 {offsets = [2, 0, 0], sizes = [1, 8, 512], strides = [1, 1, 1]} : vector<16x8x512xf32> to vector<1x8x512xf32>
    %76 = vector.shape_cast %75 : vector<1x8x512xf32> to vector<8x512xf32>
    %77 = arith.truncf %74 : vector<8x128xf32> to vector<8x128xbf16>
    %c0_22 = arith.constant 0 : index
    %c0_23 = arith.constant 0 : index
    %78 = vector.load %arg2[%c0_22, %c0_23] : memref<128x512xbf16, #tpu.memory_space<vmem>>, vector<128x512xbf16>
    %cst_24 = arith.constant dense<0.000000e+00> : vector<8x512xf32>
    %79 = tpu.matmul %77, %78, %cst_24 {dimension_numbers = #tpu.dot_dimension_numbers<[1], [0], [0], [1], [0, 0, 1, 1], [], []>} : vector<8x128xbf16>, vector<128x512xbf16>, vector<8x512xf32> -> vector<8x512xf32>
    %80 = arith.addf %76, %79 : vector<8x512xf32>
    %81 = vector.broadcast %0 : vector<1x512xf32> to vector<8x512xf32>
    %82 = arith.addf %80, %81 : vector<8x512xf32>
    %83 = vector.extract_strided_slice %82 {offsets = [0, 0], sizes = [8, 128], strides = [1, 1]} : vector<8x512xf32> to vector<8x128xf32>
    %84 = arith.negf %83 : vector<8x128xf32>
    %85 = math.exp %84 : vector<8x128xf32>
    %cst_25 = arith.constant 1.000000e+00 : f32
    %86 = vector.broadcast %cst_25 : f32 to vector<8x128xf32>
    %87 = arith.addf %86, %85 : vector<8x128xf32>
    %88 = arith.divf %86, %87 : vector<8x128xf32>
    %89 = vector.extract_strided_slice %82 {offsets = [0, 128], sizes = [8, 128], strides = [1, 1]} : vector<8x512xf32> to vector<8x128xf32>
    %90 = arith.negf %89 : vector<8x128xf32>
    %91 = math.exp %90 : vector<8x128xf32>
    %cst_26 = arith.constant 1.000000e+00 : f32
    %92 = vector.broadcast %cst_26 : f32 to vector<8x128xf32>
    %93 = arith.addf %92, %91 : vector<8x128xf32>
    %94 = arith.divf %92, %93 : vector<8x128xf32>
    %95 = vector.extract_strided_slice %82 {offsets = [0, 256], sizes = [8, 128], strides = [1, 1]} : vector<8x512xf32> to vector<8x128xf32>
    %96 = math.tanh %95 : vector<8x128xf32>
    %97 = vector.extract_strided_slice %82 {offsets = [0, 384], sizes = [8, 128], strides = [1, 1]} : vector<8x512xf32> to vector<8x128xf32>
    %98 = arith.negf %97 : vector<8x128xf32>
    %99 = math.exp %98 : vector<8x128xf32>
    %cst_27 = arith.constant 1.000000e+00 : f32
    %100 = vector.broadcast %cst_27 : f32 to vector<8x128xf32>
    %101 = arith.addf %100, %99 : vector<8x128xf32>
    %102 = arith.divf %100, %101 : vector<8x128xf32>
    %103 = arith.mulf %94, %72 : vector<8x128xf32>
    %104 = arith.mulf %88, %96 : vector<8x128xf32>
    %105 = arith.addf %103, %104 : vector<8x128xf32>
    %106 = math.tanh %105 : vector<8x128xf32>
    %107 = arith.mulf %102, %106 : vector<8x128xf32>
    %108 = vector.extract_strided_slice %6 {offsets = [3, 0, 0], sizes = [1, 8, 512], strides = [1, 1, 1]} : vector<16x8x512xf32> to vector<1x8x512xf32>
    %109 = vector.shape_cast %108 : vector<1x8x512xf32> to vector<8x512xf32>
    %110 = arith.truncf %107 : vector<8x128xf32> to vector<8x128xbf16>
    %c0_28 = arith.constant 0 : index
    %c0_29 = arith.constant 0 : index
    %111 = vector.load %arg2[%c0_28, %c0_29] : memref<128x512xbf16, #tpu.memory_space<vmem>>, vector<128x512xbf16>
    %cst_30 = arith.constant dense<0.000000e+00> : vector<8x512xf32>
    %112 = tpu.matmul %110, %111, %cst_30 {dimension_numbers = #tpu.dot_dimension_numbers<[1], [0], [0], [1], [0, 0, 1, 1], [], []>} : vector<8x128xbf16>, vector<128x512xbf16>, vector<8x512xf32> -> vector<8x512xf32>
    %113 = arith.addf %109, %112 : vector<8x512xf32>
    %114 = vector.broadcast %0 : vector<1x512xf32> to vector<8x512xf32>
    %115 = arith.addf %113, %114 : vector<8x512xf32>
    %116 = vector.extract_strided_slice %115 {offsets = [0, 0], sizes = [8, 128], strides = [1, 1]} : vector<8x512xf32> to vector<8x128xf32>
    %117 = arith.negf %116 : vector<8x128xf32>
    %118 = math.exp %117 : vector<8x128xf32>
    %cst_31 = arith.constant 1.000000e+00 : f32
    %119 = vector.broadcast %cst_31 : f32 to vector<8x128xf32>
    %120 = arith.addf %119, %118 : vector<8x128xf32>
    %121 = arith.divf %119, %120 : vector<8x128xf32>
    %122 = vector.extract_strided_slice %115 {offsets = [0, 128], sizes = [8, 128], strides = [1, 1]} : vector<8x512xf32> to vector<8x128xf32>
    %123 = arith.negf %122 : vector<8x128xf32>
    %124 = math.exp %123 : vector<8x128xf32>
    %cst_32 = arith.constant 1.000000e+00 : f32
    %125 = vector.broadcast %cst_32 : f32 to vector<8x128xf32>
    %126 = arith.addf %125, %124 : vector<8x128xf32>
    %127 = arith.divf %125, %126 : vector<8x128xf32>
    %128 = vector.extract_strided_slice %115 {offsets = [0, 256], sizes = [8, 128], strides = [1, 1]} : vector<8x512xf32> to vector<8x128xf32>
    %129 = math.tanh %128 : vector<8x128xf32>
    %130 = vector.extract_strided_slice %115 {offsets = [0, 384], sizes = [8, 128], strides = [1, 1]} : vector<8x512xf32> to vector<8x128xf32>
    %131 = arith.negf %130 : vector<8x128xf32>
    %132 = math.exp %131 : vector<8x128xf32>
    %cst_33 = arith.constant 1.000000e+00 : f32
    %133 = vector.broadcast %cst_33 : f32 to vector<8x128xf32>
    %134 = arith.addf %133, %132 : vector<8x128xf32>
    %135 = arith.divf %133, %134 : vector<8x128xf32>
    %136 = arith.mulf %127, %105 : vector<8x128xf32>
    %137 = arith.mulf %121, %129 : vector<8x128xf32>
    %138 = arith.addf %136, %137 : vector<8x128xf32>
    %139 = math.tanh %138 : vector<8x128xf32>
    %140 = arith.mulf %135, %139 : vector<8x128xf32>
    %141 = vector.extract_strided_slice %6 {offsets = [4, 0, 0], sizes = [1, 8, 512], strides = [1, 1, 1]} : vector<16x8x512xf32> to vector<1x8x512xf32>
    %142 = vector.shape_cast %141 : vector<1x8x512xf32> to vector<8x512xf32>
    %143 = arith.truncf %140 : vector<8x128xf32> to vector<8x128xbf16>
    %c0_34 = arith.constant 0 : index
    %c0_35 = arith.constant 0 : index
    %144 = vector.load %arg2[%c0_34, %c0_35] : memref<128x512xbf16, #tpu.memory_space<vmem>>, vector<128x512xbf16>
    %cst_36 = arith.constant dense<0.000000e+00> : vector<8x512xf32>
    %145 = tpu.matmul %143, %144, %cst_36 {dimension_numbers = #tpu.dot_dimension_numbers<[1], [0], [0], [1], [0, 0, 1, 1], [], []>} : vector<8x128xbf16>, vector<128x512xbf16>, vector<8x512xf32> -> vector<8x512xf32>
    %146 = arith.addf %142, %145 : vector<8x512xf32>
    %147 = vector.broadcast %0 : vector<1x512xf32> to vector<8x512xf32>
    %148 = arith.addf %146, %147 : vector<8x512xf32>
    %149 = vector.extract_strided_slice %148 {offsets = [0, 0], sizes = [8, 128], strides = [1, 1]} : vector<8x512xf32> to vector<8x128xf32>
    %150 = arith.negf %149 : vector<8x128xf32>
    %151 = math.exp %150 : vector<8x128xf32>
    %cst_37 = arith.constant 1.000000e+00 : f32
    %152 = vector.broadcast %cst_37 : f32 to vector<8x128xf32>
    %153 = arith.addf %152, %151 : vector<8x128xf32>
    %154 = arith.divf %152, %153 : vector<8x128xf32>
    %155 = vector.extract_strided_slice %148 {offsets = [0, 128], sizes = [8, 128], strides = [1, 1]} : vector<8x512xf32> to vector<8x128xf32>
    %156 = arith.negf %155 : vector<8x128xf32>
    %157 = math.exp %156 : vector<8x128xf32>
    %cst_38 = arith.constant 1.000000e+00 : f32
    %158 = vector.broadcast %cst_38 : f32 to vector<8x128xf32>
    %159 = arith.addf %158, %157 : vector<8x128xf32>
    %160 = arith.divf %158, %159 : vector<8x128xf32>
    %161 = vector.extract_strided_slice %148 {offsets = [0, 256], sizes = [8, 128], strides = [1, 1]} : vector<8x512xf32> to vector<8x128xf32>
    %162 = math.tanh %161 : vector<8x128xf32>
    %163 = vector.extract_strided_slice %148 {offsets = [0, 384], sizes = [8, 128], strides = [1, 1]} : vector<8x512xf32> to vector<8x128xf32>
    %164 = arith.negf %163 : vector<8x128xf32>
    %165 = math.exp %164 : vector<8x128xf32>
    %cst_39 = arith.constant 1.000000e+00 : f32
    %166 = vector.broadcast %cst_39 : f32 to vector<8x128xf32>
    %167 = arith.addf %166, %165 : vector<8x128xf32>
    %168 = arith.divf %166, %167 : vector<8x128xf32>
    %169 = arith.mulf %160, %138 : vector<8x128xf32>
    %170 = arith.mulf %154, %162 : vector<8x128xf32>
    %171 = arith.addf %169, %170 : vector<8x128xf32>
    %172 = math.tanh %171 : vector<8x128xf32>
    %173 = arith.mulf %168, %172 : vector<8x128xf32>
    %174 = vector.extract_strided_slice %6 {offsets = [5, 0, 0], sizes = [1, 8, 512], strides = [1, 1, 1]} : vector<16x8x512xf32> to vector<1x8x512xf32>
    %175 = vector.shape_cast %174 : vector<1x8x512xf32> to vector<8x512xf32>
    %176 = arith.truncf %173 : vector<8x128xf32> to vector<8x128xbf16>
    %c0_40 = arith.constant 0 : index
    %c0_41 = arith.constant 0 : index
    %177 = vector.load %arg2[%c0_40, %c0_41] : memref<128x512xbf16, #tpu.memory_space<vmem>>, vector<128x512xbf16>
    %cst_42 = arith.constant dense<0.000000e+00> : vector<8x512xf32>
    %178 = tpu.matmul %176, %177, %cst_42 {dimension_numbers = #tpu.dot_dimension_numbers<[1], [0], [0], [1], [0, 0, 1, 1], [], []>} : vector<8x128xbf16>, vector<128x512xbf16>, vector<8x512xf32> -> vector<8x512xf32>
    %179 = arith.addf %175, %178 : vector<8x512xf32>
    %180 = vector.broadcast %0 : vector<1x512xf32> to vector<8x512xf32>
    %181 = arith.addf %179, %180 : vector<8x512xf32>
    %182 = vector.extract_strided_slice %181 {offsets = [0, 0], sizes = [8, 128], strides = [1, 1]} : vector<8x512xf32> to vector<8x128xf32>
    %183 = arith.negf %182 : vector<8x128xf32>
    %184 = math.exp %183 : vector<8x128xf32>
    %cst_43 = arith.constant 1.000000e+00 : f32
    %185 = vector.broadcast %cst_43 : f32 to vector<8x128xf32>
    %186 = arith.addf %185, %184 : vector<8x128xf32>
    %187 = arith.divf %185, %186 : vector<8x128xf32>
    %188 = vector.extract_strided_slice %181 {offsets = [0, 128], sizes = [8, 128], strides = [1, 1]} : vector<8x512xf32> to vector<8x128xf32>
    %189 = arith.negf %188 : vector<8x128xf32>
    %190 = math.exp %189 : vector<8x128xf32>
    %cst_44 = arith.constant 1.000000e+00 : f32
    %191 = vector.broadcast %cst_44 : f32 to vector<8x128xf32>
    %192 = arith.addf %191, %190 : vector<8x128xf32>
    %193 = arith.divf %191, %192 : vector<8x128xf32>
    %194 = vector.extract_strided_slice %181 {offsets = [0, 256], sizes = [8, 128], strides = [1, 1]} : vector<8x512xf32> to vector<8x128xf32>
    %195 = math.tanh %194 : vector<8x128xf32>
    %196 = vector.extract_strided_slice %181 {offsets = [0, 384], sizes = [8, 128], strides = [1, 1]} : vector<8x512xf32> to vector<8x128xf32>
    %197 = arith.negf %196 : vector<8x128xf32>
    %198 = math.exp %197 : vector<8x128xf32>
    %cst_45 = arith.constant 1.000000e+00 : f32
    %199 = vector.broadcast %cst_45 : f32 to vector<8x128xf32>
    %200 = arith.addf %199, %198 : vector<8x128xf32>
    %201 = arith.divf %199, %200 : vector<8x128xf32>
    %202 = arith.mulf %193, %171 : vector<8x128xf32>
    %203 = arith.mulf %187, %195 : vector<8x128xf32>
    %204 = arith.addf %202, %203 : vector<8x128xf32>
    %205 = math.tanh %204 : vector<8x128xf32>
    %206 = arith.mulf %201, %205 : vector<8x128xf32>
    %207 = vector.extract_strided_slice %6 {offsets = [6, 0, 0], sizes = [1, 8, 512], strides = [1, 1, 1]} : vector<16x8x512xf32> to vector<1x8x512xf32>
    %208 = vector.shape_cast %207 : vector<1x8x512xf32> to vector<8x512xf32>
    %209 = arith.truncf %206 : vector<8x128xf32> to vector<8x128xbf16>
    %c0_46 = arith.constant 0 : index
    %c0_47 = arith.constant 0 : index
    %210 = vector.load %arg2[%c0_46, %c0_47] : memref<128x512xbf16, #tpu.memory_space<vmem>>, vector<128x512xbf16>
    %cst_48 = arith.constant dense<0.000000e+00> : vector<8x512xf32>
    %211 = tpu.matmul %209, %210, %cst_48 {dimension_numbers = #tpu.dot_dimension_numbers<[1], [0], [0], [1], [0, 0, 1, 1], [], []>} : vector<8x128xbf16>, vector<128x512xbf16>, vector<8x512xf32> -> vector<8x512xf32>
    %212 = arith.addf %208, %211 : vector<8x512xf32>
    %213 = vector.broadcast %0 : vector<1x512xf32> to vector<8x512xf32>
    %214 = arith.addf %212, %213 : vector<8x512xf32>
    %215 = vector.extract_strided_slice %214 {offsets = [0, 0], sizes = [8, 128], strides = [1, 1]} : vector<8x512xf32> to vector<8x128xf32>
    %216 = arith.negf %215 : vector<8x128xf32>
    %217 = math.exp %216 : vector<8x128xf32>
    %cst_49 = arith.constant 1.000000e+00 : f32
    %218 = vector.broadcast %cst_49 : f32 to vector<8x128xf32>
    %219 = arith.addf %218, %217 : vector<8x128xf32>
    %220 = arith.divf %218, %219 : vector<8x128xf32>
    %221 = vector.extract_strided_slice %214 {offsets = [0, 128], sizes = [8, 128], strides = [1, 1]} : vector<8x512xf32> to vector<8x128xf32>
    %222 = arith.negf %221 : vector<8x128xf32>
    %223 = math.exp %222 : vector<8x128xf32>
    %cst_50 = arith.constant 1.000000e+00 : f32
    %224 = vector.broadcast %cst_50 : f32 to vector<8x128xf32>
    %225 = arith.addf %224, %223 : vector<8x128xf32>
    %226 = arith.divf %224, %225 : vector<8x128xf32>
    %227 = vector.extract_strided_slice %214 {offsets = [0, 256], sizes = [8, 128], strides = [1, 1]} : vector<8x512xf32> to vector<8x128xf32>
    %228 = math.tanh %227 : vector<8x128xf32>
    %229 = vector.extract_strided_slice %214 {offsets = [0, 384], sizes = [8, 128], strides = [1, 1]} : vector<8x512xf32> to vector<8x128xf32>
    %230 = arith.negf %229 : vector<8x128xf32>
    %231 = math.exp %230 : vector<8x128xf32>
    %cst_51 = arith.constant 1.000000e+00 : f32
    %232 = vector.broadcast %cst_51 : f32 to vector<8x128xf32>
    %233 = arith.addf %232, %231 : vector<8x128xf32>
    %234 = arith.divf %232, %233 : vector<8x128xf32>
    %235 = arith.mulf %226, %204 : vector<8x128xf32>
    %236 = arith.mulf %220, %228 : vector<8x128xf32>
    %237 = arith.addf %235, %236 : vector<8x128xf32>
    %238 = math.tanh %237 : vector<8x128xf32>
    %239 = arith.mulf %234, %238 : vector<8x128xf32>
    %240 = vector.extract_strided_slice %6 {offsets = [7, 0, 0], sizes = [1, 8, 512], strides = [1, 1, 1]} : vector<16x8x512xf32> to vector<1x8x512xf32>
    %241 = vector.shape_cast %240 : vector<1x8x512xf32> to vector<8x512xf32>
    %242 = arith.truncf %239 : vector<8x128xf32> to vector<8x128xbf16>
    %c0_52 = arith.constant 0 : index
    %c0_53 = arith.constant 0 : index
    %243 = vector.load %arg2[%c0_52, %c0_53] : memref<128x512xbf16, #tpu.memory_space<vmem>>, vector<128x512xbf16>
    %cst_54 = arith.constant dense<0.000000e+00> : vector<8x512xf32>
    %244 = tpu.matmul %242, %243, %cst_54 {dimension_numbers = #tpu.dot_dimension_numbers<[1], [0], [0], [1], [0, 0, 1, 1], [], []>} : vector<8x128xbf16>, vector<128x512xbf16>, vector<8x512xf32> -> vector<8x512xf32>
    %245 = arith.addf %241, %244 : vector<8x512xf32>
    %246 = vector.broadcast %0 : vector<1x512xf32> to vector<8x512xf32>
    %247 = arith.addf %245, %246 : vector<8x512xf32>
    %248 = vector.extract_strided_slice %247 {offsets = [0, 0], sizes = [8, 128], strides = [1, 1]} : vector<8x512xf32> to vector<8x128xf32>
    %249 = arith.negf %248 : vector<8x128xf32>
    %250 = math.exp %249 : vector<8x128xf32>
    %cst_55 = arith.constant 1.000000e+00 : f32
    %251 = vector.broadcast %cst_55 : f32 to vector<8x128xf32>
    %252 = arith.addf %251, %250 : vector<8x128xf32>
    %253 = arith.divf %251, %252 : vector<8x128xf32>
    %254 = vector.extract_strided_slice %247 {offsets = [0, 128], sizes = [8, 128], strides = [1, 1]} : vector<8x512xf32> to vector<8x128xf32>
    %255 = arith.negf %254 : vector<8x128xf32>
    %256 = math.exp %255 : vector<8x128xf32>
    %cst_56 = arith.constant 1.000000e+00 : f32
    %257 = vector.broadcast %cst_56 : f32 to vector<8x128xf32>
    %258 = arith.addf %257, %256 : vector<8x128xf32>
    %259 = arith.divf %257, %258 : vector<8x128xf32>
    %260 = vector.extract_strided_slice %247 {offsets = [0, 256], sizes = [8, 128], strides = [1, 1]} : vector<8x512xf32> to vector<8x128xf32>
    %261 = math.tanh %260 : vector<8x128xf32>
    %262 = vector.extract_strided_slice %247 {offsets = [0, 384], sizes = [8, 128], strides = [1, 1]} : vector<8x512xf32> to vector<8x128xf32>
    %263 = arith.negf %262 : vector<8x128xf32>
    %264 = math.exp %263 : vector<8x128xf32>
    %cst_57 = arith.constant 1.000000e+00 : f32
    %265 = vector.broadcast %cst_57 : f32 to vector<8x128xf32>
    %266 = arith.addf %265, %264 : vector<8x128xf32>
    %267 = arith.divf %265, %266 : vector<8x128xf32>
    %268 = arith.mulf %259, %237 : vector<8x128xf32>
    %269 = arith.mulf %253, %261 : vector<8x128xf32>
    %270 = arith.addf %268, %269 : vector<8x128xf32>
    %271 = math.tanh %270 : vector<8x128xf32>
    %272 = arith.mulf %267, %271 : vector<8x128xf32>
    %273 = vector.extract_strided_slice %6 {offsets = [8, 0, 0], sizes = [1, 8, 512], strides = [1, 1, 1]} : vector<16x8x512xf32> to vector<1x8x512xf32>
    %274 = vector.shape_cast %273 : vector<1x8x512xf32> to vector<8x512xf32>
    %275 = arith.truncf %272 : vector<8x128xf32> to vector<8x128xbf16>
    %c0_58 = arith.constant 0 : index
    %c0_59 = arith.constant 0 : index
    %276 = vector.load %arg4[%c0_58, %c0_59] : memref<128x512xbf16, #tpu.memory_space<vmem>>, vector<128x512xbf16>
    %cst_60 = arith.constant dense<0.000000e+00> : vector<8x512xf32>
    %277 = tpu.matmul %275, %276, %cst_60 {dimension_numbers = #tpu.dot_dimension_numbers<[1], [0], [0], [1], [0, 0, 1, 1], [], []>} : vector<8x128xbf16>, vector<128x512xbf16>, vector<8x512xf32> -> vector<8x512xf32>
    %278 = arith.addf %274, %277 : vector<8x512xf32>
    %279 = vector.broadcast %1 : vector<1x512xf32> to vector<8x512xf32>
    %280 = arith.addf %278, %279 : vector<8x512xf32>
    %281 = vector.extract_strided_slice %280 {offsets = [0, 0], sizes = [8, 128], strides = [1, 1]} : vector<8x512xf32> to vector<8x128xf32>
    %282 = arith.negf %281 : vector<8x128xf32>
    %283 = math.exp %282 : vector<8x128xf32>
    %cst_61 = arith.constant 1.000000e+00 : f32
    %284 = vector.broadcast %cst_61 : f32 to vector<8x128xf32>
    %285 = arith.addf %284, %283 : vector<8x128xf32>
    %286 = arith.divf %284, %285 : vector<8x128xf32>
    %287 = vector.extract_strided_slice %280 {offsets = [0, 128], sizes = [8, 128], strides = [1, 1]} : vector<8x512xf32> to vector<8x128xf32>
    %288 = arith.negf %287 : vector<8x128xf32>
    %289 = math.exp %288 : vector<8x128xf32>
    %cst_62 = arith.constant 1.000000e+00 : f32
    %290 = vector.broadcast %cst_62 : f32 to vector<8x128xf32>
    %291 = arith.addf %290, %289 : vector<8x128xf32>
    %292 = arith.divf %290, %291 : vector<8x128xf32>
    %293 = vector.extract_strided_slice %280 {offsets = [0, 256], sizes = [8, 128], strides = [1, 1]} : vector<8x512xf32> to vector<8x128xf32>
    %294 = math.tanh %293 : vector<8x128xf32>
    %295 = vector.extract_strided_slice %280 {offsets = [0, 384], sizes = [8, 128], strides = [1, 1]} : vector<8x512xf32> to vector<8x128xf32>
    %296 = arith.negf %295 : vector<8x128xf32>
    %297 = math.exp %296 : vector<8x128xf32>
    %cst_63 = arith.constant 1.000000e+00 : f32
    %298 = vector.broadcast %cst_63 : f32 to vector<8x128xf32>
    %299 = arith.addf %298, %297 : vector<8x128xf32>
    %300 = arith.divf %298, %299 : vector<8x128xf32>
    %301 = arith.mulf %292, %270 : vector<8x128xf32>
    %302 = arith.mulf %286, %294 : vector<8x128xf32>
    %303 = arith.addf %301, %302 : vector<8x128xf32>
    %304 = math.tanh %303 : vector<8x128xf32>
    %305 = arith.mulf %300, %304 : vector<8x128xf32>
    %c0_64 = arith.constant 0 : index
    %c0_65 = arith.constant 0 : index
    %306 = vector.load %arg9[%c0_64, %c0_65] : memref<64x128xf32, #tpu.memory_space<vmem>>, vector<8x128xf32>
    tpu.vector_store %arg9[%c0_64, %c0_65], %305 {strides = array<i32>} : memref<64x128xf32, #tpu.memory_space<vmem>>, vector<8x128xf32>,
    %307 = vector.extract_strided_slice %6 {offsets = [9, 0, 0], sizes = [1, 8, 512], strides = [1, 1, 1]} : vector<16x8x512xf32> to vector<1x8x512xf32>
    %308 = vector.shape_cast %307 : vector<1x8x512xf32> to vector<8x512xf32>
    %309 = arith.truncf %305 : vector<8x128xf32> to vector<8x128xbf16>
    %c0_66 = arith.constant 0 : index
    %c0_67 = arith.constant 0 : index
    %310 = vector.load %arg4[%c0_66, %c0_67] : memref<128x512xbf16, #tpu.memory_space<vmem>>, vector<128x512xbf16>
    %cst_68 = arith.constant dense<0.000000e+00> : vector<8x512xf32>
    %311 = tpu.matmul %309, %310, %cst_68 {dimension_numbers = #tpu.dot_dimension_numbers<[1], [0], [0], [1], [0, 0, 1, 1], [], []>} : vector<8x128xbf16>, vector<128x512xbf16>, vector<8x512xf32> -> vector<8x512xf32>
    %312 = arith.addf %308, %311 : vector<8x512xf32>
    %313 = vector.broadcast %1 : vector<1x512xf32> to vector<8x512xf32>
    %314 = arith.addf %312, %313 : vector<8x512xf32>
    %315 = vector.extract_strided_slice %314 {offsets = [0, 0], sizes = [8, 128], strides = [1, 1]} : vector<8x512xf32> to vector<8x128xf32>
    %316 = arith.negf %315 : vector<8x128xf32>
    %317 = math.exp %316 : vector<8x128xf32>
    %cst_69 = arith.constant 1.000000e+00 : f32
    %318 = vector.broadcast %cst_69 : f32 to vector<8x128xf32>
    %319 = arith.addf %318, %317 : vector<8x128xf32>
    %320 = arith.divf %318, %319 : vector<8x128xf32>
    %321 = vector.extract_strided_slice %314 {offsets = [0, 128], sizes = [8, 128], strides = [1, 1]} : vector<8x512xf32> to vector<8x128xf32>
    %322 = arith.negf %321 : vector<8x128xf32>
    %323 = math.exp %322 : vector<8x128xf32>
    %cst_70 = arith.constant 1.000000e+00 : f32
    %324 = vector.broadcast %cst_70 : f32 to vector<8x128xf32>
    %325 = arith.addf %324, %323 : vector<8x128xf32>
    %326 = arith.divf %324, %325 : vector<8x128xf32>
    %327 = vector.extract_strided_slice %314 {offsets = [0, 256], sizes = [8, 128], strides = [1, 1]} : vector<8x512xf32> to vector<8x128xf32>
    %328 = math.tanh %327 : vector<8x128xf32>
    %329 = vector.extract_strided_slice %314 {offsets = [0, 384], sizes = [8, 128], strides = [1, 1]} : vector<8x512xf32> to vector<8x128xf32>
    %330 = arith.negf %329 : vector<8x128xf32>
    %331 = math.exp %330 : vector<8x128xf32>
    %cst_71 = arith.constant 1.000000e+00 : f32
    %332 = vector.broadcast %cst_71 : f32 to vector<8x128xf32>
    %333 = arith.addf %332, %331 : vector<8x128xf32>
    %334 = arith.divf %332, %333 : vector<8x128xf32>
    %335 = arith.mulf %326, %303 : vector<8x128xf32>
    %336 = arith.mulf %320, %328 : vector<8x128xf32>
    %337 = arith.addf %335, %336 : vector<8x128xf32>
    %338 = math.tanh %337 : vector<8x128xf32>
    %339 = arith.mulf %334, %338 : vector<8x128xf32>
    %c8 = arith.constant 8 : index
    %c0_72 = arith.constant 0 : index
    %340 = vector.load %arg9[%c8, %c0_72] : memref<64x128xf32, #tpu.memory_space<vmem>>, vector<8x128xf32>
    tpu.vector_store %arg9[%c8, %c0_72], %339 {strides = array<i32>} : memref<64x128xf32, #tpu.memory_space<vmem>>, vector<8x128xf32>,
    %341 = vector.extract_strided_slice %6 {offsets = [10, 0, 0], sizes = [1, 8, 512], strides = [1, 1, 1]} : vector<16x8x512xf32> to vector<1x8x512xf32>
    %342 = vector.shape_cast %341 : vector<1x8x512xf32> to vector<8x512xf32>
    %343 = arith.truncf %339 : vector<8x128xf32> to vector<8x128xbf16>
    %c0_73 = arith.constant 0 : index
    %c0_74 = arith.constant 0 : index
    %344 = vector.load %arg4[%c0_73, %c0_74] : memref<128x512xbf16, #tpu.memory_space<vmem>>, vector<128x512xbf16>
    %cst_75 = arith.constant dense<0.000000e+00> : vector<8x512xf32>
    %345 = tpu.matmul %343, %344, %cst_75 {dimension_numbers = #tpu.dot_dimension_numbers<[1], [0], [0], [1], [0, 0, 1, 1], [], []>} : vector<8x128xbf16>, vector<128x512xbf16>, vector<8x512xf32> -> vector<8x512xf32>
    %346 = arith.addf %342, %345 : vector<8x512xf32>
    %347 = vector.broadcast %1 : vector<1x512xf32> to vector<8x512xf32>
    %348 = arith.addf %346, %347 : vector<8x512xf32>
    %349 = vector.extract_strided_slice %348 {offsets = [0, 0], sizes = [8, 128], strides = [1, 1]} : vector<8x512xf32> to vector<8x128xf32>
    %350 = arith.negf %349 : vector<8x128xf32>
    %351 = math.exp %350 : vector<8x128xf32>
    %cst_76 = arith.constant 1.000000e+00 : f32
    %352 = vector.broadcast %cst_76 : f32 to vector<8x128xf32>
    %353 = arith.addf %352, %351 : vector<8x128xf32>
    %354 = arith.divf %352, %353 : vector<8x128xf32>
    %355 = vector.extract_strided_slice %348 {offsets = [0, 128], sizes = [8, 128], strides = [1, 1]} : vector<8x512xf32> to vector<8x128xf32>
    %356 = arith.negf %355 : vector<8x128xf32>
    %357 = math.exp %356 : vector<8x128xf32>
    %cst_77 = arith.constant 1.000000e+00 : f32
    %358 = vector.broadcast %cst_77 : f32 to vector<8x128xf32>
    %359 = arith.addf %358, %357 : vector<8x128xf32>
    %360 = arith.divf %358, %359 : vector<8x128xf32>
    %361 = vector.extract_strided_slice %348 {offsets = [0, 256], sizes = [8, 128], strides = [1, 1]} : vector<8x512xf32> to vector<8x128xf32>
    %362 = math.tanh %361 : vector<8x128xf32>
    %363 = vector.extract_strided_slice %348 {offsets = [0, 384], sizes = [8, 128], strides = [1, 1]} : vector<8x512xf32> to vector<8x128xf32>
    %364 = arith.negf %363 : vector<8x128xf32>
    %365 = math.exp %364 : vector<8x128xf32>
    %cst_78 = arith.constant 1.000000e+00 : f32
    %366 = vector.broadcast %cst_78 : f32 to vector<8x128xf32>
    %367 = arith.addf %366, %365 : vector<8x128xf32>
    %368 = arith.divf %366, %367 : vector<8x128xf32>
    %369 = arith.mulf %360, %337 : vector<8x128xf32>
    %370 = arith.mulf %354, %362 : vector<8x128xf32>
    %371 = arith.addf %369, %370 : vector<8x128xf32>
    %372 = math.tanh %371 : vector<8x128xf32>
    %373 = arith.mulf %368, %372 : vector<8x128xf32>
    %c16 = arith.constant 16 : index
    %c0_79 = arith.constant 0 : index
    %374 = vector.load %arg9[%c16, %c0_79] : memref<64x128xf32, #tpu.memory_space<vmem>>, vector<8x128xf32>
    tpu.vector_store %arg9[%c16, %c0_79], %373 {strides = array<i32>} : memref<64x128xf32, #tpu.memory_space<vmem>>, vector<8x128xf32>,
    %375 = vector.extract_strided_slice %6 {offsets = [11, 0, 0], sizes = [1, 8, 512], strides = [1, 1, 1]} : vector<16x8x512xf32> to vector<1x8x512xf32>
    %376 = vector.shape_cast %375 : vector<1x8x512xf32> to vector<8x512xf32>
    %377 = arith.truncf %373 : vector<8x128xf32> to vector<8x128xbf16>
    %c0_80 = arith.constant 0 : index
    %c0_81 = arith.constant 0 : index
    %378 = vector.load %arg4[%c0_80, %c0_81] : memref<128x512xbf16, #tpu.memory_space<vmem>>, vector<128x512xbf16>
    %cst_82 = arith.constant dense<0.000000e+00> : vector<8x512xf32>
    %379 = tpu.matmul %377, %378, %cst_82 {dimension_numbers = #tpu.dot_dimension_numbers<[1], [0], [0], [1], [0, 0, 1, 1], [], []>} : vector<8x128xbf16>, vector<128x512xbf16>, vector<8x512xf32> -> vector<8x512xf32>
    %380 = arith.addf %376, %379 : vector<8x512xf32>
    %381 = vector.broadcast %1 : vector<1x512xf32> to vector<8x512xf32>
    %382 = arith.addf %380, %381 : vector<8x512xf32>
    %383 = vector.extract_strided_slice %382 {offsets = [0, 0], sizes = [8, 128], strides = [1, 1]} : vector<8x512xf32> to vector<8x128xf32>
    %384 = arith.negf %383 : vector<8x128xf32>
    %385 = math.exp %384 : vector<8x128xf32>
    %cst_83 = arith.constant 1.000000e+00 : f32
    %386 = vector.broadcast %cst_83 : f32 to vector<8x128xf32>
    %387 = arith.addf %386, %385 : vector<8x128xf32>
    %388 = arith.divf %386, %387 : vector<8x128xf32>
    %389 = vector.extract_strided_slice %382 {offsets = [0, 128], sizes = [8, 128], strides = [1, 1]} : vector<8x512xf32> to vector<8x128xf32>
    %390 = arith.negf %389 : vector<8x128xf32>
    %391 = math.exp %390 : vector<8x128xf32>
    %cst_84 = arith.constant 1.000000e+00 : f32
    %392 = vector.broadcast %cst_84 : f32 to vector<8x128xf32>
    %393 = arith.addf %392, %391 : vector<8x128xf32>
    %394 = arith.divf %392, %393 : vector<8x128xf32>
    %395 = vector.extract_strided_slice %382 {offsets = [0, 256], sizes = [8, 128], strides = [1, 1]} : vector<8x512xf32> to vector<8x128xf32>
    %396 = math.tanh %395 : vector<8x128xf32>
    %397 = vector.extract_strided_slice %382 {offsets = [0, 384], sizes = [8, 128], strides = [1, 1]} : vector<8x512xf32> to vector<8x128xf32>
    %398 = arith.negf %397 : vector<8x128xf32>
    %399 = math.exp %398 : vector<8x128xf32>
    %cst_85 = arith.constant 1.000000e+00 : f32
    %400 = vector.broadcast %cst_85 : f32 to vector<8x128xf32>
    %401 = arith.addf %400, %399 : vector<8x128xf32>
    %402 = arith.divf %400, %401 : vector<8x128xf32>
    %403 = arith.mulf %394, %371 : vector<8x128xf32>
    %404 = arith.mulf %388, %396 : vector<8x128xf32>
    %405 = arith.addf %403, %404 : vector<8x128xf32>
    %406 = math.tanh %405 : vector<8x128xf32>
    %407 = arith.mulf %402, %406 : vector<8x128xf32>
    %c24 = arith.constant 24 : index
    %c0_86 = arith.constant 0 : index
    %408 = vector.load %arg9[%c24, %c0_86] : memref<64x128xf32, #tpu.memory_space<vmem>>, vector<8x128xf32>
    tpu.vector_store %arg9[%c24, %c0_86], %407 {strides = array<i32>} : memref<64x128xf32, #tpu.memory_space<vmem>>, vector<8x128xf32>,
    %409 = vector.extract_strided_slice %6 {offsets = [12, 0, 0], sizes = [1, 8, 512], strides = [1, 1, 1]} : vector<16x8x512xf32> to vector<1x8x512xf32>
    %410 = vector.shape_cast %409 : vector<1x8x512xf32> to vector<8x512xf32>
    %411 = arith.truncf %407 : vector<8x128xf32> to vector<8x128xbf16>
    %c0_87 = arith.constant 0 : index
    %c0_88 = arith.constant 0 : index
    %412 = vector.load %arg4[%c0_87, %c0_88] : memref<128x512xbf16, #tpu.memory_space<vmem>>, vector<128x512xbf16>
    %cst_89 = arith.constant dense<0.000000e+00> : vector<8x512xf32>
    %413 = tpu.matmul %411, %412, %cst_89 {dimension_numbers = #tpu.dot_dimension_numbers<[1], [0], [0], [1], [0, 0, 1, 1], [], []>} : vector<8x128xbf16>, vector<128x512xbf16>, vector<8x512xf32> -> vector<8x512xf32>
    %414 = arith.addf %410, %413 : vector<8x512xf32>
    %415 = vector.broadcast %1 : vector<1x512xf32> to vector<8x512xf32>
    %416 = arith.addf %414, %415 : vector<8x512xf32>
    %417 = vector.extract_strided_slice %416 {offsets = [0, 0], sizes = [8, 128], strides = [1, 1]} : vector<8x512xf32> to vector<8x128xf32>
    %418 = arith.negf %417 : vector<8x128xf32>
    %419 = math.exp %418 : vector<8x128xf32>
    %cst_90 = arith.constant 1.000000e+00 : f32
    %420 = vector.broadcast %cst_90 : f32 to vector<8x128xf32>
    %421 = arith.addf %420, %419 : vector<8x128xf32>
    %422 = arith.divf %420, %421 : vector<8x128xf32>
    %423 = vector.extract_strided_slice %416 {offsets = [0, 128], sizes = [8, 128], strides = [1, 1]} : vector<8x512xf32> to vector<8x128xf32>
    %424 = arith.negf %423 : vector<8x128xf32>
    %425 = math.exp %424 : vector<8x128xf32>
    %cst_91 = arith.constant 1.000000e+00 : f32
    %426 = vector.broadcast %cst_91 : f32 to vector<8x128xf32>
    %427 = arith.addf %426, %425 : vector<8x128xf32>
    %428 = arith.divf %426, %427 : vector<8x128xf32>
    %429 = vector.extract_strided_slice %416 {offsets = [0, 256], sizes = [8, 128], strides = [1, 1]} : vector<8x512xf32> to vector<8x128xf32>
    %430 = math.tanh %429 : vector<8x128xf32>
    %431 = vector.extract_strided_slice %416 {offsets = [0, 384], sizes = [8, 128], strides = [1, 1]} : vector<8x512xf32> to vector<8x128xf32>
    %432 = arith.negf %431 : vector<8x128xf32>
    %433 = math.exp %432 : vector<8x128xf32>
    %cst_92 = arith.constant 1.000000e+00 : f32
    %434 = vector.broadcast %cst_92 : f32 to vector<8x128xf32>
    %435 = arith.addf %434, %433 : vector<8x128xf32>
    %436 = arith.divf %434, %435 : vector<8x128xf32>
    %437 = arith.mulf %428, %405 : vector<8x128xf32>
    %438 = arith.mulf %422, %430 : vector<8x128xf32>
    %439 = arith.addf %437, %438 : vector<8x128xf32>
    %440 = math.tanh %439 : vector<8x128xf32>
    %441 = arith.mulf %436, %440 : vector<8x128xf32>
    %c32 = arith.constant 32 : index
    %c0_93 = arith.constant 0 : index
    %442 = vector.load %arg9[%c32, %c0_93] : memref<64x128xf32, #tpu.memory_space<vmem>>, vector<8x128xf32>
    tpu.vector_store %arg9[%c32, %c0_93], %441 {strides = array<i32>} : memref<64x128xf32, #tpu.memory_space<vmem>>, vector<8x128xf32>,
    %443 = vector.extract_strided_slice %6 {offsets = [13, 0, 0], sizes = [1, 8, 512], strides = [1, 1, 1]} : vector<16x8x512xf32> to vector<1x8x512xf32>
    %444 = vector.shape_cast %443 : vector<1x8x512xf32> to vector<8x512xf32>
    %445 = arith.truncf %441 : vector<8x128xf32> to vector<8x128xbf16>
    %c0_94 = arith.constant 0 : index
    %c0_95 = arith.constant 0 : index
    %446 = vector.load %arg4[%c0_94, %c0_95] : memref<128x512xbf16, #tpu.memory_space<vmem>>, vector<128x512xbf16>
    %cst_96 = arith.constant dense<0.000000e+00> : vector<8x512xf32>
    %447 = tpu.matmul %445, %446, %cst_96 {dimension_numbers = #tpu.dot_dimension_numbers<[1], [0], [0], [1], [0, 0, 1, 1], [], []>} : vector<8x128xbf16>, vector<128x512xbf16>, vector<8x512xf32> -> vector<8x512xf32>
    %448 = arith.addf %444, %447 : vector<8x512xf32>
    %449 = vector.broadcast %1 : vector<1x512xf32> to vector<8x512xf32>
    %450 = arith.addf %448, %449 : vector<8x512xf32>
    %451 = vector.extract_strided_slice %450 {offsets = [0, 0], sizes = [8, 128], strides = [1, 1]} : vector<8x512xf32> to vector<8x128xf32>
    %452 = arith.negf %451 : vector<8x128xf32>
    %453 = math.exp %452 : vector<8x128xf32>
    %cst_97 = arith.constant 1.000000e+00 : f32
    %454 = vector.broadcast %cst_97 : f32 to vector<8x128xf32>
    %455 = arith.addf %454, %453 : vector<8x128xf32>
    %456 = arith.divf %454, %455 : vector<8x128xf32>
    %457 = vector.extract_strided_slice %450 {offsets = [0, 128], sizes = [8, 128], strides = [1, 1]} : vector<8x512xf32> to vector<8x128xf32>
    %458 = arith.negf %457 : vector<8x128xf32>
    %459 = math.exp %458 : vector<8x128xf32>
    %cst_98 = arith.constant 1.000000e+00 : f32
    %460 = vector.broadcast %cst_98 : f32 to vector<8x128xf32>
    %461 = arith.addf %460, %459 : vector<8x128xf32>
    %462 = arith.divf %460, %461 : vector<8x128xf32>
    %463 = vector.extract_strided_slice %450 {offsets = [0, 256], sizes = [8, 128], strides = [1, 1]} : vector<8x512xf32> to vector<8x128xf32>
    %464 = math.tanh %463 : vector<8x128xf32>
    %465 = vector.extract_strided_slice %450 {offsets = [0, 384], sizes = [8, 128], strides = [1, 1]} : vector<8x512xf32> to vector<8x128xf32>
    %466 = arith.negf %465 : vector<8x128xf32>
    %467 = math.exp %466 : vector<8x128xf32>
    %cst_99 = arith.constant 1.000000e+00 : f32
    %468 = vector.broadcast %cst_99 : f32 to vector<8x128xf32>
    %469 = arith.addf %468, %467 : vector<8x128xf32>
    %470 = arith.divf %468, %469 : vector<8x128xf32>
    %471 = arith.mulf %462, %439 : vector<8x128xf32>
    %472 = arith.mulf %456, %464 : vector<8x128xf32>
    %473 = arith.addf %471, %472 : vector<8x128xf32>
    %474 = math.tanh %473 : vector<8x128xf32>
    %475 = arith.mulf %470, %474 : vector<8x128xf32>
    %c40 = arith.constant 40 : index
    %c0_100 = arith.constant 0 : index
    %476 = vector.load %arg9[%c40, %c0_100] : memref<64x128xf32, #tpu.memory_space<vmem>>, vector<8x128xf32>
    tpu.vector_store %arg9[%c40, %c0_100], %475 {strides = array<i32>} : memref<64x128xf32, #tpu.memory_space<vmem>>, vector<8x128xf32>,
    %477 = vector.extract_strided_slice %6 {offsets = [14, 0, 0], sizes = [1, 8, 512], strides = [1, 1, 1]} : vector<16x8x512xf32> to vector<1x8x512xf32>
    %478 = vector.shape_cast %477 : vector<1x8x512xf32> to vector<8x512xf32>
    %479 = arith.truncf %475 : vector<8x128xf32> to vector<8x128xbf16>
    %c0_101 = arith.constant 0 : index
    %c0_102 = arith.constant 0 : index
    %480 = vector.load %arg4[%c0_101, %c0_102] : memref<128x512xbf16, #tpu.memory_space<vmem>>, vector<128x512xbf16>
    %cst_103 = arith.constant dense<0.000000e+00> : vector<8x512xf32>
    %481 = tpu.matmul %479, %480, %cst_103 {dimension_numbers = #tpu.dot_dimension_numbers<[1], [0], [0], [1], [0, 0, 1, 1], [], []>} : vector<8x128xbf16>, vector<128x512xbf16>, vector<8x512xf32> -> vector<8x512xf32>
    %482 = arith.addf %478, %481 : vector<8x512xf32>
    %483 = vector.broadcast %1 : vector<1x512xf32> to vector<8x512xf32>
    %484 = arith.addf %482, %483 : vector<8x512xf32>
    %485 = vector.extract_strided_slice %484 {offsets = [0, 0], sizes = [8, 128], strides = [1, 1]} : vector<8x512xf32> to vector<8x128xf32>
    %486 = arith.negf %485 : vector<8x128xf32>
    %487 = math.exp %486 : vector<8x128xf32>
    %cst_104 = arith.constant 1.000000e+00 : f32
    %488 = vector.broadcast %cst_104 : f32 to vector<8x128xf32>
    %489 = arith.addf %488, %487 : vector<8x128xf32>
    %490 = arith.divf %488, %489 : vector<8x128xf32>
    %491 = vector.extract_strided_slice %484 {offsets = [0, 128], sizes = [8, 128], strides = [1, 1]} : vector<8x512xf32> to vector<8x128xf32>
    %492 = arith.negf %491 : vector<8x128xf32>
    %493 = math.exp %492 : vector<8x128xf32>
    %cst_105 = arith.constant 1.000000e+00 : f32
    %494 = vector.broadcast %cst_105 : f32 to vector<8x128xf32>
    %495 = arith.addf %494, %493 : vector<8x128xf32>
    %496 = arith.divf %494, %495 : vector<8x128xf32>
    %497 = vector.extract_strided_slice %484 {offsets = [0, 256], sizes = [8, 128], strides = [1, 1]} : vector<8x512xf32> to vector<8x128xf32>
    %498 = math.tanh %497 : vector<8x128xf32>
    %499 = vector.extract_strided_slice %484 {offsets = [0, 384], sizes = [8, 128], strides = [1, 1]} : vector<8x512xf32> to vector<8x128xf32>
    %500 = arith.negf %499 : vector<8x128xf32>
    %501 = math.exp %500 : vector<8x128xf32>
    %cst_106 = arith.constant 1.000000e+00 : f32
    %502 = vector.broadcast %cst_106 : f32 to vector<8x128xf32>
    %503 = arith.addf %502, %501 : vector<8x128xf32>
    %504 = arith.divf %502, %503 : vector<8x128xf32>
    %505 = arith.mulf %496, %473 : vector<8x128xf32>
    %506 = arith.mulf %490, %498 : vector<8x128xf32>
    %507 = arith.addf %505, %506 : vector<8x128xf32>
    %508 = math.tanh %507 : vector<8x128xf32>
    %509 = arith.mulf %504, %508 : vector<8x128xf32>
    %c48 = arith.constant 48 : index
    %c0_107 = arith.constant 0 : index
    %510 = vector.load %arg9[%c48, %c0_107] : memref<64x128xf32, #tpu.memory_space<vmem>>, vector<8x128xf32>
    tpu.vector_store %arg9[%c48, %c0_107], %509 {strides = array<i32>} : memref<64x128xf32, #tpu.memory_space<vmem>>, vector<8x128xf32>,
    %511 = vector.extract_strided_slice %6 {offsets = [15, 0, 0], sizes = [1, 8, 512], strides = [1, 1, 1]} : vector<16x8x512xf32> to vector<1x8x512xf32>
    %512 = vector.shape_cast %511 : vector<1x8x512xf32> to vector<8x512xf32>
    %513 = arith.truncf %509 : vector<8x128xf32> to vector<8x128xbf16>
    %c0_108 = arith.constant 0 : index
    %c0_109 = arith.constant 0 : index
    %514 = vector.load %arg4[%c0_108, %c0_109] : memref<128x512xbf16, #tpu.memory_space<vmem>>, vector<128x512xbf16>
    %cst_110 = arith.constant dense<0.000000e+00> : vector<8x512xf32>
    %515 = tpu.matmul %513, %514, %cst_110 {dimension_numbers = #tpu.dot_dimension_numbers<[1], [0], [0], [1], [0, 0, 1, 1], [], []>} : vector<8x128xbf16>, vector<128x512xbf16>, vector<8x512xf32> -> vector<8x512xf32>
    %516 = arith.addf %512, %515 : vector<8x512xf32>
    %517 = vector.broadcast %1 : vector<1x512xf32> to vector<8x512xf32>
    %518 = arith.addf %516, %517 : vector<8x512xf32>
    %519 = vector.extract_strided_slice %518 {offsets = [0, 0], sizes = [8, 128], strides = [1, 1]} : vector<8x512xf32> to vector<8x128xf32>
    %520 = arith.negf %519 : vector<8x128xf32>
    %521 = math.exp %520 : vector<8x128xf32>
    %cst_111 = arith.constant 1.000000e+00 : f32
    %522 = vector.broadcast %cst_111 : f32 to vector<8x128xf32>
    %523 = arith.addf %522, %521 : vector<8x128xf32>
    %524 = arith.divf %522, %523 : vector<8x128xf32>
    %525 = vector.extract_strided_slice %518 {offsets = [0, 128], sizes = [8, 128], strides = [1, 1]} : vector<8x512xf32> to vector<8x128xf32>
    %526 = arith.negf %525 : vector<8x128xf32>
    %527 = math.exp %526 : vector<8x128xf32>
    %cst_112 = arith.constant 1.000000e+00 : f32
    %528 = vector.broadcast %cst_112 : f32 to vector<8x128xf32>
    %529 = arith.addf %528, %527 : vector<8x128xf32>
    %530 = arith.divf %528, %529 : vector<8x128xf32>
    %531 = vector.extract_strided_slice %518 {offsets = [0, 256], sizes = [8, 128], strides = [1, 1]} : vector<8x512xf32> to vector<8x128xf32>
    %532 = math.tanh %531 : vector<8x128xf32>
    %533 = vector.extract_strided_slice %518 {offsets = [0, 384], sizes = [8, 128], strides = [1, 1]} : vector<8x512xf32> to vector<8x128xf32>
    %534 = arith.negf %533 : vector<8x128xf32>
    %535 = math.exp %534 : vector<8x128xf32>
    %cst_113 = arith.constant 1.000000e+00 : f32
    %536 = vector.broadcast %cst_113 : f32 to vector<8x128xf32>
    %537 = arith.addf %536, %535 : vector<8x128xf32>
    %538 = arith.divf %536, %537 : vector<8x128xf32>
    %539 = arith.mulf %530, %507 : vector<8x128xf32>
    %540 = arith.mulf %524, %532 : vector<8x128xf32>
    %541 = arith.addf %539, %540 : vector<8x128xf32>
    %542 = math.tanh %541 : vector<8x128xf32>
    %543 = arith.mulf %538, %542 : vector<8x128xf32>
    %c56 = arith.constant 56 : index
    %c0_114 = arith.constant 0 : index
    %544 = vector.load %arg9[%c56, %c0_114] : memref<64x128xf32, #tpu.memory_space<vmem>>, vector<8x128xf32>
    tpu.vector_store %arg9[%c56, %c0_114], %543 {strides = array<i32>} : memref<64x128xf32, #tpu.memory_space<vmem>>, vector<8x128xf32>,
    %c0_115 = arith.constant 0 : index
    %c0_116 = arith.constant 0 : index
    %545 = vector.load %arg9[%c0_115, %c0_116] : memref<64x128xf32, #tpu.memory_space<vmem>>, vector<64x128xf32>
    %546 = arith.truncf %545 : vector<64x128xf32> to vector<64x128xbf16>
    %c0_117 = arith.constant 0 : index
    %c0_118 = arith.constant 0 : index
    %547 = vector.load %arg6[%c0_117, %c0_118] : memref<128x128xbf16, #tpu.memory_space<vmem>>, vector<128x128xbf16>
    %cst_119 = arith.constant dense<0.000000e+00> : vector<64x128xf32>
    %548 = tpu.matmul %546, %547, %cst_119 {dimension_numbers = #tpu.dot_dimension_numbers<[1], [0], [0], [1], [0, 0, 1, 1], [], []>} : vector<64x128xbf16>, vector<128x128xbf16>, vector<64x128xf32> -> vector<64x128xf32>
    %c0_120 = arith.constant 0 : index
    %c0_121 = arith.constant 0 : index
    %549 = vector.load %arg7[%c0_120, %c0_121] : memref<1x128xf32, #tpu.memory_space<vmem>>, vector<1x128xf32>
    %550 = vector.broadcast %549 : vector<1x128xf32> to vector<64x128xf32>
    %551 = arith.addf %548, %550 : vector<64x128xf32>
    %552 = vector.extract_strided_slice %551 {offsets = [0, 0], sizes = [8, 128], strides = [1, 1]} : vector<64x128xf32> to vector<8x128xf32>
    %c0_122 = arith.constant 0 : index
    %c0_123 = arith.constant 0 : index
    %553 = vector.load %arg8[%c0_122, %c0_123] : memref<8x1024xf32, #tpu.memory_space<vmem>>, vector<8x128xf32>
    tpu.vector_store %arg8[%c0_122, %c0_123], %552 {strides = array<i32>} : memref<8x1024xf32, #tpu.memory_space<vmem>>, vector<8x128xf32>,
    %554 = vector.extract_strided_slice %551 {offsets = [8, 0], sizes = [8, 128], strides = [1, 1]} : vector<64x128xf32> to vector<8x128xf32>
    %c0_124 = arith.constant 0 : index
    %c128 = arith.constant 128 : index
    %555 = vector.load %arg8[%c0_124, %c128] : memref<8x1024xf32, #tpu.memory_space<vmem>>, vector<8x128xf32>
    tpu.vector_store %arg8[%c0_124, %c128], %554 {strides = array<i32>} : memref<8x1024xf32, #tpu.memory_space<vmem>>, vector<8x128xf32>,
    %556 = vector.extract_strided_slice %551 {offsets = [16, 0], sizes = [8, 128], strides = [1, 1]} : vector<64x128xf32> to vector<8x128xf32>
    %c0_125 = arith.constant 0 : index
    %c256 = arith.constant 256 : index
    %557 = vector.load %arg8[%c0_125, %c256] : memref<8x1024xf32, #tpu.memory_space<vmem>>, vector<8x128xf32>
    tpu.vector_store %arg8[%c0_125, %c256], %556 {strides = array<i32>} : memref<8x1024xf32, #tpu.memory_space<vmem>>, vector<8x128xf32>,
    %558 = vector.extract_strided_slice %551 {offsets = [24, 0], sizes = [8, 128], strides = [1, 1]} : vector<64x128xf32> to vector<8x128xf32>
    %c0_126 = arith.constant 0 : index
    %c384 = arith.constant 384 : index
    %559 = vector.load %arg8[%c0_126, %c384] : memref<8x1024xf32, #tpu.memory_space<vmem>>, vector<8x128xf32>
    tpu.vector_store %arg8[%c0_126, %c384], %558 {strides = array<i32>} : memref<8x1024xf32, #tpu.memory_space<vmem>>, vector<8x128xf32>,
    %560 = vector.extract_strided_slice %551 {offsets = [32, 0], sizes = [8, 128], strides = [1, 1]} : vector<64x128xf32> to vector<8x128xf32>
    %c0_127 = arith.constant 0 : index
    %c512 = arith.constant 512 : index
    %561 = vector.load %arg8[%c0_127, %c512] : memref<8x1024xf32, #tpu.memory_space<vmem>>, vector<8x128xf32>
    tpu.vector_store %arg8[%c0_127, %c512], %560 {strides = array<i32>} : memref<8x1024xf32, #tpu.memory_space<vmem>>, vector<8x128xf32>,
    %562 = vector.extract_strided_slice %551 {offsets = [40, 0], sizes = [8, 128], strides = [1, 1]} : vector<64x128xf32> to vector<8x128xf32>
    %c0_128 = arith.constant 0 : index
    %c640 = arith.constant 640 : index
    %563 = vector.load %arg8[%c0_128, %c640] : memref<8x1024xf32, #tpu.memory_space<vmem>>, vector<8x128xf32>
    tpu.vector_store %arg8[%c0_128, %c640], %562 {strides = array<i32>} : memref<8x1024xf32, #tpu.memory_space<vmem>>, vector<8x128xf32>,
    %564 = vector.extract_strided_slice %551 {offsets = [48, 0], sizes = [8, 128], strides = [1, 1]} : vector<64x128xf32> to vector<8x128xf32>
    %c0_129 = arith.constant 0 : index
    %c768 = arith.constant 768 : index
    %565 = vector.load %arg8[%c0_129, %c768] : memref<8x1024xf32, #tpu.memory_space<vmem>>, vector<8x128xf32>
    tpu.vector_store %arg8[%c0_129, %c768], %564 {strides = array<i32>} : memref<8x1024xf32, #tpu.memory_space<vmem>>, vector<8x128xf32>,
    %566 = vector.extract_strided_slice %551 {offsets = [56, 0], sizes = [8, 128], strides = [1, 1]} : vector<64x128xf32> to vector<8x128xf32>
    %c0_130 = arith.constant 0 : index
    %c896 = arith.constant 896 : index
    %567 = vector.load %arg8[%c0_130, %c896] : memref<8x1024xf32, #tpu.memory_space<vmem>>, vector<8x128xf32>
    tpu.vector_store %arg8[%c0_130, %c896], %566 {strides = array<i32>} : memref<8x1024xf32, #tpu.memory_space<vmem>>, vector<8x128xf32>,
    return
  }
}

</mosaic_0001>

<bundles_post_ra>
// kernel: seq2seq_forward.1
= control target key start
LH: loop header
LB: loop body
LE: loop exit
PB: predicated region body
PF: predicated region fallthrough
CT: control target
= control target key end

     0   :  { %13 = vsyncpa [#allocation4], 0  ;;  %s8260_s0 = inlined_call_operand.vmem [shape: bf16[16,8,256], index: 0, kind: input, shape index: {}]   ;;  %s8261_s1 = inlined_call_operand.hbm [shape: bf16[256,512], index: 1, kind: input, shape index: {}]   ;;  %s8262_s2 = inlined_call_operand.hbm [shape: bf16[128,512], index: 2, kind: input, shape index: {}]   ;;  %s8263_s3 = inlined_call_operand.vmem [shape: f32[1,512], index: 3, kind: input, shape index: {}]   ;;  %s8264_s4 = inlined_call_operand.hbm [shape: bf16[128,512], index: 4, kind: input, shape index: {}]   ;;  %s8265_s5 = inlined_call_operand.vmem [shape: f32[1,512], index: 5, kind: input, shape index: {}]   ;;  %s8266_s6 = inlined_call_operand.vmem [shape: bf16[128,128], index: 6, kind: input, shape index: {}]   ;;  %s8267_s7 = inlined_call_operand.vmem [shape: f32[1,128], index: 7, kind: input, shape index: {}]   ;;  %s8268_s8 = inlined_call_operand.vmem [shape: f32[8,1024], index: 8, kind: output, shape index: {}]  }
   0x1   :  { %14 = vsyncpa [#allocation6], 0  ;;  %s34_s29 = sshll.u32 %s8262_s2, 4  ;;  %s7094_s30 = smov [#allocation5]   ;;  %s35_s29 = int_to_ptr.hbm [resolvable:$true] %s34_s29 }
   0x2   :  { %s36_s9 = sshll.u32 %s7094_s30, 4  ;;  %s21_s12 = sshll.u32 %s8261_s1, 4  ;;  %s37_s9 = int_to_ptr.vmem [resolvable:$true] %s36_s9  ;;  %s22_s12 = int_to_ptr.hbm [resolvable:$true] %s21_s12 }
   0x3   :  { %s7095_s13 = smov 256   ;;  %s7096_s14 = smov 16  }
   0x4   :  { %42 = dma.hbm_to_vmem [thread:$0]  %s35_s29, 4096, %s37_s9, [#allocation6], %s7095_s13, %s7095_s13, %s7096_s14  }
   0x5   :  { %s7097_s15 = smov [#allocation3]   ;;  %s49_s19 = sshll.u32 %s8264_s4, 4  ;;  %s50_s19 = int_to_ptr.hbm [resolvable:$true] %s49_s19 }
   0x6   :  { %s23_s16 = sshll.u32 %s7097_s15, 4  ;;  %s7098_s2 = smov [#allocation7]   ;;  %s24_s16 = int_to_ptr.vmem [resolvable:$true] %s23_s16 }
   0x7   :  { %29 = dma.hbm_to_vmem [thread:$0]  %s22_s12, 8192, %s24_s16, [#allocation4], %s7095_s13, %s7095_s13, %s7096_s14  }
   0x8   :  { %s51_s20 = sshll.u32 %s7098_s2, 4  ;;  %s52_s20 = int_to_ptr.vmem [resolvable:$true] %s51_s20 }
   0x9   :  { %57 = dma.hbm_to_vmem [thread:$0]  %s50_s19, 4096, %s52_s20, [#allocation6], %s7095_s13, %s7095_s13, %s7096_s14  }
   0xa   :  { %7090 = dma.done.wait [#allocation4], 8192  }
   0xb   :  { %7091 = vsyncadd [#allocation4], 4294959104 }
   0xc   :  { %7092 = dma.done.wait [#allocation6], 8192  }
   0xd   :  { %7093 = vsyncadd [#allocation6], 4294959104  ;;  %v4989_v0 = vld [vmem:[#allocation3 + $0xe0] sm:$0xf]  ;;  %v6409_v1 = vld [vmem:[#allocation3 + $0xec] sm:$0xf0] }
   0xe   :  { %v6439_v2 = vld [vmem:[#allocation3 + $0x1e4] sm:$0xf]  ;;  %v4990_v3 = vor.u32 %v6409_v1, %v4989_v0  ;;  %v5119_v4 = vld [vmem:[#allocation3 + $0x1f0] sm:$0xf0]  ;;  %v4973_v5 = vld [vmem:[#allocation3 + $0xc0] sm:$0xf] }
   0xf   :  { %v6405_v6 = vld [vmem:[#allocation3 + $0xcc] sm:$0xf0]  ;;  %v5122_v7 = vor.u32 %v6439_v2, %v5119_v4  ;;  %v6435_v8 = vld [vmem:[#allocation3 + $0x1c4] sm:$0xf]  ;;  %v5103_v9 = vld [vmem:[#allocation3 + $0x1d0] sm:$0xf0] }
  0x10   :  { %559 = vmatpush.bf16.msra.mxu0 %v4990_v3  ;;  %6739 = vmatpush.bf16.msra.mxu1 %v4990_v3  ;;  %v4974_v10 = vor.u32 %v6405_v6, %v4973_v5  ;;  %v5106_v11 = vor.u32 %v6435_v8, %v5103_v9  ;;  %v4957_v12 = vld [vmem:[#allocation3 + $0xa0] sm:$0xf]  ;;  %v6401_v13 = vld [vmem:[#allocation3 + $0xac] sm:$0xf0]  ;;  %v6431_v14 = vld [vmem:[#allocation3 + $0x1a4] sm:$0xf] }
  0x11   :  { %6740 = vmatpush.bf16.msra.mxu2 %v4990_v3  ;;  %706 = vmatpush.bf16.msra.mxu3 %v5122_v7  ;;  %v5087_v15 = vld [vmem:[#allocation3 + $0x1b0] sm:$0xf0]  ;;  %v4958_v16 = vor.u32 %v6401_v13, %v4957_v12  ;;  %v4941_v18 = vld [vmem:[#allocation3 + $0x80] sm:$0xf]  ;;  %v6397_v19 = vld [vmem:[#allocation3 + $0x8c] sm:$0xf0] }
  0x12   :  { %v5090_v17 = vor.u32 %v6431_v14, %v5087_v15  ;;  %v6427_v20 = vld [vmem:[#allocation3 + $0x184] sm:$0xf]  ;;  %v5071_v21 = vld [vmem:[#allocation3 + $0x190] sm:$0xf0]  ;;  %v4942_v22 = vor.u32 %v6397_v19, %v4941_v18  ;;  %v4925_v24 = vld [vmem:[#allocation3 + $0x60] sm:$0xf] }
  0x13   :  { %v5074_v23 = vor.u32 %v6427_v20, %v5071_v21  ;;  %v6393_v25 = vld [vmem:[#allocation3 + $0x6c] sm:$0xf0]  ;;  %v6423_v26 = vld [vmem:[#allocation3 + $0x164] sm:$0xf]  ;;  %v5055_v27 = vld [vmem:[#allocation3 + $0x170] sm:$0xf0] }
  0x14   :  { %560 = vmatpush.bf16.msra.mxu0 %v4974_v10  ;;  %6741 = vmatpush.bf16.msra.mxu1 %v4974_v10  ;;  %v4926_v28 = vor.u32 %v6393_v25, %v4925_v24  ;;  %v5058_v29 = vor.u32 %v6423_v26, %v5055_v27  ;;  %v4909_v30 = vld [vmem:[#allocation3 + $0x40] sm:$0xf]  ;;  %v6389_v31 = vld [vmem:[#allocation3 + $0x4c] sm:$0xf0]  ;;  %v6419_v32 = vld [vmem:[#allocation3 + $0x144] sm:$0xf] }
  0x15   :  { %6742 = vmatpush.bf16.msra.mxu2 %v4974_v10  ;;  %707 = vmatpush.bf16.msra.mxu3 %v5106_v11  ;;  %v5039_v33 = vld [vmem:[#allocation3 + $0x150] sm:$0xf0]  ;;  %v4910_v34 = vor.u32 %v6389_v31, %v4909_v30  ;;  %v4893_v36 = vld [vmem:[#allocation3 + $0x20] sm:$0xf]  ;;  %v6385_v37 = vld [vmem:[#allocation3 + $0x2c] sm:$0xf0] }
  0x16   :  { %v5042_v35 = vor.u32 %v6419_v32, %v5039_v33  ;;  %v6415_v38 = vld [vmem:[#allocation3 + $0x124] sm:$0xf]  ;;  %v5023_v39 = vld [vmem:[#allocation3 + $0x130] sm:$0xf0]  ;;  %v4894_v40 = vor.u32 %v6385_v37, %v4893_v36  ;;  %v4877_v41 = vld [vmem:[#allocation3] sm:$0xf] }
  0x17   :  { %v6381_v42 = vld [vmem:[#allocation3 + $0xc] sm:$0xf0]  ;;  %v5026_v43 = vor.u32 %v6415_v38, %v5023_v39  ;;  %v6411_v44 = vld [vmem:[#allocation3 + $0x104] sm:$0xf]  ;;  %v5007_v45 = vld [vmem:[#allocation3 + $0x110] sm:$0xf0] }
  0x18   :  { %561 = vmatpush.bf16.msra.mxu0 %v4958_v16  ;;  %6743 = vmatpush.bf16.msra.mxu1 %v4958_v16  ;;  %v6407_v46 = vld [vmem:[#allocation3 + $0xe4] sm:$0xf]  ;;  %v4991_v47 = vld [vmem:[#allocation3 + $0xf0] sm:$0xf0]  ;;  %v4813_v48 = vld [vmem:[%s8260_s0] sm:$0xf]  ;;  %v4878_v52 = vor.u32 %v6381_v42, %v4877_v41  ;;  %v5010_v56 = vor.u32 %v6411_v44, %v5007_v45 }
  0x19   :  { %6744 = vmatpush.bf16.msra.mxu2 %v4958_v16  ;;  %708 = vmatpush.bf16.msra.mxu3 %v5090_v17  ;;  %v6364_v49 = vld [vmem:[%s8260_s0 + $0x4] sm:$0xf0]  ;;  %v5117_v50 = vld [vmem:[#allocation3 + $0x1e0] sm:$0xf]  ;;  %v6441_v51 = vld [vmem:[#allocation3 + $0x1ec] sm:$0xf0]  ;;  %v4994_v60 = vor.u32 %v6407_v46, %v4991_v47 }
  0x1a   :  { %v4853_v53 = vld [vmem:[%s8260_s0 + $0x50] sm:$0xf]  ;;  %v6374_v54 = vld [vmem:[%s8260_s0 + $0x54] sm:$0xf0]  ;;  %v6363_v55 = vld [vmem:[%s8260_s0 + $0x4] sm:$0xf]  ;;  %v5118_v61 = vor.u32 %v6441_v51, %v5117_v50  ;;  %v7178_v63 = vor.u32 %v6364_v49, %v4813_v48 }
  0x1b   :  { %v4815_v57 = vld [vmem:[%s8260_s0 + $0x8] sm:$0xf0]  ;;  %v4869_v58 = vld [vmem:[%s8260_s0 + $0x70] sm:$0xf]  ;;  %v6378_v59 = vld [vmem:[%s8260_s0 + $0x74] sm:$0xf0]  ;;  %v7180_v0 = vor.u32 %v6374_v54, %v4853_v53 }
  0x1c   :  { %562 = vmatpush.bf16.msra.mxu0 %v4942_v22  ;;  %6745 = vmatpush.bf16.msra.mxu1 %v4942_v22  ;;  %v6403_v62 = vld [vmem:[#allocation3 + $0xc4] sm:$0xf]  ;;  %v4975_v1 = vld [vmem:[#allocation3 + $0xd0] sm:$0xf0]  ;;  %v5101_v2 = vld [vmem:[#allocation3 + $0x1c0] sm:$0xf]  ;;  %v7182_v4 = vor.u32 %v6363_v55, %v4815_v57  ;;  %v7184_v5 = vor.u32 %v6378_v59, %v4869_v58 }
  0x1d   :  { %6746 = vmatpush.bf16.msra.mxu2 %v4942_v22  ;;  %709 = vmatpush.bf16.msra.mxu3 %v5074_v23  ;;  %v6437_v3 = vld [vmem:[#allocation3 + $0x1cc] sm:$0xf0]  ;;  %v4978_v6 = vor.u32 %v6403_v62, %v4975_v1  ;;  %v6399_v8 = vld [vmem:[#allocation3 + $0xa4] sm:$0xf]  ;;  %v4959_v9 = vld [vmem:[#allocation3 + $0xb0] sm:$0xf0] }
  0x1e   :  { %v5102_v7 = vor.u32 %v6437_v3, %v5101_v2  ;;  %v5085_v10 = vld [vmem:[#allocation3 + $0x1a0] sm:$0xf]  ;;  %v6433_v11 = vld [vmem:[#allocation3 + $0x1ac] sm:$0xf0]  ;;  %v6440_v12 = vld [vmem:[#allocation3 + $0x1ec] sm:$0xf]  ;;  %v4962_v14 = vor.u32 %v6399_v8, %v4959_v9 }
  0x1f   :  { %v5127_v13 = vld [vmem:[#allocation3 + $0x1f8] sm:$0xf0]  ;;  %v5086_v15 = vor.u32 %v6433_v11, %v5085_v10  ;;  %v6395_v16 = vld [vmem:[#allocation3 + $0x84] sm:$0xf]  ;;  %v4943_v18 = vld [vmem:[#allocation3 + $0x90] sm:$0xf0] }
  0x20   :  { %563 = vmatpush.bf16.msra.mxu0 %v4926_v28  ;;  %6747 = vmatpush.bf16.msra.mxu1 %v4926_v28  ;;  %v5130_v17 = vor.u32 %v6440_v12, %v5127_v13  ;;  %v5069_v19 = vld [vmem:[#allocation3 + $0x180] sm:$0xf]  ;;  %v6429_v20 = vld [vmem:[#allocation3 + $0x18c] sm:$0xf0]  ;;  %v4946_v21 = vor.u32 %v6395_v16, %v4943_v18  ;;  %v6391_v23 = vld [vmem:[#allocation3 + $0x64] sm:$0xf] }
  0x21   :  { %6748 = vmatpush.bf16.msra.mxu2 %v4926_v28  ;;  %710 = vmatpush.bf16.msra.mxu3 %v5058_v29  ;;  %v5070_v22 = vor.u32 %v6429_v20, %v5069_v19  ;;  %v4927_v24 = vld [vmem:[#allocation3 + $0x70] sm:$0xf0]  ;;  %v4821_v25 = vld [vmem:[%s8260_s0 + $0x10] sm:$0xf]  ;;  %v5053_v26 = vld [vmem:[#allocation3 + $0x160] sm:$0xf] }
  0x22   :  { %v6425_v27 = vld [vmem:[#allocation3 + $0x16c] sm:$0xf0]  ;;  %v6366_v28 = vld [vmem:[%s8260_s0 + $0x14] sm:$0xf0]  ;;  %v4861_v29 = vld [vmem:[%s8260_s0 + $0x60] sm:$0xf]  ;;  %v4930_v33 = vor.u32 %v6391_v23, %v4927_v24 }
  0x23   :  { %v6376_v30 = vld [vmem:[%s8260_s0 + $0x64] sm:$0xf0]  ;;  %v6365_v31 = vld [vmem:[%s8260_s0 + $0x14] sm:$0xf]  ;;  %v4823_v32 = vld [vmem:[%s8260_s0 + $0x18] sm:$0xf0]  ;;  %v7208_v36 = vor.u32 %v6366_v28, %v4821_v25 }
  0x24   :  { %564 = vmatpush.bf16.msra.mxu0 %v4910_v34  ;;  %6749 = vmatpush.bf16.msra.mxu1 %v4910_v34  ;;  %v7210_v37 = vor.u32 %v6376_v30, %v4861_v29  ;;  %v4911_v38 = vld [vmem:[#allocation3 + $0x50] sm:$0xf0]  ;;  %v5037_v39 = vld [vmem:[#allocation3 + $0x140] sm:$0xf]  ;;  %v7212_v41 = vor.u32 %v6365_v31, %v4823_v32  ;;  %v6383_v44 = vld [vmem:[#allocation3 + $0x24] sm:$0xf] }
  0x25   :  { %6750 = vmatpush.bf16.msra.mxu2 %v4910_v34  ;;  %711 = vmatpush.bf16.msra.mxu3 %v5042_v35  ;;  %v5054_v34 = vor.u32 %v6425_v27, %v5053_v26  ;;  %v6387_v35 = vld [vmem:[#allocation3 + $0x44] sm:$0xf]  ;;  %v4895_v45 = vld [vmem:[#allocation3 + $0x30] sm:$0xf0]  ;;  %v5021_v46 = vld [vmem:[#allocation3 + $0x120] sm:$0xf] }
  0x26   :  { %v4914_v42 = vor.u32 %v6387_v35, %v4911_v38  ;;  %v6417_v47 = vld [vmem:[#allocation3 + $0x12c] sm:$0xf0]  ;;  %v4997_v48 = vld [vmem:[#allocation3 + $0xe8] sm:$0xf]  ;;  %v6410_v49 = vld [vmem:[#allocation3 + $0xf4] sm:$0xf0]  ;;  %v4898_v55 = vor.u32 %v6383_v44, %v4895_v45 }
  0x27   :  { %v4998_v50 = vor.u32 %v6410_v49, %v4997_v48  ;;  %v4981_v51 = vld [vmem:[#allocation3 + $0xc8] sm:$0xf]  ;;  %v6436_v53 = vld [vmem:[#allocation3 + $0x1cc] sm:$0xf]  ;;  %v5111_v54 = vld [vmem:[#allocation3 + $0x1d8] sm:$0xf0] }
  0x28   :  { %565 = vmatpush.bf16.msra.mxu0 %v4894_v40  ;;  %6751 = vmatpush.bf16.msra.mxu1 %v4894_v40  ;;  %v6379_v57 = vld [vmem:[#allocation3 + $0x4] sm:$0xf]  ;;  %v4879_v58 = vld [vmem:[#allocation3 + $0x10] sm:$0xf0]  ;;  %v5114_v59 = vor.u32 %v6436_v53, %v5111_v54  ;;  %v5125_v62 = vld [vmem:[#allocation3 + $0x1e8] sm:$0xf] }
  0x29   :  { %6752 = vmatpush.bf16.msra.mxu2 %v4894_v40  ;;  %712 = vmatpush.bf16.msra.mxu3 %v5026_v43  ;;  %v6421_v40 = vld [vmem:[#allocation3 + $0x14c] sm:$0xf0]  ;;  %v6442_v2 = vld [vmem:[#allocation3 + $0x1f4] sm:$0xf0]  ;;  %v6408_v3 = vld [vmem:[#allocation3 + $0xec] sm:$0xf]  ;;  %v4882_v9 = vor.u32 %v6379_v57, %v4879_v58 }
  0x2a   :  { %v5038_v43 = vor.u32 %v6421_v40, %v5037_v39  ;;  %v6402_v8 = vld [vmem:[#allocation3 + $0xb4] sm:$0xf0]  ;;  %v5126_v11 = vor.u32 %v6442_v2, %v5125_v62  ;;  %v4829_v13 = vld [vmem:[%s8260_s0 + $0x20] sm:$0xf]  ;;  %v5109_v18 = vld [vmem:[#allocation3 + $0x1c8] sm:$0xf] }
  0x2b   :  { %v6438_v19 = vld [vmem:[#allocation3 + $0x1d4] sm:$0xf0]  ;;  %v4949_v20 = vld [vmem:[#allocation3 + $0x88] sm:$0xf]  ;;  %v6404_v26 = vld [vmem:[#allocation3 + $0xcc] sm:$0xf] }
  0x2c   :  { %566 = vmatpush.bf16.msra.mxu0 %v4878_v52  ;;  %6753 = vmatpush.bf16.msra.mxu1 %v4878_v52  ;;  %v5110_v24 = vor.u32 %v6438_v19, %v5109_v18  ;;  %v4983_v27 = vld [vmem:[#allocation3 + $0xd8] sm:$0xf0]  ;;  %v4933_v29 = vld [vmem:[#allocation3 + $0x68] sm:$0xf]  ;;  %v6394_v30 = vld [vmem:[#allocation3 + $0x74] sm:$0xf0] }
  0x2d   :  { %6754 = vmatpush.bf16.msra.mxu2 %v4878_v52  ;;  %713 = vmatpush.bf16.msra.mxu3 %v5010_v56  ;;  %v6406_v52 = vld [vmem:[#allocation3 + $0xd4] sm:$0xf0]  ;;  %v5022_v56 = vor.u32 %v6417_v47, %v5021_v46  ;;  %v4986_v28 = vor.u32 %v6404_v26, %v4983_v27  ;;  %v5093_v31 = vld [vmem:[#allocation3 + $0x1a8] sm:$0xf]  ;;  %v6432_v35 = vld [vmem:[#allocation3 + $0x1ac] sm:$0xf] }
  0x2e   :  { %v4982_v1 = vor.u32 %v6406_v52, %v4981_v51  ;;  %v6434_v32 = vld [vmem:[#allocation3 + $0x1b4] sm:$0xf0]  ;;  %v5095_v38 = vld [vmem:[#allocation3 + $0x1b8] sm:$0xf0]  ;;  %v4917_v39 = vld [vmem:[#allocation3 + $0x48] sm:$0xf] }
  0x2f   :  { %567 = vmatmul.bf16.vlgmr.msra.gmra.mxu0 %v7178_v63  ;;  %592 = vmatmul.bf16.vlgmr.msra.gmra.mxu1 %v7180_v0  ;;  %v6390_v40 = vld [vmem:[#allocation3 + $0x54] sm:$0xf0]  ;;  %v4901_v44 = vld [vmem:[#allocation3 + $0x28] sm:$0xf]  ;;  %v4837_v46 = vld [vmem:[%s8260_s0 + $0x30] sm:$0xf] }
  0x30   :  { %608 = vmatpush.bf16.msrb.mxu1 %v5118_v61  ;;  %714 = vmatmul.bf16.vlgmr.msra.gmra.mxu3 %v7182_v4  ;;  %v6413_v61 = vld [vmem:[#allocation3 + $0x10c] sm:$0xf0]  ;;  %v6386_v45 = vld [vmem:[#allocation3 + $0x34] sm:$0xf0]  ;;  %v6369_v48 = vld [vmem:[%s8260_s0 + $0x34] sm:$0xf] }
  0x31   :  { %657 = vmatpush.bf16.msrb.mxu2 %v4994_v60  ;;  %902 = vmatpush.bf16.msrb.mxu3 %v5130_v17  ;;  %v5005_v60 = vld [vmem:[#allocation3 + $0x100] sm:$0xf]  ;;  %v4831_v17 = vld [vmem:[%s8260_s0 + $0x28] sm:$0xf0]  ;;  %v6370_v47 = vld [vmem:[%s8260_s0 + $0x34] sm:$0xf0] }
  0x32   :  { %602 = vmatmul.bf16.vlgmr.msra.gmra.mxu2 %v7184_v5  ;;  %755 = vmatpush.bf16.msrb.mxu0 %v4998_v50  ;;  %v5006_v10 = vor.u32 %v6413_v61, %v5005_v60  ;;  %v4839_v49 = vld [vmem:[%s8260_s0 + $0x38] sm:$0xf0]  ;;  %v4902_v50 = vor.u32 %v6386_v45, %v4901_v44  ;;  %v4885_v51 = vld [vmem:[#allocation3 + $0x8] sm:$0xf]  ;;  %v6382_v52 = vld [vmem:[#allocation3 + $0x14] sm:$0xf0]  ;;  %v7249_v53 = vor.u32 %v6370_v47, %v4837_v46 }
  0x33   :  { %v7251_v54 = vor.u32 %v6369_v48, %v4839_v49  ;;  %v4967_v57 = vld [vmem:[#allocation3 + $0xb8] sm:$0xf0]  ;;  %v6430_v60 = vld [vmem:[#allocation3 + $0x194] sm:$0xf0]  ;;  %v6428_v61 = vld [vmem:[#allocation3 + $0x18c] sm:$0xf] }
  0x34   :  { %609 = vmatpush.bf16.msrb.mxu1 %v5102_v7  ;;  %v4965_v7 = vld [vmem:[#allocation3 + $0xa8] sm:$0xf]  ;;  %v5063_v18 = vld [vmem:[#allocation3 + $0x178] sm:$0xf0]  ;;  %v6388_v46 = vld [vmem:[#allocation3 + $0x4c] sm:$0xf] }
  0x35   :  { %658 = vmatpush.bf16.msrb.mxu2 %v4978_v6  ;;  %v4999_v6 = vld [vmem:[#allocation3 + $0xf8] sm:$0xf0]  ;;  %903 = vmatpush.bf16.msrb.mxu3 %v5114_v59  ;;  %v4966_v16 = vor.u32 %v6402_v8, %v4965_v7  ;;  %v5077_v59 = vld [vmem:[#allocation3 + $0x188] sm:$0xf]  ;;  %v6371_v7 = vld [vmem:[%s8260_s0 + $0x44] sm:$0xf] }
  0x36   :  { %v5002_v12 = vor.u32 %v6408_v3, %v4999_v6  ;;  %756 = vmatpush.bf16.msrb.mxu0 %v4982_v1  ;;  %v5078_v62 = vor.u32 %v6430_v60, %v5077_v59  ;;  %v5079_v1 = vld [vmem:[#allocation3 + $0x198] sm:$0xf0]  ;;  %v4845_v3 = vld [vmem:[%s8260_s0 + $0x40] sm:$0xf]  ;;  %v6372_v6 = vld [vmem:[%s8260_s0 + $0x44] sm:$0xf0] }
  0x37   :  { %v5082_v2 = vor.u32 %v6428_v61, %v5079_v1  ;;  %v4847_v8 = vld [vmem:[%s8260_s0 + $0x48] sm:$0xf0]  ;;  %v4935_v26 = vld [vmem:[#allocation3 + $0x78] sm:$0xf0]  ;;  %v5029_v49 = vld [vmem:[#allocation3 + $0x128] sm:$0xf] }
  0x38   :  { %610 = vmatpush.bf16.msrb.mxu1 %v5086_v15  ;;  %v6367_v15 = vld [vmem:[%s8260_s0 + $0x24] sm:$0xf]  ;;  %v4919_v47 = vld [vmem:[#allocation3 + $0x58] sm:$0xf0]  ;;  %v5013_v60 = vld [vmem:[#allocation3 + $0x108] sm:$0xf] }
  0x39   :  { %659 = vmatpush.bf16.msrb.mxu2 %v4962_v14  ;;  %v6368_v14 = vld [vmem:[%s8260_s0 + $0x24] sm:$0xf0]  ;;  %v7231_v23 = vor.u32 %v6367_v15, %v4831_v17  ;;  %v6426_v15 = vld [vmem:[#allocation3 + $0x174] sm:$0xf0]  ;;  %v4922_v48 = vor.u32 %v6388_v46, %v4919_v47  ;;  %v6380_v1 = vld [vmem:[#allocation3 + $0xc] sm:$0xf] }
  0x3a   :  { %757 = vmatpush.bf16.msrb.mxu0 %v4966_v16  ;;  %v6424_v16 = vld [vmem:[#allocation3 + $0x16c] sm:$0xf]  ;;  %v6414_v61 = vld [vmem:[#allocation3 + $0x114] sm:$0xf0]  ;;  %v5239_v46 = vld [vmem:[#allocation5 + $0xd8] sm:$0xf0] }
  0x3b   :  { %v5066_v19 = vor.u32 %v6424_v16, %v5063_v18 }
  0x3c   :  { %611 = vmatpush.bf16.msrb.mxu1 %v5070_v22  ;;  %v7229_v22 = vor.u32 %v6368_v14, %v4829_v13  ;;  %v5061_v14 = vld [vmem:[#allocation3 + $0x168] sm:$0xf] }
  0x3d   :  { %660 = vmatpush.bf16.msrb.mxu2 %v4946_v21  ;;  %v6398_v21 = vld [vmem:[#allocation3 + $0x94] sm:$0xf0]  ;;  %v5062_v17 = vor.u32 %v6426_v15, %v5061_v14  ;;  %v5247_v14 = vld [vmem:[#allocation5 + $0xf0] sm:$0xf0] }
  0x3e   :  { %v4950_v25 = vor.u32 %v6398_v21, %v4949_v20  ;;  %v6373_v20 = vld [vmem:[%s8260_s0 + $0x54] sm:$0xf]  ;;  %v4855_v21 = vld [vmem:[%s8260_s0 + $0x58] sm:$0xf0] }
  0x3f   :  { %572 = vmatmul.bf16.gmra.mxu0 %v7208_v36  ;;  %597 = vmatmul.bf16.gmra.mxu1 %v7210_v37 }
  0x40   :  { %612 = vmatpush.bf16.msrb.mxu1 %v5054_v34  ;;  %719 = vmatmul.bf16.gmra.mxu3 %v7212_v41  ;;  %v4934_v34 = vor.u32 %v6394_v30, %v4933_v29  ;;  %v6422_v29 = vld [vmem:[#allocation3 + $0x154] sm:$0xf0]  ;;  %v6420_v30 = vld [vmem:[#allocation3 + $0x14c] sm:$0xf] }
  0x41   :  { %661 = vmatpush.bf16.msrb.mxu2 %v4930_v33  ;;  %758 = vmatpush.bf16.msrb.mxu0 %v4950_v25  ;;  %v5094_v33 = vor.u32 %v6434_v32, %v5093_v31  ;;  %v6392_v25 = vld [vmem:[#allocation3 + $0x6c] sm:$0xf]  ;;  %v5047_v32 = vld [vmem:[#allocation3 + $0x158] sm:$0xf0] }
  0x42   :  { %v4938_v27 = vor.u32 %v6392_v25, %v4935_v26 }
  0x44   :  { %613 = vmatpush.bf16.msrb.mxu1 %v5038_v43  ;;  %v4918_v43 = vor.u32 %v6390_v40, %v4917_v39  ;;  %v6375_v39 = vld [vmem:[%s8260_s0 + $0x64] sm:$0xf]  ;;  %v4863_v40 = vld [vmem:[%s8260_s0 + $0x68] sm:$0xf0] }
  0x45   :  { %662 = vmatpush.bf16.msrb.mxu2 %v4914_v42  ;;  %v5098_v42 = vor.u32 %v6432_v35, %v5095_v38  ;;  %759 = vmatpush.bf16.msrb.mxu0 %v4934_v34  ;;  %v5031_v34 = vld [vmem:[#allocation3 + $0x138] sm:$0xf0]  ;;  %v5050_v35 = vor.u32 %v6420_v30, %v5047_v32  ;;  %v7295_v45 = vor.u32 %v6375_v39, %v4863_v40  ;;  %v6474_v30 = vld [vmem:[#allocation5 + $0xf4] sm:$0xf0]  ;;  %v5229_v32 = vld [vmem:[#allocation5 + $0xc0] sm:$0xf] }
  0x47   :  { %904 = vmatpush.bf16.msrb.mxu3 %v5098_v42  ;;  %v6412_v42 = vld [vmem:[#allocation3 + $0x10c] sm:$0xf] }
  0x48   :  { %614 = vmatpush.bf16.msrb.mxu1 %v5022_v56  ;;  %v6400_v56 = vld [vmem:[#allocation3 + $0xac] sm:$0xf] }
  0x49   :  { %663 = vmatpush.bf16.msrb.mxu2 %v4898_v55  ;;  %760 = vmatpush.bf16.msrb.mxu0 %v4918_v43  ;;  %v4886_v55 = vor.u32 %v6382_v52, %v4885_v51  ;;  %v4970_v58 = vor.u32 %v6400_v56, %v4967_v57  ;;  %v5015_v43 = vld [vmem:[#allocation3 + $0x118] sm:$0xf0]  ;;  %v6377_v52 = vld [vmem:[%s8260_s0 + $0x74] sm:$0xf]  ;;  %v6384_v57 = vld [vmem:[#allocation3 + $0x2c] sm:$0xf] }
  0x4a   :  { %v5018_v44 = vor.u32 %v6412_v42, %v5015_v43 }
  0x4b   :  { %905 = vmatpush.bf16.msrb.mxu3 %v5082_v2  ;;  %v4887_v2 = vld [vmem:[#allocation3 + $0x18] sm:$0xf0] }
  0x4c   :  { %615 = vmatpush.bf16.msrb.mxu1 %v5006_v10  ;;  %v7271_v10 = vor.u32 %v6371_v7, %v4847_v8  ;;  %v5245_v8 = vld [vmem:[#allocation5 + $0xe0] sm:$0xf] }
  0x4d   :  { %664 = vmatpush.bf16.msrb.mxu2 %v4882_v9  ;;  %761 = vmatpush.bf16.msrb.mxu0 %v4902_v50  ;;  %v7269_v9 = vor.u32 %v6372_v6, %v4845_v3  ;;  %v6418_v50 = vld [vmem:[#allocation3 + $0x134] sm:$0xf0]  ;;  %v4890_v3 = vor.u32 %v6380_v1, %v4887_v2 }
  0x4e   :  { %v5030_v51 = vor.u32 %v6418_v50, %v5029_v49  ;;  %v5213_v49 = vld [vmem:[#allocation5 + $0xa0] sm:$0xf]  ;;  %v6465_v50 = vld [vmem:[#allocation5 + $0xac] sm:$0xf0]  ;;  %v6470_v1 = vld [vmem:[#allocation5 + $0xd4] sm:$0xf0] }
  0x4f   :  { %577 = vmatmul.bf16.gmra.mxu0 %v7229_v22  ;;  %616 = vmatmul.bf16.vlgmr.msrb.gmra.mxu1 %v7182_v4 }
  0x50   :  { %804 = vmatpush.bf16.msra.mxu1 %v5126_v11  ;;  %665 = vmatmul.bf16.vlgmr.msrb.gmra.mxu2 %v7178_v63  ;;  %v6396_v11 = vld [vmem:[#allocation3 + $0x8c] sm:$0xf] }
  0x51   :  { %853 = vmatpush.bf16.msra.mxu2 %v5002_v12  ;;  %724 = vmatmul.bf16.gmra.mxu3 %v7231_v23  ;;  %v4951_v12 = vld [vmem:[#allocation3 + $0x98] sm:$0xf0] }
  0x52   :  { %762 = vmatpush.bf16.msrb.mxu0 %v4886_v55  ;;  %v4954_v13 = vor.u32 %v6396_v11, %v4951_v12  ;;  %906 = vmatpush.bf16.msrb.mxu3 %v5066_v19  ;;  %v4871_v55 = vld [vmem:[%s8260_s0 + $0x78] sm:$0xf0]  ;;  %v6473_v11 = vld [vmem:[#allocation5 + $0xec] sm:$0xf0]  ;;  %v6471_v12 = vld [vmem:[#allocation5 + $0xe4] sm:$0xf] }
  0x53   :  { %v7307_v56 = vor.u32 %v6377_v52, %v4871_v55  ;;  %v7321_v16 = vor.u32 %v6471_v12, %v5247_v14  ;;  %v6472_v19 = vld [vmem:[#allocation5 + $0xec] sm:$0xf]  ;;  %v5197_v52 = vld [vmem:[#allocation5 + $0x80] sm:$0xf]  ;;  %v6461_v55 = vld [vmem:[#allocation5 + $0x8c] sm:$0xf0] }
  0x54   :  { %805 = vmatpush.bf16.msra.mxu1 %v5110_v24  ;;  %v7283_v24 = vor.u32 %v6373_v20, %v4855_v21  ;;  %v5255_v20 = vld [vmem:[#allocation5 + $0xf8] sm:$0xf0]  ;;  %v5215_v14 = vld [vmem:[#allocation5 + $0xb0] sm:$0xf0] }
  0x55   :  { %854 = vmatpush.bf16.msra.mxu2 %v4986_v28  ;;  %v5045_v28 = vld [vmem:[#allocation3 + $0x148] sm:$0xf]  ;;  %v7329_v21 = vor.u32 %v6472_v19, %v5255_v20  ;;  %v5165_v20 = vld [vmem:[#allocation5 + $0x40] sm:$0xf] }
  0x56   :  { %v5046_v31 = vor.u32 %v6422_v29, %v5045_v28  ;;  %907 = vmatpush.bf16.msrb.mxu3 %v5050_v35  ;;  %v5253_v29 = vld [vmem:[#allocation5 + $0xe8] sm:$0xf] }
  0x58   :  { %806 = vmatpush.bf16.msra.mxu1 %v5094_v33  ;;  %v6416_v33 = vld [vmem:[#allocation3 + $0x12c] sm:$0xf] }
  0x59   :  { %855 = vmatpush.bf16.msra.mxu2 %v4970_v58  ;;  %v5034_v38 = vor.u32 %v6416_v33, %v5031_v34  ;;  %v4903_v58 = vld [vmem:[#allocation3 + $0x38] sm:$0xf0]  ;;  %v6469_v33 = vld [vmem:[#allocation5 + $0xcc] sm:$0xf0]  ;;  %v6467_v34 = vld [vmem:[#allocation5 + $0xc4] sm:$0xf] }
  0x5a   :  { %v4906_v59 = vor.u32 %v6384_v57, %v4903_v58  ;;  %v7347_v35 = vor.u32 %v6469_v33, %v5229_v32  ;;  %v7369_v58 = vor.u32 %v6461_v55, %v5197_v52 }
  0x5b   :  { %908 = vmatpush.bf16.msrb.mxu3 %v5034_v38  ;;  %v5231_v38 = vld [vmem:[#allocation5 + $0xd0] sm:$0xf0] }
  0x5c   :  { %807 = vmatpush.bf16.msra.mxu1 %v5078_v62  ;;  %v5014_v62 = vor.u32 %v6414_v61, %v5013_v60  ;;  %v7351_v40 = vor.u32 %v6467_v34, %v5231_v38  ;;  %v6464_v34 = vld [vmem:[#allocation5 + $0xac] sm:$0xf]  ;;  %v5223_v38 = vld [vmem:[#allocation5 + $0xb8] sm:$0xf0] }
  0x5d   :  { %856 = vmatpush.bf16.msra.mxu2 %v4954_v13  ;;  %v7319_v13 = vor.u32 %v6473_v11, %v5245_v8  ;;  %v6457_v8 = vld [vmem:[#allocation5 + $0x6c] sm:$0xf0] }
  0x5f   :  { %582 = vmatmul.bf16.gmra.mxu0 %v7249_v53  ;;  %621 = vmatmul.bf16.gmra.mxu1 %v7212_v41 }
  0x60   :  { %670 = vmatmul.bf16.gmra.mxu2 %v7208_v36  ;;  %808 = vmatpush.bf16.msra.mxu1 %v5062_v17 }
  0x61   :  { %729 = vmatmul.bf16.gmra.mxu3 %v7251_v54  ;;  %857 = vmatpush.bf16.msra.mxu2 %v4938_v27 }
  0x62   :  { %909 = vmatpush.bf16.msrb.mxu3 %v5018_v44  ;;  %1143 = vmatpush.bf16.msra.mxu0 %v7319_v13  ;;  %v6468_v44 = vld [vmem:[#allocation5 + $0xcc] sm:$0xf] }
  0x64   :  { %809 = vmatpush.bf16.msra.mxu1 %v5046_v31  ;;  %v7341_v31 = vor.u32 %v6474_v30, %v5253_v29  ;;  %v6453_v29 = vld [vmem:[#allocation5 + $0x4c] sm:$0xf0] }
  0x65   :  { %858 = vmatpush.bf16.msra.mxu2 %v4922_v48  ;;  %v7361_v48 = vor.u32 %v6468_v44, %v5239_v46  ;;  %v7401_v44 = vor.u32 %v6464_v34, %v5223_v38  ;;  %v5149_v46 = vld [vmem:[#allocation5 + $0x20] sm:$0xf] }
  0x66   :  { %1182 = vmatpush.bf16.msra.mxu3 %v7329_v21  ;;  %1144 = vmatpush.bf16.msra.mxu0 %v7347_v35 }
  0x68   :  { %810 = vmatpush.bf16.msra.mxu1 %v5030_v51  ;;  %v7363_v51 = vor.u32 %v6465_v50, %v5213_v49  ;;  %v6449_v49 = vld [vmem:[#allocation5 + $0x2c] sm:$0xf0] }
  0x69   :  { %859 = vmatpush.bf16.msra.mxu2 %v4906_v59  ;;  %v7403_v50 = vor.u32 %v6449_v49, %v5149_v46  ;;  %v6460_v49 = vld [vmem:[#allocation5 + $0x8c] sm:$0xf] }
  0x6a   :  { %1183 = vmatpush.bf16.msra.mxu3 %v7361_v48  ;;  %1145 = vmatpush.bf16.msra.mxu0 %v7363_v51 }
  0x6c   :  { %811 = vmatpush.bf16.msra.mxu1 %v5014_v62  ;;  %v5237_v62 = vld [vmem:[#allocation5 + $0xc8] sm:$0xf] }
  0x6d   :  { %860 = vmatpush.bf16.msra.mxu2 %v4890_v3  ;;  %v7377_v2 = vor.u32 %v6470_v1, %v5237_v62  ;;  %v5181_v3 = vld [vmem:[#allocation5 + $0x60] sm:$0xf] }
  0x6e   :  { %1146 = vmatpush.bf16.msra.mxu0 %v7369_v58  ;;  %v7381_v11 = vor.u32 %v6457_v8, %v5181_v3  ;;  %1184 = vmatpush.bf16.msra.mxu3 %v7401_v44 }
  0x6f   :  { %587 = vmatmul.bf16.gmra.mxu0 %v7269_v9  ;;  %626 = vmatmul.bf16.gmra.mxu1 %v7231_v23 }
  0x70   :  { %675 = vmatmul.bf16.gmra.mxu2 %v7229_v22  ;;  %1156 = vmatpush.bf16.msrb.mxu1 %v7321_v16 }
  0x71   :  { %734 = vmatmul.bf16.gmra.mxu3 %v7271_v10  ;;  %1169 = vmatpush.bf16.msrb.mxu2 %v7341_v31 }
  0x72   :  { %1147 = vmatpush.bf16.msra.mxu0 %v7381_v11 }
  0x74   :  { %1157 = vmatpush.bf16.msrb.mxu1 %v7351_v40 }
  0x75   :  { %1170 = vmatpush.bf16.msrb.mxu2 %v7377_v2 }
  0x7f   :  { %631 = vmatmul.bf16.gmra.mxu1 %v7251_v54  ;;  %763 = vmatmul.bf16.vlgmr.msrb.gmra.mxu0 %v7178_v63 }
  0x80   :  { %680 = vmatmul.bf16.gmra.mxu2 %v7249_v53 }
  0x81   :  { %739 = vmatmul.bf16.gmra.mxu3 %v7283_v24 }
  0x8f   :  { %636 = vmatmul.bf16.gmra.mxu1 %v7271_v10  ;;  %768 = vmatmul.bf16.gmra.mxu0 %v7208_v36 }
  0x90   :  { %685 = vmatmul.bf16.gmra.mxu2 %v7269_v9 }
  0x91   :  { %744 = vmatmul.bf16.gmra.mxu3 %v7295_v45 }
  0x9f   :  { %641 = vmatmul.bf16.gmra.mxu1 %v7283_v24  ;;  %773 = vmatmul.bf16.gmra.mxu0 %v7229_v22 }
  0xa0   :  { %690 = vmatmul.bf16.gmra.mxu2 %v7180_v0 }
  0xa1   :  { %749 = vmatmul.bf16.gmra.mxu3 %v7307_v56 }
  0xac   :  { %v568_v6 = vpop.f32.mrf.mxu0  ;;  %v7313_v7 = vpop.f32.mrf.mxu1 }
  0xad   :  { %8271 = vst [vmem:[#allocation10_spill] sm:$0xff] %v7313_v7 }
  0xaf   :  { %646 = vmatmul.bf16.gmra.mxu1 %v7295_v45  ;;  %778 = vmatmul.bf16.gmra.mxu0 %v7249_v53 }
  0xb0   :  { %695 = vmatmul.bf16.gmra.mxu2 %v7210_v37 }
  0xb1   :  { %910 = vmatmul.bf16.vlgmr.msrb.gmra.mxu3 %v7182_v4 }
  0xb3   :  { %v715_v15 = vpop.f32.mrf.mxu3 }
  0xb4   :  { %v7323_v17 = vpop.f32.mrf.mxu0  ;;  %v7325_v18 = vpop.f32.mrf.mxu1 }
  0xb5   :  { %8272 = vst [vmem:[#allocation11_spill] sm:$0xff] %v7325_v18  ;;  %v7334_v26 = vpop.f32.mrf.mxu2 }
  0xb6   :  { %8273 = vst [vmem:[#allocation12_spill] sm:$0xff] %v7334_v26 }
  0xbb   :  { %v7332_v25 = vpop.f32.mrf.mxu3 }
  0xbc   :  { %v7336_v27 = vpop.f32.mrf.mxu0  ;;  %v7338_v28 = vpop.f32.mrf.mxu1 }
  0xbd   :  { %8274 = vst [vmem:[#allocation13_spill] sm:$0xff] %v7338_v28  ;;  %v7359_v47 = vpop.f32.mrf.mxu2 }
  0xbe   :  { %8276 = vst [vmem:[#allocation15_spill] sm:$0xff] %v7359_v47 }
  0xbf   :  { %651 = vmatmul.bf16.gmra.mxu1 %v7307_v56  ;;  %783 = vmatmul.bf16.gmra.mxu0 %v7269_v9 }
  0xc0   :  { %700 = vmatmul.bf16.gmra.mxu2 %v7184_v5 }
  0xc1   :  { %915 = vmatmul.bf16.gmra.mxu3 %v7212_v41 }
  0xc3   :  { %v7349_v39 = vpop.f32.mrf.mxu3 }
  0xc4   :  { %v7353_v42 = vpop.f32.mrf.mxu0  ;;  %v7355_v43 = vpop.f32.mrf.mxu1 }
  0xc5   :  { %8275 = vst [vmem:[#allocation14_spill] sm:$0xff] %v7355_v43 }
  0xcb   :  { %v7367_v57 = vpop.f32.mrf.mxu3 }
  0xcc   :  { %v7371_v59 = vpop.f32.mrf.mxu0  ;;  %v617_v60 = vpop.f32.mrf.mxu1 }
  0xcd   :  { %v7373_v61 = vadd.f32 %v617_v60, %v568_v6  ;;  %v6463_v6 = vld [vmem:[#allocation5 + $0xa4] sm:$0xf]  ;;  %v6445_v60 = vld [vmem:[#allocation5 + $0xc] sm:$0xf0] }
  0xce   :  { %v7388_v19 = vor.u32 %v6463_v6, %v5215_v14  ;;  %v6466_v6 = vld [vmem:[#allocation5 + $0xb4] sm:$0xf0] }
  0xcf   :  { %788 = vmatmul.bf16.gmra.mxu0 %v7180_v0  ;;  %812 = vmatmul.bf16.vlgmr.msra.gmra.mxu1 %v7182_v4  ;;  %v7392_v4 = vor.u32 %v6453_v29, %v5165_v20  ;;  %v5199_v29 = vld [vmem:[#allocation5 + $0x90] sm:$0xf0] }
  0xd0   :  { %861 = vmatmul.bf16.vlgmr.msra.gmra.mxu2 %v7178_v63  ;;  %1158 = vmatpush.bf16.msrb.mxu1 %v7388_v19 }
  0xd1   :  { %920 = vmatmul.bf16.gmra.mxu3 %v7231_v23  ;;  %1148 = vmatpush.bf16.msra.mxu0 %v7392_v4 }
  0xd3   :  { %v666_v12 = vpop.f32.mrf.mxu2 }
  0xd4   :  { %v7385_v63 = vadd.f32 %v715_v15, %v666_v12  ;;  %v7390_v30 = vpop.f32.mrf.mxu3  ;;  %v7394_v32 = vpop.f32.mrf.mxu0 }
  0xd5   :  { %8277 = vst [vmem:[#allocation16_spill] sm:$0xff] %v7394_v32  ;;  %v619_v33 = vpop.f32.mrf.mxu1  ;;  %1149 = vmatpush.bf16.msra.mxu0 %v7403_v50 }
  0xd6   :  { %v7398_v15 = vadd.f32 %v619_v33, %v7323_v17  ;;  %v5133_v17 = vld [vmem:[#allocation5] sm:$0xf] }
  0xd7   :  { %v7412_v1 = vor.u32 %v6445_v60, %v5133_v17 }
  0xd9   :  { %1150 = vmatpush.bf16.msra.mxu0 %v7412_v1 }
  0xdb   :  { %v668_v52 = vpop.f32.mrf.mxu2 }
  0xdc   :  { %v7407_v55 = vadd.f32 %v7332_v25, %v668_v52  ;;  %v7410_v62 = vpop.f32.mrf.mxu3  ;;  %v7414_v3 = vpop.f32.mrf.mxu0  ;;  %v5221_v25 = vld [vmem:[#allocation5 + $0xa8] sm:$0xf]  ;;  %v5207_v52 = vld [vmem:[#allocation5 + $0x98] sm:$0xf0] }
  0xdd   :  { %v622_v8 = vpop.f32.mrf.mxu1  ;;  %v7421_v14 = vor.u32 %v6466_v6, %v5221_v25  ;;  %1276 = vmatpush.bf16.msrb.mxu0 %v7319_v13  ;;  %v7440_v17 = vor.u32 %v6460_v49, %v5207_v52 }
  0xde   :  { %v7417_v12 = vadd.f32 %v622_v8, %v7336_v27 }
  0xdf   :  { %793 = vmatmul.bf16.gmra.mxu0 %v7210_v37  ;;  %817 = vmatmul.bf16.gmra.mxu1 %v7212_v41 }
  0xe0   :  { %866 = vmatmul.bf16.gmra.mxu2 %v7208_v36  ;;  %v6459_v36 = vld [vmem:[#allocation5 + $0x84] sm:$0xf]  ;;  %1185 = vmatpush.bf16.msra.mxu3 %v7440_v17 }
  0xe1   :  { %925 = vmatmul.bf16.gmra.mxu3 %v7251_v54  ;;  %1171 = vmatpush.bf16.msrb.mxu2 %v7421_v14  ;;  %v7431_v33 = vor.u32 %v6459_v36, %v5199_v29  ;;  %v6462_v36 = vld [vmem:[#allocation5 + $0x94] sm:$0xf0] }
  0xe2   :  { %1277 = vmatpush.bf16.msrb.mxu0 %v7347_v35 }
  0xe3   :  { %v671_v20 = vpop.f32.mrf.mxu2  ;;  %1159 = vmatpush.bf16.msrb.mxu1 %v7431_v33 }
  0xe4   :  { %v7429_v27 = vadd.f32 %v7349_v39, %v671_v20  ;;  %v730_v34 = vpop.f32.mrf.mxu3  ;;  %v7434_v38 = vpop.f32.mrf.mxu0  ;;  %v5205_v20 = vld [vmem:[#allocation5 + $0x88] sm:$0xf] }
  0xe5   :  { %8279 = vst [vmem:[#allocation18_spill] sm:$0xff] %v7434_v38  ;;  %v624_v46 = vpop.f32.mrf.mxu1  ;;  %v7456_v29 = vor.u32 %v6462_v36, %v5205_v20  ;;  %v5191_v20 = vld [vmem:[#allocation5 + $0x78] sm:$0xf0] }
  0xe6   :  { %8278 = vst [vmem:[#allocation17_spill] sm:$0xff] %v7429_v27  ;;  %v7438_v41 = vadd.f32 %v624_v46, %v7353_v42  ;;  %1278 = vmatpush.bf16.msrb.mxu0 %v7363_v51  ;;  %v6455_v46 = vld [vmem:[#allocation5 + $0x64] sm:$0xf] }
  0xe7   :  { %1172 = vmatpush.bf16.msrb.mxu2 %v7456_v29 }
  0xe8   :  { %8280 = vst [vmem:[#allocation19_spill] sm:$0xff] %v7438_v41 }
  0xea   :  { %1279 = vmatpush.bf16.msrb.mxu0 %v7369_v58 }
  0xeb   :  { %v673_v39 = vpop.f32.mrf.mxu2 }
  0xec   :  { %v7445_v60 = vadd.f32 %v7367_v57, %v673_v39  ;;  %v7448_v8 = vpop.f32.mrf.mxu3  ;;  %v7450_v25 = vpop.f32.mrf.mxu0 }
  0xed   :  { %v627_v42 = vpop.f32.mrf.mxu1 }
  0xee   :  { %8281 = vst [vmem:[#allocation20_spill] sm:$0xff] %v7445_v60  ;;  %v7453_v6 = vadd.f32 %v627_v42, %v7371_v59  ;;  %1280 = vmatpush.bf16.msrb.mxu0 %v7381_v11 }
  0xef   :  { %798 = vmatmul.bf16.gmra.mxu0 %v7184_v5  ;;  %822 = vmatmul.bf16.gmra.mxu1 %v7231_v23  ;;  %v6456_v23 = vld [vmem:[#allocation5 + $0x6c] sm:$0xf] }
  0xf0   :  { %8282 = vst [vmem:[#allocation21_spill] sm:$0xff] %v7453_v6  ;;  %871 = vmatmul.bf16.gmra.mxu2 %v7229_v22  ;;  %v5183_v22 = vld [vmem:[#allocation5 + $0x70] sm:$0xf0]  ;;  %v7476_v36 = vor.u32 %v6456_v23, %v5191_v20  ;;  %v5189_v23 = vld [vmem:[#allocation5 + $0x68] sm:$0xf] }
  0xf1   :  { %930 = vmatmul.bf16.gmra.mxu3 %v7271_v10  ;;  %v7466_v49 = vor.u32 %v6455_v46, %v5183_v22  ;;  %v6458_v20 = vld [vmem:[#allocation5 + $0x74] sm:$0xf0] }
  0xf2   :  { %1281 = vmatpush.bf16.msrb.mxu0 %v7392_v4  ;;  %1186 = vmatpush.bf16.msra.mxu3 %v7476_v36  ;;  %v7492_v43 = vor.u32 %v6458_v20, %v5189_v23  ;;  %v6452_v23 = vld [vmem:[#allocation5 + $0x4c] sm:$0xf]  ;;  %v5175_v20 = vld [vmem:[#allocation5 + $0x58] sm:$0xf0] }
  0xf3   :  { %v676_v57 = vpop.f32.mrf.mxu2  ;;  %1160 = vmatpush.bf16.msrb.mxu1 %v7466_v49 }
  0xf4   :  { %v7464_v59 = vadd.f32 %v7390_v30, %v676_v57  ;;  %v7469_v52 = vpop.f32.mrf.mxu3  ;;  %v7471_v39 = vpop.f32.mrf.mxu0  ;;  %1173 = vmatpush.bf16.msrb.mxu2 %v7492_v43 }
  0xf5   :  { %8284 = vst [vmem:[#allocation23_spill] sm:$0xff] %v7471_v39  ;;  %v7473_v42 = vpop.f32.mrf.mxu1 }
  0xf6   :  { %8283 = vst [vmem:[#allocation22_spill] sm:$0xff] %v7464_v59  ;;  %1282 = vmatpush.bf16.msrb.mxu0 %v7403_v50 }
  0xf7   :  { %8285 = vst [vmem:[#allocation24_spill] sm:$0xff] %v7473_v42 }
  0xfa   :  { %1283 = vmatpush.bf16.msrb.mxu0 %v7412_v1 }
  0xfb   :  { %v678_v30 = vpop.f32.mrf.mxu2 }
  0xfc   :  { %v7481_v57 = vadd.f32 %v7410_v62, %v678_v30  ;;  %v7484_v46 = vpop.f32.mrf.mxu3  ;;  %v7486_v47 = vpop.f32.mrf.mxu0  ;;  %v8269_v62 = vmov 0  }
  0xfd   :  { %v632_v22 = vpop.f32.mrf.mxu1 }
  0xfe   :  { %8286 = vst [vmem:[#allocation25_spill] sm:$0xff] %v7481_v57  ;;  %v7489_v26 = vadd.f32 %v632_v22, %v7414_v3  ;;  %v6451_v3 = vld [vmem:[#allocation5 + $0x44] sm:$0xf]  ;;  %v5167_v22 = vld [vmem:[#allocation5 + $0x50] sm:$0xf0] }
  0xff   :  { %827 = vmatmul.bf16.gmra.mxu1 %v7251_v54  ;;  %1151 = vmatmul.bf16.vlgmr.msra.gmra.mxu0 %v8269_v62  ;;  %v7503_v54 = vor.u32 %v6452_v23, %v5175_v20  ;;  %v6444_v23 = vld [vmem:[#allocation5 + $0xc] sm:$0xf]  ;;  %v5143_v20 = vld [vmem:[#allocation5 + $0x18] sm:$0xf0] }
 0x100   :  { %8287 = vst [vmem:[#allocation26_spill] sm:$0xff] %v7489_v26  ;;  %876 = vmatmul.bf16.gmra.mxu2 %v7249_v53  ;;  %1400 = vmatpush.bf16.msra.mxu0 %v7319_v13  ;;  %v7501_v53 = vor.u32 %v6451_v3, %v5167_v22  ;;  %v7521_v38 = vor.u32 %v6444_v23, %v5143_v20 }
 0x101   :  { %935 = vmatmul.bf16.gmra.mxu3 %v7283_v24 }
 0x102   :  { %1161 = vmatpush.bf16.msrb.mxu1 %v7501_v53  ;;  %1187 = vmatpush.bf16.msra.mxu3 %v7503_v54 }
 0x103   :  { %v681_v30 = vpop.f32.mrf.mxu2 }
 0x104   :  { %v7498_v28 = vadd.f32 %v730_v34, %v681_v30  ;;  %v740_v18 = vpop.f32.mrf.mxu3  ;;  %v7507_v62 = vpop.f32.mrf.mxu0  ;;  %1401 = vmatpush.bf16.msra.mxu0 %v7347_v35  ;;  %v6448_v34 = vld [vmem:[#allocation5 + $0x2c] sm:$0xf]  ;;  %v5159_v30 = vld [vmem:[#allocation5 + $0x38] sm:$0xf0] }
 0x105   :  { %v7505_v7 = vpop.f32.mrf.mxu1  ;;  %v7512_v39 = vor.u32 %v6448_v34, %v5159_v30  ;;  %v6454_v30 = vld [vmem:[#allocation5 + $0x54] sm:$0xf0] }
 0x106   :  { %8288 = vst [vmem:[#allocation27_spill] sm:$0xff] %v7498_v28 }
 0x107   :  { %8289 = vst [vmem:[#allocation28_spill] sm:$0xff] %v7505_v7  ;;  %1188 = vmatpush.bf16.msra.mxu3 %v7512_v39 }
 0x108   :  { %1402 = vmatpush.bf16.msra.mxu0 %v7363_v51 }
 0x10b   :  { %v683_v3 = vpop.f32.mrf.mxu2  ;;  %1189 = vmatpush.bf16.msra.mxu3 %v7521_v38 }
 0x10c   :  { %v7515_v22 = vadd.f32 %v7448_v8, %v683_v3  ;;  %v7519_v7 = vpop.f32.mrf.mxu3  ;;  %v7523_v26 = vpop.f32.mrf.mxu0  ;;  %v5173_v8 = vld [vmem:[#allocation5 + $0x48] sm:$0xf]  ;;  %1403 = vmatpush.bf16.msra.mxu0 %v7369_v58 }
 0x10d   :  { %8291 = vst [vmem:[#allocation30_spill] sm:$0xff] %v7519_v7  ;;  %v637_v28 = vpop.f32.mrf.mxu1  ;;  %v7530_v3 = vor.u32 %v6454_v30, %v5173_v8 }
 0x10e   :  { %8290 = vst [vmem:[#allocation29_spill] sm:$0xff] %v7515_v22  ;;  %v7526_v34 = vadd.f32 %v637_v28, %v7450_v25  ;;  %v5151_v25 = vld [vmem:[#allocation5 + $0x30] sm:$0xf0] }
 0x10f   :  { %8292 = vst [vmem:[#allocation31_spill] sm:$0xff] %v7523_v26  ;;  %1315 = vmatpush.bf16.msrb.mxu3 %v7329_v21  ;;  %832 = vmatmul.bf16.gmra.mxu1 %v7271_v10 }
 0x110   :  { %8293 = vst [vmem:[#allocation32_spill] sm:$0xff] %v7526_v34  ;;  %881 = vmatmul.bf16.gmra.mxu2 %v7269_v9  ;;  %v6447_v9 = vld [vmem:[#allocation5 + $0x24] sm:$0xf]  ;;  %1404 = vmatpush.bf16.msra.mxu0 %v7381_v11 }
 0x111   :  { %940 = vmatmul.bf16.gmra.mxu3 %v7295_v45  ;;  %1174 = vmatpush.bf16.msrb.mxu2 %v7530_v3  ;;  %v7540_v20 = vor.u32 %v6447_v9, %v5151_v25 }
 0x113   :  { %v686_v23 = vpop.f32.mrf.mxu2  ;;  %1316 = vmatpush.bf16.msrb.mxu3 %v7361_v48  ;;  %1162 = vmatpush.bf16.msrb.mxu1 %v7540_v20 }
 0x114   :  { %v7538_v28 = vadd.f32 %v7469_v52, %v686_v23  ;;  %v745_v8 = vpop.f32.mrf.mxu3  ;;  %v7546_v10 = vpop.f32.mrf.mxu0  ;;  %1405 = vmatpush.bf16.msra.mxu0 %v7392_v4 }
 0x115   :  { %v7544_v30 = vpop.f32.mrf.mxu1  ;;  %8296 = vst [vmem:[#allocation35_spill] sm:$0xff] %v7546_v10 }
 0x116   :  { %8294 = vst [vmem:[#allocation33_spill] sm:$0xff] %v7538_v28  ;;  %v6450_v28 = vld [vmem:[#allocation5 + $0x34] sm:$0xf0] }
 0x117   :  { %8295 = vst [vmem:[#allocation34_spill] sm:$0xff] %v7544_v30  ;;  %1317 = vmatpush.bf16.msrb.mxu3 %v7401_v44  ;;  %v5157_v30 = vld [vmem:[#allocation5 + $0x28] sm:$0xf] }
 0x118   :  { %1406 = vmatpush.bf16.msra.mxu0 %v7403_v50  ;;  %v7563_v34 = vor.u32 %v6450_v28, %v5157_v30 }
 0x11a   :  { %1175 = vmatpush.bf16.msrb.mxu2 %v7563_v34 }
 0x11b   :  { %v688_v52 = vpop.f32.mrf.mxu2  ;;  %1318 = vmatpush.bf16.msrb.mxu3 %v7440_v17 }
 0x11c   :  { %v7552_v23 = vadd.f32 %v7484_v46, %v688_v52  ;;  %v7556_v9 = vpop.f32.mrf.mxu3  ;;  %v7560_v7 = vpop.f32.mrf.mxu0  ;;  %1407 = vmatpush.bf16.msra.mxu0 %v7412_v1 }
 0x11d   :  { %8298 = vst [vmem:[#allocation37_spill] sm:$0xff] %v7556_v9  ;;  %v7558_v25 = vpop.f32.mrf.mxu1  ;;  %v6443_v9 = vld [vmem:[#allocation5 + $0x4] sm:$0xf] }
 0x11e   :  { %8297 = vst [vmem:[#allocation36_spill] sm:$0xff] %v7552_v23 }
 0x11f   :  { %8299 = vst [vmem:[#allocation38_spill] sm:$0xff] %v7558_v25  ;;  %1319 = vmatpush.bf16.msrb.mxu3 %v7476_v36  ;;  %837 = vmatmul.bf16.gmra.mxu1 %v7283_v24  ;;  %v5135_v25 = vld [vmem:[#allocation5 + $0x10] sm:$0xf0]  ;;  %v5141_v24 = vld [vmem:[#allocation5 + $0x8] sm:$0xf] }
 0x120   :  { %8300 = vst [vmem:[#allocation39_spill] sm:$0xff] %v7560_v7  ;;  %886 = vmatmul.bf16.gmra.mxu2 %v7180_v0  ;;  %v7572_v0 = vor.u32 %v6443_v9, %v5135_v25 }
 0x121   :  { %945 = vmatmul.bf16.gmra.mxu3 %v7307_v56 }
 0x122   :  { %1163 = vmatpush.bf16.msrb.mxu1 %v7572_v0 }
 0x123   :  { %v691_v46 = vpop.f32.mrf.mxu2  ;;  %1320 = vmatpush.bf16.msrb.mxu3 %v7503_v54 }
 0x124   :  { %v7570_v52 = vadd.f32 %v740_v18, %v691_v46  ;;  %v750_v28 = vpop.f32.mrf.mxu3  ;;  %v7577_v23 = vpop.f32.mrf.mxu0  ;;  %v6446_v18 = vld [vmem:[#allocation5 + $0x14] sm:$0xf0] }
 0x125   :  { %v7575_v30 = vpop.f32.mrf.mxu1  ;;  %8303 = vst [vmem:[#allocation42_spill] sm:$0xff] %v7577_v23 }
 0x126   :  { %8301 = vst [vmem:[#allocation40_spill] sm:$0xff] %v7570_v52  ;;  %1289 = vmatpush.bf16.msra.mxu1 %v7321_v16  ;;  %v7584_v52 = vor.u32 %v6446_v18, %v5141_v24  ;;  %v8308_v18 = vmov 0  }
 0x127   :  { %8302 = vst [vmem:[#allocation41_spill] sm:$0xff] %v7575_v30  ;;  %1321 = vmatpush.bf16.msrb.mxu3 %v7512_v39 }
 0x128   :  { %1176 = vmatpush.bf16.msrb.mxu2 %v7584_v52 }
 0x12a   :  { %1290 = vmatpush.bf16.msra.mxu1 %v7351_v40 }
 0x12b   :  { %v7582_v46 = vpop.f32.mrf.mxu2  ;;  %1322 = vmatpush.bf16.msrb.mxu3 %v7521_v38 }
 0x12c   :  { %8304 = vst [vmem:[#allocation43_spill] sm:$0xff] %v7582_v46  ;;  %v7589_v9 = vpop.f32.mrf.mxu3  ;;  %1302 = vmatpush.bf16.msra.mxu2 %v7341_v31  ;;  %v7594_v30 = vpop.f32.mrf.mxu0 }
 0x12d   :  { %8305 = vst [vmem:[#allocation44_spill] sm:$0xff] %v7589_v9  ;;  %v7592_v25 = vpop.f32.mrf.mxu1 }
 0x12e   :  { %8306 = vst [vmem:[#allocation45_spill] sm:$0xff] %v7592_v25  ;;  %1291 = vmatpush.bf16.msra.mxu1 %v7388_v19 }
 0x12f   :  { %8307 = vst [vmem:[#allocation46_spill] sm:$0xff] %v7594_v30  ;;  %842 = vmatmul.bf16.gmra.mxu1 %v7295_v45 }
 0x130   :  { %891 = vmatmul.bf16.gmra.mxu2 %v7210_v37 }
 0x131   :  { %1303 = vmatpush.bf16.msra.mxu2 %v7377_v2  ;;  %1190 = vmatmul.bf16.vlgmr.msra.gmra.mxu3 %v8308_v18 }
 0x132   :  { %1292 = vmatpush.bf16.msra.mxu1 %v7431_v33  ;;  %1439 = vmatpush.bf16.msra.mxu3 %v7329_v21 }
 0x133   :  { %v696_v24 = vpop.f32.mrf.mxu2 }
 0x134   :  { %v7601_v46 = vadd.f32 %v745_v8, %v696_v24  ;;  %v911_v9 = vpop.f32.mrf.mxu3  ;;  %v7608_v37 = vpop.f32.mrf.mxu0 }
 0x135   :  { %1304 = vmatpush.bf16.msra.mxu2 %v7421_v14  ;;  %v7606_v25 = vpop.f32.mrf.mxu1  ;;  %8311 = vst [vmem:[#allocation49_spill] sm:$0xff] %v7608_v37 }
 0x136   :  { %8309 = vst [vmem:[#allocation47_spill] sm:$0xff] %v7601_v46  ;;  %1293 = vmatpush.bf16.msra.mxu1 %v7466_v49  ;;  %1440 = vmatpush.bf16.msra.mxu3 %v7361_v48 }
 0x137   :  { %8310 = vst [vmem:[#allocation48_spill] sm:$0xff] %v7606_v25 }
 0x139   :  { %1305 = vmatpush.bf16.msra.mxu2 %v7456_v29 }
 0x13a   :  { %1294 = vmatpush.bf16.msra.mxu1 %v7501_v53  ;;  %1441 = vmatpush.bf16.msra.mxu3 %v7401_v44 }
 0x13b   :  { %v7613_v45 = vpop.f32.mrf.mxu2 }
 0x13c   :  { %8312 = vst [vmem:[#allocation50_spill] sm:$0xff] %v7613_v45  ;;  %v7617_v8 = vpop.f32.mrf.mxu3  ;;  %v7622_v25 = vpop.f32.mrf.mxu0 }
 0x13d   :  { %1306 = vmatpush.bf16.msra.mxu2 %v7492_v43  ;;  %v7620_v24 = vpop.f32.mrf.mxu1  ;;  %8314 = vst [vmem:[#allocation52_spill] sm:$0xff] %v7622_v25 }
 0x13e   :  { %8313 = vst [vmem:[#allocation51_spill] sm:$0xff] %v7620_v24  ;;  %1295 = vmatpush.bf16.msra.mxu1 %v7540_v20  ;;  %1442 = vmatpush.bf16.msra.mxu3 %v7440_v17 }
 0x13f   :  { %847 = vmatmul.bf16.gmra.mxu1 %v7307_v56 }
 0x140   :  { %896 = vmatmul.bf16.gmra.mxu2 %v7184_v5 }
 0x141   :  { %1307 = vmatpush.bf16.msra.mxu2 %v7530_v3 }
 0x142   :  { %1296 = vmatpush.bf16.msra.mxu1 %v7572_v0  ;;  %1443 = vmatpush.bf16.msra.mxu3 %v7476_v36 }
 0x143   :  { %v701_v45 = vpop.f32.mrf.mxu2 }
 0x144   :  { %v7629_v46 = vadd.f32 %v750_v28, %v701_v45  ;;  %v916_v24 = vpop.f32.mrf.mxu3  ;;  %v7636_v5 = vpop.f32.mrf.mxu0 }
 0x145   :  { %1308 = vmatpush.bf16.msra.mxu2 %v7563_v34  ;;  %v7634_v25 = vpop.f32.mrf.mxu1  ;;  %8317 = vst [vmem:[#allocation55_spill] sm:$0xff] %v7636_v5 }
 0x146   :  { %8315 = vst [vmem:[#allocation53_spill] sm:$0xff] %v7629_v46  ;;  %1444 = vmatpush.bf16.msra.mxu3 %v7503_v54 }
 0x147   :  { %8316 = vst [vmem:[#allocation54_spill] sm:$0xff] %v7634_v25 }
 0x149   :  { %1309 = vmatpush.bf16.msra.mxu2 %v7584_v52 }
 0x14a   :  { %1445 = vmatpush.bf16.msra.mxu3 %v7512_v39 }
 0x14b   :  { %v7640_v56 = vpop.f32.mrf.mxu2 }
 0x14c   :  { %8318 = vst [vmem:[#allocation56_spill] sm:$0xff] %v7640_v56  ;;  %v7643_v28 = vpop.f32.mrf.mxu3  ;;  %v7645_v45 = vpop.f32.mrf.mxu0 }
 0x14d   :  { %8319 = vst [vmem:[#allocation57_spill] sm:$0xff] %v7643_v28  ;;  %v7647_v46 = vpop.f32.mrf.mxu1 }
 0x14e   :  { %8320 = vst [vmem:[#allocation58_spill] sm:$0xff] %v7645_v45  ;;  %1446 = vmatpush.bf16.msra.mxu3 %v7521_v38 }
 0x14f   :  { %1164 = vmatmul.bf16.vlgmr.msrb.gmra.mxu1 %v8308_v18 }
 0x150   :  { %1177 = vmatmul.bf16.vlgmr.msrb.gmra.mxu2 %v8308_v18  ;;  %1413 = vmatpush.bf16.msrb.mxu1 %v7321_v16 }
 0x151   :  { %1426 = vmatpush.bf16.msrb.mxu2 %v7341_v31 }
 0x153   :  { %v862_v25 = vpop.f32.mrf.mxu2 }
 0x154   :  { %v7654_v56 = vadd.f32 %v911_v9, %v862_v25  ;;  %v921_v5 = vpop.f32.mrf.mxu3  ;;  %v7657_v37 = vpop.f32.mrf.mxu0  ;;  %1414 = vmatpush.bf16.msrb.mxu1 %v7351_v40 }
 0x155   :  { %1427 = vmatpush.bf16.msrb.mxu2 %v7377_v2  ;;  %8321 = vst [vmem:[#allocation59_spill] sm:$0xff] %v7657_v37  ;;  %v7659_v45 = vpop.f32.mrf.mxu1 }
 0x158   :  { %1415 = vmatpush.bf16.msrb.mxu1 %v7388_v19 }
 0x159   :  { %1428 = vmatpush.bf16.msrb.mxu2 %v7421_v14 }
 0x15b   :  { %v7663_v22 = vpop.f32.mrf.mxu2 }
 0x15c   :  { %v7667_v18 = vpop.f32.mrf.mxu3  ;;  %v7669_v9 = vpop.f32.mrf.mxu0  ;;  %1416 = vmatpush.bf16.msrb.mxu1 %v7431_v33 }
 0x15d   :  { %1429 = vmatpush.bf16.msrb.mxu2 %v7456_v29  ;;  %8322 = vst [vmem:[#allocation60_spill] sm:$0xff] %v7667_v18  ;;  %v7671_v25 = vpop.f32.mrf.mxu1 }
 0x15e   :  { %8323 = vst [vmem:[#allocation61_spill] sm:$0xff] %v7669_v9 }
 0x15f   :  { %8324 = vst [vmem:[#allocation62_spill] sm:$0xff] %v7671_v25 }
 0x160   :  { %1417 = vmatpush.bf16.msrb.mxu1 %v7466_v49 }
 0x161   :  { %1430 = vmatpush.bf16.msrb.mxu2 %v7492_v43 }
 0x163   :  { %v867_v37 = vpop.f32.mrf.mxu2 }
 0x164   :  { %v7676_v30 = vadd.f32 %v916_v24, %v867_v37  ;;  %v926_v23 = vpop.f32.mrf.mxu3  ;;  %v7679_v57 = vpop.f32.mrf.mxu0  ;;  %1418 = vmatpush.bf16.msrb.mxu1 %v7501_v53 }
 0x165   :  { %1431 = vmatpush.bf16.msrb.mxu2 %v7530_v3  ;;  %8326 = vst [vmem:[#allocation64_spill] sm:$0xff] %v7679_v57  ;;  %v7681_v42 = vpop.f32.mrf.mxu1 }
 0x166   :  { %8325 = vst [vmem:[#allocation63_spill] sm:$0xff] %v7676_v30 }
 0x167   :  { %8327 = vst [vmem:[#allocation65_spill] sm:$0xff] %v7681_v42 }
 0x168   :  { %1419 = vmatpush.bf16.msrb.mxu1 %v7540_v20 }
 0x169   :  { %1432 = vmatpush.bf16.msrb.mxu2 %v7563_v34 }
 0x16b   :  { %v7685_v9 = vpop.f32.mrf.mxu2 }
 0x16c   :  { %8328 = vst [vmem:[#allocation66_spill] sm:$0xff] %v7685_v9  ;;  %v7689_v18 = vpop.f32.mrf.mxu3  ;;  %v7691_v37 = vpop.f32.mrf.mxu0  ;;  %1420 = vmatpush.bf16.msrb.mxu1 %v7572_v0 }
 0x16d   :  { %1433 = vmatpush.bf16.msrb.mxu2 %v7584_v52  ;;  %8329 = vst [vmem:[#allocation67_spill] sm:$0xff] %v7689_v18  ;;  %v7693_v24 = vpop.f32.mrf.mxu1 }
 0x16e   :  { %8330 = vst [vmem:[#allocation68_spill] sm:$0xff] %v7691_v37 }
 0x16f   :  { %8331 = vst [vmem:[#allocation69_spill] sm:$0xff] %v7693_v24 }
 0x173   :  { %v872_v57 = vpop.f32.mrf.mxu2 }
 0x174   :  { %v7696_v32 = vadd.f32 %v921_v5, %v872_v57  ;;  %v931_v7 = vpop.f32.mrf.mxu3  ;;  %v7698_v59 = vpop.f32.mrf.mxu0 }
 0x175   :  { %8333 = vst [vmem:[#allocation71_spill] sm:$0xff] %v7698_v59  ;;  %v7700_v6 = vpop.f32.mrf.mxu1 }
 0x176   :  { %8332 = vst [vmem:[#allocation70_spill] sm:$0xff] %v7696_v32 }
 0x177   :  { %8334 = vst [vmem:[#allocation72_spill] sm:$0xff] %v7700_v6 }
 0x17b   :  { %v7702_v42 = vpop.f32.mrf.mxu2 }
 0x17c   :  { %8335 = vst [vmem:[#allocation73_spill] sm:$0xff] %v7702_v42  ;;  %v7704_v10 = vpop.f32.mrf.mxu3  ;;  %v1152_v18 = vpop.f32.mrf.mxu0 }
 0x17d   :  { %8336 = vst [vmem:[#allocation74_spill] sm:$0xff] %v7704_v10  ;;  %v7706_v28 = vpop.f32.mrf.mxu1  ;;  %v1195_v37 = vadd.f32 %v1152_v18, %v7373_v61 }
 0x17e   :  { %8337 = vst [vmem:[#allocation75_spill] sm:$0xff] %v7706_v28 }
 0x183   :  { %v877_v24 = vpop.f32.mrf.mxu2 }
 0x184   :  { %v7709_v9 = vadd.f32 %v926_v23, %v877_v24  ;;  %v936_v60 = vpop.f32.mrf.mxu3  ;;  %v1154_v5 = vpop.f32.mrf.mxu0 }
 0x185   :  { %v7711_v57 = vpop.f32.mrf.mxu1 }
 0x186   :  { %8338 = vst [vmem:[#allocation76_spill] sm:$0xff] %v7709_v9 }
 0x187   :  { %8339 = vst [vmem:[#allocation77_spill] sm:$0xff] %v7711_v57 }
 0x18b   :  { %v7713_v32 = vpop.f32.mrf.mxu2 }
 0x18c   :  { %8340 = vst [vmem:[#allocation78_spill] sm:$0xff] %v7713_v32  ;;  %v7715_v59 = vpop.f32.mrf.mxu3 }
 0x18d   :  { %8341 = vst [vmem:[#allocation79_spill] sm:$0xff] %v7715_v59  ;;  %v7717_v6 = vpop.f32.mrf.mxu1  ;;  %v77_v59 = vld [vmem:[%s8263_s3] sm:$0xf] }
 0x18e   :  { %8342 = vst [vmem:[#allocation80_spill] sm:$0xff] %v7717_v6 }
 0x193   :  { %v882_v42 = vpop.f32.mrf.mxu2 }
 0x194   :  { %v7719_v10 = vadd.f32 %v931_v7, %v882_v42  ;;  %v941_v28 = vpop.f32.mrf.mxu3  ;;  %v7736_v7 = vperm.slane %v77_v59, 0 }
 0x195   :  { %v7721_v41 = vpop.f32.mrf.mxu1 }
 0x196   :  { %8343 = vst [vmem:[#allocation81_spill] sm:$0xff] %v7719_v10 }
 0x197   :  { %8344 = vst [vmem:[#allocation82_spill] sm:$0xff] %v7721_v41  ;;  %v1208_v41 = vadd.f32 %v7736_v7, %v1195_v37 }
 0x19b   :  { %v7723_v61 = vpop.f32.mrf.mxu2 }
 0x19c   :  { %8345 = vst [vmem:[#allocation83_spill] sm:$0xff] %v7723_v61  ;;  %v7725_v23 = vpop.f32.mrf.mxu3 }
 0x19d   :  { %8346 = vst [vmem:[#allocation84_spill] sm:$0xff] %v7725_v23  ;;  %v7727_v18 = vpop.f32.mrf.mxu1 }
 0x19e   :  { %8347 = vst [vmem:[#allocation85_spill] sm:$0xff] %v7727_v18  ;;  %v5259_v18 = vmul.f32 -1.442695, %v1208_v41 }
 0x1a0   :  { %6762 = vpow2.f32 %v5259_v18 }
 0x1a3   :  { %v887_v24 = vpop.f32.mrf.mxu2 }
 0x1a4   :  { %v7729_v5 = vadd.f32 %v936_v60, %v887_v24  ;;  %v946_v57 = vpop.f32.mrf.mxu3 }
 0x1a5   :  { %v7734_v6 = vpop.f32.mrf.mxu1 }
 0x1a6   :  { %8348 = vst [vmem:[#allocation86_spill] sm:$0xff] %v7729_v5 }
 0x1a7   :  { %8349 = vst [vmem:[#allocation87_spill] sm:$0xff] %v7734_v6  ;;  %v6763_v6 = vpop.eup %6762 }
 0x1a8   :  { %v1215_v25 = vadd.f32 1.0, %v6763_v6  ;;  %v7763_v6 = vperm.slane %v77_v59, 1 }
 0x1aa   :  { %6764 = vrcp.f32 %v1215_v25  ;;  %vm1221_vm1 = vweird.f32 %v1215_v25 }
 0x1ab   :  { %v7738_v42 = vpop.f32.mrf.mxu2 }
 0x1ac   :  { %8350 = vst [vmem:[#allocation88_spill] sm:$0xff] %v7738_v42  ;;  %v7741_v61 = vpop.f32.mrf.mxu3 }
 0x1ad   :  { %8351 = vst [vmem:[#allocation89_spill] sm:$0xff] %v7741_v61  ;;  %v7743_v23 = vpop.f32.mrf.mxu1 }
 0x1ae   :  { %8352 = vst [vmem:[#allocation90_spill] sm:$0xff] %v7743_v23  ;;  %v7756_v23 = vperm.slane %v77_v59, 3 }
 0x1b0   :  { %v6765_v18 = vpop.eup %6764 }
 0x1b1   :  { %vm1222_vm0 = vweird.f32 %v6765_v18 }
 0x1b2   :  { %vm1223_vm2 = vmor %vm1221_vm1, %vm1222_vm0 }
 0x1b3   :  { %v892_v60 = vpop.f32.mrf.mxu2 }
 0x1b4   :  { %v7745_v24 = vadd.f32 %v941_v28, %v892_v60  ;;  %v1191_v5 = vpop.f32.mrf.mxu3 }
 0x1b5   :  { %v7747_v10 = vpop.f32.mrf.mxu1  ;;  %v1198_v41 = vadd.f32 %v1191_v5, %v7654_v56  ;;  %v814_v56 = vadd.f32 %v7647_v46, %v7486_v47  ;;  %v1225_v47 = vand.u32 2147483647, %v1215_v25 }
 0x1b6   :  { %8353 = vst [vmem:[#allocation91_spill] sm:$0xff] %v7745_v24 }
 0x1b7   :  { %8354 = vst [vmem:[#allocation92_spill] sm:$0xff] %v7747_v10  ;;  %v1211_v60 = vadd.f32 %v7756_v23, %v1198_v41  ;;  %vm1226_vm3 = vcmp.eq.f32.partialorder %v1225_v47, 8.507059e+37 }
 0x1bb   :  { %v7749_v32 = vpop.f32.mrf.mxu2 }
 0x1bc   :  { %8355 = vst [vmem:[#allocation93_spill] sm:$0xff] %v7749_v32  ;;  %v1193_v9 = vpop.f32.mrf.mxu3  ;;  %v1217_v32 = vmul.f32 %v6765_v18, %v1215_v25 }
 0x1bd   :  { %v7751_v42 = vpop.f32.mrf.mxu1  ;;  %v5261_v9 = vmul.f32 -1.442695, %v1211_v60 }
 0x1be   :  { %8356 = vst [vmem:[#allocation94_spill] sm:$0xff] %v7751_v42  ;;  %v1218_v24 = vsub.f32 1.0, %v1217_v32 }
 0x1bf   :  { %6766 = vpow2.f32 %v5261_v9 }
 0x1c3   :  { %v897_v37 = vpop.f32.mrf.mxu2 }
 0x1c4   :  { %v7753_v61 = vadd.f32 %v946_v57, %v897_v37  ;;  %v7769_v37 = vperm.slane %v77_v59, 2 }
 0x1c5   :  { %v7758_v28 = vpop.f32.mrf.mxu1  ;;  %v6767_v26 = vpop.eup %6766 }
 0x1c6   :  { %8357 = vst [vmem:[#allocation95_spill] sm:$0xff] %v7753_v61 }
 0x1c7   :  { %8358 = vst [vmem:[#allocation96_spill] sm:$0xff] %v7758_v28 }
 0x1cb   :  { %v7761_v10 = vpop.f32.mrf.mxu2 }
 0x1cc   :  { %8359 = vst [vmem:[#allocation97_spill] sm:$0xff] %v7761_v10  ;;  %v1219_v10 = vmul.f32 %v6765_v18, %v1218_v24 }
 0x1cd   :  { %v1165_v42 = vpop.f32.mrf.mxu1 }
 0x1ce   :  { %v1196_v57 = vadd.f32 %v1165_v42, %v7385_v63  ;;  %v1220_v32 = vadd.f32 %v6765_v18, %v1219_v10  ;;  %v1227_v63 = vand.u32 2147483648, %v1215_v25  ;;  %v1254_v42 = vadd.f32 1.0, %v6767_v26 }
 0x1d0   :  { %v1209_v5 = vadd.f32 %v7763_v6, %v1196_v57  ;;  %v1224_v9 = vsel %vm1223_vm2, %v6765_v18, %v1220_v32  ;;  %vm1260_vm9 = vweird.f32 %v1254_v42 }
 0x1d2   :  { %v5260_v41 = vmul.f32 -1.442695, %v1209_v5  ;;  %v1228_v5 = vor.u32 1.1754944e-38, %v1227_v63 }
 0x1d3   :  { %v1178_v28 = vpop.f32.mrf.mxu2 }
 0x1d4   :  { %v1197_v61 = vadd.f32 %v1178_v28, %v814_v56  ;;  %6768 = vpow2.f32 %v5260_v41 }
 0x1d5   :  { %v1167_v30 = vpop.f32.mrf.mxu1 }
 0x1d6   :  { %v1210_v60 = vadd.f32 %v7769_v37, %v1197_v61  ;;  %v1229_v61 = vsel %vm1226_vm3, %v1228_v5, %v1224_v9 }
 0x1d8   :  { %6770 = vtanh.f32 %v1210_v60 }
 0x1d9   :  { %6772 = vrcp.f32 %v1254_v42 }
 0x1da   :  { %v6769_v59 = vpop.eup %6768 }
 0x1db   :  { %v1180_v46 = vpop.f32.mrf.mxu2  ;;  %v1234_v57 = vadd.f32 1.0, %v6769_v59 }
 0x1dd   :  { %6774 = vrcp.f32 %v1234_v57  ;;  %v1246_v26 = vand.u32 2147483648, %v1234_v57  ;;  %v1244_v25 = vand.u32 2147483647, %v1234_v57  ;;  %vm1240_vm5 = vweird.f32 %v1234_v57 }
 0x1de   :  { %v6771_v28 = vpop.eup %6770 }
 0x1df   :  { %v1271_v24 = vmul.f32 %v6771_v28, %v1229_v61  ;;  %v6773_v30 = vpop.eup %6772  ;;  %v1247_v32 = vor.u32 1.1754944e-38, %v1246_v26  ;;  %vm1245_vm7 = vcmp.eq.f32.partialorder %v1244_v25, 8.507059e+37  ;;  %v1266_v61 = vand.u32 2147483648, %v1254_v42 }
 0x1e0   :  { %v1256_v41 = vmul.f32 %v6773_v30, %v1254_v42  ;;  %vm1261_vm8 = vweird.f32 %v6773_v30 }
 0x1e1   :  { %vm1262_vm10 = vmor %vm1260_vm9, %vm1261_vm8 }
 0x1e2   :  { %v1257_v46 = vsub.f32 1.0, %v1256_v41 }
 0x1e3   :  { %v6775_v10 = vpop.eup %6774 }
 0x1e4   :  { %v1236_v56 = vmul.f32 %v6775_v10, %v1234_v57  ;;  %vm1241_vm4 = vweird.f32 %v6775_v10  ;;  %v1258_v47 = vmul.f32 %v6773_v30, %v1257_v46  ;;  %v1267_v57 = vor.u32 1.1754944e-38, %v1266_v61 }
 0x1e5   :  { %vm1242_vm6 = vmor %vm1240_vm5, %vm1241_vm4 }
 0x1e6   :  { %v1237_v60 = vsub.f32 1.0, %v1236_v56  ;;  %v1259_v28 = vadd.f32 %v6773_v30, %v1258_v47  ;;  %v1264_v56 = vand.u32 2147483647, %v1254_v42  ;;  %v914_v47 = vadd.f32 %v7617_v8, %v7663_v22 }
 0x1e7   :  { %v816_v22 = vadd.f32 %v7659_v45, %v7507_v62 }
 0x1e8   :  { %v1238_v27 = vmul.f32 %v6775_v10, %v1237_v60  ;;  %v1263_v41 = vsel %vm1262_vm10, %v6773_v30, %v1259_v28  ;;  %vm1265_vm11 = vcmp.eq.f32.partialorder %v1264_v56, 8.507059e+37 }
 0x1e9   :  { %v1268_v60 = vsel %vm1265_vm11, %v1267_v57, %v1263_v41 }
 0x1ea   :  { %v1239_v18 = vadd.f32 %v6775_v10, %v1238_v27 }
 0x1ec   :  { %v1243_v63 = vsel %vm1242_vm6, %v6775_v10, %v1239_v18 }
 0x1ed   :  { %v1248_v59 = vsel %vm1245_vm7, %v1247_v32, %v1243_v63 }
 0x1ee   :  { %v1270_v9 = vmul.f32 0.0, %v1248_v59 }
 0x1f0   :  { %v7772_v5 = vadd.f32 %v1271_v24, %v1270_v9 }
 0x1f2   :  { %6776 = vtanh.f32 %v7772_v5 }
 0x1f8   :  { %v6777_v27 = vpop.eup %6776 }
 0x1f9   :  { %v1274_v10 = vmul.f32 %v6777_v27, %v1268_v60 }
 0x1fb   :  { %v1275_v26 = vpack.c.bf16 %v1274_v10, %v1274_v10 }
 0x1fd   :  { %1284 = vmatmul.bf16.vlgmr.msrb.gmra.mxu0 %v1275_v26  ;;  %1297 = vmatmul.bf16.vlgmr.msra.gmra.mxu1 %v1275_v26 }
 0x1fe   :  { %1310 = vmatmul.bf16.vlgmr.msra.gmra.mxu2 %v1275_v26  ;;  %1323 = vmatmul.bf16.vlgmr.msrb.gmra.mxu3 %v1275_v26 }
 0x1ff   :  { %1524 = vmatpush.bf16.msrb.mxu0 %v7319_v13  ;;  %1537 = vmatpush.bf16.msra.mxu1 %v7321_v16 }
 0x200   :  { %1550 = vmatpush.bf16.msra.mxu2 %v7341_v31  ;;  %1563 = vmatpush.bf16.msrb.mxu3 %v7329_v21 }
 0x203   :  { %1525 = vmatpush.bf16.msrb.mxu0 %v7347_v35  ;;  %1538 = vmatpush.bf16.msra.mxu1 %v7351_v40 }
 0x204   :  { %1551 = vmatpush.bf16.msra.mxu2 %v7377_v2  ;;  %1564 = vmatpush.bf16.msrb.mxu3 %v7361_v48 }
 0x207   :  { %1526 = vmatpush.bf16.msrb.mxu0 %v7363_v51  ;;  %1539 = vmatpush.bf16.msra.mxu1 %v7388_v19 }
 0x208   :  { %1552 = vmatpush.bf16.msra.mxu2 %v7421_v14  ;;  %1565 = vmatpush.bf16.msrb.mxu3 %v7401_v44 }
 0x20b   :  { %1527 = vmatpush.bf16.msrb.mxu0 %v7369_v58  ;;  %1540 = vmatpush.bf16.msra.mxu1 %v7431_v33 }
 0x20c   :  { %1553 = vmatpush.bf16.msra.mxu2 %v7456_v29  ;;  %1566 = vmatpush.bf16.msrb.mxu3 %v7440_v17 }
 0x20f   :  { %1528 = vmatpush.bf16.msrb.mxu0 %v7381_v11  ;;  %1541 = vmatpush.bf16.msra.mxu1 %v7466_v49 }
 0x210   :  { %1554 = vmatpush.bf16.msra.mxu2 %v7492_v43  ;;  %1567 = vmatpush.bf16.msrb.mxu3 %v7476_v36 }
 0x213   :  { %1529 = vmatpush.bf16.msrb.mxu0 %v7392_v4  ;;  %1542 = vmatpush.bf16.msra.mxu1 %v7501_v53 }
 0x214   :  { %1555 = vmatpush.bf16.msra.mxu2 %v7530_v3  ;;  %1568 = vmatpush.bf16.msrb.mxu3 %v7503_v54 }
 0x217   :  { %1530 = vmatpush.bf16.msrb.mxu0 %v7403_v50  ;;  %1543 = vmatpush.bf16.msra.mxu1 %v7540_v20 }
 0x218   :  { %1556 = vmatpush.bf16.msra.mxu2 %v7563_v34  ;;  %1569 = vmatpush.bf16.msrb.mxu3 %v7512_v39 }
 0x21b   :  { %1531 = vmatpush.bf16.msrb.mxu0 %v7412_v1  ;;  %1544 = vmatpush.bf16.msra.mxu1 %v7572_v0 }
 0x21c   :  { %1557 = vmatpush.bf16.msra.mxu2 %v7584_v52  ;;  %1570 = vmatpush.bf16.msrb.mxu3 %v7521_v38 }
 0x27a   :  { %v1285_v42 = vpop.f32.mrf.mxu0  ;;  %v1298_v24 = vpop.f32.mrf.mxu1 }
 0x27b   :  { %v1328_v30 = vadd.f32 %v1285_v42, %v7398_v15  ;;  %v1329_v25 = vadd.f32 %v1298_v24, %v7407_v55 }
 0x27d   :  { %v1332_v46 = vadd.f32 %v1328_v30, %v7736_v7  ;;  %v1333_v18 = vadd.f32 %v1329_v25, %v7763_v6 }
 0x27f   :  { %v5262_v32 = vmul.f32 -1.442695, %v1332_v46  ;;  %v5263_v63 = vmul.f32 -1.442695, %v1333_v18 }
 0x281   :  { %6778 = vpow2.f32 %v5262_v32  ;;  %v1311_v59 = vpop.f32.mrf.mxu2  ;;  %v1324_v9 = vpop.f32.mrf.mxu3 }
 0x282   :  { %6780 = vpow2.f32 %v5263_v63  ;;  %v1331_v28 = vadd.f32 %v1324_v9, %v914_v47  ;;  %v1287_v61 = vpop.f32.mrf.mxu0  ;;  %v1300_v56 = vpop.f32.mrf.mxu1  ;;  %v1330_v8 = vadd.f32 %v1311_v59, %v816_v22 }
 0x284   :  { %v1335_v15 = vadd.f32 %v1331_v28, %v7756_v23  ;;  %v1334_v25 = vadd.f32 %v1330_v8, %v7769_v37 }
 0x286   :  { %v5264_v41 = vmul.f32 -1.442695, %v1335_v15 }
 0x287   :  { %v6779_v55 = vpop.eup %6778 }
 0x288   :  { %v6781_v57 = vpop.eup %6780  ;;  %v1339_v27 = vadd.f32 1.0, %v6779_v55  ;;  %6782 = vpow2.f32 %v5264_v41 }
 0x289   :  { %v1358_v60 = vadd.f32 1.0, %v6781_v57  ;;  %v1313_v10 = vpop.f32.mrf.mxu2  ;;  %v1326_v26 = vpop.f32.mrf.mxu3 }
 0x28a   :  { %6784 = vrcp.f32 %v1339_v27  ;;  %v1351_v9 = vand.u32 2147483648, %v1339_v27  ;;  %v1349_v62 = vand.u32 2147483647, %v1339_v27  ;;  %vm1345_vm14 = vweird.f32 %v1339_v27 }
 0x28b   :  { %6786 = vrcp.f32 %v1358_v60  ;;  %v1370_v28 = vand.u32 2147483648, %v1358_v60  ;;  %v1368_v59 = vand.u32 2147483647, %v1358_v60  ;;  %vm1364_vm15 = vweird.f32 %v1358_v60 }
 0x28c   :  { %v1352_v41 = vor.u32 1.1754944e-38, %v1351_v9  ;;  %vm1350_vm2 = vcmp.eq.f32.partialorder %v1349_v62, 8.507059e+37 }
 0x28d   :  { %v1371_v10 = vor.u32 1.1754944e-38, %v1370_v28  ;;  %vm1369_vm3 = vcmp.eq.f32.partialorder %v1368_v59, 8.507059e+37 }
 0x28e   :  { %v6783_v42 = vpop.eup %6782 }
 0x28f   :  { %v1378_v24 = vadd.f32 1.0, %v6783_v42 }
 0x290   :  { %v6785_v30 = vpop.eup %6784 }
 0x291   :  { %v6787_v46 = vpop.eup %6786  ;;  %v1341_v18 = vmul.f32 %v6785_v30, %v1339_v27  ;;  %6788 = vrcp.f32 %v1378_v24  ;;  %vm1346_vm12 = vweird.f32 %v6785_v30  ;;  %v1390_v9 = vand.u32 2147483648, %v1378_v24 }
 0x292   :  { %v1360_v32 = vmul.f32 %v6787_v46, %v1358_v60  ;;  %6790 = vtanh.f32 %v1334_v25  ;;  %vm1365_vm13 = vweird.f32 %v6787_v46  ;;  %vm1347_vm0 = vmor %vm1345_vm14, %vm1346_vm12  ;;  %vm1384_vm5 = vweird.f32 %v1378_v24 }
 0x293   :  { %v1342_v63 = vsub.f32 1.0, %v1341_v18  ;;  %vm1366_vm1 = vmor %vm1364_vm15, %vm1365_vm13 }
 0x294   :  { %v1361_v47 = vsub.f32 1.0, %v1360_v32 }
 0x295   :  { %v1343_v61 = vmul.f32 %v6785_v30, %v1342_v63 }
 0x296   :  { %v1362_v45 = vmul.f32 %v6787_v46, %v1361_v47 }
 0x297   :  { %v6789_v56 = vpop.eup %6788  ;;  %v1344_v15 = vadd.f32 %v6785_v30, %v1343_v61  ;;  %v1391_v61 = vor.u32 1.1754944e-38, %v1390_v9 }
 0x298   :  { %v1363_v55 = vadd.f32 %v6787_v46, %v1362_v45  ;;  %v1380_v57 = vmul.f32 %v6789_v56, %v1378_v24  ;;  %v6791_v22 = vpop.eup %6790  ;;  %vm1385_vm4 = vweird.f32 %v6789_v56 }
 0x299   :  { %v1348_v26 = vsel %vm1347_vm0, %v6785_v30, %v1344_v15  ;;  %v1388_v30 = vand.u32 2147483647, %v1378_v24  ;;  %vm1386_vm6 = vmor %vm1384_vm5, %vm1385_vm4  ;;  %v8360_v15 = vld [vmem:[#allocation17_spill] sm:$0xff] }
 0x29a   :  { %v1353_v8 = vsel %vm1350_vm2, %v1352_v41, %v1348_v26  ;;  %v1367_v42 = vsel %vm1366_vm1, %v6787_v46, %v1363_v55  ;;  %v1381_v25 = vsub.f32 1.0, %v1380_v57 }
 0x29b   :  { %v1372_v18 = vsel %vm1369_vm3, %v1371_v10, %v1367_v42  ;;  %v1395_v32 = vmul.f32 %v6791_v22, %v1353_v8  ;;  %vm1389_vm7 = vcmp.eq.f32.partialorder %v1388_v30, 8.507059e+37  ;;  %v8361_v42 = vld [vmem:[#allocation63_spill] sm:$0xff] }
 0x29c   :  { %v1394_v63 = vmul.f32 %v1372_v18, %v7772_v5  ;;  %v1382_v47 = vmul.f32 %v6789_v56, %v1381_v25 }
 0x29e   :  { %v7818_v27 = vadd.f32 %v1395_v32, %v1394_v63  ;;  %v1383_v60 = vadd.f32 %v6789_v56, %v1382_v47 }
 0x2a0   :  { %6792 = vtanh.f32 %v7818_v27  ;;  %v1387_v28 = vsel %vm1386_vm6, %v6789_v56, %v1383_v60 }
 0x2a1   :  { %v1392_v62 = vsel %vm1389_vm7, %v1391_v61, %v1387_v28 }
 0x2a6   :  { %v6793_v46 = vpop.eup %6792 }
 0x2a7   :  { %v1398_v45 = vmul.f32 %v6793_v46, %v1392_v62  ;;  %v8362_v46 = vld [vmem:[#allocation31_spill] sm:$0xff]  ;;  %v8363_v62 = vld [vmem:[#allocation62_spill] sm:$0xff] }
 0x2a9   :  { %v1399_v59 = vpack.c.bf16 %v1398_v45, %v1398_v45  ;;  %v819_v45 = vadd.f32 %v8363_v62, %v8362_v46 }
 0x2ab   :  { %1408 = vmatmul.bf16.vlgmr.msra.gmra.mxu0 %v1399_v59  ;;  %1421 = vmatmul.bf16.vlgmr.msrb.gmra.mxu1 %v1399_v59 }
 0x2ac   :  { %1434 = vmatmul.bf16.vlgmr.msrb.gmra.mxu2 %v1399_v59  ;;  %1447 = vmatmul.bf16.vlgmr.msra.gmra.mxu3 %v1399_v59 }
 0x2ad   :  { %1648 = vmatpush.bf16.msra.mxu0 %v7319_v13  ;;  %1661 = vmatpush.bf16.msrb.mxu1 %v7321_v16 }
 0x2ae   :  { %1674 = vmatpush.bf16.msrb.mxu2 %v7341_v31  ;;  %1687 = vmatpush.bf16.msra.mxu3 %v7329_v21 }
 0x2b1   :  { %1649 = vmatpush.bf16.msra.mxu0 %v7347_v35  ;;  %1662 = vmatpush.bf16.msrb.mxu1 %v7351_v40 }
 0x2b2   :  { %1675 = vmatpush.bf16.msrb.mxu2 %v7377_v2  ;;  %1688 = vmatpush.bf16.msra.mxu3 %v7361_v48 }
 0x2b5   :  { %1650 = vmatpush.bf16.msra.mxu0 %v7363_v51  ;;  %1663 = vmatpush.bf16.msrb.mxu1 %v7388_v19 }
 0x2b6   :  { %1676 = vmatpush.bf16.msrb.mxu2 %v7421_v14  ;;  %1689 = vmatpush.bf16.msra.mxu3 %v7401_v44 }
 0x2b9   :  { %1651 = vmatpush.bf16.msra.mxu0 %v7369_v58  ;;  %1664 = vmatpush.bf16.msrb.mxu1 %v7431_v33 }
 0x2ba   :  { %1677 = vmatpush.bf16.msrb.mxu2 %v7456_v29  ;;  %1690 = vmatpush.bf16.msra.mxu3 %v7440_v17 }
 0x2bd   :  { %1652 = vmatpush.bf16.msra.mxu0 %v7381_v11  ;;  %1665 = vmatpush.bf16.msrb.mxu1 %v7466_v49 }
 0x2be   :  { %1678 = vmatpush.bf16.msrb.mxu2 %v7492_v43  ;;  %1691 = vmatpush.bf16.msra.mxu3 %v7476_v36 }
 0x2c1   :  { %1653 = vmatpush.bf16.msra.mxu0 %v7392_v4  ;;  %1666 = vmatpush.bf16.msrb.mxu1 %v7501_v53 }
 0x2c2   :  { %1679 = vmatpush.bf16.msrb.mxu2 %v7530_v3  ;;  %1692 = vmatpush.bf16.msra.mxu3 %v7503_v54 }
 0x2c5   :  { %1654 = vmatpush.bf16.msra.mxu0 %v7403_v50  ;;  %1667 = vmatpush.bf16.msrb.mxu1 %v7540_v20 }
 0x2c6   :  { %1680 = vmatpush.bf16.msrb.mxu2 %v7563_v34  ;;  %1693 = vmatpush.bf16.msra.mxu3 %v7512_v39 }
 0x2c9   :  { %1655 = vmatpush.bf16.msra.mxu0 %v7412_v1  ;;  %1668 = vmatpush.bf16.msrb.mxu1 %v7572_v0 }
 0x2ca   :  { %1681 = vmatpush.bf16.msrb.mxu2 %v7584_v52  ;;  %1694 = vmatpush.bf16.msra.mxu3 %v7521_v38 }
 0x328   :  { %v1409_v5 = vpop.f32.mrf.mxu0  ;;  %v1422_v24 = vpop.f32.mrf.mxu1 }
 0x329   :  { %v1452_v56 = vadd.f32 %v1409_v5, %v7417_v12  ;;  %v1453_v41 = vadd.f32 %v1422_v24, %v8360_v15 }
 0x32b   :  { %v1456_v55 = vadd.f32 %v1452_v56, %v7736_v7  ;;  %v1457_v57 = vadd.f32 %v1453_v41, %v7763_v6 }
 0x32d   :  { %v5265_v10 = vmul.f32 -1.442695, %v1456_v55  ;;  %v5266_v26 = vmul.f32 -1.442695, %v1457_v57 }
 0x32f   :  { %6794 = vpow2.f32 %v5265_v10  ;;  %v1435_v22 = vpop.f32.mrf.mxu2  ;;  %v1448_v8 = vpop.f32.mrf.mxu3 }
 0x330   :  { %6796 = vpow2.f32 %v5266_v26  ;;  %v1455_v25 = vadd.f32 %v1448_v8, %v8361_v42  ;;  %v1411_v18 = vpop.f32.mrf.mxu0  ;;  %v1424_v32 = vpop.f32.mrf.mxu1  ;;  %v1454_v59 = vadd.f32 %v1435_v22, %v819_v45 }
 0x332   :  { %v1459_v63 = vadd.f32 %v1455_v25, %v7756_v23  ;;  %v1458_v15 = vadd.f32 %v1454_v59, %v7769_v37 }
 0x334   :  { %v5267_v47 = vmul.f32 -1.442695, %v1459_v63 }
 0x335   :  { %v6795_v12 = vpop.eup %6794 }
 0x336   :  { %v6797_v60 = vpop.eup %6796  ;;  %v1463_v9 = vadd.f32 1.0, %v6795_v12  ;;  %6798 = vpow2.f32 %v5267_v47 }
 0x337   :  { %v1482_v30 = vadd.f32 1.0, %v6797_v60  ;;  %v1437_v28 = vpop.f32.mrf.mxu2  ;;  %v1450_v61 = vpop.f32.mrf.mxu3 }
 0x338   :  { %6800 = vrcp.f32 %v1463_v9  ;;  %v1475_v8 = vand.u32 2147483648, %v1463_v9  ;;  %v1473_v18 = vand.u32 2147483647, %v1463_v9  ;;  %vm1469_vm10 = vweird.f32 %v1463_v9 }
 0x339   :  { %6802 = vrcp.f32 %v1482_v30  ;;  %v1494_v42 = vand.u32 2147483648, %v1482_v30  ;;  %v1492_v22 = vand.u32 2147483647, %v1482_v30  ;;  %vm1488_vm11 = vweird.f32 %v1482_v30 }
 0x33a   :  { %v1476_v12 = vor.u32 1.1754944e-38, %v1475_v8  ;;  %vm1474_vm14 = vcmp.eq.f32.partialorder %v1473_v18, 8.507059e+37 }
 0x33b   :  { %v1495_v61 = vor.u32 1.1754944e-38, %v1494_v42  ;;  %vm1493_vm15 = vcmp.eq.f32.partialorder %v1492_v22, 8.507059e+37  ;;  %v8364_v22 = vld [vmem:[#allocation19_spill] sm:$0xff] }
 0x33c   :  { %v6799_v5 = vpop.eup %6798 }
 0x33d   :  { %v1502_v24 = vadd.f32 1.0, %v6799_v5 }
 0x33e   :  { %v6801_v56 = vpop.eup %6800 }
 0x33f   :  { %v6803_v41 = vpop.eup %6802  ;;  %v1465_v55 = vmul.f32 %v6801_v56, %v1463_v9  ;;  %6804 = vrcp.f32 %v1502_v24  ;;  %vm1470_vm8 = vweird.f32 %v6801_v56  ;;  %vm1508_vm1 = vweird.f32 %v1502_v24 }
 0x340   :  { %v1484_v57 = vmul.f32 %v6803_v41, %v1482_v30  ;;  %6806 = vtanh.f32 %v1458_v15  ;;  %vm1489_vm9 = vweird.f32 %v6803_v41  ;;  %vm1471_vm12 = vmor %vm1469_vm10, %vm1470_vm8 }
 0x341   :  { %v1466_v10 = vsub.f32 1.0, %v1465_v55  ;;  %vm1490_vm13 = vmor %vm1488_vm11, %vm1489_vm9 }
 0x342   :  { %v1485_v26 = vsub.f32 1.0, %v1484_v57 }
 0x343   :  { %v1467_v25 = vmul.f32 %v6801_v56, %v1466_v10 }
 0x344   :  { %v1486_v32 = vmul.f32 %v6803_v41, %v1485_v26  ;;  %v1514_v26 = vand.u32 2147483648, %v1502_v24 }
 0x345   :  { %v6805_v63 = vpop.eup %6804  ;;  %v1468_v47 = vadd.f32 %v6801_v56, %v1467_v25 }
 0x346   :  { %v1487_v60 = vadd.f32 %v6803_v41, %v1486_v32  ;;  %v1504_v28 = vmul.f32 %v6805_v63, %v1502_v24  ;;  %v6807_v62 = vpop.eup %6806  ;;  %vm1509_vm0 = vweird.f32 %v6805_v63  ;;  %v1515_v42 = vor.u32 1.1754944e-38, %v1514_v26 }
 0x347   :  { %v1472_v46 = vsel %vm1471_vm12, %v6801_v56, %v1468_v47  ;;  %v1512_v56 = vand.u32 2147483647, %v1502_v24  ;;  %vm1510_vm2 = vmor %vm1508_vm1, %vm1509_vm0  ;;  %v8365_v47 = vld [vmem:[#allocation20_spill] sm:$0xff] }
 0x348   :  { %v1477_v45 = vsel %vm1474_vm14, %v1476_v12, %v1472_v46  ;;  %v1491_v59 = vsel %vm1490_vm13, %v6803_v41, %v1487_v60  ;;  %v1505_v5 = vsub.f32 1.0, %v1504_v28 }
 0x349   :  { %v1496_v15 = vsel %vm1493_vm15, %v1495_v61, %v1491_v59  ;;  %v1519_v55 = vmul.f32 %v6807_v62, %v1477_v45  ;;  %vm1513_vm3 = vcmp.eq.f32.partialorder %v1512_v56, 8.507059e+37  ;;  %v8366_v62 = vld [vmem:[#allocation66_spill] sm:$0xff]  ;;  %v8367_v45 = vld [vmem:[#allocation57_spill] sm:$0xff] }
 0x34a   :  { %v1518_v57 = vmul.f32 %v1496_v15, %v7818_v27  ;;  %v1506_v10 = vmul.f32 %v6805_v63, %v1505_v5  ;;  %v919_v59 = vadd.f32 %v8367_v45, %v8366_v62 }
 0x34c   :  { %v7863_v9 = vadd.f32 %v1519_v55, %v1518_v57  ;;  %v1507_v30 = vadd.f32 %v6805_v63, %v1506_v10 }
 0x34e   :  { %6808 = vtanh.f32 %v7863_v9  ;;  %v1511_v8 = vsel %vm1510_vm2, %v6805_v63, %v1507_v30 }
 0x34f   :  { %v1516_v25 = vsel %vm1513_vm3, %v1515_v42, %v1511_v8 }
 0x354   :  { %v6809_v41 = vpop.eup %6808 }
 0x355   :  { %v1522_v18 = vmul.f32 %v6809_v41, %v1516_v25 }
 0x357   :  { %v1523_v32 = vpack.c.bf16 %v1522_v18, %v1522_v18 }
 0x359   :  { %1532 = vmatmul.bf16.vlgmr.msrb.gmra.mxu0 %v1523_v32  ;;  %1545 = vmatmul.bf16.vlgmr.msra.gmra.mxu1 %v1523_v32 }
 0x35a   :  { %1558 = vmatmul.bf16.vlgmr.msra.gmra.mxu2 %v1523_v32  ;;  %1571 = vmatmul.bf16.vlgmr.msrb.gmra.mxu3 %v1523_v32  ;;  %v8368_v32 = vld [vmem:[#allocation35_spill] sm:$0xff] }
 0x35b   :  { %1772 = vmatpush.bf16.msrb.mxu0 %v7319_v13  ;;  %1785 = vmatpush.bf16.msra.mxu1 %v7321_v16 }
 0x35c   :  { %1798 = vmatpush.bf16.msra.mxu2 %v7341_v31  ;;  %1811 = vmatpush.bf16.msrb.mxu3 %v7329_v21 }
 0x35f   :  { %1773 = vmatpush.bf16.msrb.mxu0 %v7347_v35  ;;  %1786 = vmatpush.bf16.msra.mxu1 %v7351_v40 }
 0x360   :  { %1799 = vmatpush.bf16.msra.mxu2 %v7377_v2  ;;  %1812 = vmatpush.bf16.msrb.mxu3 %v7361_v48 }
 0x363   :  { %1774 = vmatpush.bf16.msrb.mxu0 %v7363_v51  ;;  %1787 = vmatpush.bf16.msra.mxu1 %v7388_v19 }
 0x364   :  { %1800 = vmatpush.bf16.msra.mxu2 %v7421_v14  ;;  %1813 = vmatpush.bf16.msrb.mxu3 %v7401_v44 }
 0x367   :  { %1775 = vmatpush.bf16.msrb.mxu0 %v7369_v58  ;;  %1788 = vmatpush.bf16.msra.mxu1 %v7431_v33 }
 0x368   :  { %1801 = vmatpush.bf16.msra.mxu2 %v7456_v29  ;;  %1814 = vmatpush.bf16.msrb.mxu3 %v7440_v17 }
 0x36b   :  { %1776 = vmatpush.bf16.msrb.mxu0 %v7381_v11  ;;  %1789 = vmatpush.bf16.msra.mxu1 %v7466_v49 }
 0x36c   :  { %1802 = vmatpush.bf16.msra.mxu2 %v7492_v43  ;;  %1815 = vmatpush.bf16.msrb.mxu3 %v7476_v36 }
 0x36f   :  { %1777 = vmatpush.bf16.msrb.mxu0 %v7392_v4  ;;  %1790 = vmatpush.bf16.msra.mxu1 %v7501_v53 }
 0x370   :  { %1803 = vmatpush.bf16.msra.mxu2 %v7530_v3  ;;  %1816 = vmatpush.bf16.msrb.mxu3 %v7503_v54 }
 0x373   :  { %1778 = vmatpush.bf16.msrb.mxu0 %v7403_v50  ;;  %1791 = vmatpush.bf16.msra.mxu1 %v7540_v20 }
 0x374   :  { %1804 = vmatpush.bf16.msra.mxu2 %v7563_v34  ;;  %1817 = vmatpush.bf16.msrb.mxu3 %v7512_v39 }
 0x377   :  { %1779 = vmatpush.bf16.msrb.mxu0 %v7412_v1  ;;  %1792 = vmatpush.bf16.msra.mxu1 %v7572_v0 }
 0x378   :  { %1805 = vmatpush.bf16.msra.mxu2 %v7584_v52  ;;  %1818 = vmatpush.bf16.msrb.mxu3 %v7521_v38 }
 0x3d6   :  { %v1533_v27 = vpop.f32.mrf.mxu0  ;;  %v1546_v24 = vpop.f32.mrf.mxu1 }
 0x3d7   :  { %v1576_v63 = vadd.f32 %v1533_v27, %v8364_v22  ;;  %v1577_v12 = vadd.f32 %v1546_v24, %v8365_v47  ;;  %v8369_v27 = vld [vmem:[#allocation65_spill] sm:$0xff] }
 0x3d8   :  { %v821_v24 = vadd.f32 %v8369_v27, %v8368_v32 }
 0x3d9   :  { %v1580_v60 = vadd.f32 %v1576_v63, %v7736_v7  ;;  %v1581_v28 = vadd.f32 %v1577_v12, %v7763_v6 }
 0x3db   :  { %v5268_v61 = vmul.f32 -1.442695, %v1580_v60  ;;  %v5269_v46 = vmul.f32 -1.442695, %v1581_v28 }
 0x3dd   :  { %6810 = vpow2.f32 %v5268_v61  ;;  %v1559_v5 = vpop.f32.mrf.mxu2  ;;  %v1572_v15 = vpop.f32.mrf.mxu3 }
 0x3de   :  { %6812 = vpow2.f32 %v5269_v46  ;;  %v1579_v55 = vadd.f32 %v1572_v15, %v919_v59  ;;  %v1535_v57 = vpop.f32.mrf.mxu0  ;;  %v1548_v10 = vpop.f32.mrf.mxu1  ;;  %v1578_v22 = vadd.f32 %v1559_v5, %v821_v24 }
 0x3e0   :  { %v1583_v30 = vadd.f32 %v1579_v55, %v7756_v23  ;;  %v1582_v60 = vadd.f32 %v1578_v22, %v7769_v37 }
 0x3e2   :  { %v5270_v26 = vmul.f32 -1.442695, %v1583_v30 }
 0x3e3   :  { %v6811_v56 = vpop.eup %6810 }
 0x3e4   :  { %v6813_v8 = vpop.eup %6812  ;;  %v1587_v42 = vadd.f32 1.0, %v6811_v56  ;;  %6814 = vpow2.f32 %v5270_v26 }
 0x3e5   :  { %v1606_v41 = vadd.f32 1.0, %v6813_v8  ;;  %v1561_v25 = vpop.f32.mrf.mxu2  ;;  %v1574_v18 = vpop.f32.mrf.mxu3 }
 0x3e6   :  { %6816 = vrcp.f32 %v1587_v42  ;;  %v1599_v59 = vand.u32 2147483648, %v1587_v42  ;;  %v1597_v57 = vand.u32 2147483647, %v1587_v42  ;;  %vm1593_vm6 = vweird.f32 %v1587_v42 }
 0x3e7   :  { %6818 = vrcp.f32 %v1606_v41  ;;  %v1618_v15 = vand.u32 2147483648, %v1606_v41  ;;  %v1616_v5 = vand.u32 2147483647, %v1606_v41  ;;  %vm1612_vm7 = vweird.f32 %v1606_v41 }
 0x3e8   :  { %v1600_v56 = vor.u32 1.1754944e-38, %v1599_v59  ;;  %vm1598_vm10 = vcmp.eq.f32.partialorder %v1597_v57, 8.507059e+37 }
 0x3e9   :  { %v1619_v18 = vor.u32 1.1754944e-38, %v1618_v15  ;;  %vm1617_vm11 = vcmp.eq.f32.partialorder %v1616_v5, 8.507059e+37  ;;  %v8370_v5 = vld [vmem:[#allocation21_spill] sm:$0xff] }
 0x3ea   :  { %v6815_v63 = vpop.eup %6814 }
 0x3eb   :  { %v1626_v47 = vadd.f32 1.0, %v6815_v63 }
 0x3ec   :  { %v6817_v12 = vpop.eup %6816 }
 0x3ed   :  { %v6819_v28 = vpop.eup %6818  ;;  %v1589_v61 = vmul.f32 %v6817_v12, %v1587_v42  ;;  %6820 = vrcp.f32 %v1626_v47  ;;  %vm1594_vm4 = vweird.f32 %v6817_v12  ;;  %vm1632_vm13 = vweird.f32 %v1626_v47 }
 0x3ee   :  { %v1608_v46 = vmul.f32 %v6819_v28, %v1606_v41  ;;  %6822 = vtanh.f32 %v1582_v60  ;;  %vm1613_vm5 = vweird.f32 %v6819_v28  ;;  %vm1595_vm8 = vmor %vm1593_vm6, %vm1594_vm4 }
 0x3ef   :  { %v1590_v62 = vsub.f32 1.0, %v1589_v61  ;;  %vm1614_vm9 = vmor %vm1612_vm7, %vm1613_vm5 }
 0x3f0   :  { %v1609_v45 = vsub.f32 1.0, %v1608_v46 }
 0x3f1   :  { %v1591_v55 = vmul.f32 %v6817_v12, %v1590_v62 }
 0x3f2   :  { %v1610_v10 = vmul.f32 %v6819_v28, %v1609_v45  ;;  %v1638_v45 = vand.u32 2147483648, %v1626_v47 }
 0x3f3   :  { %v6821_v30 = vpop.eup %6820  ;;  %v1592_v26 = vadd.f32 %v6817_v12, %v1591_v55 }
 0x3f4   :  { %v1611_v8 = vadd.f32 %v6819_v28, %v1610_v10  ;;  %v1628_v25 = vmul.f32 %v6821_v30, %v1626_v47  ;;  %v6823_v27 = vpop.eup %6822  ;;  %vm1633_vm12 = vweird.f32 %v6821_v30  ;;  %v1639_v15 = vor.u32 1.1754944e-38, %v1638_v45 }
 0x3f5   :  { %v1596_v32 = vsel %vm1595_vm8, %v6817_v12, %v1592_v26  ;;  %v1636_v12 = vand.u32 2147483647, %v1626_v47  ;;  %vm1634_vm14 = vmor %vm1632_vm13, %vm1633_vm12  ;;  %v8371_v26 = vld [vmem:[#allocation22_spill] sm:$0xff] }
 0x3f6   :  { %v1601_v24 = vsel %vm1598_vm10, %v1600_v56, %v1596_v32  ;;  %v1615_v22 = vsel %vm1614_vm9, %v6819_v28, %v1611_v8  ;;  %v1629_v63 = vsub.f32 1.0, %v1628_v25 }
 0x3f7   :  { %v1620_v60 = vsel %vm1617_vm11, %v1619_v18, %v1615_v22  ;;  %v1643_v61 = vmul.f32 %v6823_v27, %v1601_v24  ;;  %vm1637_vm15 = vcmp.eq.f32.partialorder %v1636_v12, 8.507059e+37  ;;  %v8372_v22 = vld [vmem:[#allocation70_spill] sm:$0xff] }
 0x3f8   :  { %v1642_v46 = vmul.f32 %v1620_v60, %v7863_v9  ;;  %v1630_v62 = vmul.f32 %v6821_v30, %v1629_v63 }
 0x3fa   :  { %v7909_v42 = vadd.f32 %v1643_v61, %v1642_v46  ;;  %v1631_v41 = vadd.f32 %v6821_v30, %v1630_v62 }
 0x3fc   :  { %6824 = vtanh.f32 %v7909_v42  ;;  %v1635_v59 = vsel %vm1634_vm14, %v6821_v30, %v1631_v41 }
 0x3fd   :  { %v1640_v55 = vsel %vm1637_vm15, %v1639_v15, %v1635_v59 }
 0x402   :  { %v6825_v28 = vpop.eup %6824 }
 0x403   :  { %v1646_v57 = vmul.f32 %v6825_v28, %v1640_v55  ;;  %v8373_v55 = vld [vmem:[#allocation39_spill] sm:$0xff] }
 0x405   :  { %v1647_v10 = vpack.c.bf16 %v1646_v57, %v1646_v57  ;;  %v8374_v57 = vld [vmem:[#allocation69_spill] sm:$0xff] }
 0x407   :  { %1656 = vmatmul.bf16.vlgmr.msra.gmra.mxu0 %v1647_v10  ;;  %1669 = vmatmul.bf16.vlgmr.msrb.gmra.mxu1 %v1647_v10 }
 0x408   :  { %1682 = vmatmul.bf16.vlgmr.msrb.gmra.mxu2 %v1647_v10  ;;  %1695 = vmatmul.bf16.vlgmr.msra.gmra.mxu3 %v1647_v10  ;;  %v824_v10 = vadd.f32 %v8374_v57, %v8373_v55 }
 0x409   :  { %1896 = vmatpush.bf16.msra.mxu0 %v7319_v13  ;;  %1909 = vmatpush.bf16.msrb.mxu1 %v7321_v16 }
 0x40a   :  { %1922 = vmatpush.bf16.msrb.mxu2 %v7341_v31  ;;  %1935 = vmatpush.bf16.msra.mxu3 %v7329_v21 }
 0x40d   :  { %1897 = vmatpush.bf16.msra.mxu0 %v7347_v35  ;;  %1910 = vmatpush.bf16.msrb.mxu1 %v7351_v40 }
 0x40e   :  { %1923 = vmatpush.bf16.msrb.mxu2 %v7377_v2  ;;  %1936 = vmatpush.bf16.msra.mxu3 %v7361_v48 }
 0x411   :  { %1898 = vmatpush.bf16.msra.mxu0 %v7363_v51  ;;  %1911 = vmatpush.bf16.msrb.mxu1 %v7388_v19 }
 0x412   :  { %1924 = vmatpush.bf16.msrb.mxu2 %v7421_v14  ;;  %1937 = vmatpush.bf16.msra.mxu3 %v7401_v44 }
 0x415   :  { %1899 = vmatpush.bf16.msra.mxu0 %v7369_v58  ;;  %1912 = vmatpush.bf16.msrb.mxu1 %v7431_v33 }
 0x416   :  { %1925 = vmatpush.bf16.msrb.mxu2 %v7456_v29  ;;  %1938 = vmatpush.bf16.msra.mxu3 %v7440_v17 }
 0x419   :  { %1900 = vmatpush.bf16.msra.mxu0 %v7381_v11  ;;  %1913 = vmatpush.bf16.msrb.mxu1 %v7466_v49 }
 0x41a   :  { %1926 = vmatpush.bf16.msrb.mxu2 %v7492_v43  ;;  %1939 = vmatpush.bf16.msra.mxu3 %v7476_v36 }
 0x41d   :  { %1901 = vmatpush.bf16.msra.mxu0 %v7392_v4  ;;  %1914 = vmatpush.bf16.msrb.mxu1 %v7501_v53 }
 0x41e   :  { %1927 = vmatpush.bf16.msrb.mxu2 %v7530_v3  ;;  %1940 = vmatpush.bf16.msra.mxu3 %v7503_v54 }
 0x421   :  { %1902 = vmatpush.bf16.msra.mxu0 %v7403_v50  ;;  %1915 = vmatpush.bf16.msrb.mxu1 %v7540_v20 }
 0x422   :  { %1928 = vmatpush.bf16.msrb.mxu2 %v7563_v34  ;;  %1941 = vmatpush.bf16.msra.mxu3 %v7512_v39 }
 0x425   :  { %1903 = vmatpush.bf16.msra.mxu0 %v7412_v1  ;;  %1916 = vmatpush.bf16.msrb.mxu1 %v7572_v0 }
 0x426   :  { %1929 = vmatpush.bf16.msrb.mxu2 %v7584_v52  ;;  %1942 = vmatpush.bf16.msra.mxu3 %v7521_v38 }
 0x484   :  { %v1657_v9 = vpop.f32.mrf.mxu0  ;;  %v1670_v47 = vpop.f32.mrf.mxu1 }
 0x485   :  { %v1700_v30 = vadd.f32 %v1657_v9, %v8370_v5  ;;  %v1701_v56 = vadd.f32 %v1670_v47, %v8371_v26 }
 0x487   :  { %v1704_v8 = vadd.f32 %v1700_v30, %v7736_v7  ;;  %v1705_v25 = vadd.f32 %v1701_v56, %v7763_v6 }
 0x489   :  { %v5271_v18 = vmul.f32 -1.442695, %v1704_v8  ;;  %v5272_v32 = vmul.f32 -1.442695, %v1705_v25 }
 0x48b   :  { %6826 = vpow2.f32 %v5271_v18  ;;  %v1683_v27 = vpop.f32.mrf.mxu2  ;;  %v1696_v24 = vpop.f32.mrf.mxu3 }
 0x48c   :  { %6828 = vpow2.f32 %v5272_v32  ;;  %v1703_v63 = vadd.f32 %v1696_v24, %v8372_v22  ;;  %v1659_v60 = vpop.f32.mrf.mxu0  ;;  %v1672_v61 = vpop.f32.mrf.mxu1  ;;  %v1702_v9 = vadd.f32 %v1683_v27, %v824_v10 }
 0x48e   :  { %v1707_v46 = vadd.f32 %v1703_v63, %v7756_v23  ;;  %v1706_v26 = vadd.f32 %v1702_v9, %v7769_v37 }
 0x490   :  { %v5273_v62 = vmul.f32 -1.442695, %v1707_v46 }
 0x491   :  { %v6827_v41 = vpop.eup %6826 }
 0x492   :  { %v6829_v45 = vpop.eup %6828  ;;  %v1711_v12 = vadd.f32 1.0, %v6827_v41  ;;  %6830 = vpow2.f32 %v5273_v62 }
 0x493   :  { %v1730_v59 = vadd.f32 1.0, %v6829_v45  ;;  %v1685_v15 = vpop.f32.mrf.mxu2  ;;  %v1698_v28 = vpop.f32.mrf.mxu3 }
 0x494   :  { %6832 = vrcp.f32 %v1711_v12  ;;  %v1723_v24 = vand.u32 2147483648, %v1711_v12  ;;  %v1721_v60 = vand.u32 2147483647, %v1711_v12  ;;  %vm1717_vm2 = vweird.f32 %v1711_v12 }
 0x495   :  { %6834 = vrcp.f32 %v1730_v59  ;;  %v1742_v22 = vand.u32 2147483648, %v1730_v59  ;;  %v1740_v27 = vand.u32 2147483647, %v1730_v59  ;;  %vm1736_vm3 = vweird.f32 %v1730_v59 }
 0x496   :  { %v1724_v41 = vor.u32 1.1754944e-38, %v1723_v24  ;;  %vm1722_vm6 = vcmp.eq.f32.partialorder %v1721_v60, 8.507059e+37 }
 0x497   :  { %v1743_v28 = vor.u32 1.1754944e-38, %v1742_v22  ;;  %vm1741_vm7 = vcmp.eq.f32.partialorder %v1740_v27, 8.507059e+37 }
 0x498   :  { %v6831_v47 = vpop.eup %6830 }
 0x499   :  { %v1750_v5 = vadd.f32 1.0, %v6831_v47 }
 0x49a   :  { %v6833_v30 = vpop.eup %6832 }
 0x49b   :  { %v6835_v56 = vpop.eup %6834  ;;  %v1713_v8 = vmul.f32 %v6833_v30, %v1711_v12  ;;  %6836 = vrcp.f32 %v1750_v5  ;;  %vm1718_vm0 = vweird.f32 %v6833_v30  ;;  %vm1756_vm9 = vweird.f32 %v1750_v5 }
 0x49c   :  { %v1732_v25 = vmul.f32 %v6835_v56, %v1730_v59  ;;  %6838 = vtanh.f32 %v1706_v26  ;;  %vm1737_vm1 = vweird.f32 %v6835_v56  ;;  %vm1719_vm4 = vmor %vm1717_vm2, %vm1718_vm0 }
 0x49d   :  { %v1714_v18 = vsub.f32 1.0, %v1713_v8  ;;  %vm1738_vm5 = vmor %vm1736_vm3, %vm1737_vm1 }
 0x49e   :  { %v1733_v32 = vsub.f32 1.0, %v1732_v25 }
 0x49f   :  { %v1715_v63 = vmul.f32 %v6833_v30, %v1714_v18 }
 0x4a0   :  { %v1734_v61 = vmul.f32 %v6835_v56, %v1733_v32  ;;  %v1762_v32 = vand.u32 2147483648, %v1750_v5 }
 0x4a1   :  { %v6837_v46 = vpop.eup %6836  ;;  %v1716_v62 = vadd.f32 %v6833_v30, %v1715_v63 }
 0x4a2   :  { %v1735_v45 = vadd.f32 %v6835_v56, %v1734_v61  ;;  %v1752_v15 = vmul.f32 %v6837_v46, %v1750_v5  ;;  %v6839_v57 = vpop.eup %6838  ;;  %vm1757_vm8 = vweird.f32 %v6837_v46  ;;  %v1763_v22 = vor.u32 1.1754944e-38, %v1762_v32 }
 0x4a3   :  { %v1720_v55 = vsel %vm1719_vm4, %v6833_v30, %v1716_v62  ;;  %v1760_v30 = vand.u32 2147483647, %v1750_v5  ;;  %vm1758_vm10 = vmor %vm1756_vm9, %vm1757_vm8 }
 0x4a4   :  { %v1725_v10 = vsel %vm1722_vm6, %v1724_v41, %v1720_v55  ;;  %v1739_v9 = vsel %vm1738_vm5, %v6835_v56, %v1735_v45  ;;  %v1753_v47 = vsub.f32 1.0, %v1752_v15 }
 0x4a5   :  { %v1744_v26 = vsel %vm1741_vm7, %v1743_v28, %v1739_v9  ;;  %v1767_v8 = vmul.f32 %v6839_v57, %v1725_v10  ;;  %vm1761_vm11 = vcmp.eq.f32.partialorder %v1760_v30, 8.507059e+37 }
 0x4a6   :  { %v1766_v25 = vmul.f32 %v1744_v26, %v7909_v42  ;;  %v1754_v18 = vmul.f32 %v6837_v46, %v1753_v47 }
 0x4a8   :  { %v7954_v12 = vadd.f32 %v1767_v8, %v1766_v25  ;;  %v1755_v59 = vadd.f32 %v6837_v46, %v1754_v18 }
 0x4aa   :  { %6840 = vtanh.f32 %v7954_v12  ;;  %v1759_v24 = vsel %vm1758_vm10, %v6837_v46, %v1755_v59 }
 0x4ab   :  { %v1764_v63 = vsel %vm1761_vm11, %v1763_v22, %v1759_v24 }
 0x4b0   :  { %v6841_v56 = vpop.eup %6840 }
 0x4b1   :  { %v1770_v60 = vmul.f32 %v6841_v56, %v1764_v63 }
 0x4b3   :  { %v1771_v61 = vpack.c.bf16 %v1770_v60, %v1770_v60 }
 0x4b5   :  { %1780 = vmatmul.bf16.vlgmr.msrb.gmra.mxu0 %v1771_v61  ;;  %1793 = vmatmul.bf16.vlgmr.msra.gmra.mxu1 %v1771_v61 }
 0x4b6   :  { %1806 = vmatmul.bf16.vlgmr.msra.gmra.mxu2 %v1771_v61  ;;  %1819 = vmatmul.bf16.vlgmr.msrb.gmra.mxu3 %v1771_v61 }
 0x4b7   :  { %2020 = vmatpush.bf16.msrb.mxu0 %v7319_v13  ;;  %2033 = vmatpush.bf16.msra.mxu1 %v7321_v16  ;;  %v8375_v13 = vld [vmem:[#allocation16_spill] sm:$0xff] }
 0x4b8   :  { %2046 = vmatpush.bf16.msra.mxu2 %v7341_v31  ;;  %2059 = vmatpush.bf16.msrb.mxu3 %v7329_v21  ;;  %v8376_v16 = vld [vmem:[#allocation24_spill] sm:$0xff] }
 0x4b9   :  { %v630_v21 = vadd.f32 %v8376_v16, %v8375_v13 }
 0x4bb   :  { %2021 = vmatpush.bf16.msrb.mxu0 %v7347_v35  ;;  %2034 = vmatpush.bf16.msra.mxu1 %v7351_v40 }
 0x4bc   :  { %2047 = vmatpush.bf16.msra.mxu2 %v7377_v2  ;;  %2060 = vmatpush.bf16.msrb.mxu3 %v7361_v48 }
 0x4bf   :  { %2022 = vmatpush.bf16.msrb.mxu0 %v7363_v51  ;;  %2035 = vmatpush.bf16.msra.mxu1 %v7388_v19  ;;  %v8378_v19 = vld [vmem:[#allocation73_spill] sm:$0xff] }
 0x4c0   :  { %2048 = vmatpush.bf16.msra.mxu2 %v7421_v14  ;;  %2061 = vmatpush.bf16.msrb.mxu3 %v7401_v44 }
 0x4c3   :  { %2023 = vmatpush.bf16.msrb.mxu0 %v7369_v58  ;;  %2036 = vmatpush.bf16.msra.mxu1 %v7431_v33 }
 0x4c4   :  { %2049 = vmatpush.bf16.msra.mxu2 %v7456_v29  ;;  %2062 = vmatpush.bf16.msrb.mxu3 %v7440_v17 }
 0x4c7   :  { %2024 = vmatpush.bf16.msrb.mxu0 %v7381_v11  ;;  %2037 = vmatpush.bf16.msra.mxu1 %v7466_v49 }
 0x4c8   :  { %2050 = vmatpush.bf16.msra.mxu2 %v7492_v43  ;;  %2063 = vmatpush.bf16.msrb.mxu3 %v7476_v36  ;;  %v8377_v43 = vld [vmem:[#allocation25_spill] sm:$0xff] }
 0x4cb   :  { %2025 = vmatpush.bf16.msrb.mxu0 %v7392_v4  ;;  %2038 = vmatpush.bf16.msra.mxu1 %v7501_v53  ;;  %v8379_v4 = vld [vmem:[#allocation60_spill] sm:$0xff] }
 0x4cc   :  { %2051 = vmatpush.bf16.msra.mxu2 %v7530_v3  ;;  %2064 = vmatpush.bf16.msrb.mxu3 %v7503_v54  ;;  %v924_v44 = vadd.f32 %v8379_v4, %v8378_v19  ;;  %v8380_v3 = vld [vmem:[#allocation42_spill] sm:$0xff] }
 0x4cf   :  { %2026 = vmatpush.bf16.msrb.mxu0 %v7403_v50  ;;  %2039 = vmatpush.bf16.msra.mxu1 %v7540_v20  ;;  %v8381_v20 = vld [vmem:[#allocation72_spill] sm:$0xff] }
 0x4d0   :  { %2052 = vmatpush.bf16.msra.mxu2 %v7563_v34  ;;  %2065 = vmatpush.bf16.msrb.mxu3 %v7512_v39 }
 0x4d3   :  { %2027 = vmatpush.bf16.msrb.mxu0 %v7412_v1  ;;  %2040 = vmatpush.bf16.msra.mxu1 %v7572_v0 }
 0x4d4   :  { %2053 = vmatpush.bf16.msra.mxu2 %v7584_v52  ;;  %2066 = vmatpush.bf16.msrb.mxu3 %v7521_v38  ;;  %v826_v52 = vadd.f32 %v8381_v20, %v8380_v3 }
 0x532   :  { %v1781_v31 = vpop.f32.mrf.mxu0  ;;  %v1794_v35 = vpop.f32.mrf.mxu1 }
 0x533   :  { %v1824_v40 = vadd.f32 %v1781_v31, %v630_v21  ;;  %v1825_v48 = vadd.f32 %v1794_v35, %v8377_v43 }
 0x535   :  { %v1828_v51 = vadd.f32 %v1824_v40, %v7736_v7  ;;  %v1829_v58 = vadd.f32 %v1825_v48, %v7763_v6 }
 0x537   :  { %v5274_v2 = vmul.f32 -1.442695, %v1828_v51  ;;  %v5275_v11 = vmul.f32 -1.442695, %v1829_v58 }
 0x539   :  { %6842 = vpow2.f32 %v5274_v2  ;;  %v1807_v50 = vpop.f32.mrf.mxu2  ;;  %v1820_v1 = vpop.f32.mrf.mxu3 }
 0x53a   :  { %6844 = vpow2.f32 %v5275_v11  ;;  %v1827_v14 = vadd.f32 %v1820_v1, %v924_v44  ;;  %v1783_v33 = vpop.f32.mrf.mxu0  ;;  %v1796_v38 = vpop.f32.mrf.mxu1  ;;  %v1826_v0 = vadd.f32 %v1807_v50, %v826_v52  ;;  %v8382_v44 = vld [vmem:[#allocation26_spill] sm:$0xff]  ;;  %v8383_v1 = vld [vmem:[#allocation27_spill] sm:$0xff] }
 0x53c   :  { %v1831_v17 = vadd.f32 %v1827_v14, %v7756_v23  ;;  %v1830_v46 = vadd.f32 %v1826_v0, %v7769_v37 }
 0x53e   :  { %v5276_v29 = vmul.f32 -1.442695, %v1831_v17 }
 0x53f   :  { %v6843_v49 = vpop.eup %6842 }
 0x540   :  { %v6845_v39 = vpop.eup %6844  ;;  %v1835_v36 = vadd.f32 1.0, %v6843_v49  ;;  %6846 = vpow2.f32 %v5276_v29 }
 0x541   :  { %v1854_v53 = vadd.f32 1.0, %v6845_v39  ;;  %v1809_v54 = vpop.f32.mrf.mxu2  ;;  %v1822_v34 = vpop.f32.mrf.mxu3 }
 0x542   :  { %6848 = vrcp.f32 %v1835_v36  ;;  %v1847_v55 = vand.u32 2147483648, %v1835_v36  ;;  %v1845_v9 = vand.u32 2147483647, %v1835_v36  ;;  %vm1841_vm14 = vweird.f32 %v1835_v36 }
 0x543   :  { %6850 = vrcp.f32 %v1854_v53  ;;  %v1866_v57 = vand.u32 2147483648, %v1854_v53  ;;  %v1864_v26 = vand.u32 2147483647, %v1854_v53  ;;  %vm1860_vm15 = vweird.f32 %v1854_v53 }
 0x544   :  { %v1848_v18 = vor.u32 1.1754944e-38, %v1847_v55  ;;  %vm1846_vm2 = vcmp.eq.f32.partialorder %v1845_v9, 8.507059e+37 }
 0x545   :  { %v1867_v30 = vor.u32 1.1754944e-38, %v1866_v57  ;;  %vm1865_vm3 = vcmp.eq.f32.partialorder %v1864_v26, 8.507059e+37 }
 0x546   :  { %v6847_v42 = vpop.eup %6846 }
 0x547   :  { %v1874_v5 = vadd.f32 1.0, %v6847_v42 }
 0x548   :  { %v6849_v27 = vpop.eup %6848 }
 0x549   :  { %v6851_v62 = vpop.eup %6850  ;;  %v1837_v41 = vmul.f32 %v6849_v27, %v1835_v36  ;;  %6852 = vrcp.f32 %v1874_v5  ;;  %vm1842_vm12 = vweird.f32 %v6849_v27  ;;  %v1886_v40 = vand.u32 2147483648, %v1874_v5  ;;  %v8384_v36 = vld [vmem:[#allocation76_spill] sm:$0xff] }
 0x54a   :  { %v1856_v45 = vmul.f32 %v6851_v62, %v1854_v53  ;;  %6854 = vtanh.f32 %v1830_v46  ;;  %vm1861_vm13 = vweird.f32 %v6851_v62  ;;  %vm1843_vm0 = vmor %vm1841_vm14, %vm1842_vm12  ;;  %vm1880_vm5 = vweird.f32 %v1874_v5 }
 0x54b   :  { %v1838_v15 = vsub.f32 1.0, %v1837_v41  ;;  %vm1862_vm1 = vmor %vm1860_vm15, %vm1861_vm13  ;;  %v1884_v43 = vand.u32 2147483647, %v1874_v5  ;;  %v1887_v51 = vor.u32 1.1754944e-38, %v1886_v40  ;;  %v8386_v41 = vld [vmem:[#allocation75_spill] sm:$0xff] }
 0x54c   :  { %v1857_v28 = vsub.f32 1.0, %v1856_v45 }
 0x54d   :  { %v1839_v10 = vmul.f32 %v6849_v27, %v1838_v15  ;;  %vm1885_vm7 = vcmp.eq.f32.partialorder %v1884_v43, 8.507059e+37 }
 0x54e   :  { %v1858_v47 = vmul.f32 %v6851_v62, %v1857_v28 }
 0x54f   :  { %v6853_v8 = vpop.eup %6852  ;;  %v1840_v25 = vadd.f32 %v6849_v27, %v1839_v10 }
 0x550   :  { %v1859_v59 = vadd.f32 %v6851_v62, %v1858_v47  ;;  %v1876_v32 = vmul.f32 %v6853_v8, %v1874_v5  ;;  %v6855_v22 = vpop.eup %6854  ;;  %vm1881_vm4 = vweird.f32 %v6853_v8 }
 0x551   :  { %v1844_v24 = vsel %vm1843_vm0, %v6849_v27, %v1840_v25  ;;  %vm1882_vm6 = vmor %vm1880_vm5, %vm1881_vm4 }
 0x552   :  { %v1849_v56 = vsel %vm1846_vm2, %v1848_v18, %v1844_v24  ;;  %v1863_v63 = vsel %vm1862_vm1, %v6851_v62, %v1859_v59  ;;  %v1877_v60 = vsub.f32 1.0, %v1876_v32  ;;  %v8385_v62 = vld [vmem:[#allocation46_spill] sm:$0xff] }
 0x553   :  { %v1868_v61 = vsel %vm1865_vm3, %v1867_v30, %v1863_v63  ;;  %v1891_v13 = vmul.f32 %v6855_v22, %v1849_v56  ;;  %v829_v45 = vadd.f32 %v8386_v41, %v8385_v62  ;;  %v5383_v62 = vld [vmem:[#allocation7 + $0xd0] sm:$0xf0]  ;;  %v5389_v41 = vld [vmem:[#allocation7 + $0xc8] sm:$0xf] }
 0x554   :  { %v1890_v16 = vmul.f32 %v1868_v61, %v7954_v12  ;;  %v1878_v21 = vmul.f32 %v6853_v8, %v1877_v60 }
 0x556   :  { %v8001_v31 = vadd.f32 %v1891_v13, %v1890_v16  ;;  %v1879_v35 = vadd.f32 %v6853_v8, %v1878_v21 }
 0x558   :  { %6856 = vtanh.f32 %v8001_v31  ;;  %v1883_v48 = vsel %vm1882_vm6, %v6853_v8, %v1879_v35 }
 0x559   :  { %v1888_v2 = vsel %vm1885_vm7, %v1887_v51, %v1883_v48 }
 0x55e   :  { %v6857_v58 = vpop.eup %6856 }
 0x55f   :  { %v1894_v11 = vmul.f32 %v6857_v58, %v1888_v2 }
 0x561   :  { %v1895_v19 = vpack.c.bf16 %v1894_v11, %v1894_v11 }
 0x563   :  { %1904 = vmatmul.bf16.vlgmr.msra.gmra.mxu0 %v1895_v19  ;;  %1917 = vmatmul.bf16.vlgmr.msrb.gmra.mxu1 %v1895_v19 }
 0x564   :  { %1930 = vmatmul.bf16.vlgmr.msrb.gmra.mxu2 %v1895_v19  ;;  %1943 = vmatmul.bf16.vlgmr.msra.gmra.mxu3 %v1895_v19 }
 0x5e0   :  { %v1905_v12 = vpop.f32.mrf.mxu0  ;;  %v1918_v4 = vpop.f32.mrf.mxu1 }
 0x5e1   :  { %v1948_v50 = vadd.f32 %v1905_v12, %v8382_v44  ;;  %v1949_v14 = vadd.f32 %v1918_v4, %v8383_v1 }
 0x5e3   :  { %v1952_v33 = vadd.f32 %v1948_v50, %v7736_v7  ;;  %v1953_v38 = vadd.f32 %v1949_v14, %v7763_v6 }
 0x5e5   :  { %v5277_v17 = vmul.f32 -1.442695, %v1952_v33  ;;  %v5278_v29 = vmul.f32 -1.442695, %v1953_v38 }
 0x5e7   :  { %6858 = vpow2.f32 %v5277_v17  ;;  %v1931_v49 = vpop.f32.mrf.mxu2  ;;  %v1944_v39 = vpop.f32.mrf.mxu3 }
 0x5e8   :  { %6860 = vpow2.f32 %v5278_v29  ;;  %v1951_v53 = vadd.f32 %v1944_v39, %v8384_v36  ;;  %v1907_v54 = vpop.f32.mrf.mxu0  ;;  %v1920_v34 = vpop.f32.mrf.mxu1  ;;  %v1950_v15 = vadd.f32 %v1931_v49, %v829_v45  ;;  %v6505_v29 = vld [vmem:[#allocation7 + $0xec] sm:$0xf0]  ;;  %v6503_v49 = vld [vmem:[#allocation7 + $0xe4] sm:$0xf]  ;;  %v5399_v36 = vld [vmem:[#allocation7 + $0xf0] sm:$0xf0] }
 0x5e9   :  { %v6506_v54 = vld [vmem:[#allocation7 + $0xf4] sm:$0xf0]  ;;  %v5402_v34 = vor.u32 %v6503_v49, %v5399_v36  ;;  %v5341_v49 = vld [vmem:[#allocation7 + $0x68] sm:$0xf] }
 0x5ea   :  { %v1955_v3 = vadd.f32 %v1951_v53, %v7756_v23  ;;  %v1954_v10 = vadd.f32 %v1950_v15, %v7769_v37  ;;  %v5405_v53 = vld [vmem:[#allocation7 + $0xe8] sm:$0xf]  ;;  %v6502_v45 = vld [vmem:[#allocation7 + $0xd4] sm:$0xf0] }
 0x5eb   :  { %2349 = vmatpush.bf16.msrb.mxu1 %v5402_v34  ;;  %v5343_v34 = vld [vmem:[#allocation7 + $0x78] sm:$0xf0] }
 0x5ec   :  { %v5279_v20 = vmul.f32 -1.442695, %v1955_v3  ;;  %v5406_v3 = vor.u32 %v6506_v54, %v5405_v53  ;;  %v6488_v54 = vld [vmem:[#allocation7 + $0x6c] sm:$0xf] }
 0x5ed   :  { %v6859_v52 = vpop.eup %6858 }
 0x5ee   :  { %v6861_v0 = vpop.eup %6860  ;;  %v1959_v42 = vadd.f32 1.0, %v6859_v52  ;;  %6862 = vpow2.f32 %v5279_v20  ;;  %v6504_v20 = vld [vmem:[#allocation7 + $0xec] sm:$0xf]  ;;  %v5407_v52 = vld [vmem:[#allocation7 + $0xf8] sm:$0xf0]  ;;  %2362 = vmatpush.bf16.msrb.mxu2 %v5406_v3 }
 0x5ef   :  { %v1978_v5 = vadd.f32 1.0, %v6861_v0  ;;  %v1933_v27 = vpop.f32.mrf.mxu2  ;;  %v1946_v46 = vpop.f32.mrf.mxu3  ;;  %v5410_v0 = vor.u32 %v6504_v20, %v5407_v52  ;;  %v5346_v52 = vor.u32 %v6488_v54, %v5343_v34 }
 0x5f0   :  { %6864 = vrcp.f32 %v1959_v42  ;;  %v1971_v18 = vand.u32 2147483648, %v1959_v42  ;;  %v1969_v30 = vand.u32 2147483647, %v1959_v42  ;;  %vm1965_vm10 = vweird.f32 %v1959_v42  ;;  %v6499_v27 = vld [vmem:[#allocation7 + $0xc4] sm:$0xf] }
 0x5f1   :  { %6866 = vrcp.f32 %v1978_v5  ;;  %v1990_v59 = vand.u32 2147483648, %v1978_v5  ;;  %v1988_v22 = vand.u32 2147483647, %v1978_v5  ;;  %vm1984_vm11 = vweird.f32 %v1978_v5  ;;  %2375 = vmatpush.bf16.msra.mxu3 %v5410_v0  ;;  %v5317_v0 = vld [vmem:[#allocation7 + $0x40] sm:$0xf] }
 0x5f2   :  { %v1972_v60 = vor.u32 1.1754944e-38, %v1971_v18  ;;  %vm1970_vm14 = vcmp.eq.f32.partialorder %v1969_v30, 8.507059e+37  ;;  %v5386_v15 = vor.u32 %v6499_v27, %v5383_v62  ;;  %v5373_v18 = vld [vmem:[#allocation7 + $0xa8] sm:$0xf] }
 0x5f3   :  { %v1991_v16 = vor.u32 1.1754944e-38, %v1990_v59  ;;  %vm1989_vm15 = vcmp.eq.f32.partialorder %v1988_v22, 8.507059e+37  ;;  %v6498_v59 = vld [vmem:[#allocation7 + $0xb4] sm:$0xf0]  ;;  %v5375_v22 = vld [vmem:[#allocation7 + $0xb8] sm:$0xf0] }
 0x5f4   :  { %v6863_v28 = vpop.eup %6862  ;;  %2350 = vmatpush.bf16.msrb.mxu1 %v5386_v15  ;;  %v5374_v30 = vor.u32 %v6498_v59, %v5373_v18  ;;  %v8391_v15 = vld [vmem:[#allocation67_spill] sm:$0xff] }
 0x5f5   :  { %v1998_v55 = vadd.f32 1.0, %v6863_v28  ;;  %v5390_v28 = vor.u32 %v6502_v45, %v5389_v41  ;;  %v5319_v41 = vld [vmem:[#allocation7 + $0x50] sm:$0xf0]  ;;  %v8390_v45 = vld [vmem:[#allocation78_spill] sm:$0xff] }
 0x5f6   :  { %v6865_v57 = vpop.eup %6864 }
 0x5f7   :  { %v6867_v9 = vpop.eup %6866  ;;  %v1961_v47 = vmul.f32 %v6865_v57, %v1959_v42  ;;  %6868 = vrcp.f32 %v1998_v55  ;;  %vm1966_vm8 = vweird.f32 %v6865_v57  ;;  %v2010_v4 = vand.u32 2147483648, %v1998_v55  ;;  %v5381_v42 = vld [vmem:[#allocation7 + $0xc0] sm:$0xf]  ;;  %2363 = vmatpush.bf16.msrb.mxu2 %v5390_v28 }
 0x5f8   :  { %v1980_v26 = vmul.f32 %v6867_v9, %v1978_v5  ;;  %6870 = vtanh.f32 %v1954_v10  ;;  %vm1985_vm9 = vweird.f32 %v6867_v9  ;;  %vm1967_vm12 = vmor %vm1965_vm10, %vm1966_vm8  ;;  %vm2004_vm1 = vweird.f32 %v1998_v55  ;;  %v6501_v5 = vld [vmem:[#allocation7 + $0xcc] sm:$0xf0] }
 0x5f9   :  { %v1962_v8 = vsub.f32 1.0, %v1961_v47  ;;  %vm1986_vm13 = vmor %vm1984_vm11, %vm1985_vm9  ;;  %v2008_v44 = vand.u32 2147483647, %v1998_v55  ;;  %v2011_v1 = vor.u32 1.1754944e-38, %v2010_v4  ;;  %v5382_v46 = vor.u32 %v6501_v5, %v5381_v42  ;;  %v6497_v47 = vld [vmem:[#allocation7 + $0xac] sm:$0xf0] }
 0x5fa   :  { %v1981_v25 = vsub.f32 1.0, %v1980_v26  ;;  %v6495_v26 = vld [vmem:[#allocation7 + $0xa4] sm:$0xf]  ;;  %v6485_v42 = vld [vmem:[#allocation7 + $0x4c] sm:$0xf0]  ;;  %v929_v28 = vadd.f32 %v8391_v15, %v8390_v45 }
 0x5fb   :  { %v1963_v32 = vmul.f32 %v6865_v57, %v1962_v8  ;;  %vm2009_vm3 = vcmp.eq.f32.partialorder %v2008_v44, 8.507059e+37  ;;  %2364 = vmatpush.bf16.msrb.mxu2 %v5374_v30  ;;  %v6483_v5 = vld [vmem:[#allocation7 + $0x44] sm:$0xf]  ;;  %v5318_v62 = vor.u32 %v6485_v42, %v5317_v0 }
 0x5fc   :  { %v1982_v24 = vmul.f32 %v6867_v9, %v1981_v25  ;;  %v5367_v25 = vld [vmem:[#allocation7 + $0xb0] sm:$0xf0] }
 0x5fd   :  { %v6869_v56 = vpop.eup %6868  ;;  %v1964_v63 = vadd.f32 %v6865_v57, %v1963_v32  ;;  %v5370_v32 = vor.u32 %v6495_v26, %v5367_v25  ;;  %v5327_v26 = vld [vmem:[#allocation7 + $0x58] sm:$0xf0]  ;;  %v6481_v25 = vld [vmem:[#allocation7 + $0x2c] sm:$0xf0] }
 0x5fe   :  { %v1983_v61 = vadd.f32 %v6867_v9, %v1982_v24  ;;  %v2000_v13 = vmul.f32 %v6869_v56, %v1998_v55  ;;  %v6871_v35 = vpop.eup %6870  ;;  %vm2005_vm0 = vweird.f32 %v6869_v56  ;;  %v6500_v55 = vld [vmem:[#allocation7 + $0xcc] sm:$0xf] }
 0x5ff   :  { %v1968_v21 = vsel %vm1967_vm12, %v6865_v57, %v1964_v63  ;;  %vm2006_vm2 = vmor %vm2004_vm1, %vm2005_vm0  ;;  %v5391_v57 = vld [vmem:[#allocation7 + $0xd8] sm:$0xf0]  ;;  %v6496_v24 = vld [vmem:[#allocation7 + $0xac] sm:$0xf]  ;;  %2351 = vmatpush.bf16.msrb.mxu1 %v5370_v32 }
 0x600   :  { %v1973_v40 = vsel %vm1970_vm14, %v1972_v60, %v1968_v21  ;;  %v1987_v43 = vsel %vm1986_vm13, %v6867_v9, %v1983_v61  ;;  %v2001_v48 = vsub.f32 1.0, %v2000_v13  ;;  %v5394_v10 = vor.u32 %v6500_v55, %v5391_v57  ;;  %v5365_v9 = vld [vmem:[#allocation7 + $0xa0] sm:$0xf]  ;;  %v6493_v60 = vld [vmem:[#allocation7 + $0x8c] sm:$0xf0] }
 0x601   :  { %v1992_v51 = vsel %vm1989_vm15, %v1991_v16, %v1987_v43  ;;  %v2015_v58 = vmul.f32 %v6871_v35, %v1973_v40  ;;  %v5366_v8 = vor.u32 %v6497_v47, %v5365_v9  ;;  %v5349_v63 = vld [vmem:[#allocation7 + $0x80] sm:$0xf]  ;;  %v6491_v61 = vld [vmem:[#allocation7 + $0x84] sm:$0xf]  ;;  %v5351_v16 = vld [vmem:[#allocation7 + $0x90] sm:$0xf0]  ;;  %v5322_v55 = vor.u32 %v6483_v5, %v5319_v41 }
 0x602   :  { %v2014_v2 = vmul.f32 %v1992_v51, %v8001_v31  ;;  %v2002_v11 = vmul.f32 %v6869_v56, %v2001_v48  ;;  %v5397_v31 = vld [vmem:[#allocation7 + $0xe0] sm:$0xf]  ;;  %2376 = vmatpush.bf16.msra.mxu3 %v5394_v10  ;;  %v5350_v13 = vor.u32 %v6493_v60, %v5349_v63  ;;  %v5357_v21 = vld [vmem:[#allocation7 + $0x88] sm:$0xf]  ;;  %v6494_v35 = vld [vmem:[#allocation7 + $0x94] sm:$0xf0]  ;;  %v5354_v40 = vor.u32 %v6491_v61, %v5351_v16 }
 0x603   :  { %v5398_v39 = vor.u32 %v6505_v29, %v5397_v31  ;;  %v5358_v43 = vor.u32 %v6494_v35, %v5357_v21  ;;  %v6492_v48 = vld [vmem:[#allocation7 + $0x8c] sm:$0xf]  ;;  %v5359_v51 = vld [vmem:[#allocation7 + $0x98] sm:$0xf0]  ;;  %v5335_v29 = vld [vmem:[#allocation7 + $0x70] sm:$0xf0] }
 0x604   :  { %v8014_v19 = vadd.f32 %v2015_v58, %v2014_v2  ;;  %v2003_v12 = vadd.f32 %v6869_v56, %v2002_v11  ;;  %v8387_v58 = vld [vmem:[#allocation18_spill] sm:$0xff]  ;;  %v8388_v2 = vld [vmem:[#allocation28_spill] sm:$0xff]  ;;  %2352 = vmatpush.bf16.msrb.mxu1 %v5354_v40  ;;  %v5325_v57 = vld [vmem:[#allocation7 + $0x48] sm:$0xf] }
 0x605   :  { %2336 = vmatpush.bf16.msra.mxu0 %v5398_v39  ;;  %v635_v11 = vadd.f32 %v8388_v2, %v8387_v58  ;;  %2365 = vmatpush.bf16.msrb.mxu2 %v5358_v43  ;;  %v6490_v39 = vld [vmem:[#allocation7 + $0x74] sm:$0xf0]  ;;  %v6484_v10 = vld [vmem:[#allocation7 + $0x4c] sm:$0xf]  ;;  %v5311_v16 = vld [vmem:[#allocation7 + $0x38] sm:$0xf0] }
 0x606   :  { %6872 = vtanh.f32 %v8014_v19  ;;  %v2007_v50 = vsel %vm2006_vm2, %v6869_v56, %v2003_v12  ;;  %v5378_v56 = vor.u32 %v6496_v24, %v5375_v22  ;;  %v5362_v12 = vor.u32 %v6492_v48, %v5359_v51  ;;  %v6479_v24 = vld [vmem:[#allocation7 + $0x24] sm:$0xf]  ;;  %v5303_v22 = vld [vmem:[#allocation7 + $0x30] sm:$0xf0]  ;;  %v6482_v61 = vld [vmem:[#allocation7 + $0x34] sm:$0xf0] }
 0x607   :  { %v2012_v33 = vsel %vm2009_vm3, %v2011_v1, %v2007_v50  ;;  %v5333_v50 = vld [vmem:[#allocation7 + $0x60] sm:$0xf]  ;;  %v6489_v1 = vld [vmem:[#allocation7 + $0x6c] sm:$0xf0]  ;;  %v5342_v53 = vor.u32 %v6490_v39, %v5341_v49  ;;  %v5330_v30 = vor.u32 %v6484_v10, %v5327_v26  ;;  %v5306_v60 = vor.u32 %v6479_v24, %v5303_v22  ;;  %v6475_v51 = vld [vmem:[#allocation7 + $0x4] sm:$0xf] }
 0x608   :  { %2377 = vmatpush.bf16.msra.mxu3 %v5378_v56  ;;  %v5334_v31 = vor.u32 %v6489_v1, %v5333_v50  ;;  %v5309_v56 = vld [vmem:[#allocation7 + $0x28] sm:$0xf]  ;;  %v5285_v43 = vld [vmem:[#allocation7] sm:$0xf]  ;;  %v6477_v48 = vld [vmem:[#allocation7 + $0xc] sm:$0xf0] }
 0x609   :  { %2337 = vmatpush.bf16.msra.mxu0 %v5382_v46  ;;  %2366 = vmatpush.bf16.msrb.mxu2 %v5342_v53  ;;  %v5310_v35 = vor.u32 %v6482_v61, %v5309_v56  ;;  %v5286_v58 = vor.u32 %v6477_v48, %v5285_v43  ;;  %v5287_v2 = vld [vmem:[#allocation7 + $0x10] sm:$0xf0]  ;;  %v6476_v50 = vld [vmem:[#allocation7 + $0xc] sm:$0xf]  ;;  %v5295_v1 = vld [vmem:[#allocation7 + $0x18] sm:$0xf0] }
 0x60a   :  { %v8392_v39 = vld [vmem:[#allocation49_spill] sm:$0xff]  ;;  %v6537_v43 = vld [vmem:[#allocation7 + $0xec] sm:$0xf0]  ;;  %v6535_v48 = vld [vmem:[#allocation7 + $0xe4] sm:$0xf] }
 0x60c   :  { %v6873_v14 = vpop.eup %6872  ;;  %2378 = vmatpush.bf16.msra.mxu3 %v5362_v12  ;;  %v6478_v12 = vld [vmem:[#allocation7 + $0x14] sm:$0xf0] }
 0x60d   :  { %v2018_v38 = vmul.f32 %v6873_v14, %v2012_v33  ;;  %2338 = vmatpush.bf16.msra.mxu0 %v5366_v8  ;;  %v6487_v14 = vld [vmem:[#allocation7 + $0x64] sm:$0xf]  ;;  %v5301_v8 = vld [vmem:[#allocation7 + $0x20] sm:$0xf] }
 0x60e   :  { %v5338_v36 = vor.u32 %v6487_v14, %v5335_v29  ;;  %v5302_v63 = vor.u32 %v6481_v25, %v5301_v8 }
 0x60f   :  { %v2019_v17 = vpack.c.bf16 %v2018_v38, %v2018_v38  ;;  %v8389_v38 = vld [vmem:[#allocation29_spill] sm:$0xff] }
 0x610   :  { %2353 = vmatpush.bf16.msrb.mxu1 %v5338_v36  ;;  %2379 = vmatpush.bf16.msra.mxu3 %v5346_v52  ;;  %v8393_v36 = vld [vmem:[#allocation77_spill] sm:$0xff] }
 0x611   :  { %2028 = vmatmul.bf16.vlgmr.msrb.gmra.mxu0 %v2019_v17  ;;  %2041 = vmatmul.bf16.vlgmr.msra.gmra.mxu1 %v2019_v17  ;;  %v831_v53 = vadd.f32 %v8393_v36, %v8392_v39  ;;  %v6532_v36 = vld [vmem:[#allocation7 + $0xcc] sm:$0xf] }
 0x612   :  { %2054 = vmatmul.bf16.vlgmr.msra.gmra.mxu2 %v2019_v17  ;;  %2067 = vmatmul.bf16.vlgmr.msrb.gmra.mxu3 %v2019_v17 }
 0x613   :  { %2339 = vmatpush.bf16.msra.mxu0 %v5350_v13  ;;  %v6480_v13 = vld [vmem:[#allocation7 + $0x2c] sm:$0xf] }
 0x614   :  { %2354 = vmatpush.bf16.msrb.mxu1 %v5322_v55  ;;  %2380 = vmatpush.bf16.msra.mxu3 %v5330_v30  ;;  %v5314_v40 = vor.u32 %v6480_v13, %v5311_v16 }
 0x617   :  { %2340 = vmatpush.bf16.msra.mxu0 %v5334_v31 }
 0x618   :  { %2355 = vmatpush.bf16.msrb.mxu1 %v5306_v60  ;;  %2381 = vmatpush.bf16.msra.mxu3 %v5314_v40 }
 0x61b   :  { %2341 = vmatpush.bf16.msra.mxu0 %v5318_v62 }
 0x61f   :  { %2342 = vmatpush.bf16.msra.mxu0 %v5302_v63 }
 0x623   :  { %2343 = vmatpush.bf16.msra.mxu0 %v5286_v58  ;;  %v5530_v58 = vld [vmem:[#allocation7 + $0xf0] sm:$0xf0] }
 0x68e   :  { %v2029_v4 = vpop.f32.mrf.mxu0  ;;  %v2042_v44 = vpop.f32.mrf.mxu1 }
 0x68f   :  { %v2072_v33 = vadd.f32 %v2029_v4, %v635_v11  ;;  %v2073_v17 = vadd.f32 %v2042_v44, %v8389_v38  ;;  %v5293_v11 = vld [vmem:[#allocation7 + $0x8] sm:$0xf]  ;;  %v5290_v44 = vor.u32 %v6475_v51, %v5287_v2 }
 0x690   :  { %v5536_v2 = vld [vmem:[#allocation7 + $0xe8] sm:$0xf] }
 0x691   :  { %v2076_v3 = vadd.f32 %v2072_v33, %v7736_v7  ;;  %v2077_v20 = vadd.f32 %v2073_v17, %v7763_v6  ;;  %v6486_v7 = vld [vmem:[#allocation7 + $0x54] sm:$0xf0]  ;;  %v5294_v33 = vor.u32 %v6478_v12, %v5293_v11  ;;  %v5298_v17 = vor.u32 %v6476_v50, %v5295_v1  ;;  %2356 = vmatpush.bf16.msrb.mxu1 %v5290_v44  ;;  %v6536_v44 = vld [vmem:[#allocation7 + $0xec] sm:$0xf]  ;;  %v5538_v50 = vld [vmem:[#allocation7 + $0xf8] sm:$0xf0] }
 0x692   :  { %v5326_v47 = vor.u32 %v6486_v7, %v5325_v57  ;;  %v6538_v11 = vld [vmem:[#allocation7 + $0xf4] sm:$0xf0]  ;;  %v5533_v12 = vor.u32 %v6535_v48, %v5530_v58  ;;  %v5541_v1 = vor.u32 %v6536_v44, %v5538_v50  ;;  %v5474_v58 = vld [vmem:[#allocation7 + $0x78] sm:$0xf0]  ;;  %v5448_v44 = vld [vmem:[#allocation7 + $0x40] sm:$0xf] }
 0x693   :  { %v5280_v27 = vmul.f32 -1.442695, %v2076_v3  ;;  %v5281_v46 = vmul.f32 -1.442695, %v2077_v20  ;;  %2382 = vmatpush.bf16.msra.mxu3 %v5298_v17  ;;  %v5514_v17 = vld [vmem:[#allocation7 + $0xd0] sm:$0xf0] }
 0x694   :  { %2367 = vmatpush.bf16.msrb.mxu2 %v5326_v47  ;;  %v6517_v50 = vld [vmem:[#allocation7 + $0x4c] sm:$0xf0] }
 0x695   :  { %6874 = vpow2.f32 %v5280_v27  ;;  %v2055_v6 = vpop.f32.mrf.mxu2  ;;  %v2068_v9 = vpop.f32.mrf.mxu3  ;;  %2675 = vmatpush.bf16.msra.mxu1 %v5533_v12 }
 0x696   :  { %6876 = vpow2.f32 %v5281_v46  ;;  %v2075_v18 = vadd.f32 %v2068_v9, %v929_v28  ;;  %v2031_v59 = vpop.f32.mrf.mxu0  ;;  %v2044_v32 = vpop.f32.mrf.mxu1  ;;  %v2074_v54 = vadd.f32 %v2055_v6, %v831_v53  ;;  %v5522_v53 = vld [vmem:[#allocation7 + $0xd8] sm:$0xf0] }
 0x697   :  { %2701 = vmatpush.bf16.msrb.mxu3 %v5541_v1  ;;  %v6515_v1 = vld [vmem:[#allocation7 + $0x44] sm:$0xf] }
 0x698   :  { %v2079_v21 = vadd.f32 %v2075_v18, %v7756_v23  ;;  %2368 = vmatpush.bf16.msrb.mxu2 %v5310_v35  ;;  %v2078_v52 = vadd.f32 %v2074_v54, %v7769_v37  ;;  %v5525_v54 = vor.u32 %v6532_v36, %v5522_v53 }
 0x69a   :  { %v5282_v4 = vmul.f32 -1.442695, %v2079_v21 }
 0x69b   :  { %v6875_v14 = vpop.eup %6874  ;;  %2702 = vmatpush.bf16.msrb.mxu3 %v5525_v54  ;;  %v5458_v54 = vld [vmem:[#allocation7 + $0x58] sm:$0xf0] }
 0x69c   :  { %v6877_v23 = vpop.eup %6876  ;;  %v2083_v38 = vadd.f32 1.0, %v6875_v14  ;;  %6878 = vpow2.f32 %v5282_v4  ;;  %2369 = vmatpush.bf16.msrb.mxu2 %v5294_v33  ;;  %v5537_v4 = vor.u32 %v6538_v11, %v5536_v2  ;;  %v5512_v14 = vld [vmem:[#allocation7 + $0xc0] sm:$0xf]  ;;  %v6533_v33 = vld [vmem:[#allocation7 + $0xcc] sm:$0xf0] }
 0x69d   :  { %v2102_v31 = vadd.f32 1.0, %v6877_v23  ;;  %v2057_v29 = vpop.f32.mrf.mxu2  ;;  %v2070_v49 = vpop.f32.mrf.mxu3  ;;  %v6531_v23 = vld [vmem:[#allocation7 + $0xc4] sm:$0xf] }
 0x69e   :  { %6880 = vrcp.f32 %v2083_v38  ;;  %v2095_v62 = vand.u32 2147483648, %v2083_v38  ;;  %v2093_v15 = vand.u32 2147483647, %v2083_v38  ;;  %vm2089_vm6 = vweird.f32 %v2083_v38  ;;  %v6534_v29 = vld [vmem:[#allocation7 + $0xd4] sm:$0xf0] }
 0x69f   :  { %6882 = vrcp.f32 %v2102_v31  ;;  %v2114_v41 = vand.u32 2147483648, %v2102_v31  ;;  %v2112_v55 = vand.u32 2147483647, %v2102_v31  ;;  %vm2108_vm7 = vweird.f32 %v2102_v31 }
 0x6a0   :  { %v2096_v37 = vor.u32 1.1754944e-38, %v2095_v62  ;;  %vm2094_vm10 = vcmp.eq.f32.partialorder %v2093_v15, 8.507059e+37  ;;  %2688 = vmatpush.bf16.msra.mxu2 %v5537_v4  ;;  %v5517_v49 = vor.u32 %v6531_v23, %v5514_v17  ;;  %v6528_v62 = vld [vmem:[#allocation7 + $0xac] sm:$0xf]  ;;  %v5449_v23 = vor.u32 %v6517_v50, %v5448_v44 }
 0x6a1   :  { %v2115_v9 = vor.u32 1.1754944e-38, %v2114_v41  ;;  %vm2113_vm11 = vcmp.eq.f32.partialorder %v2112_v55, 8.507059e+37  ;;  %v5506_v41 = vld [vmem:[#allocation7 + $0xb8] sm:$0xf0]  ;;  %v6525_v55 = vld [vmem:[#allocation7 + $0x8c] sm:$0xf0] }
 0x6a2   :  { %v6879_v34 = vpop.eup %6878  ;;  %2676 = vmatpush.bf16.msra.mxu1 %v5517_v49  ;;  %v5509_v15 = vor.u32 %v6528_v62, %v5506_v41  ;;  %v6516_v49 = vld [vmem:[#allocation7 + $0x4c] sm:$0xf]  ;;  %v5440_v62 = vld [vmem:[#allocation7 + $0x28] sm:$0xf] }
 0x6a3   :  { %v2122_v3 = vadd.f32 1.0, %v6879_v34  ;;  %v5496_v34 = vld [vmem:[#allocation7 + $0xa0] sm:$0xf] }
 0x6a4   :  { %v6881_v20 = vpop.eup %6880  ;;  %2703 = vmatpush.bf16.msrb.mxu3 %v5509_v15 }
 0x6a5   :  { %v6883_v0 = vpop.eup %6882  ;;  %v2085_v42 = vmul.f32 %v6881_v20, %v2083_v38  ;;  %6884 = vrcp.f32 %v2122_v3  ;;  %vm2090_vm4 = vweird.f32 %v6881_v20  ;;  %v2134_v63 = vand.u32 2147483648, %v2122_v3 }
 0x6a6   :  { %v2104_v5 = vmul.f32 %v6883_v0, %v2102_v31  ;;  %6886 = vtanh.f32 %v2078_v52  ;;  %vm2109_vm5 = vweird.f32 %v6883_v0  ;;  %vm2091_vm8 = vmor %vm2089_vm6, %vm2090_vm4  ;;  %vm2128_vm13 = vweird.f32 %v2122_v3  ;;  %v5520_v31 = vld [vmem:[#allocation7 + $0xc8] sm:$0xf] }
 0x6a7   :  { %v2086_v27 = vsub.f32 1.0, %v2085_v42  ;;  %vm2110_vm9 = vmor %vm2108_vm7, %vm2109_vm5  ;;  %v2132_v60 = vand.u32 2147483647, %v2122_v3  ;;  %v2135_v13 = vor.u32 1.1754944e-38, %v2134_v63  ;;  %v5513_v38 = vor.u32 %v6533_v33, %v5512_v14  ;;  %v5504_v42 = vld [vmem:[#allocation7 + $0xa8] sm:$0xf] }
 0x6a8   :  { %v2105_v46 = vsub.f32 1.0, %v2104_v5  ;;  %v5521_v39 = vor.u32 %v6534_v29, %v5520_v31  ;;  %v6530_v5 = vld [vmem:[#allocation7 + $0xb4] sm:$0xf0]  ;;  %v6519_v63 = vld [vmem:[#allocation7 + $0x64] sm:$0xf] }
 0x6a9   :  { %v2087_v45 = vmul.f32 %v6881_v20, %v2086_v27  ;;  %vm2133_vm15 = vcmp.eq.f32.partialorder %v2132_v60, 8.507059e+37  ;;  %v8394_v60 = vld [vmem:[#allocation32_spill] sm:$0xff]  ;;  %v5456_v31 = vld [vmem:[#allocation7 + $0x48] sm:$0xf]  ;;  %v6518_v29 = vld [vmem:[#allocation7 + $0x54] sm:$0xf0] }
 0x6aa   :  { %v2106_v28 = vmul.f32 %v6883_v0, %v2105_v46  ;;  %2689 = vmatpush.bf16.msra.mxu2 %v5521_v39  ;;  %v5505_v46 = vor.u32 %v6530_v5, %v5504_v42  ;;  %v5457_v53 = vor.u32 %v6518_v29, %v5456_v31  ;;  %v5461_v5 = vor.u32 %v6516_v49, %v5458_v54 }
 0x6ab   :  { %v6885_v57 = vpop.eup %6884  ;;  %v2088_v7 = vadd.f32 %v6881_v20, %v2087_v45  ;;  %v8035_v45 = vld [vmem:[%s8265_s5] sm:$0xf] }
 0x6ac   :  { %v2107_v10 = vadd.f32 %v6883_v0, %v2106_v28  ;;  %v2124_v6 = vmul.f32 %v6885_v57, %v2122_v3  ;;  %v6887_v26 = vpop.eup %6886  ;;  %vm2129_vm12 = vweird.f32 %v6885_v57  ;;  %v6529_v3 = vld [vmem:[#allocation7 + $0xac] sm:$0xf0]  ;;  %v5480_v28 = vld [vmem:[#allocation7 + $0x80] sm:$0xf]  ;;  %v8048_v12 = vperm.slane %v8035_v45, 3 }
 0x6ad   :  { %v2092_v47 = vsel %vm2091_vm8, %v6881_v20, %v2088_v7  ;;  %vm2130_vm14 = vmor %vm2128_vm13, %vm2129_vm12  ;;  %v6527_v20 = vld [vmem:[#allocation7 + $0xa4] sm:$0xf]  ;;  %v5497_v52 = vor.u32 %v6529_v3, %v5496_v34  ;;  %v5481_v7 = vor.u32 %v6525_v55, %v5480_v28  ;;  %v5432_v34 = vld [vmem:[#allocation7 + $0x20] sm:$0xf] }
 0x6ae   :  { %v2097_v8 = vsel %vm2094_vm10, %v2096_v37, %v2092_v47  ;;  %v2111_v25 = vsel %vm2110_vm9, %v6883_v0, %v2107_v10  ;;  %v2125_v18 = vsub.f32 1.0, %v2124_v6  ;;  %v5498_v0 = vld [vmem:[#allocation7 + $0xb0] sm:$0xf0]  ;;  %2690 = vmatpush.bf16.msra.mxu2 %v5505_v46  ;;  %v5488_v10 = vld [vmem:[#allocation7 + $0x88] sm:$0xf] }
 0x6af   :  { %v2116_v59 = vsel %vm2113_vm11, %v2115_v9, %v2111_v25  ;;  %v2139_v32 = vmul.f32 %v6887_v26, %v2097_v8  ;;  %v5501_v27 = vor.u32 %v6527_v20, %v5498_v0  ;;  %v5482_v37 = vld [vmem:[#allocation7 + $0x90] sm:$0xf0]  ;;  %v6526_v6 = vld [vmem:[#allocation7 + $0x94] sm:$0xf0]  ;;  %v6524_v26 = vld [vmem:[#allocation7 + $0x8c] sm:$0xf] }
 0x6b0   :  { %v2138_v30 = vmul.f32 %v2116_v59, %v8014_v19  ;;  %v2126_v24 = vmul.f32 %v6885_v57, %v2125_v18  ;;  %v5528_v19 = vld [vmem:[#allocation7 + $0xe0] sm:$0xf]  ;;  %v5489_v47 = vor.u32 %v6526_v6, %v5488_v10  ;;  %v5490_v8 = vld [vmem:[#allocation7 + $0x98] sm:$0xf0]  ;;  %v8038_v25 = vperm.slane %v8035_v45, 0 }
 0x6b1   :  { %v5529_v51 = vor.u32 %v6537_v43, %v5528_v19  ;;  %2677 = vmatpush.bf16.msra.mxu1 %v5501_v27  ;;  %v8041_v18 = vperm.slane %v8035_v45, 1  ;;  %v5493_v59 = vor.u32 %v6524_v26, %v5490_v8  ;;  %v6522_v19 = vld [vmem:[#allocation7 + $0x74] sm:$0xf0]  ;;  %v6513_v3 = vld [vmem:[#allocation7 + $0x2c] sm:$0xf0] }
 0x6b2   :  { %v8029_v22 = vadd.f32 %v2139_v32, %v2138_v30  ;;  %v2127_v56 = vadd.f32 %v6885_v57, %v2126_v24  ;;  %2691 = vmatpush.bf16.msra.mxu2 %v5489_v47  ;;  %v5464_v24 = vld [vmem:[#allocation7 + $0x60] sm:$0xf]  ;;  %v8396_v20 = vld [vmem:[#allocation81_spill] sm:$0xff]  ;;  %v6511_v27 = vld [vmem:[#allocation7 + $0x24] sm:$0xf]  ;;  %v5433_v41 = vor.u32 %v6513_v3, %v5432_v34 }
 0x6b3   :  { %2662 = vmatpush.bf16.msrb.mxu0 %v5529_v51  ;;  %2704 = vmatpush.bf16.msrb.mxu3 %v5493_v59  ;;  %v6520_v51 = vld [vmem:[#allocation7 + $0x6c] sm:$0xf]  ;;  %v5434_v46 = vld [vmem:[#allocation7 + $0x30] sm:$0xf0]  ;;  %v6514_v28 = vld [vmem:[#allocation7 + $0x34] sm:$0xf0] }
 0x6b4   :  { %6888 = vtanh.f32 %v8029_v22  ;;  %v2131_v61 = vsel %vm2130_vm14, %v6885_v57, %v2127_v56  ;;  %v6523_v57 = vld [vmem:[#allocation7 + $0x84] sm:$0xf]  ;;  %v6521_v56 = vld [vmem:[#allocation7 + $0x6c] sm:$0xf0]  ;;  %v5477_v4 = vor.u32 %v6520_v51, %v5474_v58  ;;  %v5437_v15 = vor.u32 %v6511_v27, %v5434_v46  ;;  %v6512_v55 = vld [vmem:[#allocation7 + $0x2c] sm:$0xf] }
 0x6b5   :  { %v2136_v21 = vsel %vm2133_vm15, %v2135_v13, %v2131_v61  ;;  %v5485_v9 = vor.u32 %v6523_v57, %v5482_v37  ;;  %v8395_v13 = vld [vmem:[#allocation33_spill] sm:$0xff]  ;;  %v5441_v37 = vor.u32 %v6514_v28, %v5440_v62  ;;  %v5416_v6 = vld [vmem:[#allocation7] sm:$0xf]  ;;  %v6507_v47 = vld [vmem:[#allocation7 + $0x4] sm:$0xf] }
 0x6b6   :  { %v5442_v57 = vld [vmem:[#allocation7 + $0x38] sm:$0xf0]  ;;  %v5418_v8 = vld [vmem:[#allocation7 + $0x10] sm:$0xf0]  ;;  %v5424_v59 = vld [vmem:[#allocation7 + $0x8] sm:$0xf] }
 0x6b7   :  { %2663 = vmatpush.bf16.msrb.mxu0 %v5513_v38  ;;  %2678 = vmatpush.bf16.msra.mxu1 %v5485_v9  ;;  %v5450_v38 = vld [vmem:[#allocation7 + $0x50] sm:$0xf0]  ;;  %v5445_v10 = vor.u32 %v6512_v55, %v5442_v57  ;;  %v6509_v9 = vld [vmem:[#allocation7 + $0xc] sm:$0xf0] }
 0x6b8   :  { %2705 = vmatpush.bf16.msrb.mxu3 %v5477_v4  ;;  %v5453_v17 = vor.u32 %v6515_v1, %v5450_v38  ;;  %v5417_v26 = vor.u32 %v6509_v9, %v5416_v6 }
 0x6ba   :  { %v6889_v16 = vpop.eup %6888 }
 0x6bb   :  { %v2142_v35 = vmul.f32 %v6889_v16, %v2136_v21  ;;  %2664 = vmatpush.bf16.msrb.mxu0 %v5497_v52  ;;  %v5465_v21 = vor.u32 %v6521_v56, %v5464_v24  ;;  %v5421_v24 = vor.u32 %v6507_v47, %v5418_v8  ;;  %v6508_v56 = vld [vmem:[#allocation7 + $0xc] sm:$0xf]  ;;  %v6569_v8 = vld [vmem:[#allocation7 + $0xec] sm:$0xf0] }
 0x6bc   :  { %2706 = vmatpush.bf16.msrb.mxu3 %v5461_v5 }
 0x6bd   :  { %v2143_v40 = vpack.c.bf16 %v2142_v35, %v2142_v35  ;;  %v5466_v35 = vld [vmem:[#allocation7 + $0x70] sm:$0xf0] }
 0x6be   :  { %v5469_v43 = vor.u32 %v6519_v63, %v5466_v35  ;;  %v5426_v63 = vld [vmem:[#allocation7 + $0x18] sm:$0xf0] }
 0x6bf   :  { %2344 = vmatmul.bf16.vlgmr.msra.gmra.mxu0 %v2143_v40  ;;  %2357 = vmatmul.bf16.vlgmr.msrb.gmra.mxu1 %v2143_v40 }
 0x6c0   :  { %2370 = vmatmul.bf16.vlgmr.msrb.gmra.mxu2 %v2143_v40  ;;  %2383 = vmatmul.bf16.vlgmr.msra.gmra.mxu3 %v2143_v40  ;;  %v5472_v40 = vld [vmem:[#allocation7 + $0x68] sm:$0xf] }
 0x6c1   :  { %2665 = vmatpush.bf16.msrb.mxu0 %v5481_v7  ;;  %v5473_v48 = vor.u32 %v6522_v19, %v5472_v40  ;;  %2679 = vmatpush.bf16.msra.mxu1 %v5469_v43  ;;  %v8397_v43 = vld [vmem:[#allocation52_spill] sm:$0xff] }
 0x6c2   :  { %2707 = vmatpush.bf16.msrb.mxu3 %v5445_v10 }
 0x6c3   :  { %2692 = vmatpush.bf16.msra.mxu2 %v5473_v48  ;;  %v8398_v48 = vld [vmem:[#allocation80_spill] sm:$0xff] }
 0x6c4   :  { %v834_v51 = vadd.f32 %v8398_v48, %v8397_v43  ;;  %v5645_v43 = vld [vmem:[#allocation7 + $0xd0] sm:$0xf0]  ;;  %v5651_v48 = vld [vmem:[#allocation7 + $0xc8] sm:$0xf] }
 0x6c5   :  { %2666 = vmatpush.bf16.msrb.mxu0 %v5465_v21  ;;  %2680 = vmatpush.bf16.msra.mxu1 %v5453_v17  ;;  %v5429_v21 = vor.u32 %v6508_v56, %v5426_v63  ;;  %v6570_v56 = vld [vmem:[#allocation7 + $0xf4] sm:$0xf0] }
 0x6c7   :  { %2693 = vmatpush.bf16.msra.mxu2 %v5457_v53  ;;  %2708 = vmatpush.bf16.msrb.mxu3 %v5429_v21  ;;  %v5643_v21 = vld [vmem:[#allocation7 + $0xc0] sm:$0xf] }
 0x6c9   :  { %2667 = vmatpush.bf16.msrb.mxu0 %v5449_v23  ;;  %2681 = vmatpush.bf16.msra.mxu1 %v5437_v15 }
 0x6cb   :  { %2694 = vmatpush.bf16.msra.mxu2 %v5441_v37 }
 0x6cd   :  { %2668 = vmatpush.bf16.msrb.mxu0 %v5433_v41  ;;  %2682 = vmatpush.bf16.msra.mxu1 %v5421_v24  ;;  %v5667_v24 = vld [vmem:[#allocation7 + $0xe8] sm:$0xf] }
 0x6d1   :  { %2669 = vmatpush.bf16.msrb.mxu0 %v5417_v26  ;;  %v5659_v26 = vld [vmem:[#allocation7 + $0xe0] sm:$0xf] }
 0x73c   :  { %v2345_v32 = vpop.f32.mrf.mxu0  ;;  %v2358_v30 = vpop.f32.mrf.mxu1 }
 0x73d   :  { %v2388_v61 = vadd.f32 %v2345_v32, %v8394_v60  ;;  %v2389_v16 = vadd.f32 %v2358_v30, %v8395_v13  ;;  %v6510_v32 = vld [vmem:[#allocation7 + $0x14] sm:$0xf0] }
 0x73f   :  { %v2401_v2 = vadd.f32 %v8038_v25, %v2388_v61  ;;  %v2402_v11 = vadd.f32 %v8041_v18, %v2389_v16  ;;  %v5425_v61 = vor.u32 %v6510_v32, %v5424_v59  ;;  %v6567_v59 = vld [vmem:[#allocation7 + $0xe4] sm:$0xf]  ;;  %v5660_v32 = vor.u32 %v6569_v8, %v5659_v26 }
 0x741   :  { %v5411_v14 = vmul.f32 -1.442695, %v2401_v2  ;;  %v5412_v33 = vmul.f32 -1.442695, %v2402_v11  ;;  %2695 = vmatpush.bf16.msra.mxu2 %v5425_v61  ;;  %v8055_v2 = vperm.slane %v8035_v45, 2  ;;  %2979 = vmatpush.bf16.msra.mxu0 %v5660_v32 }
 0x742   :  { %v6568_v61 = vld [vmem:[#allocation7 + $0xec] sm:$0xf]  ;;  %v5603_v32 = vld [vmem:[#allocation7 + $0x68] sm:$0xf] }
 0x743   :  { %6890 = vpow2.f32 %v5411_v14  ;;  %v2371_v39 = vpop.f32.mrf.mxu2  ;;  %v2384_v36 = vpop.f32.mrf.mxu3 }
 0x744   :  { %6892 = vpow2.f32 %v5412_v33  ;;  %v2391_v52 = vadd.f32 %v2384_v36, %v8396_v20  ;;  %v2347_v0 = vpop.f32.mrf.mxu0  ;;  %v2360_v42 = vpop.f32.mrf.mxu1  ;;  %v2390_v58 = vadd.f32 %v2371_v39, %v834_v51  ;;  %v6566_v51 = vld [vmem:[#allocation7 + $0xd4] sm:$0xf0] }
 0x746   :  { %v2404_v7 = vadd.f32 %v8048_v12, %v2391_v52  ;;  %v2403_v50 = vadd.f32 %v8055_v2, %v2390_v58 }
 0x748   :  { %v5413_v30 = vmul.f32 -1.442695, %v2404_v7 }
 0x749   :  { %v6891_v60 = vpop.eup %6890 }
 0x74a   :  { %v6893_v13 = vpop.eup %6892  ;;  %v2408_v16 = vadd.f32 1.0, %v6891_v60  ;;  %6894 = vpow2.f32 %v5413_v30  ;;  %v5661_v30 = vld [vmem:[#allocation7 + $0xf0] sm:$0xf0]  ;;  %v5668_v60 = vor.u32 %v6570_v56, %v5667_v24 }
 0x74b   :  { %v2427_v35 = vadd.f32 1.0, %v6893_v13  ;;  %v2373_v40 = vpop.f32.mrf.mxu2  ;;  %v2386_v19 = vpop.f32.mrf.mxu3  ;;  %v5664_v63 = vor.u32 %v6567_v59, %v5661_v30  ;;  %v5669_v13 = vld [vmem:[#allocation7 + $0xf8] sm:$0xf0]  ;;  %v5597_v59 = vld [vmem:[#allocation7 + $0x70] sm:$0xf0] }
 0x74c   :  { %6896 = vrcp.f32 %v2408_v16  ;;  %v2420_v17 = vand.u32 2147483648, %v2408_v16  ;;  %v2418_v49 = vand.u32 2147483647, %v2408_v16  ;;  %vm2414_vm2 = vweird.f32 %v2408_v16  ;;  %3005 = vmatpush.bf16.msrb.mxu2 %v5668_v60  ;;  %v6563_v40 = vld [vmem:[#allocation7 + $0xc4] sm:$0xf] }
 0x74d   :  { %6898 = vrcp.f32 %v2427_v35  ;;  %v2439_v31 = vand.u32 2147483648, %v2427_v35  ;;  %v2437_v39 = vand.u32 2147483647, %v2427_v35  ;;  %vm2433_vm3 = vweird.f32 %v2427_v35  ;;  %2992 = vmatpush.bf16.msrb.mxu1 %v5664_v63  ;;  %v6554_v30 = vld [vmem:[#allocation7 + $0x74] sm:$0xf0] }
 0x74e   :  { %v2421_v54 = vor.u32 1.1754944e-38, %v2420_v17  ;;  %vm2419_vm6 = vcmp.eq.f32.partialorder %v2418_v49, 8.507059e+37  ;;  %v5648_v58 = vor.u32 %v6563_v40, %v5645_v43  ;;  %v5635_v17 = vld [vmem:[#allocation7 + $0xa8] sm:$0xf]  ;;  %v5604_v56 = vor.u32 %v6554_v30, %v5603_v32  ;;  %v6552_v63 = vld [vmem:[#allocation7 + $0x6c] sm:$0xf] }
 0x74f   :  { %v2440_v20 = vor.u32 1.1754944e-38, %v2439_v31  ;;  %vm2438_vm7 = vcmp.eq.f32.partialorder %v2437_v39, 8.507059e+37  ;;  %v6562_v31 = vld [vmem:[#allocation7 + $0xb4] sm:$0xf0]  ;;  %v5637_v39 = vld [vmem:[#allocation7 + $0xb8] sm:$0xf0] }
 0x750   :  { %v6895_v11 = vpop.eup %6894  ;;  %v5636_v49 = vor.u32 %v6562_v31, %v5635_v17  ;;  %v5605_v60 = vld [vmem:[#allocation7 + $0x78] sm:$0xf0]  ;;  %v6547_v40 = vld [vmem:[#allocation7 + $0x44] sm:$0xf]  ;;  %v5563_v31 = vld [vmem:[#allocation7 + $0x20] sm:$0xf] }
 0x751   :  { %v2447_v4 = vadd.f32 1.0, %v6895_v11  ;;  %v5652_v11 = vor.u32 %v6566_v51, %v5651_v48  ;;  %2993 = vmatpush.bf16.msrb.mxu1 %v5648_v58  ;;  %v5581_v51 = vld [vmem:[#allocation7 + $0x50] sm:$0xf0]  ;;  %v8402_v58 = vld [vmem:[#allocation83_spill] sm:$0xff]  ;;  %v5589_v17 = vld [vmem:[#allocation7 + $0x58] sm:$0xf0] }
 0x752   :  { %v6897_v44 = vpop.eup %6896 }
 0x753   :  { %v6899_v1 = vpop.eup %6898  ;;  %v2410_v14 = vmul.f32 %v6897_v44, %v2408_v16  ;;  %6900 = vrcp.f32 %v2447_v4  ;;  %vm2415_vm0 = vweird.f32 %v6897_v44  ;;  %v2459_v57 = vand.u32 2147483648, %v2447_v4  ;;  %3006 = vmatpush.bf16.msrb.mxu2 %v5652_v11  ;;  %v8403_v11 = vld [vmem:[#allocation74_spill] sm:$0xff] }
 0x754   :  { %v2429_v33 = vmul.f32 %v6899_v1, %v2427_v35  ;;  %6902 = vtanh.f32 %v2403_v50  ;;  %vm2434_vm1 = vweird.f32 %v6899_v1  ;;  %vm2416_vm4 = vmor %vm2414_vm2, %vm2415_vm0  ;;  %vm2453_vm9 = vweird.f32 %v2447_v4  ;;  %v6565_v35 = vld [vmem:[#allocation7 + $0xcc] sm:$0xf0] }
 0x755   :  { %v2411_v23 = vsub.f32 1.0, %v2410_v14  ;;  %vm2435_vm5 = vmor %vm2433_vm3, %vm2434_vm1  ;;  %v2457_v7 = vand.u32 2147483647, %v2447_v4  ;;  %v2460_v10 = vor.u32 1.1754944e-38, %v2459_v57  ;;  %v5672_v16 = vor.u32 %v6568_v61, %v5669_v13  ;;  %v6561_v14 = vld [vmem:[#allocation7 + $0xac] sm:$0xf0] }
 0x756   :  { %v2430_v38 = vsub.f32 1.0, %v2429_v33  ;;  %v5644_v19 = vor.u32 %v6565_v35, %v5643_v21  ;;  %v6559_v33 = vld [vmem:[#allocation7 + $0xa4] sm:$0xf]  ;;  %v5579_v21 = vld [vmem:[#allocation7 + $0x40] sm:$0xf] }
 0x757   :  { %v2412_v29 = vmul.f32 %v6897_v44, %v2411_v23  ;;  %vm2458_vm11 = vcmp.eq.f32.partialorder %v2457_v7, 8.507059e+37  ;;  %3018 = vmatpush.bf16.msra.mxu3 %v5672_v16  ;;  %3007 = vmatpush.bf16.msrb.mxu2 %v5636_v49  ;;  %v5608_v16 = vor.u32 %v6552_v63, %v5605_v60  ;;  %v6549_v35 = vld [vmem:[#allocation7 + $0x4c] sm:$0xf0]  ;;  %v8404_v60 = vld [vmem:[#allocation55_spill] sm:$0xff] }
 0x758   :  { %v2431_v45 = vmul.f32 %v6899_v1, %v2430_v38  ;;  %2980 = vmatpush.bf16.msra.mxu0 %v5644_v19  ;;  %v5629_v38 = vld [vmem:[#allocation7 + $0xb0] sm:$0xf0]  ;;  %v5580_v48 = vor.u32 %v6549_v35, %v5579_v21 }
 0x759   :  { %v6901_v36 = vpop.eup %6900  ;;  %v2413_v53 = vadd.f32 %v6897_v44, %v2412_v29  ;;  %v5632_v29 = vor.u32 %v6559_v33, %v5629_v38 }
 0x75a   :  { %v2432_v34 = vadd.f32 %v6899_v1, %v2431_v45  ;;  %v2449_v3 = vmul.f32 %v6901_v36, %v2447_v4  ;;  %v6903_v0 = vpop.eup %6902  ;;  %vm2454_vm8 = vweird.f32 %v6901_v36  ;;  %v6564_v4 = vld [vmem:[#allocation7 + $0xcc] sm:$0xf] }
 0x75b   :  { %v2417_v52 = vsel %vm2416_vm4, %v6897_v44, %v2413_v53  ;;  %vm2455_vm10 = vmor %vm2453_vm9, %vm2454_vm8  ;;  %v5653_v44 = vld [vmem:[#allocation7 + $0xd8] sm:$0xf0]  ;;  %v6560_v45 = vld [vmem:[#allocation7 + $0xac] sm:$0xf]  ;;  %2994 = vmatpush.bf16.msrb.mxu1 %v5632_v29 }
 0x75c   :  { %v2422_v42 = vsel %vm2419_vm6, %v2421_v54, %v2417_v52  ;;  %v2436_v5 = vsel %vm2435_vm5, %v6899_v1, %v2432_v34  ;;  %v2450_v27 = vsub.f32 1.0, %v2449_v3  ;;  %v5656_v50 = vor.u32 %v6564_v4, %v5653_v44  ;;  %v5627_v1 = vld [vmem:[#allocation7 + $0xa0] sm:$0xf]  ;;  %v6557_v54 = vld [vmem:[#allocation7 + $0x8c] sm:$0xf0] }
 0x75d   :  { %v2441_v46 = vsel %vm2438_vm7, %v2440_v20, %v2436_v5  ;;  %v2464_v62 = vmul.f32 %v6903_v0, %v2422_v42  ;;  %v5628_v23 = vor.u32 %v6561_v14, %v5627_v1  ;;  %v5611_v53 = vld [vmem:[#allocation7 + $0x80] sm:$0xf]  ;;  %v6555_v34 = vld [vmem:[#allocation7 + $0x84] sm:$0xf]  ;;  %v5613_v20 = vld [vmem:[#allocation7 + $0x90] sm:$0xf0]  ;;  %v934_v4 = vadd.f32 %v8403_v11, %v8402_v58 }
 0x75e   :  { %v2463_v41 = vmul.f32 %v2441_v46, %v8029_v22  ;;  %v2451_v15 = vmul.f32 %v6901_v36, %v2450_v27  ;;  %3019 = vmatpush.bf16.msra.mxu3 %v5656_v50  ;;  %v5612_v3 = vor.u32 %v6557_v54, %v5611_v53  ;;  %v5619_v52 = vld [vmem:[#allocation7 + $0x88] sm:$0xf]  ;;  %v6558_v0 = vld [vmem:[#allocation7 + $0x94] sm:$0xf0]  ;;  %v5616_v42 = vor.u32 %v6555_v34, %v5613_v20  ;;  %v6556_v27 = vld [vmem:[#allocation7 + $0x8c] sm:$0xf] }
 0x75f   :  { %2981 = vmatpush.bf16.msra.mxu0 %v5628_v23  ;;  %v5620_v5 = vor.u32 %v6558_v0, %v5619_v52  ;;  %v5621_v46 = vld [vmem:[#allocation7 + $0x98] sm:$0xf0]  ;;  %v5584_v44 = vor.u32 %v6547_v40, %v5581_v51  ;;  %v5587_v50 = vld [vmem:[#allocation7 + $0x48] sm:$0xf]  ;;  %v6550_v1 = vld [vmem:[#allocation7 + $0x54] sm:$0xf0] }
 0x760   :  { %v8059_v28 = vadd.f32 %v2464_v62, %v2463_v41  ;;  %v2452_v55 = vadd.f32 %v6901_v36, %v2451_v15  ;;  %v8399_v62 = vld [vmem:[#allocation23_spill] sm:$0xff]  ;;  %v8400_v41 = vld [vmem:[#allocation34_spill] sm:$0xff]  ;;  %2995 = vmatpush.bf16.msrb.mxu1 %v5616_v42  ;;  %v5588_v38 = vor.u32 %v6550_v1, %v5587_v50  ;;  %v6545_v29 = vld [vmem:[#allocation7 + $0x2c] sm:$0xf0] }
 0x761   :  { %v640_v15 = vadd.f32 %v8400_v41, %v8399_v62  ;;  %3008 = vmatpush.bf16.msrb.mxu2 %v5620_v5  ;;  %v6548_v14 = vld [vmem:[#allocation7 + $0x4c] sm:$0xf]  ;;  %v6543_v53 = vld [vmem:[#allocation7 + $0x24] sm:$0xf]  ;;  %v5565_v54 = vld [vmem:[#allocation7 + $0x30] sm:$0xf0] }
 0x762   :  { %6904 = vtanh.f32 %v8059_v28  ;;  %v2456_v37 = vsel %vm2455_vm10, %v6901_v36, %v2452_v55  ;;  %v5640_v36 = vor.u32 %v6560_v45, %v5637_v39  ;;  %v5624_v55 = vor.u32 %v6556_v27, %v5621_v46  ;;  %v5571_v34 = vld [vmem:[#allocation7 + $0x28] sm:$0xf]  ;;  %v6546_v52 = vld [vmem:[#allocation7 + $0x34] sm:$0xf0]  ;;  %v6544_v0 = vld [vmem:[#allocation7 + $0x2c] sm:$0xf] }
 0x763   :  { %v2461_v9 = vsel %vm2458_vm11, %v2460_v10, %v2456_v37  ;;  %2982 = vmatpush.bf16.msra.mxu0 %v5612_v3  ;;  %v5595_v37 = vld [vmem:[#allocation7 + $0x60] sm:$0xf]  ;;  %v6553_v10 = vld [vmem:[#allocation7 + $0x6c] sm:$0xf0]  ;;  %v5564_v3 = vor.u32 %v6545_v29, %v5563_v31  ;;  %v5568_v20 = vor.u32 %v6543_v53, %v5565_v54  ;;  %v5573_v42 = vld [vmem:[#allocation7 + $0x38] sm:$0xf0]  ;;  %v5572_v27 = vor.u32 %v6546_v52, %v5571_v34 }
 0x764   :  { %3020 = vmatpush.bf16.msra.mxu3 %v5640_v36  ;;  %v5596_v8 = vor.u32 %v6553_v10, %v5595_v37  ;;  %v5592_v36 = vor.u32 %v6548_v14, %v5589_v17  ;;  %v5576_v46 = vor.u32 %v6544_v0, %v5573_v42  ;;  %v5547_v62 = vld [vmem:[#allocation7] sm:$0xf]  ;;  %v6541_v41 = vld [vmem:[#allocation7 + $0xc] sm:$0xf0]  ;;  %v6542_v37 = vld [vmem:[#allocation7 + $0x14] sm:$0xf0] }
 0x765   :  { %3009 = vmatpush.bf16.msrb.mxu2 %v5604_v56 }
 0x767   :  { %2983 = vmatpush.bf16.msra.mxu0 %v5596_v8 }
 0x768   :  { %v6905_v6 = vpop.eup %6904  ;;  %3021 = vmatpush.bf16.msra.mxu3 %v5624_v55  ;;  %v5548_v55 = vor.u32 %v6541_v41, %v5547_v62 }
 0x769   :  { %v8062_v47 = vmul.f32 %v6905_v6, %v2461_v9  ;;  %v6551_v6 = vld [vmem:[#allocation7 + $0x64] sm:$0xf]  ;;  %3010 = vmatpush.bf16.msrb.mxu2 %v5588_v38 }
 0x76a   :  { %v5600_v24 = vor.u32 %v6551_v6, %v5597_v59 }
 0x76b   :  { %v2469_v22 = vpack.c.bf16 %v8062_v47, %v8062_v47  ;;  %2984 = vmatpush.bf16.msra.mxu0 %v5580_v48 }
 0x76c   :  { %2996 = vmatpush.bf16.msrb.mxu1 %v5600_v24  ;;  %3022 = vmatpush.bf16.msra.mxu3 %v5608_v16 }
 0x76d   :  { %2670 = vmatmul.bf16.vlgmr.msrb.gmra.mxu0 %v2469_v22  ;;  %2683 = vmatmul.bf16.vlgmr.msra.gmra.mxu1 %v2469_v22 }
 0x76e   :  { %2696 = vmatmul.bf16.vlgmr.msra.gmra.mxu2 %v2469_v22  ;;  %2709 = vmatmul.bf16.vlgmr.msrb.gmra.mxu3 %v2469_v22  ;;  %v8401_v22 = vld [vmem:[#allocation36_spill] sm:$0xff] }
 0x76f   :  { %2985 = vmatpush.bf16.msra.mxu0 %v5564_v3  ;;  %3011 = vmatpush.bf16.msrb.mxu2 %v5572_v27 }
 0x770   :  { %2997 = vmatpush.bf16.msrb.mxu1 %v5584_v44  ;;  %3023 = vmatpush.bf16.msra.mxu3 %v5592_v36 }
 0x773   :  { %2986 = vmatpush.bf16.msra.mxu0 %v5548_v55 }
 0x774   :  { %2998 = vmatpush.bf16.msrb.mxu1 %v5568_v20  ;;  %3024 = vmatpush.bf16.msra.mxu3 %v5576_v46 }
 0x7ea   :  { %v2671_v57 = vpop.f32.mrf.mxu0  ;;  %v2684_v7 = vpop.f32.mrf.mxu1 }
 0x7eb   :  { %v2714_v9 = vadd.f32 %v2671_v57, %v640_v15  ;;  %v2715_v26 = vadd.f32 %v2684_v7, %v8401_v22  ;;  %v6539_v15 = vld [vmem:[#allocation7 + $0x4] sm:$0xf]  ;;  %v5549_v57 = vld [vmem:[#allocation7 + $0x10] sm:$0xf0]  ;;  %v5555_v7 = vld [vmem:[#allocation7 + $0x8] sm:$0xf] }
 0x7ec   :  { %v5552_v6 = vor.u32 %v6539_v15, %v5549_v57  ;;  %v5557_v22 = vld [vmem:[#allocation7 + $0x18] sm:$0xf0]  ;;  %v5556_v8 = vor.u32 %v6542_v37, %v5555_v7  ;;  %v5790_v57 = vld [vmem:[#allocation7 + $0xe0] sm:$0xf]  ;;  %v6601_v7 = vld [vmem:[#allocation7 + $0xec] sm:$0xf0] }
 0x7ed   :  { %v2718_v61 = vadd.f32 %v2714_v9, %v8038_v25  ;;  %v2719_v13 = vadd.f32 %v2715_v26, %v8041_v18  ;;  %v6540_v9 = vld [vmem:[#allocation7 + $0xc] sm:$0xf]  ;;  %v6599_v37 = vld [vmem:[#allocation7 + $0xe4] sm:$0xf] }
 0x7ee   :  { %v5560_v30 = vor.u32 %v6540_v9, %v5557_v22  ;;  %2999 = vmatpush.bf16.msrb.mxu1 %v5552_v6  ;;  %3012 = vmatpush.bf16.msrb.mxu2 %v5556_v8  ;;  %v5792_v6 = vld [vmem:[#allocation7 + $0xf0] sm:$0xf0]  ;;  %v5798_v9 = vld [vmem:[#allocation7 + $0xe8] sm:$0xf]  ;;  %v6602_v22 = vld [vmem:[#allocation7 + $0xf4] sm:$0xf0] }
 0x7ef   :  { %v5542_v19 = vmul.f32 -1.442695, %v2718_v61  ;;  %v5543_v43 = vmul.f32 -1.442695, %v2719_v13  ;;  %v8405_v61 = vld [vmem:[#allocation82_spill] sm:$0xff]  ;;  %v5799_v8 = vor.u32 %v6602_v22, %v5798_v9 }
 0x7f0   :  { %v836_v13 = vadd.f32 %v8405_v61, %v8404_v60  ;;  %3025 = vmatpush.bf16.msra.mxu3 %v5560_v30  ;;  %v5776_v61 = vld [vmem:[#allocation7 + $0xd0] sm:$0xf0]  ;;  %v6586_v9 = vld [vmem:[#allocation7 + $0x74] sm:$0xf0] }
 0x7f1   :  { %6906 = vpow2.f32 %v5542_v19  ;;  %v2697_v33 = vpop.f32.mrf.mxu2  ;;  %v2710_v23 = vpop.f32.mrf.mxu3 }
 0x7f2   :  { %6908 = vpow2.f32 %v5543_v43  ;;  %v2717_v49 = vadd.f32 %v2710_v23, %v934_v4  ;;  %v2673_v45 = vpop.f32.mrf.mxu0  ;;  %v2686_v39 = vpop.f32.mrf.mxu1  ;;  %v2716_v16 = vadd.f32 %v2697_v33, %v836_v13  ;;  %3322 = vmatpush.bf16.msra.mxu2 %v5799_v8  ;;  %v5782_v13 = vld [vmem:[#allocation7 + $0xc8] sm:$0xf]  ;;  %v6584_v8 = vld [vmem:[#allocation7 + $0x6c] sm:$0xf] }
 0x7f4   :  { %v2721_v5 = vadd.f32 %v2717_v49, %v8048_v12  ;;  %v2720_v19 = vadd.f32 %v2716_v16, %v8055_v2  ;;  %v6598_v16 = vld [vmem:[#allocation7 + $0xd4] sm:$0xf0] }
 0x7f6   :  { %v5544_v10 = vmul.f32 -1.442695, %v2721_v5 }
 0x7f7   :  { %v6907_v26 = vpop.eup %6906 }
 0x7f8   :  { %v6909_v59 = vpop.eup %6908  ;;  %v2725_v32 = vadd.f32 1.0, %v6907_v26  ;;  %6910 = vpow2.f32 %v5544_v10  ;;  %v5791_v10 = vor.u32 %v6601_v7, %v5790_v57  ;;  %v5795_v26 = vor.u32 %v6599_v37, %v5792_v6  ;;  %v8408_v57 = vld [vmem:[#allocation40_spill] sm:$0xff]  ;;  %v5734_v6 = vld [vmem:[#allocation7 + $0x68] sm:$0xf] }
 0x7f9   :  { %v2744_v24 = vadd.f32 1.0, %v6909_v59  ;;  %v2699_v56 = vpop.f32.mrf.mxu2  ;;  %v2712_v63 = vpop.f32.mrf.mxu3  ;;  %v6600_v59 = vld [vmem:[#allocation7 + $0xec] sm:$0xf] }
 0x7fa   :  { %6912 = vrcp.f32 %v2725_v32  ;;  %v2737_v4 = vand.u32 2147483648, %v2725_v32  ;;  %v2735_v1 = vand.u32 2147483647, %v2725_v32  ;;  %vm2731_vm14 = vweird.f32 %v2725_v32  ;;  %3296 = vmatpush.bf16.msrb.mxu0 %v5791_v10  ;;  %3309 = vmatpush.bf16.msra.mxu1 %v5795_v26  ;;  %v6597_v56 = vld [vmem:[#allocation7 + $0xcc] sm:$0xf0] }
 0x7fb   :  { %6914 = vrcp.f32 %v2744_v24  ;;  %v2756_v44 = vand.u32 2147483648, %v2744_v24  ;;  %v2754_v33 = vand.u32 2147483647, %v2744_v24  ;;  %vm2750_vm15 = vweird.f32 %v2744_v24  ;;  %v6595_v63 = vld [vmem:[#allocation7 + $0xc4] sm:$0xf] }
 0x7fc   :  { %v2738_v17 = vor.u32 1.1754944e-38, %v2737_v4  ;;  %vm2736_vm2 = vcmp.eq.f32.partialorder %v2735_v1, 8.507059e+37  ;;  %v5760_v4 = vld [vmem:[#allocation7 + $0xb0] sm:$0xf0]  ;;  %v5735_v26 = vor.u32 %v6586_v9, %v5734_v6 }
 0x7fd   :  { %v2757_v49 = vor.u32 1.1754944e-38, %v2756_v44  ;;  %vm2755_vm3 = vcmp.eq.f32.partialorder %v2754_v33, 8.507059e+37  ;;  %v5766_v44 = vld [vmem:[#allocation7 + $0xa8] sm:$0xf]  ;;  %v6592_v33 = vld [vmem:[#allocation7 + $0xac] sm:$0xf] }
 0x7fe   :  { %v6911_v21 = vpop.eup %6910  ;;  %v5728_v10 = vld [vmem:[#allocation7 + $0x70] sm:$0xf0] }
 0x7ff   :  { %v2764_v35 = vadd.f32 1.0, %v6911_v21  ;;  %v5779_v21 = vor.u32 %v6595_v63, %v5776_v61  ;;  %v6581_v63 = vld [vmem:[#allocation7 + $0x4c] sm:$0xf0] }
 0x800   :  { %v6913_v40 = vpop.eup %6912 }
 0x801   :  { %v6915_v43 = vpop.eup %6914  ;;  %v2727_v48 = vmul.f32 %v6913_v40, %v2725_v32  ;;  %6916 = vrcp.f32 %v2764_v35  ;;  %vm2732_vm12 = vweird.f32 %v6913_v40  ;;  %v2776_v5 = vand.u32 2147483648, %v2764_v35  ;;  %v5800_v32 = vld [vmem:[#allocation7 + $0xf8] sm:$0xf0]  ;;  %3310 = vmatpush.bf16.msra.mxu1 %v5779_v21  ;;  %v5712_v21 = vld [vmem:[#allocation7 + $0x50] sm:$0xf0] }
 0x802   :  { %v2746_v51 = vmul.f32 %v6915_v43, %v2744_v24  ;;  %6918 = vtanh.f32 %v2720_v19  ;;  %vm2751_vm13 = vweird.f32 %v6915_v43  ;;  %vm2733_vm0 = vmor %vm2731_vm14, %vm2732_vm12  ;;  %vm2770_vm5 = vweird.f32 %v2764_v35  ;;  %v5774_v24 = vld [vmem:[#allocation7 + $0xc0] sm:$0xf]  ;;  %v5784_v19 = vld [vmem:[#allocation7 + $0xd8] sm:$0xf0] }
 0x803   :  { %v2728_v58 = vsub.f32 1.0, %v2727_v48  ;;  %vm2752_vm1 = vmor %vm2750_vm15, %vm2751_vm13  ;;  %v2774_v27 = vand.u32 2147483647, %v2764_v35  ;;  %v2777_v62 = vor.u32 1.1754944e-38, %v2776_v5  ;;  %v5803_v30 = vor.u32 %v6600_v59, %v5800_v32  ;;  %v5758_v48 = vld [vmem:[#allocation7 + $0xa0] sm:$0xf] }
 0x804   :  { %v2747_v11 = vsub.f32 1.0, %v2746_v51  ;;  %v5775_v60 = vor.u32 %v6597_v56, %v5774_v24  ;;  %v6593_v51 = vld [vmem:[#allocation7 + $0xac] sm:$0xf0]  ;;  %v5736_v59 = vld [vmem:[#allocation7 + $0x78] sm:$0xf0] }
 0x805   :  { %v2729_v50 = vmul.f32 %v6913_v40, %v2728_v58  ;;  %vm2775_vm7 = vcmp.eq.f32.partialorder %v2774_v27, 8.507059e+37  ;;  %3335 = vmatpush.bf16.msrb.mxu3 %v5803_v30  ;;  %v6591_v58 = vld [vmem:[#allocation7 + $0xa4] sm:$0xf]  ;;  %v5739_v24 = vor.u32 %v6584_v8, %v5736_v59  ;;  %v5710_v56 = vld [vmem:[#allocation7 + $0x40] sm:$0xf]  ;;  %v8411_v59 = vld [vmem:[#allocation85_spill] sm:$0xff] }
 0x806   :  { %v2748_v14 = vmul.f32 %v6915_v43, %v2747_v11  ;;  %3297 = vmatpush.bf16.msrb.mxu0 %v5775_v60  ;;  %v5759_v11 = vor.u32 %v6593_v51, %v5758_v48  ;;  %v5763_v1 = vor.u32 %v6591_v58, %v5760_v4  ;;  %v6579_v60 = vld [vmem:[#allocation7 + $0x44] sm:$0xf]  ;;  %v5694_v4 = vld [vmem:[#allocation7 + $0x20] sm:$0xf] }
 0x807   :  { %v6917_v23 = vpop.eup %6916  ;;  %v2730_v38 = vadd.f32 %v6913_v40, %v2729_v50  ;;  %v6594_v50 = vld [vmem:[#allocation7 + $0xb4] sm:$0xf0]  ;;  %v8410_v8 = vld [vmem:[#allocation58_spill] sm:$0xff] }
 0x808   :  { %v2749_v31 = vadd.f32 %v6915_v43, %v2748_v14  ;;  %v2766_v29 = vmul.f32 %v6917_v23, %v2764_v35  ;;  %v6919_v39 = vpop.eup %6918  ;;  %vm2771_vm4 = vweird.f32 %v6917_v23  ;;  %v5783_v35 = vor.u32 %v6598_v16, %v5782_v13  ;;  %3311 = vmatpush.bf16.msra.mxu1 %v5763_v1 }
 0x809   :  { %v2734_v45 = vsel %vm2733_vm0, %v6913_v40, %v2730_v38  ;;  %vm2772_vm6 = vmor %vm2770_vm5, %vm2771_vm4  ;;  %v6596_v40 = vld [vmem:[#allocation7 + $0xcc] sm:$0xf]  ;;  %v5767_v14 = vor.u32 %v6594_v50, %v5766_v44  ;;  %v5711_v16 = vor.u32 %v6581_v63, %v5710_v56  ;;  %v6577_v44 = vld [vmem:[#allocation7 + $0x2c] sm:$0xf0] }
 0x80a   :  { %v2739_v36 = vsel %vm2736_vm2, %v2738_v17, %v2734_v45  ;;  %v2753_v53 = vsel %vm2752_vm1, %v6915_v43, %v2749_v31  ;;  %v2767_v54 = vsub.f32 1.0, %v2766_v29  ;;  %v5787_v43 = vor.u32 %v6596_v40, %v5784_v19  ;;  %3323 = vmatpush.bf16.msra.mxu2 %v5783_v35  ;;  %3298 = vmatpush.bf16.msrb.mxu0 %v5759_v11  ;;  %v5742_v17 = vld [vmem:[#allocation7 + $0x80] sm:$0xf]  ;;  %v6589_v31 = vld [vmem:[#allocation7 + $0x8c] sm:$0xf0] }
 0x80b   :  { %v2758_v34 = vsel %vm2755_vm3, %v2757_v49, %v2753_v53  ;;  %v2781_v3 = vmul.f32 %v6919_v39, %v2739_v36  ;;  %v6587_v29 = vld [vmem:[#allocation7 + $0x84] sm:$0xf]  ;;  %v5743_v49 = vor.u32 %v6589_v31, %v5742_v17  ;;  %v5744_v45 = vld [vmem:[#allocation7 + $0x90] sm:$0xf0]  ;;  %v5750_v39 = vld [vmem:[#allocation7 + $0x88] sm:$0xf]  ;;  %v5715_v35 = vor.u32 %v6579_v60, %v5712_v21 }
 0x80c   :  { %v2780_v20 = vmul.f32 %v2758_v34, %v8059_v28  ;;  %v2768_v52 = vmul.f32 %v6917_v23, %v2767_v54  ;;  %3336 = vmatpush.bf16.msrb.mxu3 %v5787_v43  ;;  %v6590_v36 = vld [vmem:[#allocation7 + $0x94] sm:$0xf0]  ;;  %v5747_v53 = vor.u32 %v6587_v29, %v5744_v45  ;;  %v6588_v34 = vld [vmem:[#allocation7 + $0x8c] sm:$0xf]  ;;  %v5718_v40 = vld [vmem:[#allocation7 + $0x48] sm:$0xf]  ;;  %v5695_v29 = vor.u32 %v6577_v44, %v5694_v4 }
 0x80d   :  { %v5751_v54 = vor.u32 %v6590_v36, %v5750_v39  ;;  %v6582_v19 = vld [vmem:[#allocation7 + $0x54] sm:$0xf0]  ;;  %v6580_v43 = vld [vmem:[#allocation7 + $0x4c] sm:$0xf]  ;;  %v5720_v11 = vld [vmem:[#allocation7 + $0x58] sm:$0xf0] }
 0x80e   :  { %v8078_v0 = vadd.f32 %v2781_v3, %v2780_v20  ;;  %v2769_v42 = vadd.f32 %v6917_v23, %v2768_v52  ;;  %3324 = vmatpush.bf16.msra.mxu2 %v5767_v14  ;;  %v5752_v3 = vld [vmem:[#allocation7 + $0x98] sm:$0xf0]  ;;  %v8406_v20 = vld [vmem:[#allocation10_spill] sm:$0xff]  ;;  %3299 = vmatpush.bf16.msrb.mxu0 %v5743_v49  ;;  %v5719_v58 = vor.u32 %v6582_v19, %v5718_v40  ;;  %v5696_v17 = vld [vmem:[#allocation7 + $0x30] sm:$0xf0] }
 0x80f   :  { %v8407_v52 = vld [vmem:[#allocation38_spill] sm:$0xff]  ;;  %v5755_v5 = vor.u32 %v6588_v34, %v5752_v3  ;;  %3312 = vmatpush.bf16.msra.mxu1 %v5747_v53  ;;  %v5702_v31 = vld [vmem:[#allocation7 + $0x28] sm:$0xf]  ;;  %v6578_v45 = vld [vmem:[#allocation7 + $0x34] sm:$0xf0] }
 0x810   :  { %6920 = vtanh.f32 %v8078_v0  ;;  %v2773_v46 = vsel %vm2772_vm6, %v6917_v23, %v2769_v42  ;;  %v5768_v23 = vld [vmem:[#allocation7 + $0xb8] sm:$0xf0]  ;;  %v643_v42 = vadd.f32 %v8407_v52, %v8406_v20  ;;  %v8409_v50 = vld [vmem:[#allocation86_spill] sm:$0xff]  ;;  %v6576_v39 = vld [vmem:[#allocation7 + $0x2c] sm:$0xf] }
 0x811   :  { %v2778_v15 = vsel %vm2775_vm7, %v2777_v62, %v2773_v46  ;;  %v5771_v38 = vor.u32 %v6592_v33, %v5768_v23  ;;  %v5726_v62 = vld [vmem:[#allocation7 + $0x60] sm:$0xf]  ;;  %v5723_v23 = vor.u32 %v6580_v43, %v5720_v11  ;;  %v5704_v36 = vld [vmem:[#allocation7 + $0x38] sm:$0xf0]  ;;  %v6573_v20 = vld [vmem:[#allocation7 + $0xc] sm:$0xf0] }
 0x812   :  { %3325 = vmatpush.bf16.msra.mxu2 %v5751_v54  ;;  %v5703_v54 = vor.u32 %v6578_v45, %v5702_v31  ;;  %v5707_v34 = vor.u32 %v6576_v39, %v5704_v36  ;;  %v5678_v3 = vld [vmem:[#allocation7] sm:$0xf]  ;;  %v6571_v52 = vld [vmem:[#allocation7 + $0x4] sm:$0xf] }
 0x813   :  { %3337 = vmatpush.bf16.msrb.mxu3 %v5771_v38  ;;  %v6575_v38 = vld [vmem:[#allocation7 + $0x24] sm:$0xf] }
 0x814   :  { %v5699_v49 = vor.u32 %v6575_v38, %v5696_v17 }
 0x816   :  { %v6921_v41 = vpop.eup %6920  ;;  %3326 = vmatpush.bf16.msra.mxu2 %v5735_v26 }
 0x817   :  { %v8081_v55 = vmul.f32 %v6921_v41, %v2778_v15  ;;  %v6585_v41 = vld [vmem:[#allocation7 + $0x6c] sm:$0xf0]  ;;  %v6583_v15 = vld [vmem:[#allocation7 + $0x64] sm:$0xf]  ;;  %3338 = vmatpush.bf16.msrb.mxu3 %v5755_v5  ;;  %v5680_v5 = vld [vmem:[#allocation7 + $0x10] sm:$0xf0] }
 0x818   :  { %v5727_v37 = vor.u32 %v6585_v41, %v5726_v62  ;;  %v5731_v22 = vor.u32 %v6583_v15, %v5728_v10  ;;  %v5683_v41 = vor.u32 %v6571_v52, %v5680_v5  ;;  %v6572_v15 = vld [vmem:[#allocation7 + $0xc] sm:$0xf] }
 0x819   :  { %v2786_v28 = vpack.c.bf16 %v8081_v55, %v8081_v55 }
 0x81a   :  { %3300 = vmatpush.bf16.msrb.mxu0 %v5727_v37  ;;  %3313 = vmatpush.bf16.msra.mxu1 %v5731_v22 }
 0x81b   :  { %2987 = vmatmul.bf16.vlgmr.msra.gmra.mxu0 %v2786_v28  ;;  %3000 = vmatmul.bf16.vlgmr.msrb.gmra.mxu1 %v2786_v28 }
 0x81c   :  { %3013 = vmatmul.bf16.vlgmr.msrb.gmra.mxu2 %v2786_v28  ;;  %3026 = vmatmul.bf16.vlgmr.msra.gmra.mxu3 %v2786_v28 }
 0x81d   :  { %3339 = vmatpush.bf16.msrb.mxu3 %v5739_v24  ;;  %3327 = vmatpush.bf16.msra.mxu2 %v5719_v58 }
 0x81e   :  { %3301 = vmatpush.bf16.msrb.mxu0 %v5711_v16  ;;  %3314 = vmatpush.bf16.msra.mxu1 %v5715_v35 }
 0x821   :  { %3340 = vmatpush.bf16.msrb.mxu3 %v5723_v23  ;;  %3328 = vmatpush.bf16.msra.mxu2 %v5703_v54 }
 0x822   :  { %3302 = vmatpush.bf16.msrb.mxu0 %v5695_v29  ;;  %3315 = vmatpush.bf16.msra.mxu1 %v5699_v49 }
 0x825   :  { %3341 = vmatpush.bf16.msrb.mxu3 %v5707_v34 }
 0x826   :  { %3316 = vmatpush.bf16.msra.mxu1 %v5683_v41 }
 0x898   :  { %v2988_v27 = vpop.f32.mrf.mxu0  ;;  %v3001_v46 = vpop.f32.mrf.mxu1 }
 0x899   :  { %v3031_v28 = vadd.f32 %v2988_v27, %v643_v42  ;;  %v3032_v7 = vadd.f32 %v3001_v46, %v8408_v57  ;;  %v5679_v42 = vor.u32 %v6573_v20, %v5678_v3  ;;  %v5686_v27 = vld [vmem:[#allocation7 + $0x8] sm:$0xf]  ;;  %v6574_v46 = vld [vmem:[#allocation7 + $0x14] sm:$0xf0] }
 0x89b   :  { %v3035_v32 = vadd.f32 %v3031_v28, %v8038_v25  ;;  %v3036_v30 = vadd.f32 %v3032_v7, %v8041_v18  ;;  %v5688_v28 = vld [vmem:[#allocation7 + $0x18] sm:$0xf0]  ;;  %v5687_v7 = vor.u32 %v6574_v46, %v5686_v27  ;;  %3303 = vmatpush.bf16.msrb.mxu0 %v5679_v42  ;;  %v5921_v27 = vld [vmem:[#allocation7 + $0xe0] sm:$0xf]  ;;  %v6633_v46 = vld [vmem:[#allocation7 + $0xec] sm:$0xf0] }
 0x89c   :  { %v5691_v6 = vor.u32 %v6572_v15, %v5688_v28  ;;  %v5922_v41 = vor.u32 %v6633_v46, %v5921_v27  ;;  %v5923_v15 = vld [vmem:[#allocation7 + $0xf0] sm:$0xf0]  ;;  %v5929_v28 = vld [vmem:[#allocation7 + $0xe8] sm:$0xf]  ;;  %v5857_v27 = vld [vmem:[#allocation7 + $0x60] sm:$0xf] }
 0x89d   :  { %v5673_v61 = vmul.f32 -1.442695, %v3035_v32  ;;  %v5674_v13 = vmul.f32 -1.442695, %v3036_v30  ;;  %v839_v32 = vadd.f32 %v8411_v59, %v8410_v8  ;;  %3329 = vmatpush.bf16.msra.mxu2 %v5687_v7  ;;  %v6627_v8 = vld [vmem:[#allocation7 + $0xc4] sm:$0xf] }
 0x89e   :  { %3342 = vmatpush.bf16.msrb.mxu3 %v5691_v6  ;;  %v5931_v6 = vld [vmem:[#allocation7 + $0xf8] sm:$0xf0]  ;;  %v6617_v46 = vld [vmem:[#allocation7 + $0x6c] sm:$0xf0] }
 0x89f   :  { %6922 = vpow2.f32 %v5673_v61  ;;  %v3014_v48 = vpop.f32.mrf.mxu2  ;;  %v3027_v51 = vpop.f32.mrf.mxu3  ;;  %3613 = vmatpush.bf16.msra.mxu0 %v5922_v41 }
 0x8a0   :  { %6924 = vpow2.f32 %v5674_v13  ;;  %v3034_v1 = vadd.f32 %v3027_v51, %v8409_v50  ;;  %v2990_v14 = vpop.f32.mrf.mxu0  ;;  %v3003_v33 = vpop.f32.mrf.mxu1  ;;  %v3033_v30 = vadd.f32 %v3014_v48, %v839_v32  ;;  %v5907_v32 = vld [vmem:[#allocation7 + $0xd0] sm:$0xf0] }
 0x8a2   :  { %v3038_v53 = vadd.f32 %v3034_v1, %v8048_v12  ;;  %v3037_v60 = vadd.f32 %v3033_v30, %v8055_v2  ;;  %v5913_v30 = vld [vmem:[#allocation7 + $0xc8] sm:$0xf] }
 0x8a4   :  { %v5675_v62 = vmul.f32 -1.442695, %v3038_v53 }
 0x8a5   :  { %v6923_v57 = vpop.eup %6922 }
 0x8a6   :  { %v6925_v37 = vpop.eup %6924  ;;  %v3042_v10 = vadd.f32 1.0, %v6923_v57  ;;  %6926 = vpow2.f32 %v5675_v62  ;;  %v6631_v62 = vld [vmem:[#allocation7 + $0xe4] sm:$0xf]  ;;  %v6634_v57 = vld [vmem:[#allocation7 + $0xf4] sm:$0xf0] }
 0x8a7   :  { %v3061_v9 = vadd.f32 1.0, %v6925_v37  ;;  %v3016_v22 = vpop.f32.mrf.mxu2  ;;  %v3029_v26 = vpop.f32.mrf.mxu3  ;;  %v5926_v7 = vor.u32 %v6631_v62, %v5923_v15  ;;  %v5930_v37 = vor.u32 %v6634_v57, %v5929_v28  ;;  %v6615_v62 = vld [vmem:[#allocation7 + $0x64] sm:$0xf]  ;;  %v5858_v28 = vor.u32 %v6617_v46, %v5857_v27  ;;  %v5859_v57 = vld [vmem:[#allocation7 + $0x70] sm:$0xf0] }
 0x8a8   :  { %6928 = vrcp.f32 %v3042_v10  ;;  %v3054_v40 = vand.u32 2147483648, %v3042_v10  ;;  %v3052_v51 = vand.u32 2147483647, %v3042_v10  ;;  %vm3048_vm10 = vweird.f32 %v3042_v10  ;;  %v5905_v22 = vld [vmem:[#allocation7 + $0xc0] sm:$0xf] }
 0x8a9   :  { %6930 = vrcp.f32 %v3061_v9  ;;  %v3073_v19 = vand.u32 2147483648, %v3061_v9  ;;  %v3071_v48 = vand.u32 2147483647, %v3061_v9  ;;  %vm3067_vm11 = vweird.f32 %v3061_v9  ;;  %3626 = vmatpush.bf16.msrb.mxu1 %v5926_v7  ;;  %3639 = vmatpush.bf16.msrb.mxu2 %v5930_v37  ;;  %v6629_v26 = vld [vmem:[#allocation7 + $0xcc] sm:$0xf0] }
 0x8aa   :  { %v3055_v44 = vor.u32 1.1754944e-38, %v3054_v40  ;;  %vm3053_vm14 = vcmp.eq.f32.partialorder %v3052_v51, 8.507059e+37  ;;  %v5906_v59 = vor.u32 %v6629_v26, %v5905_v22  ;;  %v6626_v51 = vld [vmem:[#allocation7 + $0xb4] sm:$0xf0]  ;;  %v5865_v7 = vld [vmem:[#allocation7 + $0x68] sm:$0xf] }
 0x8ab   :  { %v3074_v14 = vor.u32 1.1754944e-38, %v3073_v19  ;;  %vm3072_vm15 = vcmp.eq.f32.partialorder %v3071_v48, 8.507059e+37  ;;  %v5891_v19 = vld [vmem:[#allocation7 + $0xb0] sm:$0xf0]  ;;  %v6618_v37 = vld [vmem:[#allocation7 + $0x74] sm:$0xf0] }
 0x8ac   :  { %v6927_v24 = vpop.eup %6926  ;;  %3614 = vmatpush.bf16.msra.mxu0 %v5906_v59  ;;  %v5867_v22 = vld [vmem:[#allocation7 + $0x78] sm:$0xf0]  ;;  %v5817_v27 = vld [vmem:[#allocation7 + $0x8] sm:$0xf]  ;;  %v6606_v46 = vld [vmem:[#allocation7 + $0x14] sm:$0xf0] }
 0x8ad   :  { %v3081_v56 = vadd.f32 1.0, %v6927_v24  ;;  %v6630_v24 = vld [vmem:[#allocation7 + $0xd4] sm:$0xf0] }
 0x8ae   :  { %v6929_v63 = vpop.eup %6928 }
 0x8af   :  { %v6931_v61 = vpop.eup %6930  ;;  %v3044_v13 = vmul.f32 %v6929_v63, %v3042_v10  ;;  %6932 = vrcp.f32 %v3081_v56  ;;  %vm3049_vm8 = vweird.f32 %v6929_v63  ;;  %v3093_v54 = vand.u32 2147483648, %v3081_v56  ;;  %v6632_v10 = vld [vmem:[#allocation7 + $0xec] sm:$0xf] }
 0x8b0   :  { %v3063_v16 = vmul.f32 %v6931_v61, %v3061_v9  ;;  %6934 = vtanh.f32 %v3037_v60  ;;  %vm3068_vm9 = vweird.f32 %v6931_v61  ;;  %vm3050_vm12 = vmor %vm3048_vm10, %vm3049_vm8  ;;  %vm3087_vm1 = vweird.f32 %v3081_v56  ;;  %v6628_v60 = vld [vmem:[#allocation7 + $0xcc] sm:$0xf] }
 0x8b1   :  { %v3045_v21 = vsub.f32 1.0, %v3044_v13  ;;  %vm3069_vm13 = vmor %vm3067_vm11, %vm3068_vm9  ;;  %v3091_v34 = vand.u32 2147483647, %v3081_v56  ;;  %v3094_v20 = vor.u32 1.1754944e-38, %v3093_v54  ;;  %v5934_v9 = vor.u32 %v6632_v10, %v5931_v6 }
 0x8b2   :  { %v3064_v35 = vsub.f32 1.0, %v3063_v16  ;;  %v5889_v16 = vld [vmem:[#allocation7 + $0xa0] sm:$0xf]  ;;  %v5862_v10 = vor.u32 %v6615_v62, %v5859_v57  ;;  %v5866_v6 = vor.u32 %v6618_v37, %v5865_v7  ;;  %v5818_v7 = vor.u32 %v6606_v46, %v5817_v27 }
 0x8b3   :  { %v3046_v43 = vmul.f32 %v6929_v63, %v3045_v21  ;;  %vm3092_vm3 = vcmp.eq.f32.partialorder %v3091_v34, 8.507059e+37  ;;  %3652 = vmatpush.bf16.msra.mxu3 %v5934_v9  ;;  %v6625_v21 = vld [vmem:[#allocation7 + $0xac] sm:$0xf0]  ;;  %v8414_v34 = vld [vmem:[#allocation43_spill] sm:$0xff]  ;;  %v6052_v46 = vld [vmem:[#allocation7 + $0xe0] sm:$0xf] }
 0x8b4   :  { %v3065_v58 = vmul.f32 %v6931_v61, %v3064_v35  ;;  %v6623_v35 = vld [vmem:[#allocation7 + $0xa4] sm:$0xf]  ;;  %v5890_v40 = vor.u32 %v6625_v21, %v5889_v16  ;;  %v6616_v9 = vld [vmem:[#allocation7 + $0x6c] sm:$0xf] }
 0x8b5   :  { %v6933_v11 = vpop.eup %6932  ;;  %v3047_v4 = vadd.f32 %v6929_v63, %v3046_v43  ;;  %v5897_v43 = vld [vmem:[#allocation7 + $0xa8] sm:$0xf]  ;;  %v5870_v59 = vor.u32 %v6616_v9, %v5867_v22 }
 0x8b6   :  { %v3066_v50 = vadd.f32 %v6931_v61, %v3065_v58  ;;  %v3083_v1 = vmul.f32 %v6933_v11, %v3081_v56  ;;  %v6935_v23 = vpop.eup %6934  ;;  %vm3088_vm0 = vweird.f32 %v6933_v11  ;;  %v5910_v56 = vor.u32 %v6627_v8, %v5907_v32  ;;  %3615 = vmatpush.bf16.msra.mxu0 %v5890_v40  ;;  %v5841_v32 = vld [vmem:[#allocation7 + $0x40] sm:$0xf]  ;;  %v8417_v16 = vld [vmem:[#allocation79_spill] sm:$0xff] }
 0x8b7   :  { %v3051_v33 = vsel %vm3050_vm12, %v6929_v63, %v3047_v4  ;;  %vm3089_vm2 = vmor %vm3087_vm1, %vm3088_vm0  ;;  %v5914_v63 = vor.u32 %v6630_v24, %v5913_v30  ;;  %v5894_v58 = vor.u32 %v6623_v35, %v5891_v19  ;;  %v5898_v48 = vor.u32 %v6626_v51, %v5897_v43  ;;  %v5899_v4 = vld [vmem:[#allocation7 + $0xb8] sm:$0xf0]  ;;  %v6613_v30 = vld [vmem:[#allocation7 + $0x4c] sm:$0xf0] }
 0x8b8   :  { %v3056_v38 = vsel %vm3053_vm14, %v3055_v44, %v3051_v33  ;;  %v3070_v17 = vsel %vm3069_vm13, %v6931_v61, %v3066_v50  ;;  %v3084_v31 = vsub.f32 1.0, %v3083_v1  ;;  %v5915_v61 = vld [vmem:[#allocation7 + $0xd8] sm:$0xf0]  ;;  %3627 = vmatpush.bf16.msrb.mxu1 %v5910_v56  ;;  %v5873_v50 = vld [vmem:[#allocation7 + $0x80] sm:$0xf] }
 0x8b9   :  { %v3075_v29 = vsel %vm3072_vm15, %v3074_v14, %v3070_v17  ;;  %v3098_v49 = vmul.f32 %v6935_v23, %v3056_v38  ;;  %v5918_v13 = vor.u32 %v6628_v60, %v5915_v61  ;;  %3640 = vmatpush.bf16.msrb.mxu2 %v5914_v63  ;;  %v6621_v1 = vld [vmem:[#allocation7 + $0x8c] sm:$0xf0]  ;;  %v6619_v14 = vld [vmem:[#allocation7 + $0x84] sm:$0xf]  ;;  %v5875_v23 = vld [vmem:[#allocation7 + $0x90] sm:$0xf0]  ;;  %v5842_v60 = vor.u32 %v6613_v30, %v5841_v32 }
 0x8ba   :  { %v3097_v45 = vmul.f32 %v3075_v29, %v8078_v0  ;;  %v3085_v39 = vmul.f32 %v6933_v11, %v3084_v31  ;;  %v5874_v33 = vor.u32 %v6621_v1, %v5873_v50  ;;  %v5881_v38 = vld [vmem:[#allocation7 + $0x88] sm:$0xf]  ;;  %v6622_v17 = vld [vmem:[#allocation7 + $0x94] sm:$0xf0]  ;;  %v5878_v31 = vor.u32 %v6619_v14, %v5875_v23  ;;  %v6611_v24 = vld [vmem:[#allocation7 + $0x44] sm:$0xf] }
 0x8bb   :  { %3653 = vmatpush.bf16.msra.mxu3 %v5918_v13  ;;  %v5882_v29 = vor.u32 %v6622_v17, %v5881_v38  ;;  %v5843_v61 = vld [vmem:[#allocation7 + $0x50] sm:$0xf0]  ;;  %v5849_v40 = vld [vmem:[#allocation7 + $0x48] sm:$0xf]  ;;  %v6614_v19 = vld [vmem:[#allocation7 + $0x54] sm:$0xf0] }
 0x8bc   :  { %v8096_v36 = vadd.f32 %v3098_v49, %v3097_v45  ;;  %v3086_v53 = vadd.f32 %v6933_v11, %v3085_v39  ;;  %3628 = vmatpush.bf16.msrb.mxu1 %v5894_v58  ;;  %v6620_v49 = vld [vmem:[#allocation7 + $0x8c] sm:$0xf]  ;;  %v5883_v45 = vld [vmem:[#allocation7 + $0x98] sm:$0xf0]  ;;  %3616 = vmatpush.bf16.msra.mxu0 %v5874_v33  ;;  %v8416_v13 = vld [vmem:[#allocation88_spill] sm:$0xff]  ;;  %v5846_v35 = vor.u32 %v6611_v24, %v5843_v61 }
 0x8bd   :  { %3641 = vmatpush.bf16.msrb.mxu2 %v5898_v48  ;;  %v8412_v39 = vld [vmem:[#allocation11_spill] sm:$0xff]  ;;  %v939_v21 = vadd.f32 %v8417_v16, %v8416_v13  ;;  %v5850_v48 = vor.u32 %v6614_v19, %v5849_v40  ;;  %v6607_v23 = vld [vmem:[#allocation7 + $0x24] sm:$0xf]  ;;  %v5827_v38 = vld [vmem:[#allocation7 + $0x30] sm:$0xf0] }
 0x8be   :  { %6936 = vtanh.f32 %v8096_v36  ;;  %v3090_v3 = vsel %vm3089_vm2, %v6933_v11, %v3086_v53  ;;  %v6624_v11 = vld [vmem:[#allocation7 + $0xac] sm:$0xf]  ;;  %v8413_v53 = vld [vmem:[#allocation41_spill] sm:$0xff]  ;;  %v5833_v17 = vld [vmem:[#allocation7 + $0x28] sm:$0xf] }
 0x8bf   :  { %v3095_v42 = vsel %vm3092_vm3, %v3094_v20, %v3090_v3  ;;  %v5902_v44 = vor.u32 %v6624_v11, %v5899_v4  ;;  %v645_v54 = vadd.f32 %v8413_v53, %v8412_v39  ;;  %v8415_v3 = vld [vmem:[#allocation30_spill] sm:$0xff]  ;;  %v6612_v43 = vld [vmem:[#allocation7 + $0x4c] sm:$0xf]  ;;  %v5851_v11 = vld [vmem:[#allocation7 + $0x58] sm:$0xf0] }
 0x8c0   :  { %v743_v20 = vadd.f32 %v8415_v3, %v8414_v34  ;;  %3629 = vmatpush.bf16.msrb.mxu1 %v5878_v31  ;;  %3617 = vmatpush.bf16.msra.mxu0 %v5858_v28  ;;  %v5825_v4 = vld [vmem:[#allocation7 + $0x20] sm:$0xf]  ;;  %v5854_v33 = vor.u32 %v6612_v43, %v5851_v11  ;;  %v5835_v39 = vld [vmem:[#allocation7 + $0x38] sm:$0xf0] }
 0x8c1   :  { %3654 = vmatpush.bf16.msra.mxu3 %v5902_v44  ;;  %3642 = vmatpush.bf16.msrb.mxu2 %v5882_v29  ;;  %v6609_v44 = vld [vmem:[#allocation7 + $0x2c] sm:$0xf0]  ;;  %v5830_v29 = vor.u32 %v6607_v23, %v5827_v38  ;;  %v5809_v3 = vld [vmem:[#allocation7] sm:$0xf]  ;;  %v5819_v28 = vld [vmem:[#allocation7 + $0x18] sm:$0xf0] }
 0x8c2   :  { %v5826_v31 = vor.u32 %v6609_v44, %v5825_v4 }
 0x8c4   :  { %v6937_v52 = vpop.eup %6936  ;;  %3630 = vmatpush.bf16.msrb.mxu1 %v5862_v10  ;;  %3618 = vmatpush.bf16.msra.mxu0 %v5842_v60 }
 0x8c5   :  { %v8099_v5 = vmul.f32 %v6937_v52, %v3095_v42  ;;  %v5886_v52 = vor.u32 %v6620_v49, %v5883_v45  ;;  %3643 = vmatpush.bf16.msrb.mxu2 %v5866_v6  ;;  %v6610_v49 = vld [vmem:[#allocation7 + $0x34] sm:$0xf0]  ;;  %v6608_v45 = vld [vmem:[#allocation7 + $0x2c] sm:$0xf] }
 0x8c6   :  { %v5838_v34 = vor.u32 %v6608_v45, %v5835_v39 }
 0x8c7   :  { %v3103_v0 = vpack.c.bf16 %v8099_v5, %v8099_v5  ;;  %3655 = vmatpush.bf16.msra.mxu3 %v5886_v52  ;;  %v6603_v52 = vld [vmem:[#allocation7 + $0x4] sm:$0xf] }
 0x8c8   :  { %3631 = vmatpush.bf16.msrb.mxu1 %v5846_v35  ;;  %3619 = vmatpush.bf16.msra.mxu0 %v5826_v31 }
 0x8c9   :  { %3304 = vmatmul.bf16.vlgmr.msrb.gmra.mxu0 %v3103_v0  ;;  %3317 = vmatmul.bf16.vlgmr.msra.gmra.mxu1 %v3103_v0 }
 0x8ca   :  { %3330 = vmatmul.bf16.vlgmr.msra.gmra.mxu2 %v3103_v0  ;;  %3343 = vmatmul.bf16.vlgmr.msrb.gmra.mxu3 %v3103_v0 }
 0x8cb   :  { %3656 = vmatpush.bf16.msra.mxu3 %v5870_v59  ;;  %3644 = vmatpush.bf16.msrb.mxu2 %v5850_v48  ;;  %v8419_v59 = vld [vmem:[#allocation87_spill] sm:$0xff] }
 0x8cc   :  { %3632 = vmatpush.bf16.msrb.mxu1 %v5830_v29 }
 0x8cf   :  { %3657 = vmatpush.bf16.msra.mxu3 %v5854_v33 }
 0x8d3   :  { %3658 = vmatpush.bf16.msra.mxu3 %v5838_v34 }
 0x946   :  { %v3305_v42 = vpop.f32.mrf.mxu0  ;;  %v3318_v0 = vpop.f32.mrf.mxu1 }
 0x947   :  { %v3348_v41 = vadd.f32 %v3305_v42, %v645_v54  ;;  %v3349_v15 = vadd.f32 %v3318_v0, %v743_v20  ;;  %v5834_v54 = vor.u32 %v6610_v49, %v5833_v17  ;;  %v6605_v20 = vld [vmem:[#allocation7 + $0xc] sm:$0xf0]  ;;  %v5811_v0 = vld [vmem:[#allocation7 + $0x10] sm:$0xf0] }
 0x948   :  { %v5810_v42 = vor.u32 %v6605_v20, %v5809_v3 }
 0x949   :  { %v3352_v26 = vadd.f32 %v3348_v41, %v8038_v25  ;;  %v3353_v8 = vadd.f32 %v3349_v15, %v8041_v18  ;;  %v5814_v41 = vor.u32 %v6603_v52, %v5811_v0  ;;  %v6604_v15 = vld [vmem:[#allocation7 + $0xc] sm:$0xf]  ;;  %3645 = vmatpush.bf16.msrb.mxu2 %v5834_v54 }
 0x94a   :  { %v5822_v6 = vor.u32 %v6604_v15, %v5819_v28  ;;  %3620 = vmatpush.bf16.msra.mxu0 %v5810_v42  ;;  %v6054_v28 = vld [vmem:[#allocation7 + $0xf0] sm:$0xf0] }
 0x94b   :  { %v5804_v56 = vmul.f32 -1.442695, %v3352_v26  ;;  %v5805_v63 = vmul.f32 -1.442695, %v3353_v8  ;;  %v8418_v8 = vld [vmem:[#allocation59_spill] sm:$0xff]  ;;  %3633 = vmatpush.bf16.msrb.mxu1 %v5814_v41 }
 0x94c   :  { %v841_v32 = vadd.f32 %v8419_v59, %v8418_v8  ;;  %3659 = vmatpush.bf16.msra.mxu3 %v5822_v6  ;;  %v6663_v41 = vld [vmem:[#allocation7 + $0xe4] sm:$0xf]  ;;  %v6664_v6 = vld [vmem:[#allocation7 + $0xec] sm:$0xf]  ;;  %v6661_v8 = vld [vmem:[#allocation7 + $0xcc] sm:$0xf0] }
 0x94d   :  { %6938 = vpow2.f32 %v5804_v56  ;;  %v3331_v51 = vpop.f32.mrf.mxu2  ;;  %v3344_v58 = vpop.f32.mrf.mxu3  ;;  %3646 = vmatpush.bf16.msrb.mxu2 %v5818_v7  ;;  %v6666_v7 = vld [vmem:[#allocation7 + $0xf4] sm:$0xf0]  ;;  %v6659_v59 = vld [vmem:[#allocation7 + $0xc4] sm:$0xf] }
 0x94e   :  { %6940 = vpow2.f32 %v5805_v63  ;;  %v3351_v50 = vadd.f32 %v3344_v58, %v939_v21  ;;  %v3307_v1 = vpop.f32.mrf.mxu0  ;;  %v3320_v14 = vpop.f32.mrf.mxu1  ;;  %v3350_v30 = vadd.f32 %v3331_v51, %v841_v32 }
 0x950   :  { %v3355_v53 = vadd.f32 %v3351_v50, %v8048_v12  ;;  %v3354_v60 = vadd.f32 %v3350_v30, %v8055_v2  ;;  %v6038_v30 = vld [vmem:[#allocation7 + $0xd0] sm:$0xf0] }
 0x952   :  { %v5806_v62 = vmul.f32 -1.442695, %v3355_v53 }
 0x953   :  { %v6939_v57 = vpop.eup %6938 }
 0x954   :  { %v6941_v37 = vpop.eup %6940  ;;  %v3359_v10 = vadd.f32 1.0, %v6939_v57  ;;  %6942 = vpow2.f32 %v5806_v62  ;;  %v6665_v62 = vld [vmem:[#allocation7 + $0xec] sm:$0xf0]  ;;  %v6060_v57 = vld [vmem:[#allocation7 + $0xe8] sm:$0xf] }
 0x955   :  { %v3378_v9 = vadd.f32 1.0, %v6941_v37  ;;  %v3333_v22 = vpop.f32.mrf.mxu2  ;;  %v3346_v26 = vpop.f32.mrf.mxu3  ;;  %v6053_v15 = vor.u32 %v6665_v62, %v6052_v46  ;;  %v6057_v37 = vor.u32 %v6663_v41, %v6054_v28  ;;  %v6647_v46 = vld [vmem:[#allocation7 + $0x64] sm:$0xf]  ;;  %v8422_v41 = vld [vmem:[#allocation47_spill] sm:$0xff] }
 0x956   :  { %6944 = vrcp.f32 %v3359_v10  ;;  %v3371_v40 = vand.u32 2147483648, %v3359_v10  ;;  %v3369_v58 = vand.u32 2147483647, %v3359_v10  ;;  %vm3365_vm6 = vweird.f32 %v3359_v10  ;;  %v6036_v26 = vld [vmem:[#allocation7 + $0xc0] sm:$0xf] }
 0x957   :  { %6946 = vrcp.f32 %v3378_v9  ;;  %v3390_v19 = vand.u32 2147483648, %v3378_v9  ;;  %v3388_v51 = vand.u32 2147483647, %v3378_v9  ;;  %vm3384_vm7 = vweird.f32 %v3378_v9  ;;  %3930 = vmatpush.bf16.msrb.mxu0 %v6053_v15  ;;  %3943 = vmatpush.bf16.msra.mxu1 %v6057_v37  ;;  %v6650_v37 = vld [vmem:[#allocation7 + $0x74] sm:$0xf0] }
 0x958   :  { %v3372_v44 = vor.u32 1.1754944e-38, %v3371_v40  ;;  %vm3370_vm10 = vcmp.eq.f32.partialorder %v3369_v58, 8.507059e+37  ;;  %v6037_v32 = vor.u32 %v6661_v8, %v6036_v26  ;;  %v6655_v40 = vld [vmem:[#allocation7 + $0xa4] sm:$0xf]  ;;  %v6028_v58 = vld [vmem:[#allocation7 + $0xa8] sm:$0xf] }
 0x959   :  { %v3391_v14 = vor.u32 1.1754944e-38, %v3390_v19  ;;  %vm3389_vm11 = vcmp.eq.f32.partialorder %v3388_v51, 8.507059e+37 }
 0x95a   :  { %v6943_v24 = vpop.eup %6942 }
 0x95b   :  { %v3398_v56 = vadd.f32 1.0, %v6943_v24  ;;  %v6044_v24 = vld [vmem:[#allocation7 + $0xc8] sm:$0xf]  ;;  %3931 = vmatpush.bf16.msrb.mxu0 %v6037_v32  ;;  %v5972_v32 = vld [vmem:[#allocation7 + $0x40] sm:$0xf] }
 0x95c   :  { %v6945_v63 = vpop.eup %6944 }
 0x95d   :  { %v6947_v61 = vpop.eup %6946  ;;  %v3361_v13 = vmul.f32 %v6945_v63, %v3359_v10  ;;  %6948 = vrcp.f32 %v3398_v56  ;;  %vm3366_vm4 = vweird.f32 %v6945_v63  ;;  %v3410_v34 = vand.u32 2147483648, %v3398_v56 }
 0x95e   :  { %v3380_v16 = vmul.f32 %v6947_v61, %v3378_v9  ;;  %6950 = vtanh.f32 %v3354_v60  ;;  %vm3385_vm5 = vweird.f32 %v6947_v61  ;;  %vm3367_vm8 = vmor %vm3365_vm6, %vm3366_vm4  ;;  %vm3404_vm13 = vweird.f32 %v3398_v56  ;;  %v6062_v9 = vld [vmem:[#allocation7 + $0xf8] sm:$0xf0] }
 0x95f   :  { %v3362_v21 = vsub.f32 1.0, %v3361_v13  ;;  %vm3386_vm9 = vmor %vm3384_vm7, %vm3385_vm5  ;;  %v3408_v3 = vand.u32 2147483647, %v3398_v56  ;;  %v3411_v52 = vor.u32 1.1754944e-38, %v3410_v34  ;;  %v6061_v10 = vor.u32 %v6666_v7, %v6060_v57  ;;  %v6046_v13 = vld [vmem:[#allocation7 + $0xd8] sm:$0xf0] }
 0x960   :  { %v3381_v35 = vsub.f32 1.0, %v3380_v16  ;;  %v6065_v22 = vor.u32 %v6664_v6, %v6062_v9  ;;  %v8421_v34 = vld [vmem:[#allocation45_spill] sm:$0xff]  ;;  %v5990_v57 = vld [vmem:[#allocation7 + $0x70] sm:$0xf0]  ;;  %v5996_v7 = vld [vmem:[#allocation7 + $0x68] sm:$0xf] }
 0x961   :  { %v3363_v43 = vmul.f32 %v6945_v63, %v3362_v21  ;;  %vm3409_vm15 = vcmp.eq.f32.partialorder %v3408_v3, 8.507059e+37  ;;  %3956 = vmatpush.bf16.msra.mxu2 %v6061_v10  ;;  %v6020_v21 = vld [vmem:[#allocation7 + $0xa0] sm:$0xf]  ;;  %v5993_v10 = vor.u32 %v6647_v46, %v5990_v57  ;;  %v5997_v6 = vor.u32 %v6650_v37, %v5996_v7  ;;  %v6648_v9 = vld [vmem:[#allocation7 + $0x6c] sm:$0xf] }
 0x962   :  { %v3382_v48 = vmul.f32 %v6947_v61, %v3381_v35  ;;  %3969 = vmatpush.bf16.msrb.mxu3 %v6065_v22  ;;  %v6657_v35 = vld [vmem:[#allocation7 + $0xac] sm:$0xf0]  ;;  %v5998_v22 = vld [vmem:[#allocation7 + $0x78] sm:$0xf0] }
 0x963   :  { %v6949_v11 = vpop.eup %6948  ;;  %v3364_v4 = vadd.f32 %v6945_v63, %v3363_v43  ;;  %v6021_v19 = vor.u32 %v6657_v35, %v6020_v21  ;;  %v6022_v43 = vld [vmem:[#allocation7 + $0xb0] sm:$0xf0]  ;;  %v6646_v21 = vld [vmem:[#allocation7 + $0x54] sm:$0xf0]  ;;  %v6644_v35 = vld [vmem:[#allocation7 + $0x4c] sm:$0xf] }
 0x964   :  { %v3383_v50 = vadd.f32 %v6947_v61, %v3382_v48  ;;  %v3400_v1 = vmul.f32 %v6949_v11, %v3398_v56  ;;  %v6951_v23 = vpop.eup %6950  ;;  %vm3405_vm12 = vweird.f32 %v6949_v11  ;;  %v6662_v56 = vld [vmem:[#allocation7 + $0xd4] sm:$0xf0]  ;;  %v6025_v51 = vor.u32 %v6655_v40, %v6022_v43 }
 0x965   :  { %v3368_v33 = vsel %vm3367_vm8, %v6945_v63, %v3364_v4  ;;  %vm3406_vm14 = vmor %vm3404_vm13, %vm3405_vm12  ;;  %v6041_v63 = vor.u32 %v6659_v59, %v6038_v30  ;;  %v6045_v60 = vor.u32 %v6662_v56, %v6044_v24  ;;  %v6658_v48 = vld [vmem:[#allocation7 + $0xb4] sm:$0xf0]  ;;  %v6656_v4 = vld [vmem:[#allocation7 + $0xac] sm:$0xf]  ;;  %3932 = vmatpush.bf16.msrb.mxu0 %v6021_v19  ;;  %v6001_v59 = vor.u32 %v6648_v9, %v5998_v22 }
 0x966   :  { %v3373_v38 = vsel %vm3370_vm10, %v3372_v44, %v3368_v33  ;;  %v3387_v17 = vsel %vm3386_vm9, %v6947_v61, %v3383_v50  ;;  %v3401_v31 = vsub.f32 1.0, %v3400_v1  ;;  %v6660_v61 = vld [vmem:[#allocation7 + $0xcc] sm:$0xf]  ;;  %v6030_v44 = vld [vmem:[#allocation7 + $0xb8] sm:$0xf0] }
 0x967   :  { %v3392_v29 = vsel %vm3389_vm11, %v3391_v14, %v3387_v17  ;;  %v3415_v49 = vmul.f32 %v6951_v23, %v3373_v38  ;;  %v6049_v16 = vor.u32 %v6660_v61, %v6046_v13  ;;  %3944 = vmatpush.bf16.msra.mxu1 %v6041_v63  ;;  %3957 = vmatpush.bf16.msra.mxu2 %v6045_v60  ;;  %v6004_v1 = vld [vmem:[#allocation7 + $0x80] sm:$0xf]  ;;  %v6653_v14 = vld [vmem:[#allocation7 + $0x8c] sm:$0xf0]  ;;  %v6651_v33 = vld [vmem:[#allocation7 + $0x84] sm:$0xf] }
 0x968   :  { %v3414_v45 = vmul.f32 %v3392_v29, %v8096_v36  ;;  %v3402_v39 = vmul.f32 %v6949_v11, %v3401_v31  ;;  %v6033_v50 = vor.u32 %v6656_v4, %v6030_v44  ;;  %v6005_v23 = vor.u32 %v6653_v14, %v6004_v1  ;;  %v6006_v38 = vld [vmem:[#allocation7 + $0x90] sm:$0xf0]  ;;  %v6012_v17 = vld [vmem:[#allocation7 + $0x88] sm:$0xf]  ;;  %v6654_v31 = vld [vmem:[#allocation7 + $0x94] sm:$0xf0] }
 0x969   :  { %3970 = vmatpush.bf16.msrb.mxu3 %v6049_v16  ;;  %v6009_v29 = vor.u32 %v6651_v33, %v6006_v38  ;;  %v6645_v30 = vld [vmem:[#allocation7 + $0x4c] sm:$0xf0]  ;;  %v6643_v24 = vld [vmem:[#allocation7 + $0x44] sm:$0xf]  ;;  %v5974_v61 = vld [vmem:[#allocation7 + $0x50] sm:$0xf0] }
 0x96a   :  { %v8116_v53 = vadd.f32 %v3415_v49, %v3414_v45  ;;  %v3403_v54 = vadd.f32 %v6949_v11, %v3402_v39  ;;  %v6013_v49 = vor.u32 %v6654_v31, %v6012_v17  ;;  %v6652_v45 = vld [vmem:[#allocation7 + $0x8c] sm:$0xf]  ;;  %v6014_v39 = vld [vmem:[#allocation7 + $0x98] sm:$0xf0]  ;;  %3933 = vmatpush.bf16.msrb.mxu0 %v6005_v23  ;;  %v5973_v60 = vor.u32 %v6645_v30, %v5972_v32  ;;  %v5980_v16 = vld [vmem:[#allocation7 + $0x48] sm:$0xf] }
 0x96b   :  { %3945 = vmatpush.bf16.msra.mxu1 %v6025_v51  ;;  %v5977_v13 = vor.u32 %v6643_v24, %v5974_v61  ;;  %v5981_v43 = vor.u32 %v6646_v21, %v5980_v16  ;;  %v6641_v51 = vld [vmem:[#allocation7 + $0x2c] sm:$0xf0]  ;;  %v6639_v14 = vld [vmem:[#allocation7 + $0x24] sm:$0xf]  ;;  %v5958_v33 = vld [vmem:[#allocation7 + $0x30] sm:$0xf0] }
 0x96c   :  { %6952 = vtanh.f32 %v8116_v53  ;;  %v3407_v20 = vsel %vm3406_vm14, %v6949_v11, %v3403_v54  ;;  %v6029_v11 = vor.u32 %v6658_v48, %v6028_v58  ;;  %v8420_v54 = vld [vmem:[#allocation13_spill] sm:$0xff]  ;;  %v5956_v48 = vld [vmem:[#allocation7 + $0x20] sm:$0xf]  ;;  %v5964_v23 = vld [vmem:[#allocation7 + $0x28] sm:$0xf]  ;;  %v5961_v17 = vor.u32 %v6639_v14, %v5958_v33 }
 0x96d   :  { %v3412_v0 = vsel %vm3409_vm15, %v3411_v52, %v3407_v20  ;;  %3971 = vmatpush.bf16.msrb.mxu3 %v6033_v50  ;;  %v648_v3 = vadd.f32 %v8421_v34, %v8420_v54  ;;  %v6017_v20 = vor.u32 %v6652_v45, %v6014_v39  ;;  %v5982_v58 = vld [vmem:[#allocation7 + $0x58] sm:$0xf0]  ;;  %v5957_v38 = vor.u32 %v6641_v51, %v5956_v48  ;;  %v6642_v31 = vld [vmem:[#allocation7 + $0x34] sm:$0xf0]  ;;  %v5940_v34 = vld [vmem:[#allocation7] sm:$0xf] }
 0x96e   :  { %3958 = vmatpush.bf16.msra.mxu2 %v6029_v11  ;;  %v8423_v11 = vld [vmem:[#allocation91_spill] sm:$0xff]  ;;  %v5985_v1 = vor.u32 %v6644_v35, %v5982_v58  ;;  %v5965_v39 = vor.u32 %v6642_v31, %v5964_v23 }
 0x96f   :  { %3946 = vmatpush.bf16.msra.mxu1 %v6009_v29  ;;  %v6640_v29 = vld [vmem:[#allocation7 + $0x2c] sm:$0xf] }
 0x971   :  { %3972 = vmatpush.bf16.msrb.mxu3 %v6017_v20  ;;  %v6635_v20 = vld [vmem:[#allocation7 + $0x4] sm:$0xf] }
 0x972   :  { %v6953_v42 = vpop.eup %6952  ;;  %3959 = vmatpush.bf16.msra.mxu2 %v6013_v49  ;;  %v5966_v49 = vld [vmem:[#allocation7 + $0x38] sm:$0xf0] }
 0x973   :  { %v8119_v27 = vmul.f32 %v6953_v42, %v3412_v0  ;;  %v5988_v0 = vld [vmem:[#allocation7 + $0x60] sm:$0xf]  ;;  %3947 = vmatpush.bf16.msra.mxu1 %v5993_v10  ;;  %v5969_v54 = vor.u32 %v6640_v29, %v5966_v49 }
 0x975   :  { %v3420_v36 = vpack.c.bf16 %v8119_v27, %v8119_v27  ;;  %3973 = vmatpush.bf16.msrb.mxu3 %v6001_v59 }
 0x976   :  { %3960 = vmatpush.bf16.msra.mxu2 %v5997_v6 }
 0x977   :  { %3621 = vmatmul.bf16.vlgmr.msra.gmra.mxu0 %v3420_v36  ;;  %3634 = vmatmul.bf16.vlgmr.msrb.gmra.mxu1 %v3420_v36 }
 0x978   :  { %3647 = vmatmul.bf16.vlgmr.msrb.gmra.mxu2 %v3420_v36  ;;  %3660 = vmatmul.bf16.vlgmr.msra.gmra.mxu3 %v3420_v36  ;;  %v6649_v36 = vld [vmem:[#allocation7 + $0x6c] sm:$0xf0] }
 0x979   :  { %v5989_v28 = vor.u32 %v6649_v36, %v5988_v0  ;;  %3948 = vmatpush.bf16.msra.mxu1 %v5977_v13  ;;  %3974 = vmatpush.bf16.msrb.mxu3 %v5985_v1  ;;  %v5948_v0 = vld [vmem:[#allocation7 + $0x8] sm:$0xf]  ;;  %v6638_v36 = vld [vmem:[#allocation7 + $0x14] sm:$0xf0] }
 0x97a   :  { %3961 = vmatpush.bf16.msra.mxu2 %v5981_v43  ;;  %v5949_v57 = vor.u32 %v6638_v36, %v5948_v0 }
 0x97b   :  { %3934 = vmatpush.bf16.msrb.mxu0 %v5989_v28 }
 0x97d   :  { %3949 = vmatpush.bf16.msra.mxu1 %v5961_v17  ;;  %3975 = vmatpush.bf16.msrb.mxu3 %v5969_v54 }
 0x97e   :  { %3962 = vmatpush.bf16.msra.mxu2 %v5965_v39 }
 0x97f   :  { %3935 = vmatpush.bf16.msrb.mxu0 %v5973_v60 }
 0x982   :  { %3963 = vmatpush.bf16.msra.mxu2 %v5949_v57  ;;  %v6191_v57 = vld [vmem:[#allocation7 + $0xe8] sm:$0xf] }
 0x983   :  { %3936 = vmatpush.bf16.msrb.mxu0 %v5957_v38 }
 0x9f4   :  { %v3622_v52 = vpop.f32.mrf.mxu0  ;;  %v3635_v42 = vpop.f32.mrf.mxu1 }
 0x9f5   :  { %v3665_v62 = vadd.f32 %v3622_v52, %v648_v3  ;;  %v3666_v15 = vadd.f32 %v3635_v42, %v8422_v41  ;;  %v6637_v3 = vld [vmem:[#allocation7 + $0xc] sm:$0xf0]  ;;  %v5942_v42 = vld [vmem:[#allocation7 + $0x10] sm:$0xf0]  ;;  %v6636_v41 = vld [vmem:[#allocation7 + $0xc] sm:$0xf] }
 0x9f6   :  { %v5941_v52 = vor.u32 %v6637_v3, %v5940_v34 }
 0x9f7   :  { %v3669_v26 = vadd.f32 %v3665_v62, %v8038_v25  ;;  %v3670_v8 = vadd.f32 %v3666_v15, %v8041_v18  ;;  %v5945_v62 = vor.u32 %v6635_v20, %v5942_v42  ;;  %v5950_v15 = vld [vmem:[#allocation7 + $0x18] sm:$0xf0] }
 0x9f8   :  { %v5953_v10 = vor.u32 %v6636_v41, %v5950_v15  ;;  %3937 = vmatpush.bf16.msrb.mxu0 %v5941_v52  ;;  %v6695_v41 = vld [vmem:[#allocation7 + $0xe4] sm:$0xf] }
 0x9f9   :  { %v5935_v56 = vmul.f32 -1.442695, %v3669_v26  ;;  %v5936_v63 = vmul.f32 -1.442695, %v3670_v8  ;;  %v8424_v26 = vld [vmem:[#allocation61_spill] sm:$0xff]  ;;  %v8425_v8 = vld [vmem:[#allocation90_spill] sm:$0xff]  ;;  %3950 = vmatpush.bf16.msra.mxu1 %v5945_v62 }
 0x9fa   :  { %v844_v59 = vadd.f32 %v8425_v8, %v8424_v26  ;;  %3976 = vmatpush.bf16.msrb.mxu3 %v5953_v10  ;;  %v6697_v62 = vld [vmem:[#allocation7 + $0xec] sm:$0xf0]  ;;  %v6167_v26 = vld [vmem:[#allocation7 + $0xc0] sm:$0xf] }
 0x9fb   :  { %6954 = vpow2.f32 %v5935_v56  ;;  %v3648_v40 = vpop.f32.mrf.mxu2  ;;  %v3661_v19 = vpop.f32.mrf.mxu3  ;;  %v6693_v8 = vld [vmem:[#allocation7 + $0xcc] sm:$0xf0] }
 0x9fc   :  { %6956 = vpow2.f32 %v5936_v63  ;;  %v3668_v4 = vadd.f32 %v3661_v19, %v8423_v11  ;;  %v3624_v44 = vpop.f32.mrf.mxu0  ;;  %v3637_v50 = vpop.f32.mrf.mxu1  ;;  %v3667_v32 = vadd.f32 %v3648_v40, %v844_v59  ;;  %v6691_v59 = vld [vmem:[#allocation7 + $0xc4] sm:$0xf] }
 0x9fe   :  { %v3672_v45 = vadd.f32 %v3668_v4, %v8048_v12  ;;  %v3671_v63 = vadd.f32 %v3667_v32, %v8055_v2  ;;  %v6168_v32 = vor.u32 %v6693_v8, %v6167_v26  ;;  %v6680_v8 = vld [vmem:[#allocation7 + $0x6c] sm:$0xf] }
 0xa00   :  { %v5937_v46 = vmul.f32 -1.442695, %v3672_v45 }
 0xa01   :  { %v6955_v28 = vpop.eup %6954 }
 0xa02   :  { %v6957_v7 = vpop.eup %6956  ;;  %v3676_v37 = vadd.f32 1.0, %v6955_v28  ;;  %6958 = vpow2.f32 %v5937_v46  ;;  %v6183_v46 = vld [vmem:[#allocation7 + $0xe0] sm:$0xf]  ;;  %v6185_v28 = vld [vmem:[#allocation7 + $0xf0] sm:$0xf0] }
 0xa03   :  { %v3695_v6 = vadd.f32 1.0, %v6957_v7  ;;  %v3650_v9 = vpop.f32.mrf.mxu2  ;;  %v3663_v22 = vpop.f32.mrf.mxu3  ;;  %v6184_v15 = vor.u32 %v6697_v62, %v6183_v46  ;;  %v6698_v7 = vld [vmem:[#allocation7 + $0xf4] sm:$0xf0] }
 0xa04   :  { %6960 = vrcp.f32 %v3676_v37  ;;  %v3688_v35 = vand.u32 2147483648, %v3676_v37  ;;  %v3686_v58 = vand.u32 2147483647, %v3676_v37  ;;  %vm3682_vm2 = vweird.f32 %v3676_v37  ;;  %v6193_v9 = vld [vmem:[#allocation7 + $0xf8] sm:$0xf0] }
 0xa05   :  { %6962 = vrcp.f32 %v3695_v6  ;;  %v3707_v19 = vand.u32 2147483648, %v3695_v6  ;;  %v3705_v40 = vand.u32 2147483647, %v3695_v6  ;;  %vm3701_vm3 = vweird.f32 %v3695_v6  ;;  %4247 = vmatpush.bf16.msra.mxu0 %v6184_v15  ;;  %v6681_v15 = vld [vmem:[#allocation7 + $0x6c] sm:$0xf0] }
 0xa06   :  { %v3689_v4 = vor.u32 1.1754944e-38, %v3688_v35  ;;  %vm3687_vm6 = vcmp.eq.f32.partialorder %v3686_v58, 8.507059e+37  ;;  %v6192_v10 = vor.u32 %v6698_v7, %v6191_v57  ;;  %v6689_v35 = vld [vmem:[#allocation7 + $0xac] sm:$0xf0]  ;;  %v6153_v58 = vld [vmem:[#allocation7 + $0xb0] sm:$0xf0] }
 0xa07   :  { %v3708_v1 = vor.u32 1.1754944e-38, %v3707_v19  ;;  %vm3706_vm7 = vcmp.eq.f32.partialorder %v3705_v40, 8.507059e+37  ;;  %v6687_v19 = vld [vmem:[#allocation7 + $0xa4] sm:$0xf]  ;;  %v6690_v40 = vld [vmem:[#allocation7 + $0xb4] sm:$0xf0] }
 0xa08   :  { %v6959_v30 = vpop.eup %6958  ;;  %4273 = vmatpush.bf16.msrb.mxu2 %v6192_v10  ;;  %v6121_v10 = vld [vmem:[#allocation7 + $0x70] sm:$0xf0] }
 0xa09   :  { %v3715_v24 = vadd.f32 1.0, %v6959_v30  ;;  %v6169_v30 = vld [vmem:[#allocation7 + $0xd0] sm:$0xf0]  ;;  %4248 = vmatpush.bf16.msra.mxu0 %v6168_v32 }
 0xa0a   :  { %v6961_v56 = vpop.eup %6960 }
 0xa0b   :  { %v6963_v60 = vpop.eup %6962  ;;  %v3678_v61 = vmul.f32 %v6961_v56, %v3676_v37  ;;  %6964 = vrcp.f32 %v3715_v24  ;;  %vm3683_vm0 = vweird.f32 %v6961_v56  ;;  %v3727_v34 = vand.u32 2147483648, %v3715_v24 }
 0xa0c   :  { %v3697_v13 = vmul.f32 %v6963_v60, %v3695_v6  ;;  %6966 = vtanh.f32 %v3671_v63  ;;  %vm3702_vm1 = vweird.f32 %v6963_v60  ;;  %vm3684_vm4 = vmor %vm3682_vm2, %vm3683_vm0  ;;  %vm3721_vm9 = vweird.f32 %v3715_v24  ;;  %v6696_v6 = vld [vmem:[#allocation7 + $0xec] sm:$0xf] }
 0xa0d   :  { %v3679_v16 = vsub.f32 1.0, %v3678_v61  ;;  %vm3703_vm5 = vmor %vm3701_vm3, %vm3702_vm1  ;;  %v3725_v3 = vand.u32 2147483647, %v3715_v24  ;;  %v3728_v52 = vor.u32 1.1754944e-38, %v3727_v34  ;;  %v6188_v37 = vor.u32 %v6695_v41, %v6185_v28  ;;  %v6692_v61 = vld [vmem:[#allocation7 + $0xcc] sm:$0xf] }
 0xa0e   :  { %v3698_v21 = vsub.f32 1.0, %v3697_v13  ;;  %v6196_v22 = vor.u32 %v6696_v6, %v6193_v9  ;;  %v6172_v63 = vor.u32 %v6691_v59, %v6169_v30  ;;  %v6177_v13 = vld [vmem:[#allocation7 + $0xd8] sm:$0xf0]  ;;  %v8426_v34 = vld [vmem:[#allocation14_spill] sm:$0xff]  ;;  %v6127_v6 = vld [vmem:[#allocation7 + $0x68] sm:$0xf] }
 0xa0f   :  { %v3680_v43 = vmul.f32 %v6961_v56, %v3679_v16  ;;  %vm3726_vm11 = vcmp.eq.f32.partialorder %v3725_v3, 8.507059e+37  ;;  %4260 = vmatpush.bf16.msrb.mxu1 %v6188_v37  ;;  %v6180_v16 = vor.u32 %v6692_v61, %v6177_v13  ;;  %v8427_v3 = vld [vmem:[#allocation48_spill] sm:$0xff]  ;;  %v6119_v41 = vld [vmem:[#allocation7 + $0x60] sm:$0xf]  ;;  %v6679_v28 = vld [vmem:[#allocation7 + $0x64] sm:$0xf] }
 0xa10   :  { %v3699_v48 = vmul.f32 %v6963_v60, %v3698_v21  ;;  %4286 = vmatpush.bf16.msra.mxu3 %v6196_v22  ;;  %v6151_v21 = vld [vmem:[#allocation7 + $0xa0] sm:$0xf]  ;;  %v6120_v37 = vor.u32 %v6681_v15, %v6119_v41  ;;  %v6682_v9 = vld [vmem:[#allocation7 + $0x74] sm:$0xf0]  ;;  %v6124_v22 = vor.u32 %v6679_v28, %v6121_v10  ;;  %v6129_v59 = vld [vmem:[#allocation7 + $0x78] sm:$0xf0] }
 0xa11   :  { %v6965_v51 = vpop.eup %6964  ;;  %v3681_v11 = vadd.f32 %v6961_v56, %v3680_v43  ;;  %v6152_v43 = vor.u32 %v6689_v35, %v6151_v21  ;;  %v6128_v26 = vor.u32 %v6682_v9, %v6127_v6  ;;  %v6105_v21 = vld [vmem:[#allocation7 + $0x50] sm:$0xf0]  ;;  %v8430_v35 = vld [vmem:[#allocation93_spill] sm:$0xff]  ;;  %v6079_v28 = vld [vmem:[#allocation7 + $0x8] sm:$0xf] }
 0xa12   :  { %v3700_v44 = vadd.f32 %v6963_v60, %v3699_v48  ;;  %v3717_v50 = vmul.f32 %v6965_v51, %v3715_v24  ;;  %v6967_v33 = vpop.eup %6966  ;;  %vm3722_vm8 = vweird.f32 %v6965_v51  ;;  %v6175_v24 = vld [vmem:[#allocation7 + $0xc8] sm:$0xf]  ;;  %v6073_v15 = vld [vmem:[#allocation7 + $0x10] sm:$0xf0]  ;;  %v6668_v10 = vld [vmem:[#allocation7 + $0xc] sm:$0xf] }
 0xa13   :  { %v3685_v14 = vsel %vm3684_vm4, %v6961_v56, %v3681_v11  ;;  %vm3723_vm10 = vmor %vm3721_vm9, %vm3722_vm8  ;;  %v6694_v56 = vld [vmem:[#allocation7 + $0xd4] sm:$0xf0]  ;;  %4261 = vmatpush.bf16.msrb.mxu1 %v6172_v63  ;;  %v6159_v48 = vld [vmem:[#allocation7 + $0xa8] sm:$0xf]  ;;  %4249 = vmatpush.bf16.msra.mxu0 %v6152_v43 }
 0xa14   :  { %v3690_v23 = vsel %vm3687_vm6, %v3689_v4, %v3685_v14  ;;  %v3704_v38 = vsel %vm3703_vm5, %v6963_v60, %v3700_v44  ;;  %v3718_v17 = vsub.f32 1.0, %v3717_v50  ;;  %v6176_v60 = vor.u32 %v6694_v56, %v6175_v24  ;;  %4287 = vmatpush.bf16.msra.mxu3 %v6180_v16  ;;  %v6688_v4 = vld [vmem:[#allocation7 + $0xac] sm:$0xf]  ;;  %v6161_v44 = vld [vmem:[#allocation7 + $0xb8] sm:$0xf0] }
 0xa15   :  { %v3709_v31 = vsel %vm3706_vm7, %v3708_v1, %v3704_v38  ;;  %v3732_v29 = vmul.f32 %v6967_v33, %v3690_v23  ;;  %v6160_v11 = vor.u32 %v6690_v40, %v6159_v48  ;;  %v6164_v50 = vor.u32 %v6688_v4, %v6161_v44  ;;  %v6135_v1 = vld [vmem:[#allocation7 + $0x80] sm:$0xf]  ;;  %v6685_v14 = vld [vmem:[#allocation7 + $0x8c] sm:$0xf0]  ;;  %v6683_v33 = vld [vmem:[#allocation7 + $0x84] sm:$0xf] }
 0xa16   :  { %v3731_v49 = vmul.f32 %v3709_v31, %v8116_v53  ;;  %v3719_v45 = vmul.f32 %v6965_v51, %v3718_v17  ;;  %4274 = vmatpush.bf16.msrb.mxu2 %v6176_v60  ;;  %v6136_v23 = vor.u32 %v6685_v14, %v6135_v1  ;;  %v6137_v38 = vld [vmem:[#allocation7 + $0x90] sm:$0xf0]  ;;  %v6143_v17 = vld [vmem:[#allocation7 + $0x88] sm:$0xf]  ;;  %v6686_v31 = vld [vmem:[#allocation7 + $0x94] sm:$0xf0]  ;;  %v6132_v24 = vor.u32 %v6680_v8, %v6129_v59 }
 0xa17   :  { %v6103_v56 = vld [vmem:[#allocation7 + $0x40] sm:$0xf]  ;;  %v6677_v63 = vld [vmem:[#allocation7 + $0x4c] sm:$0xf0]  ;;  %v6675_v60 = vld [vmem:[#allocation7 + $0x44] sm:$0xf] }
 0xa18   :  { %v8134_v39 = vadd.f32 %v3732_v29, %v3731_v49  ;;  %v3720_v54 = vadd.f32 %v6965_v51, %v3719_v45  ;;  %4288 = vmatpush.bf16.msra.mxu3 %v6164_v50  ;;  %v6140_v29 = vor.u32 %v6683_v33, %v6137_v38  ;;  %v6144_v49 = vor.u32 %v6686_v31, %v6143_v17  ;;  %v6684_v45 = vld [vmem:[#allocation7 + $0x8c] sm:$0xf]  ;;  %v6111_v48 = vld [vmem:[#allocation7 + $0x48] sm:$0xf]  ;;  %v6678_v40 = vld [vmem:[#allocation7 + $0x54] sm:$0xf0] }
 0xa19   :  { %4250 = vmatpush.bf16.msra.mxu0 %v6136_v23  ;;  %v6104_v16 = vor.u32 %v6677_v63, %v6103_v56  ;;  %v6112_v44 = vor.u32 %v6678_v40, %v6111_v48  ;;  %v6113_v50 = vld [vmem:[#allocation7 + $0x58] sm:$0xf0]  ;;  %v6087_v1 = vld [vmem:[#allocation7 + $0x20] sm:$0xf]  ;;  %v6673_v14 = vld [vmem:[#allocation7 + $0x2c] sm:$0xf0] }
 0xa1a   :  { %6968 = vtanh.f32 %v8134_v39  ;;  %v3724_v20 = vsel %vm3723_vm10, %v6965_v51, %v3720_v54  ;;  %v6156_v51 = vor.u32 %v6687_v19, %v6153_v58  ;;  %4275 = vmatpush.bf16.msrb.mxu2 %v6160_v11  ;;  %v6145_v54 = vld [vmem:[#allocation7 + $0x98] sm:$0xf0]  ;;  %v8431_v19 = vld [vmem:[#allocation84_spill] sm:$0xff]  ;;  %v6108_v58 = vor.u32 %v6675_v60, %v6105_v21  ;;  %v6671_v31 = vld [vmem:[#allocation7 + $0x24] sm:$0xf] }
 0xa1b   :  { %v3729_v0 = vsel %vm3726_vm11, %v3728_v52, %v3724_v20  ;;  %v650_v20 = vadd.f32 %v8427_v3, %v8426_v34  ;;  %v8428_v52 = vld [vmem:[#allocation50_spill] sm:$0xff]  ;;  %v944_v43 = vadd.f32 %v8431_v19, %v8430_v35  ;;  %v6674_v34 = vld [vmem:[#allocation7 + $0x34] sm:$0xf0]  ;;  %v6672_v3 = vld [vmem:[#allocation7 + $0x2c] sm:$0xf] }
 0xa1c   :  { %4262 = vmatpush.bf16.msrb.mxu1 %v6156_v51  ;;  %v6676_v51 = vld [vmem:[#allocation7 + $0x4c] sm:$0xf]  ;;  %v6081_v6 = vld [vmem:[#allocation7 + $0x18] sm:$0xf0]  ;;  %v8432_v56 = vld [vmem:[#allocation64_spill] sm:$0xff] }
 0xa1d   :  { %4251 = vmatpush.bf16.msra.mxu0 %v6120_v37  ;;  %v6116_v17 = vor.u32 %v6676_v51, %v6113_v50  ;;  %v6084_v59 = vor.u32 %v6668_v10, %v6081_v6  ;;  %v8433_v63 = vld [vmem:[#allocation92_spill] sm:$0xff] }
 0xa1e   :  { %4276 = vmatpush.bf16.msrb.mxu2 %v6144_v49  ;;  %v6095_v49 = vld [vmem:[#allocation7 + $0x28] sm:$0xf]  ;;  %v846_v60 = vadd.f32 %v8433_v63, %v8432_v56  ;;  %v6729_v10 = vld [vmem:[#allocation7 + $0xec] sm:$0xf0]  ;;  %v6727_v63 = vld [vmem:[#allocation7 + $0xe4] sm:$0xf] }
 0xa20   :  { %v6969_v42 = vpop.eup %6968  ;;  %4263 = vmatpush.bf16.msrb.mxu1 %v6140_v29  ;;  %v6089_v29 = vld [vmem:[#allocation7 + $0x30] sm:$0xf0] }
 0xa21   :  { %v8137_v36 = vmul.f32 %v6969_v42, %v3729_v0  ;;  %v8429_v42 = vld [vmem:[#allocation37_spill] sm:$0xff]  ;;  %4252 = vmatpush.bf16.msra.mxu0 %v6104_v16 }
 0xa22   :  { %v748_v0 = vadd.f32 %v8429_v42, %v8428_v52  ;;  %4277 = vmatpush.bf16.msrb.mxu2 %v6128_v26  ;;  %v6096_v42 = vor.u32 %v6674_v34, %v6095_v49 }
 0xa23   :  { %v3737_v53 = vpack.c.bf16 %v8137_v36, %v8137_v36 }
 0xa24   :  { %4264 = vmatpush.bf16.msrb.mxu1 %v6124_v22 }
 0xa25   :  { %3938 = vmatmul.bf16.vlgmr.msrb.gmra.mxu0 %v3737_v53  ;;  %3951 = vmatmul.bf16.vlgmr.msra.gmra.mxu1 %v3737_v53 }
 0xa26   :  { %3964 = vmatmul.bf16.vlgmr.msra.gmra.mxu2 %v3737_v53  ;;  %3977 = vmatmul.bf16.vlgmr.msrb.gmra.mxu3 %v3737_v53  ;;  %v6148_v53 = vor.u32 %v6684_v45, %v6145_v54  ;;  %v6088_v45 = vor.u32 %v6673_v14, %v6087_v1  ;;  %v6092_v54 = vor.u32 %v6671_v31, %v6089_v29 }
 0xa27   :  { %4278 = vmatpush.bf16.msrb.mxu2 %v6112_v44 }
 0xa28   :  { %4289 = vmatpush.bf16.msra.mxu3 %v6148_v53  ;;  %4265 = vmatpush.bf16.msrb.mxu1 %v6108_v58  ;;  %v6071_v53 = vld [vmem:[#allocation7] sm:$0xf] }
 0xa29   :  { %4253 = vmatpush.bf16.msra.mxu0 %v6088_v45 }
 0xa2b   :  { %4279 = vmatpush.bf16.msrb.mxu2 %v6096_v42 }
 0xa2c   :  { %4290 = vmatpush.bf16.msra.mxu3 %v6132_v24  ;;  %4266 = vmatpush.bf16.msrb.mxu1 %v6092_v54 }
 0xa30   :  { %4291 = vmatpush.bf16.msra.mxu3 %v6116_v17 }
 0xaa2   :  { %v3939_v46 = vpop.f32.mrf.mxu0  ;;  %v3952_v62 = vpop.f32.mrf.mxu1 }
 0xaa3   :  { %v3982_v57 = vadd.f32 %v3939_v46, %v650_v20  ;;  %v3983_v7 = vadd.f32 %v3952_v62, %v748_v0  ;;  %v6097_v20 = vld [vmem:[#allocation7 + $0x38] sm:$0xf0]  ;;  %v6669_v46 = vld [vmem:[#allocation7 + $0xc] sm:$0xf0]  ;;  %v6667_v62 = vld [vmem:[#allocation7 + $0x4] sm:$0xf] }
 0xaa4   :  { %v6100_v0 = vor.u32 %v6672_v3, %v6097_v20  ;;  %v6072_v41 = vor.u32 %v6669_v46, %v6071_v53  ;;  %v6076_v37 = vor.u32 %v6667_v62, %v6073_v15 }
 0xaa5   :  { %v3986_v32 = vadd.f32 %v3982_v57, %v8038_v25  ;;  %v3987_v30 = vadd.f32 %v3983_v7, %v8041_v18  ;;  %v6670_v57 = vld [vmem:[#allocation7 + $0x14] sm:$0xf0] }
 0xaa6   :  { %v6080_v22 = vor.u32 %v6670_v57, %v6079_v28  ;;  %4292 = vmatpush.bf16.msra.mxu3 %v6100_v0  ;;  %4254 = vmatpush.bf16.msra.mxu0 %v6072_v41 }
 0xaa7   :  { %v6066_v61 = vmul.f32 -1.442695, %v3986_v32  ;;  %v6067_v13 = vmul.f32 -1.442695, %v3987_v30  ;;  %4267 = vmatpush.bf16.msrb.mxu1 %v6076_v37  ;;  %v6314_v37 = vld [vmem:[#allocation7 + $0xe0] sm:$0xf] }
 0xaa8   :  { %4280 = vmatpush.bf16.msrb.mxu2 %v6080_v22  ;;  %v6315_v6 = vor.u32 %v6729_v10, %v6314_v37  ;;  %v6725_v22 = vld [vmem:[#allocation7 + $0xcc] sm:$0xf0]  ;;  %v6716_v37 = vld [vmem:[#allocation7 + $0x8c] sm:$0xf]  ;;  %v6276_v10 = vld [vmem:[#allocation7 + $0x98] sm:$0xf0] }
 0xaa9   :  { %6970 = vpow2.f32 %v6066_v61  ;;  %v3965_v11 = vpop.f32.mrf.mxu2  ;;  %v3978_v4 = vpop.f32.mrf.mxu3 }
 0xaaa   :  { %6972 = vpow2.f32 %v6067_v13  ;;  %v3985_v33 = vadd.f32 %v3978_v4, %v944_v43  ;;  %v3941_v23 = vpop.f32.mrf.mxu0  ;;  %v3954_v38 = vpop.f32.mrf.mxu1  ;;  %v3984_v61 = vadd.f32 %v3965_v11, %v846_v60  ;;  %4293 = vmatpush.bf16.msra.mxu3 %v6084_v59  ;;  %4564 = vmatpush.bf16.msrb.mxu0 %v6315_v6  ;;  %v6721_v59 = vld [vmem:[#allocation7 + $0xac] sm:$0xf0]  ;;  %v6316_v60 = vld [vmem:[#allocation7 + $0xf0] sm:$0xf0] }
 0xaac   :  { %v3989_v52 = vadd.f32 %v3985_v33, %v8048_v12  ;;  %v3988_v35 = vadd.f32 %v3984_v61, %v8055_v2  ;;  %v6322_v61 = vld [vmem:[#allocation7 + $0xe8] sm:$0xf] }
 0xaae   :  { %v6068_v7 = vmul.f32 -1.442695, %v3989_v52 }
 0xaaf   :  { %v6971_v9 = vpop.eup %6970 }
 0xab0   :  { %v6973_v26 = vpop.eup %6972  ;;  %v3993_v8 = vadd.f32 1.0, %v6971_v9  ;;  %6974 = vpow2.f32 %v6068_v7  ;;  %v6298_v9 = vld [vmem:[#allocation7 + $0xc0] sm:$0xf] }
 0xab1   :  { %v4012_v32 = vadd.f32 1.0, %v6973_v26  ;;  %v3967_v30 = vpop.f32.mrf.mxu2  ;;  %v3980_v24 = vpop.f32.mrf.mxu3  ;;  %v6299_v26 = vor.u32 %v6725_v22, %v6298_v9  ;;  %v6279_v9 = vor.u32 %v6716_v37, %v6276_v10  ;;  %v8434_v22 = vld [vmem:[#allocation12_spill] sm:$0xff]  ;;  %v6736_v10 = vld [vmem:[%s8266_s6 + $0x28] sm:$0xff] }
 0xab2   :  { %6976 = vrcp.f32 %v3993_v8  ;;  %v4005_v51 = vand.u32 2147483648, %v3993_v8  ;;  %v4003_v50 = vand.u32 2147483647, %v3993_v8  ;;  %vm3999_vm14 = vweird.f32 %v3993_v8  ;;  %v6266_v30 = vld [vmem:[#allocation7 + $0x80] sm:$0xf] }
 0xab3   :  { %6978 = vrcp.f32 %v4012_v32  ;;  %v4024_v4 = vand.u32 2147483648, %v4012_v32  ;;  %v4022_v11 = vand.u32 2147483647, %v4012_v32  ;;  %vm4018_vm15 = vweird.f32 %v4012_v32  ;;  %4565 = vmatpush.bf16.msrb.mxu0 %v6299_v26  ;;  %v6717_v24 = vld [vmem:[#allocation7 + $0x8c] sm:$0xf0]  ;;  %v8435_v26 = vld [vmem:[#allocation51_spill] sm:$0xff] }
 0xab4   :  { %v4006_v23 = vor.u32 1.1754944e-38, %v4005_v51  ;;  %vm4004_vm2 = vcmp.eq.f32.partialorder %v4003_v50, 8.507059e+37  ;;  %v6267_v56 = vor.u32 %v6717_v24, %v6266_v30  ;;  %v6723_v51 = vld [vmem:[#allocation7 + $0xc4] sm:$0xf] }
 0xab5   :  { %v4025_v31 = vor.u32 1.1754944e-38, %v4024_v4  ;;  %vm4023_vm3 = vcmp.eq.f32.partialorder %v4022_v11, 8.507059e+37  ;;  %v6300_v4 = vld [vmem:[#allocation7 + $0xd0] sm:$0xf0]  ;;  %v6724_v11 = vld [vmem:[#allocation7 + $0xcc] sm:$0xf] }
 0xab6   :  { %v6975_v13 = vpop.eup %6974  ;;  %v6303_v50 = vor.u32 %v6723_v51, %v6300_v4  ;;  %v6738_v51 = vld [vmem:[%s8266_s6 + $0x38] sm:$0xff] }
 0xab7   :  { %v4032_v16 = vadd.f32 1.0, %v6975_v13  ;;  %v6319_v13 = vor.u32 %v6727_v63, %v6316_v60  ;;  %v6711_v63 = vld [vmem:[#allocation7 + $0x64] sm:$0xf]  ;;  %v6252_v60 = vld [vmem:[#allocation7 + $0x70] sm:$0xf0] }
 0xab8   :  { %v6977_v21 = vpop.eup %6976 }
 0xab9   :  { %v6979_v19 = vpop.eup %6978  ;;  %v3995_v43 = vmul.f32 %v6977_v21, %v3993_v8  ;;  %6980 = vrcp.f32 %v4032_v16  ;;  %vm4000_vm12 = vweird.f32 %v6977_v21  ;;  %v4044_v46 = vand.u32 2147483648, %v4032_v16  ;;  %v6282_v8 = vld [vmem:[#allocation7 + $0xa0] sm:$0xf]  ;;  %4577 = vmatpush.bf16.msra.mxu1 %v6319_v13 }
 0xaba   :  { %v4014_v58 = vmul.f32 %v6979_v19, %v4012_v32  ;;  %6982 = vtanh.f32 %v3988_v35  ;;  %vm4019_vm13 = vweird.f32 %v6979_v19  ;;  %vm4001_vm0 = vmor %vm3999_vm14, %vm4000_vm12  ;;  %vm4038_vm5 = vweird.f32 %v4032_v16  ;;  %v6324_v35 = vld [vmem:[#allocation7 + $0xf8] sm:$0xf0] }
 0xabb   :  { %v3996_v48 = vsub.f32 1.0, %v3995_v43  ;;  %vm4020_vm1 = vmor %vm4018_vm15, %vm4019_vm13  ;;  %v4042_v62 = vand.u32 2147483647, %v4032_v16  ;;  %v4045_v15 = vor.u32 1.1754944e-38, %v4044_v46  ;;  %v6283_v32 = vor.u32 %v6721_v59, %v6282_v8  ;;  %v6705_v46 = vld [vmem:[#allocation7 + $0x2c] sm:$0xf0] }
 0xabc   :  { %v4015_v40 = vsub.f32 1.0, %v4014_v58  ;;  %v6250_v58 = vld [vmem:[#allocation7 + $0x60] sm:$0xf]  ;;  %v653_v8 = vadd.f32 %v8435_v26, %v8434_v22  ;;  %v6210_v26 = vld [vmem:[#allocation7 + $0x8] sm:$0xf] }
 0xabd   :  { %v3997_v44 = vmul.f32 %v6977_v21, %v3996_v48  ;;  %vm4043_vm7 = vcmp.eq.f32.partialorder %v4042_v62, 8.507059e+37  ;;  %4566 = vmatpush.bf16.msrb.mxu0 %v6283_v32  ;;  %v6713_v48 = vld [vmem:[#allocation7 + $0x6c] sm:$0xf0]  ;;  %4578 = vmatpush.bf16.msra.mxu1 %v6303_v50  ;;  %v6202_v59 = vld [vmem:[#allocation7] sm:$0xf] }
 0xabe   :  { %v4016_v1 = vmul.f32 %v6979_v19, %v4015_v40  ;;  %v6251_v40 = vor.u32 %v6713_v48, %v6250_v58  ;;  %v6701_v32 = vld [vmem:[#allocation7 + $0xc] sm:$0xf0]  ;;  %v6260_v58 = vld [vmem:[#allocation7 + $0x78] sm:$0xf0]  ;;  %v6707_v50 = vld [vmem:[#allocation7 + $0x44] sm:$0xf] }
 0xabf   :  { %v6981_v14 = vpop.eup %6980  ;;  %v3998_v33 = vadd.f32 %v6977_v21, %v3997_v44  ;;  %v6306_v44 = vld [vmem:[#allocation7 + $0xc8] sm:$0xf] }
 0xac0   :  { %v4017_v38 = vadd.f32 %v6979_v19, %v4016_v1  ;;  %v4034_v17 = vmul.f32 %v6981_v14, %v4032_v16  ;;  %v6983_v49 = vpop.eup %6982  ;;  %vm4039_vm4 = vweird.f32 %v6981_v14  ;;  %v6730_v16 = vld [vmem:[#allocation7 + $0xf4] sm:$0xf0] }
 0xac1   :  { %v4002_v29 = vsel %vm4001_vm0, %v6977_v21, %v3998_v33  ;;  %vm4040_vm6 = vmor %vm4038_vm5, %vm4039_vm4  ;;  %v6728_v21 = vld [vmem:[#allocation7 + $0xec] sm:$0xf]  ;;  %4567 = vmatpush.bf16.msrb.mxu0 %v6267_v56  ;;  %v6726_v1 = vld [vmem:[#allocation7 + $0xd4] sm:$0xf0]  ;;  %v6203_v56 = vor.u32 %v6701_v32, %v6202_v59 }
 0xac2   :  { %v4007_v45 = vsel %vm4004_vm2, %v4006_v23, %v4002_v29  ;;  %v4021_v54 = vsel %vm4020_vm1, %v6979_v19, %v4017_v38  ;;  %v4035_v34 = vsub.f32 1.0, %v4034_v17  ;;  %v6323_v19 = vor.u32 %v6730_v16, %v6322_v61  ;;  %v6234_v38 = vld [vmem:[#allocation7 + $0x40] sm:$0xf]  ;;  %v6709_v17 = vld [vmem:[#allocation7 + $0x4c] sm:$0xf0]  ;;  %v8436_v16 = vld [vmem:[#allocation53_spill] sm:$0xff] }
 0xac3   :  { %v4026_v3 = vsel %vm4023_vm3, %v4025_v31, %v4021_v54  ;;  %v4049_v20 = vmul.f32 %v6983_v49, %v4007_v45  ;;  %v6327_v43 = vor.u32 %v6728_v21, %v6324_v35  ;;  %v6307_v33 = vor.u32 %v6726_v1, %v6306_v44  ;;  %v6719_v29 = vld [vmem:[#allocation7 + $0xa4] sm:$0xf]  ;;  %v6284_v49 = vld [vmem:[#allocation7 + $0xb0] sm:$0xf0]  ;;  %v6290_v45 = vld [vmem:[#allocation7 + $0xa8] sm:$0xf] }
 0xac4   :  { %v4048_v52 = vmul.f32 %v4026_v3, %v8134_v39  ;;  %v4036_v42 = vmul.f32 %v6981_v14, %v4035_v34  ;;  %4590 = vmatpush.bf16.msra.mxu2 %v6323_v19  ;;  %v6235_v31 = vor.u32 %v6709_v17, %v6234_v38  ;;  %v6287_v54 = vor.u32 %v6719_v29, %v6284_v49  ;;  %v6722_v34 = vld [vmem:[#allocation7 + $0xb4] sm:$0xf0]  ;;  %v6720_v3 = vld [vmem:[#allocation7 + $0xac] sm:$0xf]  ;;  %v6258_v61 = vld [vmem:[#allocation7 + $0x68] sm:$0xf] }
 0xac5   :  { %4603 = vmatpush.bf16.msrb.mxu3 %v6327_v43  ;;  %4568 = vmatpush.bf16.msrb.mxu0 %v6251_v40  ;;  %v6255_v35 = vor.u32 %v6711_v63, %v6252_v60  ;;  %v6714_v19 = vld [vmem:[#allocation7 + $0x74] sm:$0xf0]  ;;  %v6712_v43 = vld [vmem:[#allocation7 + $0x6c] sm:$0xf]  ;;  %v6236_v1 = vld [vmem:[#allocation7 + $0x50] sm:$0xf0] }
 0xac6   :  { %v8154_v0 = vadd.f32 %v4049_v20, %v4048_v52  ;;  %v4037_v53 = vadd.f32 %v6981_v14, %v4036_v42  ;;  %v6292_v20 = vld [vmem:[#allocation7 + $0xb8] sm:$0xf0]  ;;  %v6291_v52 = vor.u32 %v6722_v34, %v6290_v45  ;;  %4579 = vmatpush.bf16.msra.mxu1 %v6287_v54  ;;  %v6259_v48 = vor.u32 %v6714_v19, %v6258_v61  ;;  %v6710_v38 = vld [vmem:[#allocation7 + $0x54] sm:$0xf0]  ;;  %v6737_v49 = vld [vmem:[%s8266_s6 + $0x30] sm:$0xff] }
 0xac7   :  { %v6295_v42 = vor.u32 %v6720_v3, %v6292_v20  ;;  %v6263_v40 = vor.u32 %v6712_v43, %v6260_v58  ;;  %v6244_v29 = vld [vmem:[#allocation7 + $0x58] sm:$0xf0]  ;;  %v6703_v3 = vld [vmem:[#allocation7 + $0x24] sm:$0xf]  ;;  %v6220_v20 = vld [vmem:[#allocation7 + $0x30] sm:$0xf0] }
 0xac8   :  { %6984 = vtanh.f32 %v8154_v0  ;;  %v4041_v41 = vsel %vm4040_vm6, %v6981_v14, %v4037_v53  ;;  %v6308_v14 = vld [vmem:[#allocation7 + $0xd8] sm:$0xf0]  ;;  %4591 = vmatpush.bf16.msra.mxu2 %v6307_v33  ;;  %v6218_v53 = vld [vmem:[#allocation7 + $0x20] sm:$0xf]  ;;  %v6700_v59 = vld [vmem:[#allocation7 + $0xc] sm:$0xf] }
 0xac9   :  { %v4046_v57 = vsel %vm4043_vm7, %v4045_v15, %v4041_v41  ;;  %v6311_v23 = vor.u32 %v6724_v11, %v6308_v14  ;;  %4569 = vmatpush.bf16.msrb.mxu0 %v6235_v31  ;;  %v6219_v62 = vor.u32 %v6705_v46, %v6218_v53  ;;  %v6715_v41 = vld [vmem:[#allocation7 + $0x84] sm:$0xf]  ;;  %v6268_v15 = vld [vmem:[#allocation7 + $0x90] sm:$0xf0]  ;;  %v6242_v11 = vld [vmem:[#allocation7 + $0x48] sm:$0xf] }
 0xaca   :  { %v6243_v17 = vor.u32 %v6710_v38, %v6242_v11  ;;  %v6708_v31 = vld [vmem:[#allocation7 + $0x4c] sm:$0xf]  ;;  %v6735_v61 = vld [vmem:[%s8266_s6 + $0x20] sm:$0xff]  ;;  %v8438_v43 = vld [vmem:[#allocation68_spill] sm:$0xff] }
 0xacb   :  { %4604 = vmatpush.bf16.msrb.mxu3 %v6311_v23  ;;  %v6239_v23 = vor.u32 %v6707_v50, %v6236_v1  ;;  %v6247_v34 = vor.u32 %v6708_v31, %v6244_v29  ;;  %v8439_v58 = vld [vmem:[#allocation94_spill] sm:$0xff]  ;;  %v6733_v50 = vld [vmem:[%s8266_s6 + $0x10] sm:$0xff] }
 0xacc   :  { %4592 = vmatpush.bf16.msra.mxu2 %v6291_v52  ;;  %v6226_v52 = vld [vmem:[#allocation7 + $0x28] sm:$0xf] }
 0xacd   :  { %4570 = vmatpush.bf16.msrb.mxu0 %v6219_v62 }
 0xace   :  { %v6985_v28 = vpop.eup %6984 }
 0xacf   :  { %v8157_v7 = vmul.f32 %v6985_v28, %v4046_v57  ;;  %4605 = vmatpush.bf16.msrb.mxu3 %v6295_v42  ;;  %v6274_v28 = vld [vmem:[#allocation7 + $0x88] sm:$0xf]  ;;  %v6271_v57 = vor.u32 %v6715_v41, %v6268_v15  ;;  %v6223_v41 = vor.u32 %v6703_v3, %v6220_v20  ;;  %v6706_v15 = vld [vmem:[#allocation7 + $0x34] sm:$0xf0] }
 0xad0   :  { %v8437_v42 = vld [vmem:[#allocation95_spill] sm:$0xff] }
 0xad1   :  { %v4054_v39 = vpack.c.bf16 %v8157_v7, %v8157_v7  ;;  %4580 = vmatpush.bf16.msra.mxu1 %v6271_v57  ;;  %4571 = vmatpush.bf16.msrb.mxu0 %v6203_v56  ;;  %v6228_v57 = vld [vmem:[#allocation7 + $0x38] sm:$0xf0] }
 0xad3   :  { %4255 = vmatmul.bf16.vlgmr.msra.gmra.mxu0 %v4054_v39  ;;  %4268 = vmatmul.bf16.vlgmr.msrb.gmra.mxu1 %v4054_v39 }
 0xad4   :  { %4281 = vmatmul.bf16.vlgmr.msrb.gmra.mxu2 %v4054_v39  ;;  %4294 = vmatmul.bf16.vlgmr.msra.gmra.mxu3 %v4054_v39  ;;  %v6718_v39 = vld [vmem:[#allocation7 + $0x94] sm:$0xf0] }
 0xad5   :  { %v6275_v6 = vor.u32 %v6718_v39, %v6274_v28  ;;  %4606 = vmatpush.bf16.msrb.mxu3 %v6279_v9  ;;  %4581 = vmatpush.bf16.msra.mxu1 %v6255_v35  ;;  %v6704_v28 = vld [vmem:[#allocation7 + $0x2c] sm:$0xf]  ;;  %v6227_v39 = vor.u32 %v6706_v15, %v6226_v52  ;;  %v6204_v9 = vld [vmem:[#allocation7 + $0x10] sm:$0xf0] }
 0xad6   :  { %4768 = vmatpush.bf16.msra.mxu0 %v6738_v51  ;;  %v6231_v37 = vor.u32 %v6704_v28, %v6228_v57 }
 0xad7   :  { %4593 = vmatpush.bf16.msra.mxu2 %v6275_v6  ;;  %v6699_v6 = vld [vmem:[#allocation7 + $0x4] sm:$0xf] }
 0xad8   :  { %v6207_v32 = vor.u32 %v6699_v6, %v6204_v9 }
 0xad9   :  { %4607 = vmatpush.bf16.msrb.mxu3 %v6263_v40  ;;  %4582 = vmatpush.bf16.msra.mxu1 %v6239_v23  ;;  %v6734_v40 = vld [vmem:[%s8266_s6 + $0x18] sm:$0xff] }
 0xada   :  { %4769 = vmatpush.bf16.msra.mxu0 %v6737_v49 }
 0xadb   :  { %4594 = vmatpush.bf16.msra.mxu2 %v6259_v48  ;;  %v849_v48 = vadd.f32 %v8439_v58, %v8438_v43  ;;  %v8442_v43 = vld [vmem:[#allocation56_spill] sm:$0xff] }
 0xadc   :  { %v8443_v58 = vld [vmem:[#allocation44_spill] sm:$0xff] }
 0xadd   :  { %4608 = vmatpush.bf16.msrb.mxu3 %v6247_v34  ;;  %4583 = vmatpush.bf16.msra.mxu1 %v6223_v41 }
 0xade   :  { %4770 = vmatpush.bf16.msra.mxu0 %v6736_v10 }
 0xadf   :  { %4595 = vmatpush.bf16.msra.mxu2 %v6243_v17  ;;  %v6732_v17 = vld [vmem:[%s8266_s6 + $0x8] sm:$0xff] }
 0xae1   :  { %4609 = vmatpush.bf16.msrb.mxu3 %v6231_v37  ;;  %4584 = vmatpush.bf16.msra.mxu1 %v6207_v32 }
 0xae2   :  { %4771 = vmatpush.bf16.msra.mxu0 %v6735_v61  ;;  %v4696_v61 = vpack.c.bf16 %v8081_v55, %v8062_v47 }
 0xae3   :  { %4596 = vmatpush.bf16.msra.mxu2 %v6227_v39 }
 0xae6   :  { %4772 = vmatpush.bf16.msra.mxu0 %v6734_v40 }
 0xaea   :  { %4773 = vmatpush.bf16.msra.mxu0 %v6733_v50  ;;  %v8444_v50 = vld [vmem:[#allocation97_spill] sm:$0xff] }
 0xaee   :  { %4774 = vmatpush.bf16.msra.mxu0 %v6732_v17 }
 0xb50   :  { %v4256_v30 = vpop.f32.mrf.mxu0  ;;  %v4269_v24 = vpop.f32.mrf.mxu1 }
 0xb51   :  { %v4299_v13 = vadd.f32 %v4256_v30, %v653_v8  ;;  %v4300_v21 = vadd.f32 %v4269_v24, %v8436_v16  ;;  %v6702_v8 = vld [vmem:[#allocation7 + $0x14] sm:$0xf0]  ;;  %v6212_v30 = vld [vmem:[#allocation7 + $0x18] sm:$0xf0] }
 0xb52   :  { %v6211_v56 = vor.u32 %v6702_v8, %v6210_v26  ;;  %v6215_v60 = vor.u32 %v6700_v59, %v6212_v30 }
 0xb53   :  { %v4303_v4 = vadd.f32 %v4299_v13, %v8038_v25  ;;  %v4304_v44 = vadd.f32 %v4300_v21, %v8041_v18 }
 0xb54   :  { %4597 = vmatpush.bf16.msra.mxu2 %v6211_v56  ;;  %4610 = vmatpush.bf16.msrb.mxu3 %v6215_v60 }
 0xb55   :  { %v6197_v14 = vmul.f32 -1.442695, %v4303_v4  ;;  %v6198_v33 = vmul.f32 -1.442695, %v4304_v44 }
 0xb57   :  { %6986 = vpow2.f32 %v6197_v14  ;;  %v4282_v45 = vpop.f32.mrf.mxu2  ;;  %v4295_v54 = vpop.f32.mrf.mxu3 }
 0xb58   :  { %6988 = vpow2.f32 %v6198_v33  ;;  %v4302_v53 = vadd.f32 %v4295_v54, %v8437_v42  ;;  %v4258_v46 = vpop.f32.mrf.mxu0  ;;  %v4271_v62 = vpop.f32.mrf.mxu1  ;;  %v4301_v51 = vadd.f32 %v4282_v45, %v849_v48  ;;  %v6731_v42 = vld [vmem:[%s8266_s6] sm:$0xff]  ;;  %v753_v48 = vadd.f32 %v8443_v58, %v8442_v43 }
 0xb59   :  { %4775 = vmatpush.bf16.msra.mxu0 %v6731_v42 }
 0xb5a   :  { %v4306_v22 = vadd.f32 %v4302_v53, %v8048_v12  ;;  %v4305_v11 = vadd.f32 %v4301_v51, %v8055_v2 }
 0xb5c   :  { %v6199_v24 = vmul.f32 -1.442695, %v4306_v22 }
 0xb5d   :  { %v6987_v63 = vpop.eup %6986 }
 0xb5e   :  { %v6989_v13 = vpop.eup %6988  ;;  %v4310_v16 = vadd.f32 1.0, %v6987_v63  ;;  %6990 = vpow2.f32 %v6199_v24 }
 0xb5f   :  { %v4329_v21 = vadd.f32 1.0, %v6989_v13  ;;  %v4284_v35 = vpop.f32.mrf.mxu2  ;;  %v4297_v19 = vpop.f32.mrf.mxu3  ;;  %v4697_v13 = vpack.c.bf16 %v8119_v27, %v8099_v5 }
 0xb60   :  { %6992 = vrcp.f32 %v4310_v16  ;;  %v4322_v29 = vand.u32 2147483648, %v4310_v16  ;;  %v4320_v54 = vand.u32 2147483647, %v4310_v16  ;;  %vm4316_vm10 = vweird.f32 %v4310_v16  ;;  %v8441_v35 = vld [vmem:[#allocation54_spill] sm:$0xff] }
 0xb61   :  { %6994 = vrcp.f32 %v4329_v21  ;;  %v4341_v49 = vand.u32 2147483648, %v4329_v21  ;;  %v4339_v3 = vand.u32 2147483647, %v4329_v21  ;;  %vm4335_vm11 = vweird.f32 %v4329_v21 }
 0xb62   :  { %v4323_v53 = vor.u32 1.1754944e-38, %v4322_v29  ;;  %vm4321_vm14 = vcmp.eq.f32.partialorder %v4320_v54, 8.507059e+37 }
 0xb63   :  { %v4342_v41 = vor.u32 1.1754944e-38, %v4341_v49  ;;  %vm4340_vm15 = vcmp.eq.f32.partialorder %v4339_v3, 8.507059e+37  ;;  %v8447_v3 = vld [vmem:[#allocation96_spill] sm:$0xff] }
 0xb64   :  { %v6991_v4 = vpop.eup %6990 }
 0xb65   :  { %v4349_v44 = vadd.f32 1.0, %v6991_v4 }
 0xb66   :  { %v6993_v1 = vpop.eup %6992 }
 0xb67   :  { %v6995_v14 = vpop.eup %6994  ;;  %v4312_v33 = vmul.f32 %v6993_v1, %v4310_v16  ;;  %6996 = vrcp.f32 %v4349_v44  ;;  %vm4317_vm8 = vweird.f32 %v6993_v1  ;;  %v4361_v59 = vand.u32 2147483648, %v4349_v44 }
 0xb68   :  { %v4331_v23 = vmul.f32 %v6995_v14, %v4329_v21  ;;  %6998 = vtanh.f32 %v4305_v11  ;;  %vm4336_vm9 = vweird.f32 %v6995_v14  ;;  %vm4318_vm12 = vmor %vm4316_vm10, %vm4317_vm8  ;;  %vm4355_vm1 = vweird.f32 %v4349_v44  ;;  %v8440_v21 = vld [vmem:[#allocation15_spill] sm:$0xff] }
 0xb69   :  { %v4313_v38 = vsub.f32 1.0, %v4312_v33  ;;  %vm4337_vm13 = vmor %vm4335_vm11, %vm4336_vm9  ;;  %v4359_v32 = vand.u32 2147483647, %v4349_v44  ;;  %v4362_v24 = vor.u32 1.1754944e-38, %v4361_v59  ;;  %v4698_v16 = vpack.c.bf16 %v8157_v7, %v8137_v36 }
 0xb6a   :  { %v4332_v31 = vsub.f32 1.0, %v4331_v23  ;;  %v655_v19 = vadd.f32 %v8441_v35, %v8440_v21 }
 0xb6b   :  { %v4314_v45 = vmul.f32 %v6993_v1, %v4313_v38  ;;  %vm4360_vm3 = vcmp.eq.f32.partialorder %v4359_v32, 8.507059e+37 }
 0xb6c   :  { %v4333_v34 = vmul.f32 %v6995_v14, %v4332_v31 }
 0xb6d   :  { %v6997_v20 = vpop.eup %6996  ;;  %v4315_v52 = vadd.f32 %v6993_v1, %v4314_v45 }
 0xb6e   :  { %v4334_v46 = vadd.f32 %v6995_v14, %v4333_v34  ;;  %v4351_v62 = vmul.f32 %v6997_v20, %v4349_v44  ;;  %v6999_v28 = vpop.eup %6998  ;;  %vm4356_vm0 = vweird.f32 %v6997_v20  ;;  %v8446_v34 = vld [vmem:[#allocation71_spill] sm:$0xff] }
 0xb6f   :  { %v4319_v15 = vsel %vm4318_vm12, %v6993_v1, %v4315_v52  ;;  %vm4357_vm2 = vmor %vm4355_vm1, %vm4356_vm0  ;;  %v8445_v1 = vld [vmem:[#allocation89_spill] sm:$0xff] }
 0xb70   :  { %v4324_v57 = vsel %vm4321_vm14, %v4323_v53, %v4319_v15  ;;  %v4338_v39 = vsel %vm4337_vm13, %v6995_v14, %v4334_v46  ;;  %v4352_v37 = vsub.f32 1.0, %v4351_v62  ;;  %v949_v36 = vadd.f32 %v8445_v1, %v8444_v50 }
 0xb71   :  { %v4343_v10 = vsel %vm4340_vm15, %v4342_v41, %v4338_v39  ;;  %v4366_v6 = vmul.f32 %v6999_v28, %v4324_v57 }
 0xb72   :  { %v4365_v9 = vmul.f32 %v4343_v10, %v8154_v0  ;;  %v4353_v22 = vmul.f32 %v6997_v20, %v4352_v37 }
 0xb74   :  { %v8196_v26 = vadd.f32 %v4366_v6, %v4365_v9  ;;  %v4354_v8 = vadd.f32 %v6997_v20, %v4353_v22 }
 0xb76   :  { %7000 = vtanh.f32 %v8196_v26  ;;  %v4358_v30 = vsel %vm4357_vm2, %v6997_v20, %v4354_v8  ;;  %v851_v20 = vadd.f32 %v8447_v3, %v8446_v34 }
 0xb77   :  { %v4363_v63 = vsel %vm4360_vm3, %v4362_v24, %v4358_v30 }
 0xb7c   :  { %v7001_v56 = vpop.eup %7000 }
 0xb7d   :  { %v8199_v60 = vmul.f32 %v7001_v56, %v4363_v63 }
 0xb7f   :  { %v4371_v0 = vpack.c.bf16 %v8199_v60, %v8199_v60 }
 0xb81   :  { %4572 = vmatmul.bf16.vlgmr.msrb.gmra.mxu0 %v4371_v0  ;;  %4585 = vmatmul.bf16.vlgmr.msra.gmra.mxu1 %v4371_v0 }
 0xb82   :  { %4598 = vmatmul.bf16.vlgmr.msra.gmra.mxu2 %v4371_v0  ;;  %4611 = vmatmul.bf16.vlgmr.msrb.gmra.mxu3 %v4371_v0 }
 0xb91   :  { %4776 = vmatmul.bf16.vlgmr.msra.gmra.mxu0 %v4696_v61 }
 0xba1   :  { %4781 = vmatmul.bf16.gmra.mxu0 %v4697_v13 }
 0xbb1   :  { %4786 = vmatmul.bf16.gmra.mxu0 %v4698_v16 }
 0xbfe   :  { %v4573_v40 = vpop.f32.mrf.mxu0  ;;  %v4586_v51 = vpop.f32.mrf.mxu1 }
 0xbff   :  { %v4616_v4 = vadd.f32 %v4573_v40, %v655_v19  ;;  %v4617_v44 = vadd.f32 %v4586_v51, %v753_v48 }
 0xc01   :  { %v4620_v47 = vadd.f32 %v4616_v4, %v8038_v25  ;;  %v4621_v55 = vadd.f32 %v4617_v44, %v8041_v18  ;;  %v8221_v18 = vld [vmem:[%s8267_s7] ss:$0 sm:$0xff] }
 0xc03   :  { %v6328_v5 = vmul.f32 -1.442695, %v4620_v47  ;;  %v6329_v27 = vmul.f32 -1.442695, %v4621_v55 }
 0xc05   :  { %7002 = vpow2.f32 %v6328_v5  ;;  %v4599_v7 = vpop.f32.mrf.mxu2  ;;  %v4612_v11 = vpop.f32.mrf.mxu3 }
 0xc06   :  { %7004 = vpow2.f32 %v6329_v27  ;;  %v4619_v14 = vadd.f32 %v4612_v11, %v949_v36  ;;  %v4575_v33 = vpop.f32.mrf.mxu0  ;;  %v4588_v23 = vpop.f32.mrf.mxu1 }
 0xc08   :  { %v4623_v38 = vadd.f32 %v4619_v14, %v8048_v12  ;;  %v4618_v12 = vadd.f32 %v4599_v7, %v851_v20 }
 0xc0a   :  { %v6330_v17 = vmul.f32 -1.442695, %v4623_v38  ;;  %v4622_v41 = vadd.f32 %v4618_v12, %v8055_v2 }
 0xc0b   :  { %v7003_v31 = vpop.eup %7002 }
 0xc0c   :  { %v7005_v29 = vpop.eup %7004  ;;  %v4627_v25 = vadd.f32 1.0, %v7003_v31  ;;  %7006 = vpow2.f32 %v6330_v17 }
 0xc0d   :  { %v4646_v49 = vadd.f32 1.0, %v7005_v29  ;;  %v4601_v45 = vpop.f32.mrf.mxu2  ;;  %v4614_v54 = vpop.f32.mrf.mxu3 }
 0xc0e   :  { %7008 = vrcp.f32 %v4627_v25  ;;  %v4777_v52 = vpop.f32.mrf.mxu0  ;;  %v4639_v9 = vand.u32 2147483648, %v4627_v25  ;;  %v4637_v59 = vand.u32 2147483647, %v4627_v25  ;;  %vm4633_vm6 = vweird.f32 %v4627_v25 }
 0xc0f   :  { %7010 = vrcp.f32 %v4646_v49  ;;  %v4778_v42 = vadd.f32 %v8221_v18, %v4777_v52  ;;  %v4658_v22 = vand.u32 2147483648, %v4646_v49  ;;  %v4656_v32 = vand.u32 2147483647, %v4646_v49 }
 0xc10   :  { %vm4652_vm7 = vweird.f32 %v4646_v49  ;;  %v4640_v56 = vor.u32 1.1754944e-38, %v4639_v9  ;;  %vm4638_vm10 = vcmp.eq.f32.partialorder %v4637_v59, 8.507059e+37 }
 0xc11   :  { %4797 = vst [vmem:[%s8268_s8] sm:$0xff] %v4778_v42  ;;  %v4659_v61 = vor.u32 1.1754944e-38, %v4658_v22  ;;  %vm4657_vm11 = vcmp.eq.f32.partialorder %v4656_v32, 8.507059e+37 }
 0xc12   :  { %v7007_v53 = vpop.eup %7006 }
 0xc13   :  { %v4666_v46 = vadd.f32 1.0, %v7007_v53 }
 0xc14   :  { %v7009_v62 = vpop.eup %7008 }
 0xc15   :  { %v7011_v15 = vpop.eup %7010  ;;  %v4629_v28 = vmul.f32 %v7009_v62, %v4627_v25  ;;  %7012 = vrcp.f32 %v4666_v46  ;;  %vm4634_vm4 = vweird.f32 %v7009_v62  ;;  %v4678_v55 = vand.u32 2147483648, %v4666_v46 }
 0xc16   :  { %v4648_v57 = vmul.f32 %v7011_v15, %v4646_v49  ;;  %v4779_v39 = vpop.f32.mrf.mxu0  ;;  %7014 = vtanh.f32 %v4622_v41  ;;  %vm4653_vm5 = vweird.f32 %v7011_v15  ;;  %vm4635_vm8 = vmor %vm4633_vm6, %vm4634_vm4  ;;  %vm4672_vm13 = vweird.f32 %v4666_v46 }
 0xc17   :  { %v4630_v37 = vsub.f32 1.0, %v4629_v28  ;;  %v4780_v10 = vadd.f32 %v8221_v18, %v4779_v39  ;;  %vm4654_vm9 = vmor %vm4652_vm7, %vm4653_vm5  ;;  %v4676_v5 = vand.u32 2147483647, %v4666_v46  ;;  %v4679_v36 = vor.u32 1.1754944e-38, %v4678_v55 }
 0xc18   :  { %v4649_v6 = vsub.f32 1.0, %v4648_v57 }
 0xc19   :  { %v4631_v8 = vmul.f32 %v7009_v62, %v4630_v37  ;;  %4798 = vst [vmem:[%s8268_s8 + $0x8] sm:$0xff] %v4780_v10  ;;  %vm4677_vm15 = vcmp.eq.f32.partialorder %v4676_v5, 8.507059e+37 }
 0xc1a   :  { %v4650_v2 = vmul.f32 %v7011_v15, %v4649_v6 }
 0xc1b   :  { %v7013_v30 = vpop.eup %7012  ;;  %v4632_v24 = vadd.f32 %v7009_v62, %v4631_v8 }
 0xc1c   :  { %v4651_v63 = vadd.f32 %v7011_v15, %v4650_v2  ;;  %v4668_v0 = vmul.f32 %v7013_v30, %v4666_v46  ;;  %v7015_v16 = vpop.eup %7014  ;;  %vm4673_vm12 = vweird.f32 %v7013_v30 }
 0xc1d   :  { %v4636_v13 = vsel %vm4635_vm8, %v7009_v62, %v4632_v24  ;;  %vm4674_vm14 = vmor %vm4672_vm13, %vm4673_vm12 }
 0xc1e   :  { %v4641_v21 = vsel %vm4638_vm10, %v4640_v56, %v4636_v13  ;;  %v4655_v35 = vsel %vm4654_vm9, %v7011_v15, %v4651_v63  ;;  %v4782_v19 = vpop.f32.mrf.mxu0  ;;  %v4669_v43 = vsub.f32 1.0, %v4668_v0 }
 0xc1f   :  { %v4660_v58 = vsel %vm4657_vm11, %v4659_v61, %v4655_v35  ;;  %v4683_v48 = vmul.f32 %v7015_v16, %v4641_v21  ;;  %v4783_v40 = vadd.f32 %v8221_v18, %v4782_v19 }
 0xc20   :  { %v4682_v51 = vmul.f32 %v4660_v58, %v8196_v26  ;;  %v4670_v4 = vmul.f32 %v7013_v30, %v4669_v43 }
 0xc21   :  { %4799 = vst [vmem:[%s8268_s8 + $0x10] sm:$0xff] %v4783_v40 }
 0xc22   :  { %v4684_v44 = vadd.f32 %v4683_v48, %v4682_v51  ;;  %v4671_v47 = vadd.f32 %v7013_v30, %v4670_v4 }
 0xc24   :  { %7016 = vtanh.f32 %v4684_v44  ;;  %v4675_v1 = vsel %vm4674_vm14, %v7013_v30, %v4671_v47 }
 0xc25   :  { %v4680_v7 = vsel %vm4677_vm15, %v4679_v36, %v4675_v1 }
 0xc26   :  { %v4784_v27 = vpop.f32.mrf.mxu0 }
 0xc27   :  { %v4785_v50 = vadd.f32 %v8221_v18, %v4784_v27 }
 0xc29   :  { %4800 = vst [vmem:[%s8268_s8 + $0x18] sm:$0xff] %v4785_v50 }
 0xc2a   :  { %v7017_v26 = vpop.eup %7016 }
 0xc2b   :  { %v4686_v11 = vmul.f32 %v7017_v26, %v4680_v7 }
 0xc2d   :  { %v4699_v14 = vpack.c.bf16 %v4686_v11, %v8199_v60 }
 0xc2e   :  { %v4787_v33 = vpop.f32.mrf.mxu0 }
 0xc2f   :  { %v4788_v23 = vadd.f32 %v8221_v18, %v4787_v33  ;;  %4791 = vmatmul.bf16.gmra.mxu0 %v4699_v14 }
 0xc31   :  { %4801 = vst [vmem:[%s8268_s8 + $0x20] sm:$0xff] %v4788_v23 }
 0xc36   :  { %v4789_v38 = vpop.f32.mrf.mxu0 }
 0xc37   :  { %v4790_v17 = vadd.f32 %v8221_v18, %v4789_v38 }
 0xc39   :  { %4802 = vst [vmem:[%s8268_s8 + $0x28] sm:$0xff] %v4790_v17 }
 0xcac   :  { %v4792_v31 = vpop.f32.mrf.mxu0 }
 0xcad   :  { %v4793_v29 = vadd.f32 %v8221_v18, %v4792_v31 }
 0xcaf   :  { %4803 = vst [vmem:[%s8268_s8 + $0x30] sm:$0xff] %v4793_v29 }
 0xcb4   :  { %v4794_v60 = vpop.f32.mrf.mxu0 }
 0xcb5   :  { %v4795_v25 = vadd.f32 %v8221_v18, %v4794_v60 }
 0xcb7   :  { %4804 = vst [vmem:[%s8268_s8 + $0x38] sm:$0xff] %v4795_v25 }
 0xcb8   :  { %4809 = vsyncpa [#allocation4], 1 }
 0xcb9   :  { %4810 = vsyncpa [#allocation6], 1 }

</bundles_post_ra>
